<compile_context>
chip_gen: v6e
topology: v6e:2x2x1
jax: 0.10.0
libtpu: 0.0.40
codegen_flags: <defaults>
</compile_context>

<pallas_src>
import functools

import jax
import jax.numpy as jnp
from jax import lax
from jax.experimental import pallas as pl
from jax.experimental.pallas import tpu as pltpu

NZ = 100
NGF = 64
NC = 3
KSIZE = 4
BN_EPS = 1e-5


def _round_up(x, m):
    return (x + m - 1) // m * m


def _row_tile(m, cap):
    """Row tile size + padded row count for a (rows, C) elementwise/reduction grid."""
    if m <= cap:
        return m, m
    return cap, _round_up(m, cap)


# --------------------------------------------------------------------------
# Pallas GEMM: bf16 operands, fp32 accumulation.  Every layer has K <= 512,
# so K is never tiled -- each grid step is a single full-K MXU dot product
# block and there is no reduction axis / accumulator scratch.
# --------------------------------------------------------------------------
def _matmul_kernel(a_ref, b_ref, o_ref):
    o_ref[...] = jnp.dot(a_ref[...], b_ref[...],
                         preferred_element_type=jnp.float32).astype(o_ref.dtype)


def pallas_matmul(a, b):
    """(M, K) @ (K, N) -> (M, N) float32."""
    M, K = a.shape
    K2, N = b.shape
    assert K == K2
    a = a.astype(jnp.bfloat16)
    b = b.astype(jnp.bfloat16)

    tm = _round_up(M, 16) if M <= 512 else 512
    mpad = _round_up(M, tm)
    tn = min(_round_up(N, 128), 512)
    npad = _round_up(N, tn)

    if mpad != M:
        a = jnp.pad(a, ((0, mpad - M), (0, 0)))
    if npad != N:
        b = jnp.pad(b, ((0, 0), (0, npad - N)))

    out = pl.pallas_call(
        _matmul_kernel,
        out_shape=jax.ShapeDtypeStruct((mpad, npad), jnp.float32),
        grid_spec=pltpu.PrefetchScalarGridSpec(
            num_scalar_prefetch=0,
            grid=(mpad // tm, npad // tn),
            in_specs=[pl.BlockSpec((tm, K), lambda i, j: (i, 0)),
                      pl.BlockSpec((K, tn), lambda i, j: (0, j))],
            out_specs=pl.BlockSpec((tm, tn), lambda i, j: (i, j))),
        compiler_params=pltpu.CompilerParams(
            dimension_semantics=("parallel", "parallel")),
    )(a, b)
    if mpad != M or npad != N:
        out = out[:M, :N]
    return out


# --------------------------------------------------------------------------
# BatchNorm2d (training-mode batch stats) as two tiled Pallas kernels.
# Input is (M, C) with M = N*H*W, so per-channel stats = per-column stats.
# --------------------------------------------------------------------------
def _bn_stats_kernel(y_ref, mean_ref, istd_ref, s_ref, q_ref, *, inv_m):
    @pl.when(pl.program_id(0) == 0)
    def _():
        s_ref[...] = jnp.zeros_like(s_ref)
        q_ref[...] = jnp.zeros_like(q_ref)

    y = y_ref[...].astype(jnp.float32)
    s_ref[...] += jnp.sum(y, axis=0, keepdims=True)
    q_ref[...] += jnp.sum(y * y, axis=0, keepdims=True)

    @pl.when(pl.program_id(0) == pl.num_programs(0) - 1)
    def _():
        m = s_ref[...] * inv_m
        var = jnp.maximum(q_ref[...] * inv_m - m * m, 0.0)   # biased batch var
        mean_ref[...] = m
        istd_ref[...] = lax.rsqrt(var + BN_EPS)


def pallas_bn_stats(y):
    """Returns (mean, inv_std), each (1, C) float32.  Tiled reduction over rows."""
    M, C = y.shape
    tr, mpad = _row_tile(M, 512)
    if mpad != M:
        y = jnp.pad(y, ((0, mpad - M), (0, 0)))   # zero rows do not change sums
    kernel = functools.partial(_bn_stats_kernel, inv_m=1.0 / M)
    return pl.pallas_call(
        kernel,
        out_shape=(jax.ShapeDtypeStruct((1, C), jnp.float32),
                   jax.ShapeDtypeStruct((1, C), jnp.float32)),
        grid_spec=pltpu.PrefetchScalarGridSpec(
            num_scalar_prefetch=0,
            grid=(mpad // tr,),
            in_specs=[pl.BlockSpec((tr, C), lambda i: (i, 0))],
            out_specs=[pl.BlockSpec((1, C), lambda i: (0, 0)),
                       pl.BlockSpec((1, C), lambda i: (0, 0))],
            scratch_shapes=[pltpu.VMEM((1, C), jnp.float32),
                            pltpu.VMEM((1, C), jnp.float32)]),
        compiler_params=pltpu.CompilerParams(
            dimension_semantics=("arbitrary",)),
    )(y)


def _bn_relu_kernel(y_ref, mean_ref, istd_ref, g_ref, b_ref, o_ref):
    y = y_ref[...].astype(jnp.float32)
    scale = istd_ref[...] * g_ref[...]
    o_ref[...] = jnp.maximum((y - mean_ref[...]) * scale + b_ref[...],
                             0.0).astype(o_ref.dtype)


def pallas_bn_apply_relu(y, mean, istd, gamma, beta, out_dtype=jnp.bfloat16):
    """Normalize + affine + ReLU, row-tiled ("parallel" grid).  Emits bf16,
    which is exactly the operand dtype of the next layer's GEMM."""
    M, C = y.shape
    tr, mpad = _row_tile(M, 512)
    if mpad != M:
        y = jnp.pad(y, ((0, mpad - M), (0, 0)))
    g = gamma.reshape(1, C).astype(jnp.float32)
    b = beta.reshape(1, C).astype(jnp.float32)
    out = pl.pallas_call(
        _bn_relu_kernel,
        out_shape=jax.ShapeDtypeStruct((mpad, C), out_dtype),
        grid_spec=pltpu.PrefetchScalarGridSpec(
            num_scalar_prefetch=0,
            grid=(mpad // tr,),
            in_specs=[pl.BlockSpec((tr, C), lambda i: (i, 0)),
                      pl.BlockSpec((1, C), lambda i: (0, 0)),
                      pl.BlockSpec((1, C), lambda i: (0, 0)),
                      pl.BlockSpec((1, C), lambda i: (0, 0)),
                      pl.BlockSpec((1, C), lambda i: (0, 0))],
            out_specs=pl.BlockSpec((tr, C), lambda i: (i, 0))),
        compiler_params=pltpu.CompilerParams(
            dimension_semantics=("parallel",)),
    )(y, mean, istd, g, b)
    return out[:M] if mpad != M else out


# --------------------------------------------------------------------------
# Final Tanh on a lane-dense (rows, 128) reshape (avoids a 3-lane-wide block).
# --------------------------------------------------------------------------
def _tanh_kernel(y_ref, o_ref):
    o_ref[...] = jnp.tanh(y_ref[...].astype(jnp.float32)).astype(o_ref.dtype)


def pallas_tanh(y):
    M, C = y.shape
    lanes = 128
    total = M * C
    rows = -(-total // lanes)
    flat = y.reshape(-1)
    if rows * lanes != total:
        flat = jnp.pad(flat, (0, rows * lanes - total))
    y2 = flat.reshape(rows, lanes)
    tr, rpad = _row_tile(rows, 512)
    if rpad != rows:
        y2 = jnp.pad(y2, ((0, rpad - rows), (0, 0)))
    out = pl.pallas_call(
        _tanh_kernel,
        out_shape=jax.ShapeDtypeStruct((rpad, lanes), jnp.float32),
        grid_spec=pltpu.PrefetchScalarGridSpec(
            num_scalar_prefetch=0,
            grid=(rpad // tr,),
            in_specs=[pl.BlockSpec((tr, lanes), lambda i: (i, 0))],
            out_specs=pl.BlockSpec((tr, lanes), lambda i: (i, 0))),
        compiler_params=pltpu.CompilerParams(
            dimension_semantics=("parallel",)),
    )(y2)
    return out.reshape(-1)[:total].reshape(M, C)


# --------------------------------------------------------------------------
# XLA glue: weight reshaping and the stride-2 col2im scatter-add (pure data
# movement / 16 static shifted adds -- no Pallas kernel needed here).
# --------------------------------------------------------------------------
def _weight_to_gemm(w):
    """PyTorch ConvTranspose2d weight (Cin, Cout, k, k) -> (Cin, k*k*Cout)
    with column order (ky, kx, co).  No spatial flip (scatter formulation)."""
    cin, cout, k, _ = w.shape
    return w.transpose(0, 2, 3, 1).reshape(cin, k * k * cout)


def _col2im_stride2(ycols, n, h, w, cout):
    """col2im for k=4, stride=2, pad=1.

    ycols: (n*h*w, 16*cout) = per-input-pixel 4x4 tap blocks (tap order ky,kx,co).
    Returns the transposed-conv output, NHWC-flattened: (n*(2h)*(2w), cout).
    Each output pixel receives exactly 2x2 = 4 taps; they are combined with
    16 static shifted adds and a 2x2 sub-pixel phase interleave.
    """
    y6 = ycols.reshape(n, h, w, KSIZE, KSIZE, cout)
    yp = jnp.pad(y6, ((0, 0), (1, 1), (1, 1), (0, 0), (0, 0), (0, 0)))
    # For output phase r = o % 2: contributing (kernel tap k, padded offset d)
    # such that out[2j+r] += y[j + d - 1, tap k].
    taps = {0: ((1, 1), (3, 0)), 1: ((2, 1), (0, 2))}
    rows = []
    for ry in (0, 1):
        cols = []
        for rx in (0, 1):
            acc = 0.0
            for ky, dy in taps[ry]:
                for kx, dx in taps[rx]:
                    acc = acc + yp[:, dy:dy + h, dx:dx + w, ky, kx, :]
            cols.append(acc)
        rows.append(jnp.stack(cols, axis=0))
    out = jnp.stack(rows, axis=0)                   # (2, 2, n, h, w, cout)
    out = out.transpose(2, 3, 0, 4, 1, 5)           # (n, h, 2, w, 2, cout)
    return out.reshape(n * 2 * h * 2 * w, cout)


# --------------------------------------------------------------------------
# Generator forward pass (activations stay NHWC-flattened between layers).
# --------------------------------------------------------------------------
def generator_forward(x, params):
    n = x.shape[0]

    # Layer 1: ConvT(nz, 512, 4, stride=1, pad=0) on a 1x1 input is a plain GEMM.
    y = pallas_matmul(x.reshape(n, NZ), _weight_to_gemm(params["w1"]))
    act = y.reshape(n * KSIZE * KSIZE, NGF * 8)            # (n*4*4, 512) NHWC-flat
    mean, istd = pallas_bn_stats(act)
    act = pallas_bn_apply_relu(act, mean, istd, params["gamma1"], params["beta1"])
    h = w_sp = KSIZE

    # Layers 2..5: ConvT(cin, cout, 4, stride=2, pad=1) = GEMM + col2im.
    chans = [(NGF * 8, NGF * 4), (NGF * 4, NGF * 2), (NGF * 2, NGF), (NGF, NC)]
    for li, (_, cout) in enumerate(chans, start=2):
        wmat = _weight_to_gemm(params[f"w{li}"])           # (cin, 16*cout)
        ycols = pallas_matmul(act, wmat)                   # (n*h*w, 16*cout) f32
        act = _col2im_stride2(ycols, n, h, w_sp, cout)     # (n*2h*2w, cout) f32
        h, w_sp = 2 * h, 2 * w_sp
        if li < 5:
            mean, istd = pallas_bn_stats(act)
            act = pallas_bn_apply_relu(act, mean, istd,
                                       params[f"gamma{li}"], params[f"beta{li}"])
        else:
            # TODO(synk): tanh cannot be fused into the layer-5 GEMM epilogue
            # because the col2im sum sits between them; run it lane-dense instead.
            act = pallas_tanh(act)

    return act.reshape(n, h, w_sp, NC).transpose(0, 3, 1, 2)   # NHWC -> NCHW


def init_params(key):
    """Deterministic DCGAN-style init (N(0, 0.02) weights, BN gamma=1 beta=0)."""
    chans = [(NZ, NGF * 8), (NGF * 8, NGF * 4), (NGF * 4, NGF * 2),
             (NGF * 2, NGF), (NGF, NC)]
    params = {}
    keys = jax.random.split(key, len(chans))
    for i, ((cin, cout), k) in enumerate(zip(chans, keys)):
        params[f"w{i + 1}"] = 0.02 * jax.random.normal(
            k, (cin, cout, KSIZE, KSIZE), jnp.float32)
        if i < 4:
            params[f"gamma{i + 1}"] = jnp.ones((cout,), jnp.float32)
            params[f"beta{i + 1}"] = jnp.zeros((cout,), jnp.float32)
    return params


if __name__ == "__main__":
    key = jax.random.PRNGKey(0)
    pkey, xkey = jax.random.split(key)
    params = init_params(pkey)

    batch = 2
    x = jax.random.normal(xkey, (batch, NZ, 1, 1), jnp.float32)  # (N, nz, 1, 1)

    fwd = jax.jit(functools.partial(generator_forward, params=params))
    out = jax.block_until_ready(fwd(x))

    assert out.shape == (batch, NC, 64, 64), out.shape
    assert bool(jnp.all(jnp.isfinite(out)))
    assert bool(jnp.all(jnp.abs(out) <= 1.0 + 1e-6))  # tanh range
    print("KERNEL_OK")
</pallas_src>

<mosaic_0001>
module attributes {stable_mosaic.version = 11 : i64} {
  func.func @_matmul_kernel(%arg0: i32, %arg1: i32, %arg2: memref<16x100xbf16, #tpu.memory_space<vmem>>, %arg3: memref<100x512xbf16, #tpu.memory_space<vmem>>, %arg4: memref<16x512xf32, #tpu.memory_space<vmem>>) attributes {dimension_semantics = [#tpu.dimension_semantics<parallel>, #tpu.dimension_semantics<parallel>], iteration_bounds = array<i64: 1, 16>, scalar_prefetch = 0 : i64, scratch_operands = 0 : i64, tpu.core_type = #tpu.core_type<tc>, window_params = [{transform_indices = @transform_0, window_bounds = array<i64: 16, 100>}, {transform_indices = @transform_1, window_bounds = array<i64: 100, 512>}, {transform_indices = @transform_2, window_bounds = array<i64: 16, 512>}]} {
    %c0 = arith.constant 0 : index
    %c0_0 = arith.constant 0 : index
    %0 = vector.load %arg2[%c0, %c0_0] : memref<16x100xbf16, #tpu.memory_space<vmem>>, vector<16x100xbf16>
    %c0_1 = arith.constant 0 : index
    %c0_2 = arith.constant 0 : index
    %1 = vector.load %arg3[%c0_1, %c0_2] : memref<100x512xbf16, #tpu.memory_space<vmem>>, vector<100x512xbf16>
    %cst = arith.constant dense<0.000000e+00> : vector<16x512xf32>
    %2 = tpu.matmul %0, %1, %cst {dimension_numbers = #tpu.dot_dimension_numbers<[1], [0], [0], [1], [0, 0, 1, 1], [], []>} : vector<16x100xbf16>, vector<100x512xbf16>, vector<16x512xf32> -> vector<16x512xf32>
    %c0_3 = arith.constant 0 : index
    %c0_4 = arith.constant 0 : index
    %3 = vector.load %arg4[%c0_3, %c0_4] : memref<16x512xf32, #tpu.memory_space<vmem>>, vector<16x512xf32>
    tpu.vector_store %arg4[%c0_3, %c0_4], %2 {strides = array<i32>} : memref<16x512xf32, #tpu.memory_space<vmem>>, vector<16x512xf32>,
    return
  }
  func.func @transform_0(%arg0: i32, %arg1: i32) -> (i32, i32) {
    %c0_i32 = arith.constant 0 : i32
    %c0_i32_0 = arith.constant 0 : i32
    return %arg0, %c0_i32 : i32, i32
  }
  func.func @transform_1(%arg0: i32, %arg1: i32) -> (i32, i32) {
    %c0_i32 = arith.constant 0 : i32
    %c0_i32_0 = arith.constant 0 : i32
    return %c0_i32, %arg1 : i32, i32
  }
  func.func @transform_2(%arg0: i32, %arg1: i32) -> (i32, i32) {
    %c0_i32 = arith.constant 0 : i32
    return %arg0, %arg1 : i32, i32
  }
}

module attributes {stable_mosaic.version = 11 : i64} {
  func.func @_bn_stats_kernel(%arg0: i32, %arg1: memref<32x512xf32, #tpu.memory_space<vmem>>, %arg2: memref<1x512xf32, #tpu.memory_space<vmem>>, %arg3: memref<1x512xf32, #tpu.memory_space<vmem>>, %arg4: memref<1x512xf32, #tpu.memory_space<vmem>>, %arg5: memref<1x512xf32, #tpu.memory_space<vmem>>) attributes {dimension_semantics = [#tpu.dimension_semantics<arbitrary>], iteration_bounds = array<i64: 1>, scalar_prefetch = 0 : i64, scratch_operands = 2 : i64, tpu.core_type = #tpu.core_type<tc>, window_params = [{transform_indices = @transform_0, window_bounds = array<i64: 32, 512>}, {pipeline_mode = #tpu.pipeline_mode<synchronous>, transform_indices = @transform_1, window_bounds = array<i64: 1, 512>}, {pipeline_mode = #tpu.pipeline_mode<synchronous>, transform_indices = @transform_2, window_bounds = array<i64: 1, 512>}]} {
    %c0_i32 = arith.constant 0 : i32
    %0 = arith.cmpi eq, %arg0, %c0_i32 : i32
    %1 = arith.extui %0 : i1 to i32
    %c0_i32_0 = arith.constant 0 : i32
    %2 = arith.cmpi ne, %1, %c0_i32_0 : i32
    scf.if %2 {
      %cst_13 = arith.constant 0.000000e+00 : f32
      %18 = vector.broadcast %cst_13 : f32 to vector<1x512xf32>
      %c0_14 = arith.constant 0 : index
      %c0_15 = arith.constant 0 : index
      %19 = vector.load %arg4[%c0_14, %c0_15] : memref<1x512xf32, #tpu.memory_space<vmem>>, vector<1x512xf32>
      tpu.vector_store %arg4[%c0_14, %c0_15], %18 {strides = array<i32>} : memref<1x512xf32, #tpu.memory_space<vmem>>, vector<1x512xf32>,
      %cst_16 = arith.constant 0.000000e+00 : f32
      %20 = vector.broadcast %cst_16 : f32 to vector<1x512xf32>
      %c0_17 = arith.constant 0 : index
      %c0_18 = arith.constant 0 : index
      %21 = vector.load %arg5[%c0_17, %c0_18] : memref<1x512xf32, #tpu.memory_space<vmem>>, vector<1x512xf32>
      tpu.vector_store %arg5[%c0_17, %c0_18], %20 {strides = array<i32>} : memref<1x512xf32, #tpu.memory_space<vmem>>, vector<1x512xf32>,
    } else {
    }
    %c0 = arith.constant 0 : index
    %c0_1 = arith.constant 0 : index
    %3 = vector.load %arg1[%c0, %c0_1] : memref<32x512xf32, #tpu.memory_space<vmem>>, vector<32x512xf32>
    %c0_2 = arith.constant 0 : index
    %c0_3 = arith.constant 0 : index
    %4 = vector.load %arg4[%c0_2, %c0_3] : memref<1x512xf32, #tpu.memory_space<vmem>>, vector<1x512xf32>
    %cst = arith.constant dense<0.000000e+00> : vector<512xf32>
    %5 = vector.multi_reduction <add>, %3, %cst [0] : vector<32x512xf32> to vector<512xf32>
    %6 = vector.shape_cast %5 : vector<512xf32> to vector<1x512xf32>
    %7 = arith.addf %4, %6 : vector<1x512xf32>
    %c0_4 = arith.constant 0 : index
    %c0_5 = arith.constant 0 : index
    %8 = vector.load %arg4[%c0_4, %c0_5] : memref<1x512xf32, #tpu.memory_space<vmem>>, vector<1x512xf32>
    tpu.vector_store %arg4[%c0_4, %c0_5], %7 {strides = array<i32>} : memref<1x512xf32, #tpu.memory_space<vmem>>, vector<1x512xf32>,
    %c0_6 = arith.constant 0 : index
    %c0_7 = arith.constant 0 : index
    %9 = vector.load %arg5[%c0_6, %c0_7] : memref<1x512xf32, #tpu.memory_space<vmem>>, vector<1x512xf32>
    %10 = arith.mulf %3, %3 : vector<32x512xf32>
    %cst_8 = arith.constant dense<0.000000e+00> : vector<512xf32>
    %11 = vector.multi_reduction <add>, %10, %cst_8 [0] : vector<32x512xf32> to vector<512xf32>
    %12 = vector.shape_cast %11 : vector<512xf32> to vector<1x512xf32>
    %13 = arith.addf %9, %12 : vector<1x512xf32>
    %c0_9 = arith.constant 0 : index
    %c0_10 = arith.constant 0 : index
    %14 = vector.load %arg5[%c0_9, %c0_10] : memref<1x512xf32, #tpu.memory_space<vmem>>, vector<1x512xf32>
    tpu.vector_store %arg5[%c0_9, %c0_10], %13 {strides = array<i32>} : memref<1x512xf32, #tpu.memory_space<vmem>>, vector<1x512xf32>,
    %c0_i32_11 = arith.constant 0 : i32
    %15 = arith.cmpi eq, %arg0, %c0_i32_11 : i32
    %16 = arith.extui %15 : i1 to i32
    %c0_i32_12 = arith.constant 0 : i32
    %17 = arith.cmpi ne, %16, %c0_i32_12 : i32
    scf.if %17 {
      %c0_13 = arith.constant 0 : index
      %c0_14 = arith.constant 0 : index
      %18 = vector.load %arg4[%c0_13, %c0_14] : memref<1x512xf32, #tpu.memory_space<vmem>>, vector<1x512xf32>
      %cst_15 = arith.constant 3.125000e-02 : f32
      %19 = vector.broadcast %cst_15 : f32 to vector<1x512xf32>
      %20 = arith.mulf %18, %19 : vector<1x512xf32>
      %c0_16 = arith.constant 0 : index
      %c0_17 = arith.constant 0 : index
      %21 = vector.load %arg5[%c0_16, %c0_17] : memref<1x512xf32, #tpu.memory_space<vmem>>, vector<1x512xf32>
      %cst_18 = arith.constant 3.125000e-02 : f32
      %22 = vector.broadcast %cst_18 : f32 to vector<1x512xf32>
      %23 = arith.mulf %21, %22 : vector<1x512xf32>
      %24 = arith.mulf %20, %20 : vector<1x512xf32>
      %25 = arith.subf %23, %24 : vector<1x512xf32>
      %cst_19 = arith.constant 0.000000e+00 : f32
      %26 = vector.broadcast %cst_19 : f32 to vector<1x512xf32>
      %27 = arith.maximumf %25, %26 : vector<1x512xf32>
      %c0_20 = arith.constant 0 : index
      %c0_21 = arith.constant 0 : index
      %28 = vector.load %arg2[%c0_20, %c0_21] : memref<1x512xf32, #tpu.memory_space<vmem>>, vector<1x512xf32>
      tpu.vector_store %arg2[%c0_20, %c0_21], %20 {strides = array<i32>} : memref<1x512xf32, #tpu.memory_space<vmem>>, vector<1x512xf32>,
      %cst_22 = arith.constant 9.99999974E-6 : f32
      %29 = vector.broadcast %cst_22 : f32 to vector<1x512xf32>
      %30 = arith.addf %27, %29 : vector<1x512xf32>
      %31 = math.rsqrt %30 : vector<1x512xf32>
      %c0_23 = arith.constant 0 : index
      %c0_24 = arith.constant 0 : index
      %32 = vector.load %arg3[%c0_23, %c0_24] : memref<1x512xf32, #tpu.memory_space<vmem>>, vector<1x512xf32>
      tpu.vector_store %arg3[%c0_23, %c0_24], %31 {strides = array<i32>} : memref<1x512xf32, #tpu.memory_space<vmem>>, vector<1x512xf32>,
    } else {
    }
    return
  }
  func.func @transform_0(%arg0: i32) -> (i32, i32) {
    %c0_i32 = arith.constant 0 : i32
    %c0_i32_0 = arith.constant 0 : i32
    return %arg0, %c0_i32 : i32, i32
  }
  func.func @transform_1(%arg0: i32) -> (i32, i32) {
    %c0_i32 = arith.constant 0 : i32
    %c0_i32_0 = arith.constant 0 : i32
    %c0_i32_1 = arith.constant 0 : i32
    return %c0_i32, %c0_i32_0 : i32, i32
  }
  func.func @transform_2(%arg0: i32) -> (i32, i32) {
    %c0_i32 = arith.constant 0 : i32
    %c0_i32_0 = arith.constant 0 : i32
    %c0_i32_1 = arith.constant 0 : i32
    return %c0_i32, %c0_i32_0 : i32, i32
  }
}

module attributes {stable_mosaic.version = 11 : i64} {
  func.func @_bn_relu_kernel(%arg0: i32, %arg1: memref<32x512xf32, #tpu.memory_space<vmem>>, %arg2: memref<1x512xf32, #tpu.memory_space<vmem>>, %arg3: memref<1x512xf32, #tpu.memory_space<vmem>>, %arg4: memref<1x512xf32, #tpu.memory_space<vmem>>, %arg5: memref<1x512xf32, #tpu.memory_space<vmem>>, %arg6: memref<32x512xbf16, #tpu.memory_space<vmem>>) attributes {dimension_semantics = [#tpu.dimension_semantics<parallel>], iteration_bounds = array<i64: 1>, scalar_prefetch = 0 : i64, scratch_operands = 0 : i64, tpu.core_type = #tpu.core_type<tc>, window_params = [{transform_indices = @transform_0, window_bounds = array<i64: 32, 512>}, {pipeline_mode = #tpu.pipeline_mode<synchronous>, transform_indices = @transform_1, window_bounds = array<i64: 1, 512>}, {pipeline_mode = #tpu.pipeline_mode<synchronous>, transform_indices = @transform_2, window_bounds = array<i64: 1, 512>}, {pipeline_mode = #tpu.pipeline_mode<synchronous>, transform_indices = @transform_3, window_bounds = array<i64: 1, 512>}, {pipeline_mode = #tpu.pipeline_mode<synchronous>, transform_indices = @transform_4, window_bounds = array<i64: 1, 512>}, {transform_indices = @transform_5, window_bounds = array<i64: 32, 512>}]} {
    %c0 = arith.constant 0 : index
    %c0_0 = arith.constant 0 : index
    %0 = vector.load %arg1[%c0, %c0_0] : memref<32x512xf32, #tpu.memory_space<vmem>>, vector<32x512xf32>
    %c0_1 = arith.constant 0 : index
    %c0_2 = arith.constant 0 : index
    %1 = vector.load %arg3[%c0_1, %c0_2] : memref<1x512xf32, #tpu.memory_space<vmem>>, vector<1x512xf32>
    %c0_3 = arith.constant 0 : index
    %c0_4 = arith.constant 0 : index
    %2 = vector.load %arg4[%c0_3, %c0_4] : memref<1x512xf32, #tpu.memory_space<vmem>>, vector<1x512xf32>
    %3 = arith.mulf %1, %2 : vector<1x512xf32>
    %c0_5 = arith.constant 0 : index
    %c0_6 = arith.constant 0 : index
    %4 = vector.load %arg2[%c0_5, %c0_6] : memref<1x512xf32, #tpu.memory_space<vmem>>, vector<1x512xf32>
    %5 = vector.broadcast %4 : vector<1x512xf32> to vector<32x512xf32>
    %6 = arith.subf %0, %5 : vector<32x512xf32>
    %7 = vector.broadcast %3 : vector<1x512xf32> to vector<32x512xf32>
    %8 = arith.mulf %6, %7 : vector<32x512xf32>
    %c0_7 = arith.constant 0 : index
    %c0_8 = arith.constant 0 : index
    %9 = vector.load %arg5[%c0_7, %c0_8] : memref<1x512xf32, #tpu.memory_space<vmem>>, vector<1x512xf32>
    %10 = vector.broadcast %9 : vector<1x512xf32> to vector<32x512xf32>
    %11 = arith.addf %8, %10 : vector<32x512xf32>
    %cst = arith.constant 0.000000e+00 : f32
    %12 = vector.broadcast %cst : f32 to vector<32x512xf32>
    %13 = arith.maximumf %11, %12 : vector<32x512xf32>
    %14 = arith.truncf %13 : vector<32x512xf32> to vector<32x512xbf16>
    %c0_9 = arith.constant 0 : index
    %c0_10 = arith.constant 0 : index
    %15 = vector.load %arg6[%c0_9, %c0_10] : memref<32x512xbf16, #tpu.memory_space<vmem>>, vector<32x512xbf16>
    tpu.vector_store %arg6[%c0_9, %c0_10], %14 {strides = array<i32>} : memref<32x512xbf16, #tpu.memory_space<vmem>>, vector<32x512xbf16>,
    return
  }
  func.func @transform_0(%arg0: i32) -> (i32, i32) {
    %c0_i32 = arith.constant 0 : i32
    %c0_i32_0 = arith.constant 0 : i32
    return %arg0, %c0_i32 : i32, i32
  }
  func.func @transform_1(%arg0: i32) -> (i32, i32) {
    %c0_i32 = arith.constant 0 : i32
    %c0_i32_0 = arith.constant 0 : i32
    %c0_i32_1 = arith.constant 0 : i32
    return %c0_i32, %c0_i32_0 : i32, i32
  }
  func.func @transform_2(%arg0: i32) -> (i32, i32) {
    %c0_i32 = arith.constant 0 : i32
    %c0_i32_0 = arith.constant 0 : i32
    %c0_i32_1 = arith.constant 0 : i32
    return %c0_i32, %c0_i32_0 : i32, i32
  }
  func.func @transform_3(%arg0: i32) -> (i32, i32) {
    %c0_i32 = arith.constant 0 : i32
    %c0_i32_0 = arith.constant 0 : i32
    %c0_i32_1 = arith.constant 0 : i32
    return %c0_i32, %c0_i32_0 : i32, i32
  }
  func.func @transform_4(%arg0: i32) -> (i32, i32) {
    %c0_i32 = arith.constant 0 : i32
    %c0_i32_0 = arith.constant 0 : i32
    %c0_i32_1 = arith.constant 0 : i32
    return %c0_i32, %c0_i32_0 : i32, i32
  }
  func.func @transform_5(%arg0: i32) -> (i32, i32) {
    %c0_i32 = arith.constant 0 : i32
    %c0_i32_0 = arith.constant 0 : i32
    return %arg0, %c0_i32 : i32, i32
  }
}

module attributes {stable_mosaic.version = 11 : i64} {
  func.func @_matmul_kernel(%arg0: i32, %arg1: i32, %arg2: memref<32x512xbf16, #tpu.memory_space<vmem>>, %arg3: memref<512x512xbf16, #tpu.memory_space<vmem>>, %arg4: memref<32x512xf32, #tpu.memory_space<vmem>>) attributes {dimension_semantics = [#tpu.dimension_semantics<parallel>, #tpu.dimension_semantics<parallel>], iteration_bounds = array<i64: 1, 8>, scalar_prefetch = 0 : i64, scratch_operands = 0 : i64, tpu.core_type = #tpu.core_type<tc>, window_params = [{transform_indices = @transform_0, window_bounds = array<i64: 32, 512>}, {transform_indices = @transform_1, window_bounds = array<i64: 512, 512>}, {transform_indices = @transform_2, window_bounds = array<i64: 32, 512>}]} {
    %c0 = arith.constant 0 : index
    %c0_0 = arith.constant 0 : index
    %0 = vector.load %arg2[%c0, %c0_0] : memref<32x512xbf16, #tpu.memory_space<vmem>>, vector<32x512xbf16>
    %c0_1 = arith.constant 0 : index
    %c0_2 = arith.constant 0 : index
    %1 = vector.load %arg3[%c0_1, %c0_2] : memref<512x512xbf16, #tpu.memory_space<vmem>>, vector<512x512xbf16>
    %cst = arith.constant dense<0.000000e+00> : vector<32x512xf32>
    %2 = tpu.matmul %0, %1, %cst {dimension_numbers = #tpu.dot_dimension_numbers<[1], [0], [0], [1], [0, 0, 1, 1], [], []>} : vector<32x512xbf16>, vector<512x512xbf16>, vector<32x512xf32> -> vector<32x512xf32>
    %c0_3 = arith.constant 0 : index
    %c0_4 = arith.constant 0 : index
    %3 = vector.load %arg4[%c0_3, %c0_4] : memref<32x512xf32, #tpu.memory_space<vmem>>, vector<32x512xf32>
    tpu.vector_store %arg4[%c0_3, %c0_4], %2 {strides = array<i32>} : memref<32x512xf32, #tpu.memory_space<vmem>>, vector<32x512xf32>,
    return
  }
  func.func @transform_0(%arg0: i32, %arg1: i32) -> (i32, i32) {
    %c0_i32 = arith.constant 0 : i32
    %c0_i32_0 = arith.constant 0 : i32
    return %arg0, %c0_i32 : i32, i32
  }
  func.func @transform_1(%arg0: i32, %arg1: i32) -> (i32, i32) {
    %c0_i32 = arith.constant 0 : i32
    %c0_i32_0 = arith.constant 0 : i32
    return %c0_i32, %arg1 : i32, i32
  }
  func.func @transform_2(%arg0: i32, %arg1: i32) -> (i32, i32) {
    %c0_i32 = arith.constant 0 : i32
    return %arg0, %arg1 : i32, i32
  }
}

module attributes {stable_mosaic.version = 11 : i64} {
  func.func @_bn_stats_kernel(%arg0: i32, %arg1: memref<128x256xf32, #tpu.memory_space<vmem>>, %arg2: memref<1x256xf32, #tpu.memory_space<vmem>>, %arg3: memref<1x256xf32, #tpu.memory_space<vmem>>, %arg4: memref<1x256xf32, #tpu.memory_space<vmem>>, %arg5: memref<1x256xf32, #tpu.memory_space<vmem>>) attributes {dimension_semantics = [#tpu.dimension_semantics<arbitrary>], iteration_bounds = array<i64: 1>, scalar_prefetch = 0 : i64, scratch_operands = 2 : i64, tpu.core_type = #tpu.core_type<tc>, window_params = [{transform_indices = @transform_0, window_bounds = array<i64: 128, 256>}, {pipeline_mode = #tpu.pipeline_mode<synchronous>, transform_indices = @transform_1, window_bounds = array<i64: 1, 256>}, {pipeline_mode = #tpu.pipeline_mode<synchronous>, transform_indices = @transform_2, window_bounds = array<i64: 1, 256>}]} {
    %c0_i32 = arith.constant 0 : i32
    %0 = arith.cmpi eq, %arg0, %c0_i32 : i32
    %1 = arith.extui %0 : i1 to i32
    %c0_i32_0 = arith.constant 0 : i32
    %2 = arith.cmpi ne, %1, %c0_i32_0 : i32
    scf.if %2 {
      %cst_13 = arith.constant 0.000000e+00 : f32
      %18 = vector.broadcast %cst_13 : f32 to vector<1x256xf32>
      %c0_14 = arith.constant 0 : index
      %c0_15 = arith.constant 0 : index
      %19 = vector.load %arg4[%c0_14, %c0_15] : memref<1x256xf32, #tpu.memory_space<vmem>>, vector<1x256xf32>
      tpu.vector_store %arg4[%c0_14, %c0_15], %18 {strides = array<i32>} : memref<1x256xf32, #tpu.memory_space<vmem>>, vector<1x256xf32>,
      %cst_16 = arith.constant 0.000000e+00 : f32
      %20 = vector.broadcast %cst_16 : f32 to vector<1x256xf32>
      %c0_17 = arith.constant 0 : index
      %c0_18 = arith.constant 0 : index
      %21 = vector.load %arg5[%c0_17, %c0_18] : memref<1x256xf32, #tpu.memory_space<vmem>>, vector<1x256xf32>
      tpu.vector_store %arg5[%c0_17, %c0_18], %20 {strides = array<i32>} : memref<1x256xf32, #tpu.memory_space<vmem>>, vector<1x256xf32>,
    } else {
    }
    %c0 = arith.constant 0 : index
    %c0_1 = arith.constant 0 : index
    %3 = vector.load %arg1[%c0, %c0_1] : memref<128x256xf32, #tpu.memory_space<vmem>>, vector<128x256xf32>
    %c0_2 = arith.constant 0 : index
    %c0_3 = arith.constant 0 : index
    %4 = vector.load %arg4[%c0_2, %c0_3] : memref<1x256xf32, #tpu.memory_space<vmem>>, vector<1x256xf32>
    %cst = arith.constant dense<0.000000e+00> : vector<256xf32>
    %5 = vector.multi_reduction <add>, %3, %cst [0] : vector<128x256xf32> to vector<256xf32>
    %6 = vector.shape_cast %5 : vector<256xf32> to vector<1x256xf32>
    %7 = arith.addf %4, %6 : vector<1x256xf32>
    %c0_4 = arith.constant 0 : index
    %c0_5 = arith.constant 0 : index
    %8 = vector.load %arg4[%c0_4, %c0_5] : memref<1x256xf32, #tpu.memory_space<vmem>>, vector<1x256xf32>
    tpu.vector_store %arg4[%c0_4, %c0_5], %7 {strides = array<i32>} : memref<1x256xf32, #tpu.memory_space<vmem>>, vector<1x256xf32>,
    %c0_6 = arith.constant 0 : index
    %c0_7 = arith.constant 0 : index
    %9 = vector.load %arg5[%c0_6, %c0_7] : memref<1x256xf32, #tpu.memory_space<vmem>>, vector<1x256xf32>
    %10 = arith.mulf %3, %3 : vector<128x256xf32>
    %cst_8 = arith.constant dense<0.000000e+00> : vector<256xf32>
    %11 = vector.multi_reduction <add>, %10, %cst_8 [0] : vector<128x256xf32> to vector<256xf32>
    %12 = vector.shape_cast %11 : vector<256xf32> to vector<1x256xf32>
    %13 = arith.addf %9, %12 : vector<1x256xf32>
    %c0_9 = arith.constant 0 : index
    %c0_10 = arith.constant 0 : index
    %14 = vector.load %arg5[%c0_9, %c0_10] : memref<1x256xf32, #tpu.memory_space<vmem>>, vector<1x256xf32>
    tpu.vector_store %arg5[%c0_9, %c0_10], %13 {strides = array<i32>} : memref<1x256xf32, #tpu.memory_space<vmem>>, vector<1x256xf32>,
    %c0_i32_11 = arith.constant 0 : i32
    %15 = arith.cmpi eq, %arg0, %c0_i32_11 : i32
    %16 = arith.extui %15 : i1 to i32
    %c0_i32_12 = arith.constant 0 : i32
    %17 = arith.cmpi ne, %16, %c0_i32_12 : i32
    scf.if %17 {
      %c0_13 = arith.constant 0 : index
      %c0_14 = arith.constant 0 : index
      %18 = vector.load %arg4[%c0_13, %c0_14] : memref<1x256xf32, #tpu.memory_space<vmem>>, vector<1x256xf32>
      %cst_15 = arith.constant 7.812500e-03 : f32
      %19 = vector.broadcast %cst_15 : f32 to vector<1x256xf32>
      %20 = arith.mulf %18, %19 : vector<1x256xf32>
      %c0_16 = arith.constant 0 : index
      %c0_17 = arith.constant 0 : index
      %21 = vector.load %arg5[%c0_16, %c0_17] : memref<1x256xf32, #tpu.memory_space<vmem>>, vector<1x256xf32>
      %cst_18 = arith.constant 7.812500e-03 : f32
      %22 = vector.broadcast %cst_18 : f32 to vector<1x256xf32>
      %23 = arith.mulf %21, %22 : vector<1x256xf32>
      %24 = arith.mulf %20, %20 : vector<1x256xf32>
      %25 = arith.subf %23, %24 : vector<1x256xf32>
      %cst_19 = arith.constant 0.000000e+00 : f32
      %26 = vector.broadcast %cst_19 : f32 to vector<1x256xf32>
      %27 = arith.maximumf %25, %26 : vector<1x256xf32>
      %c0_20 = arith.constant 0 : index
      %c0_21 = arith.constant 0 : index
      %28 = vector.load %arg2[%c0_20, %c0_21] : memref<1x256xf32, #tpu.memory_space<vmem>>, vector<1x256xf32>
      tpu.vector_store %arg2[%c0_20, %c0_21], %20 {strides = array<i32>} : memref<1x256xf32, #tpu.memory_space<vmem>>, vector<1x256xf32>,
      %cst_22 = arith.constant 9.99999974E-6 : f32
      %29 = vector.broadcast %cst_22 : f32 to vector<1x256xf32>
      %30 = arith.addf %27, %29 : vector<1x256xf32>
      %31 = math.rsqrt %30 : vector<1x256xf32>
      %c0_23 = arith.constant 0 : index
      %c0_24 = arith.constant 0 : index
      %32 = vector.load %arg3[%c0_23, %c0_24] : memref<1x256xf32, #tpu.memory_space<vmem>>, vector<1x256xf32>
      tpu.vector_store %arg3[%c0_23, %c0_24], %31 {strides = array<i32>} : memref<1x256xf32, #tpu.memory_space<vmem>>, vector<1x256xf32>,
    } else {
    }
    return
  }
  func.func @transform_0(%arg0: i32) -> (i32, i32) {
    %c0_i32 = arith.constant 0 : i32
    %c0_i32_0 = arith.constant 0 : i32
    return %arg0, %c0_i32 : i32, i32
  }
  func.func @transform_1(%arg0: i32) -> (i32, i32) {
    %c0_i32 = arith.constant 0 : i32
    %c0_i32_0 = arith.constant 0 : i32
    %c0_i32_1 = arith.constant 0 : i32
    return %c0_i32, %c0_i32_0 : i32, i32
  }
  func.func @transform_2(%arg0: i32) -> (i32, i32) {
    %c0_i32 = arith.constant 0 : i32
    %c0_i32_0 = arith.constant 0 : i32
    %c0_i32_1 = arith.constant 0 : i32
    return %c0_i32, %c0_i32_0 : i32, i32
  }
}

module attributes {stable_mosaic.version = 11 : i64} {
  func.func @_matmul_kernel(%arg0: i32, %arg1: i32, %arg2: memref<128x256xbf16, #tpu.memory_space<vmem>>, %arg3: memref<256x512xbf16, #tpu.memory_space<vmem>>, %arg4: memref<128x512xf32, #tpu.memory_space<vmem>>) attributes {dimension_semantics = [#tpu.dimension_semantics<parallel>, #tpu.dimension_semantics<parallel>], iteration_bounds = array<i64: 1, 4>, scalar_prefetch = 0 : i64, scratch_operands = 0 : i64, tpu.core_type = #tpu.core_type<tc>, window_params = [{transform_indices = @transform_0, window_bounds = array<i64: 128, 256>}, {transform_indices = @transform_1, window_bounds = array<i64: 256, 512>}, {transform_indices = @transform_2, window_bounds = array<i64: 128, 512>}]} {
    %c0 = arith.constant 0 : index
    %c0_0 = arith.constant 0 : index
    %0 = vector.load %arg2[%c0, %c0_0] : memref<128x256xbf16, #tpu.memory_space<vmem>>, vector<128x256xbf16>
    %c0_1 = arith.constant 0 : index
    %c0_2 = arith.constant 0 : index
    %1 = vector.load %arg3[%c0_1, %c0_2] : memref<256x512xbf16, #tpu.memory_space<vmem>>, vector<256x512xbf16>
    %cst = arith.constant dense<0.000000e+00> : vector<128x512xf32>
    %2 = tpu.matmul %0, %1, %cst {dimension_numbers = #tpu.dot_dimension_numbers<[1], [0], [0], [1], [0, 0, 1, 1], [], []>} : vector<128x256xbf16>, vector<256x512xbf16>, vector<128x512xf32> -> vector<128x512xf32>
    %c0_3 = arith.constant 0 : index
    %c0_4 = arith.constant 0 : index
    %3 = vector.load %arg4[%c0_3, %c0_4] : memref<128x512xf32, #tpu.memory_space<vmem>>, vector<128x512xf32>
    tpu.vector_store %arg4[%c0_3, %c0_4], %2 {strides = array<i32>} : memref<128x512xf32, #tpu.memory_space<vmem>>, vector<128x512xf32>,
    return
  }
  func.func @transform_0(%arg0: i32, %arg1: i32) -> (i32, i32) {
    %c0_i32 = arith.constant 0 : i32
    %c0_i32_0 = arith.constant 0 : i32
    return %arg0, %c0_i32 : i32, i32
  }
  func.func @transform_1(%arg0: i32, %arg1: i32) -> (i32, i32) {
    %c0_i32 = arith.constant 0 : i32
    %c0_i32_0 = arith.constant 0 : i32
    return %c0_i32, %arg1 : i32, i32
  }
  func.func @transform_2(%arg0: i32, %arg1: i32) -> (i32, i32) {
    %c0_i32 = arith.constant 0 : i32
    return %arg0, %arg1 : i32, i32
  }
}

module attributes {stable_mosaic.version = 11 : i64} {
  func.func @_bn_relu_kernel(%arg0: i32, %arg1: memref<128x256xf32, #tpu.memory_space<vmem>>, %arg2: memref<1x256xf32, #tpu.memory_space<vmem>>, %arg3: memref<1x256xf32, #tpu.memory_space<vmem>>, %arg4: memref<1x256xf32, #tpu.memory_space<vmem>>, %arg5: memref<1x256xf32, #tpu.memory_space<vmem>>, %arg6: memref<128x256xbf16, #tpu.memory_space<vmem>>) attributes {dimension_semantics = [#tpu.dimension_semantics<parallel>], iteration_bounds = array<i64: 1>, scalar_prefetch = 0 : i64, scratch_operands = 0 : i64, tpu.core_type = #tpu.core_type<tc>, window_params = [{transform_indices = @transform_0, window_bounds = array<i64: 128, 256>}, {pipeline_mode = #tpu.pipeline_mode<synchronous>, transform_indices = @transform_1, window_bounds = array<i64: 1, 256>}, {pipeline_mode = #tpu.pipeline_mode<synchronous>, transform_indices = @transform_2, window_bounds = array<i64: 1, 256>}, {pipeline_mode = #tpu.pipeline_mode<synchronous>, transform_indices = @transform_3, window_bounds = array<i64: 1, 256>}, {pipeline_mode = #tpu.pipeline_mode<synchronous>, transform_indices = @transform_4, window_bounds = array<i64: 1, 256>}, {transform_indices = @transform_5, window_bounds = array<i64: 128, 256>}]} {
    %c0 = arith.constant 0 : index
    %c0_0 = arith.constant 0 : index
    %0 = vector.load %arg1[%c0, %c0_0] : memref<128x256xf32, #tpu.memory_space<vmem>>, vector<128x256xf32>
    %c0_1 = arith.constant 0 : index
    %c0_2 = arith.constant 0 : index
    %1 = vector.load %arg3[%c0_1, %c0_2] : memref<1x256xf32, #tpu.memory_space<vmem>>, vector<1x256xf32>
    %c0_3 = arith.constant 0 : index
    %c0_4 = arith.constant 0 : index
    %2 = vector.load %arg4[%c0_3, %c0_4] : memref<1x256xf32, #tpu.memory_space<vmem>>, vector<1x256xf32>
    %3 = arith.mulf %1, %2 : vector<1x256xf32>
    %c0_5 = arith.constant 0 : index
    %c0_6 = arith.constant 0 : index
    %4 = vector.load %arg2[%c0_5, %c0_6] : memref<1x256xf32, #tpu.memory_space<vmem>>, vector<1x256xf32>
    %5 = vector.broadcast %4 : vector<1x256xf32> to vector<128x256xf32>
    %6 = arith.subf %0, %5 : vector<128x256xf32>
    %7 = vector.broadcast %3 : vector<1x256xf32> to vector<128x256xf32>
    %8 = arith.mulf %6, %7 : vector<128x256xf32>
    %c0_7 = arith.constant 0 : index
    %c0_8 = arith.constant 0 : index
    %9 = vector.load %arg5[%c0_7, %c0_8] : memref<1x256xf32, #tpu.memory_space<vmem>>, vector<1x256xf32>
    %10 = vector.broadcast %9 : vector<1x256xf32> to vector<128x256xf32>
    %11 = arith.addf %8, %10 : vector<128x256xf32>
    %cst = arith.constant 0.000000e+00 : f32
    %12 = vector.broadcast %cst : f32 to vector<128x256xf32>
    %13 = arith.maximumf %11, %12 : vector<128x256xf32>
    %14 = arith.truncf %13 : vector<128x256xf32> to vector<128x256xbf16>
    %c0_9 = arith.constant 0 : index
    %c0_10 = arith.constant 0 : index
    %15 = vector.load %arg6[%c0_9, %c0_10] : memref<128x256xbf16, #tpu.memory_space<vmem>>, vector<128x256xbf16>
    tpu.vector_store %arg6[%c0_9, %c0_10], %14 {strides = array<i32>} : memref<128x256xbf16, #tpu.memory_space<vmem>>, vector<128x256xbf16>,
    return
  }
  func.func @transform_0(%arg0: i32) -> (i32, i32) {
    %c0_i32 = arith.constant 0 : i32
    %c0_i32_0 = arith.constant 0 : i32
    return %arg0, %c0_i32 : i32, i32
  }
  func.func @transform_1(%arg0: i32) -> (i32, i32) {
    %c0_i32 = arith.constant 0 : i32
    %c0_i32_0 = arith.constant 0 : i32
    %c0_i32_1 = arith.constant 0 : i32
    return %c0_i32, %c0_i32_0 : i32, i32
  }
  func.func @transform_2(%arg0: i32) -> (i32, i32) {
    %c0_i32 = arith.constant 0 : i32
    %c0_i32_0 = arith.constant 0 : i32
    %c0_i32_1 = arith.constant 0 : i32
    return %c0_i32, %c0_i32_0 : i32, i32
  }
  func.func @transform_3(%arg0: i32) -> (i32, i32) {
    %c0_i32 = arith.constant 0 : i32
    %c0_i32_0 = arith.constant 0 : i32
    %c0_i32_1 = arith.constant 0 : i32
    return %c0_i32, %c0_i32_0 : i32, i32
  }
  func.func @transform_4(%arg0: i32) -> (i32, i32) {
    %c0_i32 = arith.constant 0 : i32
    %c0_i32_0 = arith.constant 0 : i32
    %c0_i32_1 = arith.constant 0 : i32
    return %c0_i32, %c0_i32_0 : i32, i32
  }
  func.func @transform_5(%arg0: i32) -> (i32, i32) {
    %c0_i32 = arith.constant 0 : i32
    %c0_i32_0 = arith.constant 0 : i32
    return %arg0, %c0_i32 : i32, i32
  }
}

module attributes {stable_mosaic.version = 11 : i64} {
  func.func @_bn_stats_kernel(%arg0: i32, %arg1: memref<512x128xf32, #tpu.memory_space<vmem>>, %arg2: memref<1x128xf32, #tpu.memory_space<vmem>>, %arg3: memref<1x128xf32, #tpu.memory_space<vmem>>, %arg4: memref<1x128xf32, #tpu.memory_space<vmem>>, %arg5: memref<1x128xf32, #tpu.memory_space<vmem>>) attributes {dimension_semantics = [#tpu.dimension_semantics<arbitrary>], iteration_bounds = array<i64: 1>, scalar_prefetch = 0 : i64, scratch_operands = 2 : i64, tpu.core_type = #tpu.core_type<tc>, window_params = [{transform_indices = @transform_0, window_bounds = array<i64: 512, 128>}, {pipeline_mode = #tpu.pipeline_mode<synchronous>, transform_indices = @transform_1, window_bounds = array<i64: 1, 128>}, {pipeline_mode = #tpu.pipeline_mode<synchronous>, transform_indices = @transform_2, window_bounds = array<i64: 1, 128>}]} {
    %c0_i32 = arith.constant 0 : i32
    %0 = arith.cmpi eq, %arg0, %c0_i32 : i32
    %1 = arith.extui %0 : i1 to i32
    %c0_i32_0 = arith.constant 0 : i32
    %2 = arith.cmpi ne, %1, %c0_i32_0 : i32
    scf.if %2 {
      %cst_13 = arith.constant 0.000000e+00 : f32
      %18 = vector.broadcast %cst_13 : f32 to vector<1x128xf32>
      %c0_14 = arith.constant 0 : index
      %c0_15 = arith.constant 0 : index
      %19 = vector.load %arg4[%c0_14, %c0_15] : memref<1x128xf32, #tpu.memory_space<vmem>>, vector<1x128xf32>
      tpu.vector_store %arg4[%c0_14, %c0_15], %18 {strides = array<i32>} : memref<1x128xf32, #tpu.memory_space<vmem>>, vector<1x128xf32>,
      %cst_16 = arith.constant 0.000000e+00 : f32
      %20 = vector.broadcast %cst_16 : f32 to vector<1x128xf32>
      %c0_17 = arith.constant 0 : index
      %c0_18 = arith.constant 0 : index
      %21 = vector.load %arg5[%c0_17, %c0_18] : memref<1x128xf32, #tpu.memory_space<vmem>>, vector<1x128xf32>
      tpu.vector_store %arg5[%c0_17, %c0_18], %20 {strides = array<i32>} : memref<1x128xf32, #tpu.memory_space<vmem>>, vector<1x128xf32>,
    } else {
    }
    %c0 = arith.constant 0 : index
    %c0_1 = arith.constant 0 : index
    %3 = vector.load %arg1[%c0, %c0_1] : memref<512x128xf32, #tpu.memory_space<vmem>>, vector<512x128xf32>
    %c0_2 = arith.constant 0 : index
    %c0_3 = arith.constant 0 : index
    %4 = vector.load %arg4[%c0_2, %c0_3] : memref<1x128xf32, #tpu.memory_space<vmem>>, vector<1x128xf32>
    %cst = arith.constant dense<0.000000e+00> : vector<128xf32>
    %5 = vector.multi_reduction <add>, %3, %cst [0] : vector<512x128xf32> to vector<128xf32>
    %6 = vector.shape_cast %5 : vector<128xf32> to vector<1x128xf32>
    %7 = arith.addf %4, %6 : vector<1x128xf32>
    %c0_4 = arith.constant 0 : index
    %c0_5 = arith.constant 0 : index
    %8 = vector.load %arg4[%c0_4, %c0_5] : memref<1x128xf32, #tpu.memory_space<vmem>>, vector<1x128xf32>
    tpu.vector_store %arg4[%c0_4, %c0_5], %7 {strides = array<i32>} : memref<1x128xf32, #tpu.memory_space<vmem>>, vector<1x128xf32>,
    %c0_6 = arith.constant 0 : index
    %c0_7 = arith.constant 0 : index
    %9 = vector.load %arg5[%c0_6, %c0_7] : memref<1x128xf32, #tpu.memory_space<vmem>>, vector<1x128xf32>
    %10 = arith.mulf %3, %3 : vector<512x128xf32>
    %cst_8 = arith.constant dense<0.000000e+00> : vector<128xf32>
    %11 = vector.multi_reduction <add>, %10, %cst_8 [0] : vector<512x128xf32> to vector<128xf32>
    %12 = vector.shape_cast %11 : vector<128xf32> to vector<1x128xf32>
    %13 = arith.addf %9, %12 : vector<1x128xf32>
    %c0_9 = arith.constant 0 : index
    %c0_10 = arith.constant 0 : index
    %14 = vector.load %arg5[%c0_9, %c0_10] : memref<1x128xf32, #tpu.memory_space<vmem>>, vector<1x128xf32>
    tpu.vector_store %arg5[%c0_9, %c0_10], %13 {strides = array<i32>} : memref<1x128xf32, #tpu.memory_space<vmem>>, vector<1x128xf32>,
    %c0_i32_11 = arith.constant 0 : i32
    %15 = arith.cmpi eq, %arg0, %c0_i32_11 : i32
    %16 = arith.extui %15 : i1 to i32
    %c0_i32_12 = arith.constant 0 : i32
    %17 = arith.cmpi ne, %16, %c0_i32_12 : i32
    scf.if %17 {
      %c0_13 = arith.constant 0 : index
      %c0_14 = arith.constant 0 : index
      %18 = vector.load %arg4[%c0_13, %c0_14] : memref<1x128xf32, #tpu.memory_space<vmem>>, vector<1x128xf32>
      %cst_15 = arith.constant 0.001953125 : f32
      %19 = vector.broadcast %cst_15 : f32 to vector<1x128xf32>
      %20 = arith.mulf %18, %19 : vector<1x128xf32>
      %c0_16 = arith.constant 0 : index
      %c0_17 = arith.constant 0 : index
      %21 = vector.load %arg5[%c0_16, %c0_17] : memref<1x128xf32, #tpu.memory_space<vmem>>, vector<1x128xf32>
      %cst_18 = arith.constant 0.001953125 : f32
      %22 = vector.broadcast %cst_18 : f32 to vector<1x128xf32>
      %23 = arith.mulf %21, %22 : vector<1x128xf32>
      %24 = arith.mulf %20, %20 : vector<1x128xf32>
      %25 = arith.subf %23, %24 : vector<1x128xf32>
      %cst_19 = arith.constant 0.000000e+00 : f32
      %26 = vector.broadcast %cst_19 : f32 to vector<1x128xf32>
      %27 = arith.maximumf %25, %26 : vector<1x128xf32>
      %c0_20 = arith.constant 0 : index
      %c0_21 = arith.constant 0 : index
      %28 = vector.load %arg2[%c0_20, %c0_21] : memref<1x128xf32, #tpu.memory_space<vmem>>, vector<1x128xf32>
      tpu.vector_store %arg2[%c0_20, %c0_21], %20 {strides = array<i32>} : memref<1x128xf32, #tpu.memory_space<vmem>>, vector<1x128xf32>,
      %cst_22 = arith.constant 9.99999974E-6 : f32
      %29 = vector.broadcast %cst_22 : f32 to vector<1x128xf32>
      %30 = arith.addf %27, %29 : vector<1x128xf32>
      %31 = math.rsqrt %30 : vector<1x128xf32>
      %c0_23 = arith.constant 0 : index
      %c0_24 = arith.constant 0 : index
      %32 = vector.load %arg3[%c0_23, %c0_24] : memref<1x128xf32, #tpu.memory_space<vmem>>, vector<1x128xf32>
      tpu.vector_store %arg3[%c0_23, %c0_24], %31 {strides = array<i32>} : memref<1x128xf32, #tpu.memory_space<vmem>>, vector<1x128xf32>,
    } else {
    }
    return
  }
  func.func @transform_0(%arg0: i32) -> (i32, i32) {
    %c0_i32 = arith.constant 0 : i32
    %c0_i32_0 = arith.constant 0 : i32
    return %arg0, %c0_i32 : i32, i32
  }
  func.func @transform_1(%arg0: i32) -> (i32, i32) {
    %c0_i32 = arith.constant 0 : i32
    %c0_i32_0 = arith.constant 0 : i32
    %c0_i32_1 = arith.constant 0 : i32
    return %c0_i32, %c0_i32_0 : i32, i32
  }
  func.func @transform_2(%arg0: i32) -> (i32, i32) {
    %c0_i32 = arith.constant 0 : i32
    %c0_i32_0 = arith.constant 0 : i32
    %c0_i32_1 = arith.constant 0 : i32
    return %c0_i32, %c0_i32_0 : i32, i32
  }
}

module attributes {stable_mosaic.version = 11 : i64} {
  func.func @_bn_relu_kernel(%arg0: i32, %arg1: memref<512x128xf32, #tpu.memory_space<vmem>>, %arg2: memref<1x128xf32, #tpu.memory_space<vmem>>, %arg3: memref<1x128xf32, #tpu.memory_space<vmem>>, %arg4: memref<1x128xf32, #tpu.memory_space<vmem>>, %arg5: memref<1x128xf32, #tpu.memory_space<vmem>>, %arg6: memref<512x128xbf16, #tpu.memory_space<vmem>>) attributes {dimension_semantics = [#tpu.dimension_semantics<parallel>], iteration_bounds = array<i64: 1>, scalar_prefetch = 0 : i64, scratch_operands = 0 : i64, tpu.core_type = #tpu.core_type<tc>, window_params = [{transform_indices = @transform_0, window_bounds = array<i64: 512, 128>}, {pipeline_mode = #tpu.pipeline_mode<synchronous>, transform_indices = @transform_1, window_bounds = array<i64: 1, 128>}, {pipeline_mode = #tpu.pipeline_mode<synchronous>, transform_indices = @transform_2, window_bounds = array<i64: 1, 128>}, {pipeline_mode = #tpu.pipeline_mode<synchronous>, transform_indices = @transform_3, window_bounds = array<i64: 1, 128>}, {pipeline_mode = #tpu.pipeline_mode<synchronous>, transform_indices = @transform_4, window_bounds = array<i64: 1, 128>}, {transform_indices = @transform_5, window_bounds = array<i64: 512, 128>}]} {
    %c0 = arith.constant 0 : index
    %c0_0 = arith.constant 0 : index
    %0 = vector.load %arg1[%c0, %c0_0] : memref<512x128xf32, #tpu.memory_space<vmem>>, vector<512x128xf32>
    %c0_1 = arith.constant 0 : index
    %c0_2 = arith.constant 0 : index
    %1 = vector.load %arg3[%c0_1, %c0_2] : memref<1x128xf32, #tpu.memory_space<vmem>>, vector<1x128xf32>
    %c0_3 = arith.constant 0 : index
    %c0_4 = arith.constant 0 : index
    %2 = vector.load %arg4[%c0_3, %c0_4] : memref<1x128xf32, #tpu.memory_space<vmem>>, vector<1x128xf32>
    %3 = arith.mulf %1, %2 : vector<1x128xf32>
    %c0_5 = arith.constant 0 : index
    %c0_6 = arith.constant 0 : index
    %4 = vector.load %arg2[%c0_5, %c0_6] : memref<1x128xf32, #tpu.memory_space<vmem>>, vector<1x128xf32>
    %5 = vector.broadcast %4 : vector<1x128xf32> to vector<512x128xf32>
    %6 = arith.subf %0, %5 : vector<512x128xf32>
    %7 = vector.broadcast %3 : vector<1x128xf32> to vector<512x128xf32>
    %8 = arith.mulf %6, %7 : vector<512x128xf32>
    %c0_7 = arith.constant 0 : index
    %c0_8 = arith.constant 0 : index
    %9 = vector.load %arg5[%c0_7, %c0_8] : memref<1x128xf32, #tpu.memory_space<vmem>>, vector<1x128xf32>
    %10 = vector.broadcast %9 : vector<1x128xf32> to vector<512x128xf32>
    %11 = arith.addf %8, %10 : vector<512x128xf32>
    %cst = arith.constant 0.000000e+00 : f32
    %12 = vector.broadcast %cst : f32 to vector<512x128xf32>
    %13 = arith.maximumf %11, %12 : vector<512x128xf32>
    %14 = arith.truncf %13 : vector<512x128xf32> to vector<512x128xbf16>
    %c0_9 = arith.constant 0 : index
    %c0_10 = arith.constant 0 : index
    %15 = vector.load %arg6[%c0_9, %c0_10] : memref<512x128xbf16, #tpu.memory_space<vmem>>, vector<512x128xbf16>
    tpu.vector_store %arg6[%c0_9, %c0_10], %14 {strides = array<i32>} : memref<512x128xbf16, #tpu.memory_space<vmem>>, vector<512x128xbf16>,
    return
  }
  func.func @transform_0(%arg0: i32) -> (i32, i32) {
    %c0_i32 = arith.constant 0 : i32
    %c0_i32_0 = arith.constant 0 : i32
    return %arg0, %c0_i32 : i32, i32
  }
  func.func @transform_1(%arg0: i32) -> (i32, i32) {
    %c0_i32 = arith.constant 0 : i32
    %c0_i32_0 = arith.constant 0 : i32
    %c0_i32_1 = arith.constant 0 : i32
    return %c0_i32, %c0_i32_0 : i32, i32
  }
  func.func @transform_2(%arg0: i32) -> (i32, i32) {
    %c0_i32 = arith.constant 0 : i32
    %c0_i32_0 = arith.constant 0 : i32
    %c0_i32_1 = arith.constant 0 : i32
    return %c0_i32, %c0_i32_0 : i32, i32
  }
  func.func @transform_3(%arg0: i32) -> (i32, i32) {
    %c0_i32 = arith.constant 0 : i32
    %c0_i32_0 = arith.constant 0 : i32
    %c0_i32_1 = arith.constant 0 : i32
    return %c0_i32, %c0_i32_0 : i32, i32
  }
  func.func @transform_4(%arg0: i32) -> (i32, i32) {
    %c0_i32 = arith.constant 0 : i32
    %c0_i32_0 = arith.constant 0 : i32
    %c0_i32_1 = arith.constant 0 : i32
    return %c0_i32, %c0_i32_0 : i32, i32
  }
  func.func @transform_5(%arg0: i32) -> (i32, i32) {
    %c0_i32 = arith.constant 0 : i32
    %c0_i32_0 = arith.constant 0 : i32
    return %arg0, %c0_i32 : i32, i32
  }
}

module attributes {stable_mosaic.version = 11 : i64} {
  func.func @_matmul_kernel(%arg0: i32, %arg1: i32, %arg2: memref<512x128xbf16, #tpu.memory_space<vmem>>, %arg3: memref<128x512xbf16, #tpu.memory_space<vmem>>, %arg4: memref<512x512xf32, #tpu.memory_space<vmem>>) attributes {dimension_semantics = [#tpu.dimension_semantics<parallel>, #tpu.dimension_semantics<parallel>], iteration_bounds = array<i64: 1, 2>, scalar_prefetch = 0 : i64, scratch_operands = 0 : i64, tpu.core_type = #tpu.core_type<tc>, window_params = [{transform_indices = @transform_0, window_bounds = array<i64: 512, 128>}, {transform_indices = @transform_1, window_bounds = array<i64: 128, 512>}, {transform_indices = @transform_2, window_bounds = array<i64: 512, 512>}]} {
    %c0 = arith.constant 0 : index
    %c0_0 = arith.constant 0 : index
    %0 = vector.load %arg2[%c0, %c0_0] : memref<512x128xbf16, #tpu.memory_space<vmem>>, vector<512x128xbf16>
    %c0_1 = arith.constant 0 : index
    %c0_2 = arith.constant 0 : index
    %1 = vector.load %arg3[%c0_1, %c0_2] : memref<128x512xbf16, #tpu.memory_space<vmem>>, vector<128x512xbf16>
    %cst = arith.constant dense<0.000000e+00> : vector<512x512xf32>
    %2 = tpu.matmul %0, %1, %cst {dimension_numbers = #tpu.dot_dimension_numbers<[1], [0], [0], [1], [0, 0, 1, 1], [], []>} : vector<512x128xbf16>, vector<128x512xbf16>, vector<512x512xf32> -> vector<512x512xf32>
    %c0_3 = arith.constant 0 : index
    %c0_4 = arith.constant 0 : index
    %3 = vector.load %arg4[%c0_3, %c0_4] : memref<512x512xf32, #tpu.memory_space<vmem>>, vector<512x512xf32>
    tpu.vector_store %arg4[%c0_3, %c0_4], %2 {strides = array<i32>} : memref<512x512xf32, #tpu.memory_space<vmem>>, vector<512x512xf32>,
    return
  }
  func.func @transform_0(%arg0: i32, %arg1: i32) -> (i32, i32) {
    %c0_i32 = arith.constant 0 : i32
    %c0_i32_0 = arith.constant 0 : i32
    return %arg0, %c0_i32 : i32, i32
  }
  func.func @transform_1(%arg0: i32, %arg1: i32) -> (i32, i32) {
    %c0_i32 = arith.constant 0 : i32
    %c0_i32_0 = arith.constant 0 : i32
    return %c0_i32, %arg1 : i32, i32
  }
  func.func @transform_2(%arg0: i32, %arg1: i32) -> (i32, i32) {
    %c0_i32 = arith.constant 0 : i32
    return %arg0, %arg1 : i32, i32
  }
}

module attributes {stable_mosaic.version = 11 : i64} {
  func.func @_bn_stats_kernel(%arg0: i32, %arg1: memref<512x64xf32, #tpu.memory_space<vmem>>, %arg2: memref<1x64xf32, #tpu.memory_space<vmem>>, %arg3: memref<1x64xf32, #tpu.memory_space<vmem>>, %arg4: memref<1x64xf32, #tpu.memory_space<vmem>>, %arg5: memref<1x64xf32, #tpu.memory_space<vmem>>) attributes {dimension_semantics = [#tpu.dimension_semantics<arbitrary>], iteration_bounds = array<i64: 4>, scalar_prefetch = 0 : i64, scratch_operands = 2 : i64, tpu.core_type = #tpu.core_type<tc>, window_params = [{transform_indices = @transform_0, window_bounds = array<i64: 512, 64>}, {pipeline_mode = #tpu.pipeline_mode<synchronous>, transform_indices = @transform_1, window_bounds = array<i64: 1, 64>}, {pipeline_mode = #tpu.pipeline_mode<synchronous>, transform_indices = @transform_2, window_bounds = array<i64: 1, 64>}]} {
    %c0_i32 = arith.constant 0 : i32
    %0 = arith.cmpi eq, %arg0, %c0_i32 : i32
    %1 = arith.extui %0 : i1 to i32
    %c0_i32_0 = arith.constant 0 : i32
    %2 = arith.cmpi ne, %1, %c0_i32_0 : i32
    scf.if %2 {
      %cst_12 = arith.constant 0.000000e+00 : f32
      %18 = vector.broadcast %cst_12 : f32 to vector<1x64xf32>
      %c0_13 = arith.constant 0 : index
      %c0_14 = arith.constant 0 : index
      %19 = vector.load %arg4[%c0_13, %c0_14] : memref<1x64xf32, #tpu.memory_space<vmem>>, vector<1x64xf32>
      tpu.vector_store %arg4[%c0_13, %c0_14], %18 {strides = array<i32>} : memref<1x64xf32, #tpu.memory_space<vmem>>, vector<1x64xf32>,
      %cst_15 = arith.constant 0.000000e+00 : f32
      %20 = vector.broadcast %cst_15 : f32 to vector<1x64xf32>
      %c0_16 = arith.constant 0 : index
      %c0_17 = arith.constant 0 : index
      %21 = vector.load %arg5[%c0_16, %c0_17] : memref<1x64xf32, #tpu.memory_space<vmem>>, vector<1x64xf32>
      tpu.vector_store %arg5[%c0_16, %c0_17], %20 {strides = array<i32>} : memref<1x64xf32, #tpu.memory_space<vmem>>, vector<1x64xf32>,
    } else {
    }
    %c0 = arith.constant 0 : index
    %c0_1 = arith.constant 0 : index
    %3 = vector.load %arg1[%c0, %c0_1] : memref<512x64xf32, #tpu.memory_space<vmem>>, vector<512x64xf32>
    %c0_2 = arith.constant 0 : index
    %c0_3 = arith.constant 0 : index
    %4 = vector.load %arg4[%c0_2, %c0_3] : memref<1x64xf32, #tpu.memory_space<vmem>>, vector<1x64xf32>
    %cst = arith.constant dense<0.000000e+00> : vector<64xf32>
    %5 = vector.multi_reduction <add>, %3, %cst [0] : vector<512x64xf32> to vector<64xf32>
    %6 = vector.shape_cast %5 : vector<64xf32> to vector<1x64xf32>
    %7 = arith.addf %4, %6 : vector<1x64xf32>
    %c0_4 = arith.constant 0 : index
    %c0_5 = arith.constant 0 : index
    %8 = vector.load %arg4[%c0_4, %c0_5] : memref<1x64xf32, #tpu.memory_space<vmem>>, vector<1x64xf32>
    tpu.vector_store %arg4[%c0_4, %c0_5], %7 {strides = array<i32>} : memref<1x64xf32, #tpu.memory_space<vmem>>, vector<1x64xf32>,
    %c0_6 = arith.constant 0 : index
    %c0_7 = arith.constant 0 : index
    %9 = vector.load %arg5[%c0_6, %c0_7] : memref<1x64xf32, #tpu.memory_space<vmem>>, vector<1x64xf32>
    %10 = arith.mulf %3, %3 : vector<512x64xf32>
    %cst_8 = arith.constant dense<0.000000e+00> : vector<64xf32>
    %11 = vector.multi_reduction <add>, %10, %cst_8 [0] : vector<512x64xf32> to vector<64xf32>
    %12 = vector.shape_cast %11 : vector<64xf32> to vector<1x64xf32>
    %13 = arith.addf %9, %12 : vector<1x64xf32>
    %c0_9 = arith.constant 0 : index
    %c0_10 = arith.constant 0 : index
    %14 = vector.load %arg5[%c0_9, %c0_10] : memref<1x64xf32, #tpu.memory_space<vmem>>, vector<1x64xf32>
    tpu.vector_store %arg5[%c0_9, %c0_10], %13 {strides = array<i32>} : memref<1x64xf32, #tpu.memory_space<vmem>>, vector<1x64xf32>,
    %c3_i32 = arith.constant 3 : i32
    %15 = arith.cmpi eq, %arg0, %c3_i32 : i32
    %16 = arith.extui %15 : i1 to i32
    %c0_i32_11 = arith.constant 0 : i32
    %17 = arith.cmpi ne, %16, %c0_i32_11 : i32
    scf.if %17 {
      %c0_12 = arith.constant 0 : index
      %c0_13 = arith.constant 0 : index
      %18 = vector.load %arg4[%c0_12, %c0_13] : memref<1x64xf32, #tpu.memory_space<vmem>>, vector<1x64xf32>
      %cst_14 = arith.constant 4.8828125E-4 : f32
      %19 = vector.broadcast %cst_14 : f32 to vector<1x64xf32>
      %20 = arith.mulf %18, %19 : vector<1x64xf32>
      %c0_15 = arith.constant 0 : index
      %c0_16 = arith.constant 0 : index
      %21 = vector.load %arg5[%c0_15, %c0_16] : memref<1x64xf32, #tpu.memory_space<vmem>>, vector<1x64xf32>
      %cst_17 = arith.constant 4.8828125E-4 : f32
      %22 = vector.broadcast %cst_17 : f32 to vector<1x64xf32>
      %23 = arith.mulf %21, %22 : vector<1x64xf32>
      %24 = arith.mulf %20, %20 : vector<1x64xf32>
      %25 = arith.subf %23, %24 : vector<1x64xf32>
      %cst_18 = arith.constant 0.000000e+00 : f32
      %26 = vector.broadcast %cst_18 : f32 to vector<1x64xf32>
      %27 = arith.maximumf %25, %26 : vector<1x64xf32>
      %c0_19 = arith.constant 0 : index
      %c0_20 = arith.constant 0 : index
      %28 = vector.load %arg2[%c0_19, %c0_20] : memref<1x64xf32, #tpu.memory_space<vmem>>, vector<1x64xf32>
      tpu.vector_store %arg2[%c0_19, %c0_20], %20 {strides = array<i32>} : memref<1x64xf32, #tpu.memory_space<vmem>>, vector<1x64xf32>,
      %cst_21 = arith.constant 9.99999974E-6 : f32
      %29 = vector.broadcast %cst_21 : f32 to vector<1x64xf32>
      %30 = arith.addf %27, %29 : vector<1x64xf32>
      %31 = math.rsqrt %30 : vector<1x64xf32>
      %c0_22 = arith.constant 0 : index
      %c0_23 = arith.constant 0 : index
      %32 = vector.load %arg3[%c0_22, %c0_23] : memref<1x64xf32, #tpu.memory_space<vmem>>, vector<1x64xf32>
      tpu.vector_store %arg3[%c0_22, %c0_23], %31 {strides = array<i32>} : memref<1x64xf32, #tpu.memory_space<vmem>>, vector<1x64xf32>,
    } else {
    }
    return
  }
  func.func @transform_0(%arg0: i32) -> (i32, i32) {
    %c0_i32 = arith.constant 0 : i32
    %c0_i32_0 = arith.constant 0 : i32
    return %arg0, %c0_i32 : i32, i32
  }
  func.func @transform_1(%arg0: i32) -> (i32, i32) {
    %c0_i32 = arith.constant 0 : i32
    %c0_i32_0 = arith.constant 0 : i32
    %c0_i32_1 = arith.constant 0 : i32
    return %c0_i32, %c0_i32_0 : i32, i32
  }
  func.func @transform_2(%arg0: i32) -> (i32, i32) {
    %c0_i32 = arith.constant 0 : i32
    %c0_i32_0 = arith.constant 0 : i32
    %c0_i32_1 = arith.constant 0 : i32
    return %c0_i32, %c0_i32_0 : i32, i32
  }
}

module attributes {stable_mosaic.version = 11 : i64} {
  func.func @_bn_relu_kernel(%arg0: i32, %arg1: memref<512x64xf32, #tpu.memory_space<vmem>>, %arg2: memref<1x64xf32, #tpu.memory_space<vmem>>, %arg3: memref<1x64xf32, #tpu.memory_space<vmem>>, %arg4: memref<1x64xf32, #tpu.memory_space<vmem>>, %arg5: memref<1x64xf32, #tpu.memory_space<vmem>>, %arg6: memref<512x64xbf16, #tpu.memory_space<vmem>>) attributes {dimension_semantics = [#tpu.dimension_semantics<parallel>], iteration_bounds = array<i64: 4>, scalar_prefetch = 0 : i64, scratch_operands = 0 : i64, tpu.core_type = #tpu.core_type<tc>, window_params = [{transform_indices = @transform_0, window_bounds = array<i64: 512, 64>}, {pipeline_mode = #tpu.pipeline_mode<synchronous>, transform_indices = @transform_1, window_bounds = array<i64: 1, 64>}, {pipeline_mode = #tpu.pipeline_mode<synchronous>, transform_indices = @transform_2, window_bounds = array<i64: 1, 64>}, {pipeline_mode = #tpu.pipeline_mode<synchronous>, transform_indices = @transform_3, window_bounds = array<i64: 1, 64>}, {pipeline_mode = #tpu.pipeline_mode<synchronous>, transform_indices = @transform_4, window_bounds = array<i64: 1, 64>}, {transform_indices = @transform_5, window_bounds = array<i64: 512, 64>}]} {
    %c0 = arith.constant 0 : index
    %c0_0 = arith.constant 0 : index
    %0 = vector.load %arg1[%c0, %c0_0] : memref<512x64xf32, #tpu.memory_space<vmem>>, vector<512x64xf32>
    %c0_1 = arith.constant 0 : index
    %c0_2 = arith.constant 0 : index
    %1 = vector.load %arg3[%c0_1, %c0_2] : memref<1x64xf32, #tpu.memory_space<vmem>>, vector<1x64xf32>
    %c0_3 = arith.constant 0 : index
    %c0_4 = arith.constant 0 : index
    %2 = vector.load %arg4[%c0_3, %c0_4] : memref<1x64xf32, #tpu.memory_space<vmem>>, vector<1x64xf32>
    %3 = arith.mulf %1, %2 : vector<1x64xf32>
    %c0_5 = arith.constant 0 : index
    %c0_6 = arith.constant 0 : index
    %4 = vector.load %arg2[%c0_5, %c0_6] : memref<1x64xf32, #tpu.memory_space<vmem>>, vector<1x64xf32>
    %5 = vector.broadcast %4 : vector<1x64xf32> to vector<512x64xf32>
    %6 = arith.subf %0, %5 : vector<512x64xf32>
    %7 = vector.broadcast %3 : vector<1x64xf32> to vector<512x64xf32>
    %8 = arith.mulf %6, %7 : vector<512x64xf32>
    %c0_7 = arith.constant 0 : index
    %c0_8 = arith.constant 0 : index
    %9 = vector.load %arg5[%c0_7, %c0_8] : memref<1x64xf32, #tpu.memory_space<vmem>>, vector<1x64xf32>
    %10 = vector.broadcast %9 : vector<1x64xf32> to vector<512x64xf32>
    %11 = arith.addf %8, %10 : vector<512x64xf32>
    %cst = arith.constant 0.000000e+00 : f32
    %12 = vector.broadcast %cst : f32 to vector<512x64xf32>
    %13 = arith.maximumf %11, %12 : vector<512x64xf32>
    %14 = arith.truncf %13 : vector<512x64xf32> to vector<512x64xbf16>
    %c0_9 = arith.constant 0 : index
    %c0_10 = arith.constant 0 : index
    %15 = vector.load %arg6[%c0_9, %c0_10] : memref<512x64xbf16, #tpu.memory_space<vmem>>, vector<512x64xbf16>
    tpu.vector_store %arg6[%c0_9, %c0_10], %14 {strides = array<i32>} : memref<512x64xbf16, #tpu.memory_space<vmem>>, vector<512x64xbf16>,
    return
  }
  func.func @transform_0(%arg0: i32) -> (i32, i32) {
    %c0_i32 = arith.constant 0 : i32
    %c0_i32_0 = arith.constant 0 : i32
    return %arg0, %c0_i32 : i32, i32
  }
  func.func @transform_1(%arg0: i32) -> (i32, i32) {
    %c0_i32 = arith.constant 0 : i32
    %c0_i32_0 = arith.constant 0 : i32
    %c0_i32_1 = arith.constant 0 : i32
    return %c0_i32, %c0_i32_0 : i32, i32
  }
  func.func @transform_2(%arg0: i32) -> (i32, i32) {
    %c0_i32 = arith.constant 0 : i32
    %c0_i32_0 = arith.constant 0 : i32
    %c0_i32_1 = arith.constant 0 : i32
    return %c0_i32, %c0_i32_0 : i32, i32
  }
  func.func @transform_3(%arg0: i32) -> (i32, i32) {
    %c0_i32 = arith.constant 0 : i32
    %c0_i32_0 = arith.constant 0 : i32
    %c0_i32_1 = arith.constant 0 : i32
    return %c0_i32, %c0_i32_0 : i32, i32
  }
  func.func @transform_4(%arg0: i32) -> (i32, i32) {
    %c0_i32 = arith.constant 0 : i32
    %c0_i32_0 = arith.constant 0 : i32
    %c0_i32_1 = arith.constant 0 : i32
    return %c0_i32, %c0_i32_0 : i32, i32
  }
  func.func @transform_5(%arg0: i32) -> (i32, i32) {
    %c0_i32 = arith.constant 0 : i32
    %c0_i32_0 = arith.constant 0 : i32
    return %arg0, %c0_i32 : i32, i32
  }
}

module attributes {stable_mosaic.version = 11 : i64} {
  func.func @_matmul_kernel(%arg0: i32, %arg1: i32, %arg2: memref<512x64xbf16, #tpu.memory_space<vmem>>, %arg3: memref<64x128xbf16, #tpu.memory_space<vmem>>, %arg4: memref<512x128xf32, #tpu.memory_space<vmem>>) attributes {dimension_semantics = [#tpu.dimension_semantics<parallel>, #tpu.dimension_semantics<parallel>], iteration_bounds = array<i64: 4, 1>, scalar_prefetch = 0 : i64, scratch_operands = 0 : i64, tpu.core_type = #tpu.core_type<tc>, window_params = [{transform_indices = @transform_0, window_bounds = array<i64: 512, 64>}, {transform_indices = @transform_1, window_bounds = array<i64: 64, 128>}, {transform_indices = @transform_2, window_bounds = array<i64: 512, 128>}]} {
    %c0 = arith.constant 0 : index
    %c0_0 = arith.constant 0 : index
    %0 = vector.load %arg2[%c0, %c0_0] : memref<512x64xbf16, #tpu.memory_space<vmem>>, vector<512x64xbf16>
    %c0_1 = arith.constant 0 : index
    %c0_2 = arith.constant 0 : index
    %1 = vector.load %arg3[%c0_1, %c0_2] : memref<64x128xbf16, #tpu.memory_space<vmem>>, vector<64x128xbf16>
    %cst = arith.constant dense<0.000000e+00> : vector<512x128xf32>
    %2 = tpu.matmul %0, %1, %cst {dimension_numbers = #tpu.dot_dimension_numbers<[1], [0], [0], [1], [0, 0, 1, 1], [], []>} : vector<512x64xbf16>, vector<64x128xbf16>, vector<512x128xf32> -> vector<512x128xf32>
    %c0_3 = arith.constant 0 : index
    %c0_4 = arith.constant 0 : index
    %3 = vector.load %arg4[%c0_3, %c0_4] : memref<512x128xf32, #tpu.memory_space<vmem>>, vector<512x128xf32>
    tpu.vector_store %arg4[%c0_3, %c0_4], %2 {strides = array<i32>} : memref<512x128xf32, #tpu.memory_space<vmem>>, vector<512x128xf32>,
    return
  }
  func.func @transform_0(%arg0: i32, %arg1: i32) -> (i32, i32) {
    %c0_i32 = arith.constant 0 : i32
    %c0_i32_0 = arith.constant 0 : i32
    return %arg0, %c0_i32 : i32, i32
  }
  func.func @transform_1(%arg0: i32, %arg1: i32) -> (i32, i32) {
    %c0_i32 = arith.constant 0 : i32
    %c0_i32_0 = arith.constant 0 : i32
    return %c0_i32, %arg1 : i32, i32
  }
  func.func @transform_2(%arg0: i32, %arg1: i32) -> (i32, i32) {
    %c0_i32 = arith.constant 0 : i32
    return %arg0, %arg1 : i32, i32
  }
}

module attributes {stable_mosaic.version = 11 : i64} {
  func.func @_tanh_kernel(%arg0: i32, %arg1: memref<192x128xf32, #tpu.memory_space<vmem>>, %arg2: memref<192x128xf32, #tpu.memory_space<vmem>>) attributes {dimension_semantics = [#tpu.dimension_semantics<parallel>], iteration_bounds = array<i64: 1>, scalar_prefetch = 0 : i64, scratch_operands = 0 : i64, tpu.core_type = #tpu.core_type<tc>, window_params = [{transform_indices = @transform_0, window_bounds = array<i64: 192, 128>}, {transform_indices = @transform_1, window_bounds = array<i64: 192, 128>}]} {
    %c0 = arith.constant 0 : index
    %c0_0 = arith.constant 0 : index
    %0 = vector.load %arg1[%c0, %c0_0] : memref<192x128xf32, #tpu.memory_space<vmem>>, vector<192x128xf32>
    %1 = math.tanh %0 : vector<192x128xf32>
    %c0_1 = arith.constant 0 : index
    %c0_2 = arith.constant 0 : index
    %2 = vector.load %arg2[%c0_1, %c0_2] : memref<192x128xf32, #tpu.memory_space<vmem>>, vector<192x128xf32>
    tpu.vector_store %arg2[%c0_1, %c0_2], %1 {strides = array<i32>} : memref<192x128xf32, #tpu.memory_space<vmem>>, vector<192x128xf32>,
    return
  }
  func.func @transform_0(%arg0: i32) -> (i32, i32) {
    %c0_i32 = arith.constant 0 : i32
    %c0_i32_0 = arith.constant 0 : i32
    return %arg0, %c0_i32 : i32, i32
  }
  func.func @transform_1(%arg0: i32) -> (i32, i32) {
    %c0_i32 = arith.constant 0 : i32
    %c0_i32_0 = arith.constant 0 : i32
    return %arg0, %c0_i32 : i32, i32
  }
}

</mosaic_0001>

<bundles_post_ra>
// kernel: generator_forward.14
= control target key start
LH: loop header
LB: loop body
LE: loop exit
PB: predicated region body
PF: predicated region fallthrough
CT: control target
= control target key end

     0   :  { %7 = vsyncpa [#allocation3], 0  ;;  %s1012_s0 = inlined_call_operand.vmem [shape: bf16[16,100], index: 0, kind: input, shape index: {}]   ;;  %s1013_s1 = inlined_call_operand.hbm [shape: bf16[100,8192], index: 1, kind: input, shape index: {}]   ;;  %s1014_s2 = inlined_call_operand.vmem [shape: f32[16,8192], index: 2, kind: output, shape index: {}]  }
   0x1   :  { %9 = vsyncpa [#allocation3 + $0x1], 0  ;;  %s855_s9 = smov 0   ;;  %s857_s10 = smov 0  }
   0x2   :  { %s859_s11 = smov 0   ;;  %s861_s12 = smov 0  }
   0x3   :  { %s863_s13 = smov 0   ;;  %s865_s14 = smov 0  }
   0x4 LB: > { %s604_s15 = sadd.s32 4294967295, %s833_s14   ;;  %s24_s16 = sadd.s32 1, %s829_s13  ;;  %s833_s14 = sphi %s865_s14, %s15_s14   ;;  %s829_s13 = sphi %s863_s13, %s1023_s13   ;;  %s825_s12 = sphi %s861_s12, %s1022_s12   ;;  %s821_s11 = sphi %s859_s11, %s1021_s11   ;;  %s817_s10 = sphi %s857_s10, %s1020_s10   ;;  %s813_s9 = sphi %s855_s9, %s1019_s9  }
   0x5   : > { %p25_p0 = scmp.ge.s32.totalorder %s24_s16, 16  ;;  %s60_s17 = sadd.s32 1, %s821_s11 }
   0x6   : > { %p67_p1 = scmp.ne.s32.totalorder %s821_s11, %s817_s10  ;;  %p68_p2 = scmp.eq.s32.totalorder %s833_s14, 0 }
   0x7   : > { %s1025_s16 = smov (%p25_p0, %s24_s16), 0  ;;  %p73_p4 = scmp.ne.s32.totalorder %s817_s10, %s813_s9 }
   0x8   : > { %p891_p3 = por %p68_p2, %p67_p1  ;;  %s57_s19 = ssub.s32 %s829_s13, %s1025_s16 }
   0x9   : > { %p74_p5 = scmp.eq.s32.totalorder %s604_s15, 0  ;;  %p58_p6 = scmp.eq.s32.totalorder %s57_s19, 0 }
   0xa   : > { %p99_p7 = scmp.eq.s32.totalorder %s604_s15, 15  ;;  %p661_p10 = scmp.lt.s32.totalorder %s833_s14, 16 }
   0xb   : > { %p898_p8 = por %p74_p5, %p73_p4  ;;  %s134_s23 = sand.u32 1, %s821_s11  }
   0xc   : > { %s903_s21 = scalar_select %p58_p6, %s821_s11, %s60_s17  }
   0xd   : > { %p905_p9 = por %p99_p7, %p67_p1  ;;  %s651_s24 = sshll.u32 %s829_s13, 8 }
   0xe   : > { %s653_s25 = smul.u32 208, %s134_s23  ;;  %s144_s28 = scalar_lea.hbm %s1013_s1, %s651_s24 }
   0xf   : > { %p917_p11 = pnand %p661_p10, %p891_p3  ;;  %p611_p12 = scmp.ge.s32.totalorder %s833_s14, 1 }
  0x10   : > { %s138_s30 = scalar_lea.vmem [#allocation2], %s653_s25  ;;  %s135_s4 = scalar_lea.sflag [#allocation3], %s134_s23 }
  0x11   : > { %s145_s3 = sshll.u32 %s138_s30, 4  ;;  %p757_p13 = pneg %p917_p11  ;;  %s146_s3 = int_to_ptr.vmem [resolvable:$true] %s145_s3 }
  0x12   : > { %s768_s5 = scalar_lea.vmem %s146_s3, 3328  ;;  %s835_s6 = smov [#allocation2]  }
  0x13   : > { %p769_p0 = scmp.ne.s32.totalorder %s146_s3, %s768_s5  ;;  %s773_s7 = sshll.u32 %s835_s6, 4  ;;  %s774_s7 = int_to_ptr.vmem [resolvable:$false] %s773_s7 }
  0x14   : > { %s775_s8 = scalar_lea.vmem %s774_s7, 6656  ;;  %p776_p3 = scmp.lt.s32.totalorder %s146_s3, %s774_s7 }
  0x15   : > { %p771_p1 = pnand %p769_p0, %p757_p13  ;;  %p777_p4 = scmp.lt.s32.totalorder %s775_s8, %s768_s5 }
  0x17   : > { %p772_p2 = pneg %p771_p1  ;;  %p778_p5 = por %p777_p4, %p776_p3 }
  0x19   : > { %p779_p6 = pnand %p778_p5, %p772_p2 }
  0x1b   : > { %782 = shalt.err (!%p779_p6)
}
  0x1c   : > { %s836_s9 = smov 4096   ;;  %s837_s15 = smov 256  }
  0x1d   : > { %s838_s17 = smov 16   ;;  %p153_p7 = scmp.lt.s32.totalorder %s833_s14, 17 }
  0x1e   : > { %660 = dma.hbm_to_vmem [thread:$0]  (!%p917_p11), %s144_s28, 3328, %s146_s3, %s135_s4, %s836_s9, %s837_s15, %s838_s17  }
  0x1f   : > { %p154_p10 = pnand %p611_p12, %p153_p7 }
  0x20   : > { %s930_s18 = sand.u32 (!%p154_p10), 1, %s817_s10  }
  0x21   : > { %157 = sbr.rel (%p154_p10) target bundleno = 279 (0x117), region = 28  ;;  %s160_s23 = scalar_lea.sflag (!%p154_p10), [#allocation3], %s930_s18 }
  0x22   : > { %s654_s19 = smul.u32 (!%p154_p10), 208, %s930_s18 }
  0x24   : > { %s934_s24 = scalar_lea.vmem (!%p154_p10), [#allocation2], %s654_s19 }
  0x26   : > { %808 = dma.done.wait (%p898_p8), %s160_s23, 3328  }
  0x27   : > { %810 = vsyncadd (%p898_p8), %s160_s23, 4294963968  ;;  %v839_v0 = vmov 0   ;;  %v224_v1 = vld [vmem:[%s934_s24 + $0xc0] sm:$0x33]  ;;  %vm365_vm0 = vcmask 1041408   ;;  %vm361_vm1 = vcmask 818176  }
  0x28   : > { %410 = vmatprep.mubr.bf16.mxu0 %v839_v0  ;;  %453 = vmatprep.mubr.bf16.mxu1 %v839_v0  ;;  %v225_v2 = vld [vmem:[%s934_s24 + $0xc8] sm:$0x33]  ;;  %v639_v3 = vcombine.high %v224_v1, %v224_v1  ;;  %v638_v5 = vcombine.low %v224_v1, %v224_v1  ;;  %v718_v7 = vld [vmem:[%s934_s24 + $0xa4] ss:$16 sps:$4 sm:$0xff]   ;;  %v722_v11 = vld [vmem:[%s934_s24 + $0xa0] ss:$16 sps:$4 sm:$0xff]  }
  0x29   : > { %v641_v4 = vcombine.high %v225_v2, %v225_v2  ;;  %v640_v6 = vcombine.low %v225_v2, %v225_v2  ;;  %v720_v8 = vld [vmem:[%s934_s24 + $0xac] ss:$16 sps:$4 sm:$0xff]   ;;  %v723_v12 = vld [vmem:[%s934_s24 + $0xa8] ss:$16 sps:$4 sm:$0xff]   ;;  %v724_v13 = vld [vmem:[%s934_s24 + $0x84] ss:$16 sps:$4 sm:$0xff]  }
  0x2a   : > { %642 = vmatprep.subr.msk.bf16.mxu0 %vm365_vm0, %v639_v3  ;;  %v367_v9 = vsel %vm365_vm0, %v638_v5, 0  ;;  %v726_v14 = vld [vmem:[%s934_s24 + $0x8c] ss:$16 sps:$4 sm:$0xff]   ;;  %v728_v15 = vld [vmem:[%s934_s24 + $0x80] ss:$16 sps:$4 sm:$0xff]   ;;  %s612_s26 = sshll.u32 %s930_s18, 6 }
  0x2b   : > { %644 = vmatprep.subr.msk.bf16.mxu1 %vm365_vm0, %v641_v4  ;;  %v373_v10 = vsel %vm365_vm0, %v640_v6, 0  ;;  %381 = vmatpush1.bf16.msra.mxu0 %v367_v9  ;;  %v729_v16 = vld [vmem:[%s934_s24 + $0x88] ss:$16 sps:$4 sm:$0xff]   ;;  %v730_v17 = vld [vmem:[%s934_s24 + $0x64] ss:$16 sps:$4 sm:$0xff]   ;;  %s970_s27 = scalar_lea.vmem [#allocation4], %s612_s26 }
  0x2c   : > { %424 = vmatpush1.bf16.msra.mxu1 %v373_v10  ;;  %382 = vmatprep.subr.bf16.mxu0 %v718_v7  ;;  %v732_v18 = vld [vmem:[%s934_s24 + $0x6c] ss:$16 sps:$4 sm:$0xff]   ;;  %v734_v19 = vld [vmem:[%s934_s24 + $0x60] ss:$16 sps:$4 sm:$0xff]   ;;  %v735_v20 = vld [vmem:[%s934_s24 + $0x68] ss:$16 sps:$4 sm:$0xff]  }
  0x2d   : > { %425 = vmatprep.subr.bf16.mxu1 %v720_v8  ;;  %v736_v21 = vld [vmem:[%s934_s24 + $0x44] ss:$16 sps:$4 sm:$0xff]   ;;  %v738_v22 = vld [vmem:[%s934_s24 + $0x4c] ss:$16 sps:$4 sm:$0xff]   ;;  %v740_v23 = vld [vmem:[%s934_s24 + $0x40] ss:$16 sps:$4 sm:$0xff]  }
  0x2e   : > { %v741_v24 = vld [vmem:[%s934_s24 + $0x48] ss:$16 sps:$4 sm:$0xff]   ;;  %v742_v25 = vld [vmem:[%s934_s24 + $0x24] ss:$16 sps:$4 sm:$0xff]   ;;  %v744_v26 = vld [vmem:[%s934_s24 + $0x2c] ss:$16 sps:$4 sm:$0xff]  }
  0x2f   : > { %383 = vmatpush1.bf16.msra.mxu0 %v722_v11  ;;  %v746_v27 = vld [vmem:[%s934_s24 + $0x20] ss:$16 sps:$4 sm:$0xff]   ;;  %v747_v28 = vld [vmem:[%s934_s24 + $0x28] ss:$16 sps:$4 sm:$0xff]   ;;  %v748_v29 = vld [vmem:[%s934_s24 + $0x4] ss:$16 sps:$4 sm:$0xff]  }
  0x30   : > { %426 = vmatpush1.bf16.msra.mxu1 %v723_v12  ;;  %384 = vmatprep.subr.bf16.mxu0 %v724_v13  ;;  %v750_v30 = vld [vmem:[%s934_s24 + $0xc] ss:$16 sps:$4 sm:$0xff]   ;;  %v752_v31 = vld [vmem:[%s934_s24] ss:$16 sps:$4 sm:$0xff]   ;;  %v753_v32 = vld [vmem:[%s934_s24 + $0x8] ss:$16 sps:$4 sm:$0xff]  }
  0x31   : > { %427 = vmatprep.subr.bf16.mxu1 %v726_v14  ;;  %v754_v33 = vld [vmem:[%s1012_s0] sm:$0xff]   ;;  %s652_s28 = sshll.u32 (%p905_p9), %s825_s12, 5 }
  0x32   : > { %s484_s3 = scalar_lea.vmem (%p905_p9), %s1014_s2, %s652_s28 }
  0x33   : > { %385 = vmatpush1.bf16.msra.mxu0 %v728_v15 }
  0x34   : > { %428 = vmatpush1.bf16.msra.mxu1 %v729_v16  ;;  %386 = vmatprep.subr.bf16.mxu0 %v730_v17 }
  0x35   : > { %429 = vmatprep.subr.bf16.mxu1 %v732_v18 }
  0x37   : > { %387 = vmatpush1.bf16.msra.mxu0 %v734_v19 }
  0x38   : > { %430 = vmatpush1.bf16.msra.mxu1 %v735_v20  ;;  %388 = vmatprep.subr.bf16.mxu0 %v736_v21 }
  0x39   : > { %431 = vmatprep.subr.bf16.mxu1 %v738_v22 }
  0x3b   : > { %389 = vmatpush1.bf16.msra.mxu0 %v740_v23 }
  0x3c   : > { %432 = vmatpush1.bf16.msra.mxu1 %v741_v24  ;;  %390 = vmatprep.subr.bf16.mxu0 %v742_v25 }
  0x3d   : > { %433 = vmatprep.subr.bf16.mxu1 %v744_v26 }
  0x3f   : > { %391 = vmatpush1.bf16.msra.mxu0 %v746_v27 }
  0x40   : > { %434 = vmatpush1.bf16.msra.mxu1 %v747_v28  ;;  %392 = vmatprep.subr.bf16.mxu0 %v748_v29 }
  0x41   : > { %435 = vmatprep.subr.bf16.mxu1 %v750_v30 }
  0x43   : > { %393 = vmatpush1.bf16.msra.mxu0 %v752_v31 }
  0x44   : > { %436 = vmatpush1.bf16.msra.mxu1 %v753_v32 }
  0x46   : > { %643 = vmatmul.mubr.msk.bf16.vlgmr.msra.gmra.mxu0 %vm361_vm1, %v754_v33 }
  0x47   : > { %645 = vmatmul.mubr.msk.bf16.vlgmr.msra.gmra.mxu1 %vm361_vm1, %v754_v33 }
 0x106   : > { %v412_v34 = vpop.f32.mrf.mxu0 }
 0x107   : > { %v455_v35 = vpop.f32.mrf.mxu1  ;;  %464 = vst [vmem:[%s970_s27] sm:$0xff] %v412_v34 }
 0x108   : > { %466 = vst [vmem:[%s970_s27 + $0x10] sm:$0xff] %v455_v35  ;;  %v414_v36 = vpop.f32.mrf.mxu0 }
 0x109   : > { %v457_v37 = vpop.f32.mrf.mxu1  ;;  %465 = vst [vmem:[%s970_s27 + $0x8] sm:$0xff] %v414_v36 }
 0x10a   : > { %467 = vst [vmem:[%s970_s27 + $0x18] sm:$0xff] %v457_v37  ;;  %v416_v38 = vpop.f32.mrf.mxu0  ;;  %478 = sbr.rel (!%p905_p9) target bundleno = 279 (0x117), region = 36 }
 0x10b   : > { %v459_v39 = vpop.f32.mrf.mxu1  ;;  %468 = vst [vmem:[%s970_s27 + $0x20] sm:$0xff] %v416_v38 }
 0x10c   : > { %470 = vst [vmem:[%s970_s27 + $0x30] sm:$0xff] %v459_v39  ;;  %v418_v40 = vpop.f32.mrf.mxu0 }
 0x10d   : > { %v461_v41 = vpop.f32.mrf.mxu1  ;;  %469 = vst [vmem:[%s970_s27 + $0x28] sm:$0xff] %v418_v40 }
 0x10e   : > { %471 = vst [vmem:[%s970_s27 + $0x38] sm:$0xff] %v461_v41  ;;  %v497_v42 = vld [vmem:[%s970_s27] sm:$0xff] (%p905_p9) }
 0x10f   : > { %v501_v44 = vld [vmem:[%s970_s27 + $0x10] sm:$0xff]  ;;  %498 = vst [vmem:[%s484_s3] sm:$0xff] %v497_v42 }
 0x110   : > { %v499_v43 = vld [vmem:[%s970_s27 + $0x8] sm:$0xff]  ;;  %502 = vst [vmem:[%s484_s3 + $0x10] sm:$0xff] %v501_v44 }
 0x111   : > { %v503_v45 = vld [vmem:[%s970_s27 + $0x18] sm:$0xff]  ;;  %500 = vst [vmem:[%s484_s3 + $0x8] sm:$0xff] %v499_v43 }
 0x112   : > { %v505_v46 = vld [vmem:[%s970_s27 + $0x20] sm:$0xff]  ;;  %504 = vst [vmem:[%s484_s3 + $0x18] sm:$0xff] %v503_v45 }
 0x113   : > { %506 = vst [vmem:[%s484_s3 + $0x200] sm:$0xff] %v505_v46  ;;  %v509_v48 = vld [vmem:[%s970_s27 + $0x30] sm:$0xff] }
 0x114   : > { %v507_v47 = vld [vmem:[%s970_s27 + $0x28] sm:$0xff]  ;;  %510 = vst [vmem:[%s484_s3 + $0x210] sm:$0xff] %v509_v48 }
 0x115   : > { %508 = vst [vmem:[%s484_s3 + $0x208] sm:$0xff] %v507_v47  ;;  %v511_v49 = vld [vmem:[%s970_s27 + $0x38] sm:$0xff] }
 0x116   : > { %512 = vst [vmem:[%s484_s3 + $0x218] sm:$0xff] %v511_v49 }
 0x117 PF: > { %s15_s14 = sadd.s32 1, %s833_s14   ;;  %s1019_s9 = smov %s817_s10 }
 0x118   : > { %p12_p8 = scmp.ge.s32.totalorder %s15_s14, 18   ;;  %s1020_s10 = smov %s821_s11 }
 0x119   : > { %s1021_s11 = smov %s903_s21  ;;  %s1022_s12 = smov %s829_s13 }
 0x11a   : > { %s1023_s13 = smov %s1025_s16  ;;  %14 = sbr.rel (!%p12_p8) target bundleno = 4 (0x4), region = 94 }
 0x11f   :  { %528 = vsyncpa [#allocation3], 1 }
 0x120   :  { %530 = vsyncpa [#allocation3 + $0x1], 1 }

// kernel: generator_forward.15
= control target key start
LH: loop header
LB: loop body
LE: loop exit
PB: predicated region body
PF: predicated region fallthrough
CT: control target
= control target key end

     0   :  { %v14_v0 = vlaneseq  ;;  %v218_v1 = vmov 1966171168   ;;  %v219_v13 = vmov 0.0   ;;  %s313_s0 = inlined_call_operand.vmem [shape: f32[32,512], index: 0, kind: input, shape index: {}]   ;;  %s314_s1 = inlined_call_operand.vmem [shape: f32[1,512], index: 1, kind: output, shape index: {0}]   ;;  %s315_s2 = inlined_call_operand.vmem [shape: f32[1,512], index: 2, kind: output, shape index: {1}]  }
   0x1   :  { %v80_v2 = vunpack.c.l.s4 %v218_v1  ;;  %v20_v3 = vld [vmem:[%s313_s0] sm:$0xff]  ;;  %v21_v4 = vld [vmem:[%s313_s0 + $0x8] sm:$0xff]  ;;  %v22_v5 = vld [vmem:[%s313_s0 + $0x10] sm:$0xff] }
   0x2   :  { %vm244_vm0 = vcmp.lt.s32.totalorder %v14_v0, 512  ;;  %v83_v7 = vshrl.u32 %v14_v0, 7  ;;  %v23_v8 = vld [vmem:[%s313_s0 + $0x18] sm:$0xff]  ;;  %v24_v9 = vld [vmem:[%s313_s0 + $0x20] sm:$0xff]  ;;  %v25_v10 = vld [vmem:[%s313_s0 + $0x28] sm:$0xff]  ;;  %v109_v11 = vmul.f32 %v20_v3, %v20_v3  ;;  %v110_v12 = vmul.f32 %v21_v4, %v21_v4 }
   0x3   :  { %18 = vst.msk [vmem:[#allocation2] sm:$0xf] %vm244_vm0, %v219_v13  ;;  %v81_v14 = vunpack.c.0.s8 %v80_v2  ;;  %19 = vst.msk [vmem:[#allocation3] sm:$0xf] %vm244_vm0, %v219_v13  ;;  %v26_v15 = vld [vmem:[%s313_s0 + $0x30] sm:$0xff]  ;;  %v27_v16 = vld [vmem:[%s313_s0 + $0x38] sm:$0xff]  ;;  %v37_v18 = vadd.f32 %v24_v9, %v20_v3  ;;  %v46_v19 = vadd.f32 %v25_v10, %v21_v4  ;;  %v111_v20 = vmul.f32 %v22_v5, %v22_v5 }
   0x4   :  { %v28_v17 = vld [vmem:[%s313_s0 + $0x40] sm:$0xff]  ;;  %v29_v21 = vld [vmem:[%s313_s0 + $0x48] sm:$0xff]  ;;  %v30_v22 = vld [vmem:[%s313_s0 + $0x50] sm:$0xff]  ;;  %v55_v24 = vadd.f32 %v26_v15, %v22_v5  ;;  %v64_v25 = vadd.f32 %v27_v16, %v23_v8  ;;  %v112_v26 = vmul.f32 %v23_v8, %v23_v8  ;;  %v113_v27 = vmul.f32 %v24_v9, %v24_v9 }
   0x5   :  { %v31_v23 = vld [vmem:[%s313_s0 + $0x58] sm:$0xff]  ;;  %v279_v28 = vsub.s32 %v81_v14, %v83_v7  ;;  %v32_v29 = vld [vmem:[%s313_s0 + $0x60] sm:$0xff]  ;;  %v33_v30 = vld [vmem:[%s313_s0 + $0x68] sm:$0xff]  ;;  %v38_v32 = vadd.f32 %v37_v18, %v28_v17  ;;  %v47_v33 = vadd.f32 %v46_v19, %v29_v21  ;;  %v114_v34 = vmul.f32 %v25_v10, %v25_v10 }
   0x6   :  { %v34_v31 = vld [vmem:[%s313_s0 + $0x70] sm:$0xff]  ;;  %v35_v35 = vld [vmem:[%s313_s0 + $0x78] sm:$0xff]  ;;  %v56_v36 = vadd.f32 %v55_v24, %v30_v22  ;;  %v65_v37 = vadd.f32 %v64_v25, %v31_v23  ;;  %v115_v38 = vmul.f32 %v26_v15, %v26_v15  ;;  %v116_v39 = vmul.f32 %v27_v16, %v27_v16 }
   0x7   :  { %v39_v40 = vadd.f32 %v38_v32, %v32_v29  ;;  %v48_v41 = vadd.f32 %v47_v33, %v33_v30  ;;  %v117_v42 = vmul.f32 %v28_v17, %v28_v17  ;;  %v118_v43 = vmul.f32 %v29_v21, %v29_v21 }
   0x8   :  { %v57_v44 = vadd.f32 %v56_v36, %v34_v31  ;;  %v66_v45 = vadd.f32 %v65_v37, %v35_v35  ;;  %v119_v46 = vmul.f32 %v30_v22, %v30_v22  ;;  %v120_v47 = vmul.f32 %v31_v23, %v31_v23 }
   0x9   :  { %v40_v48 = vrot.slane %v39_v40, 4  ;;  %v49_v49 = vrot.slane %v48_v41, 4  ;;  %v121_v50 = vmul.f32 %v32_v29, %v32_v29  ;;  %v122_v51 = vmul.f32 %v33_v30, %v33_v30 }
   0xa   :  { %v58_v52 = vrot.slane %v57_v44, 4  ;;  %v67_v53 = vrot.slane %v66_v45, 4  ;;  %v123_v54 = vmul.f32 %v34_v31, %v34_v31  ;;  %v124_v55 = vmul.f32 %v35_v35, %v35_v35 }
   0xb   :  { %v41_v56 = vadd.f32 %v40_v48, %v39_v40  ;;  %v50_v57 = vadd.f32 %v49_v49, %v48_v41  ;;  %v125_v58 = vadd.f32 %v113_v27, %v109_v11  ;;  %v134_v59 = vadd.f32 %v114_v34, %v110_v12 }
   0xc   :  { %v59_v60 = vadd.f32 %v58_v52, %v57_v44  ;;  %v68_v61 = vadd.f32 %v67_v53, %v66_v45  ;;  %v143_v62 = vadd.f32 %v115_v38, %v111_v20  ;;  %v152_v63 = vadd.f32 %v116_v39, %v112_v26 }
   0xd   :  { %v42_v0 = vrot.slane %v41_v56, 2  ;;  %v51_v1 = vrot.slane %v50_v57, 2  ;;  %v126_v2 = vadd.f32 %v125_v58, %v117_v42  ;;  %v135_v3 = vadd.f32 %v134_v59, %v118_v43 }
   0xe   :  { %v60_v4 = vrot.slane %v59_v60, 2  ;;  %v69_v5 = vrot.slane %v68_v61, 2  ;;  %v144_v7 = vadd.f32 %v143_v62, %v119_v46  ;;  %v153_v8 = vadd.f32 %v152_v63, %v120_v47  ;;  %v108_v63 = vld [vmem:[#allocation3] sm:$0xf] }
   0xf   :  { %v43_v9 = vadd.f32 %v42_v0, %v41_v56  ;;  %v52_v10 = vadd.f32 %v51_v1, %v50_v57  ;;  %v127_v13 = vadd.f32 %v126_v2, %v121_v50  ;;  %v136_v14 = vadd.f32 %v135_v3, %v122_v51  ;;  %v36_v51 = vld [vmem:[#allocation2] sm:$0xf] }
  0x10   :  { %v61_v15 = vadd.f32 %v60_v4, %v59_v60  ;;  %v70_v16 = vadd.f32 %v69_v5, %v68_v61  ;;  %v145_v11 = vadd.f32 %v144_v7, %v123_v54  ;;  %v154_v12 = vadd.f32 %v153_v8, %v124_v55 }
  0x11   :  { %v44_v17 = vrot.slane %v43_v9, 1  ;;  %v53_v18 = vrot.slane %v52_v10, 1  ;;  %v128_v19 = vrot.slane %v127_v13, 4  ;;  %v137_v20 = vrot.slane %v136_v14, 4 }
  0x12   :  { %v62_v21 = vrot.slane %v61_v15, 1  ;;  %v71_v22 = vrot.slane %v70_v16, 1  ;;  %v146_v23 = vrot.slane %v145_v11, 4  ;;  %v155_v24 = vrot.slane %v154_v12, 4 }
  0x13   :  { %v45_v25 = vadd.f32 %v44_v17, %v43_v9  ;;  %v54_v26 = vadd.f32 %v53_v18, %v52_v10  ;;  %v129_v27 = vadd.f32 %v128_v19, %v127_v13  ;;  %v138_v29 = vadd.f32 %v137_v20, %v136_v14 }
  0x14   :  { %v63_v30 = vadd.f32 %v62_v21, %v61_v15  ;;  %v72_v31 = vadd.f32 %v71_v22, %v70_v16  ;;  %v147_v32 = vadd.f32 %v146_v23, %v145_v11  ;;  %v156_v33 = vadd.f32 %v155_v24, %v154_v12 }
  0x15   :  { %v77_v34 = vcombine.low %v45_v25, %v54_v26  ;;  %v130_v35 = vrot.slane %v129_v27, 2  ;;  %v139_v36 = vrot.slane %v138_v29, 2 }
  0x16   :  { %v78_v37 = vcombine.low %v63_v30, %v72_v31  ;;  %v148_v38 = vrot.slane %v147_v32, 2  ;;  %v157_v39 = vrot.slane %v156_v33, 2 }
  0x17   :  { %v85_v40 = vrot.slane %v77_v34, %v279_v28  ;;  %v131_v41 = vadd.f32 %v130_v35, %v129_v27  ;;  %v140_v42 = vadd.f32 %v139_v36, %v138_v29 }
  0x18   :  { %v92_v43 = vrot.slane %v78_v37, %v279_v28  ;;  %v149_v44 = vadd.f32 %v148_v38, %v147_v32  ;;  %v158_v45 = vadd.f32 %v157_v39, %v156_v33 }
  0x19   :  { %v132_v46 = vrot.slane %v131_v41, 1  ;;  %v141_v47 = vrot.slane %v140_v42, 1 }
  0x1a   :  { %v93_v48 = vcombine.low %v85_v40, %v92_v43  ;;  %v150_v49 = vrot.slane %v149_v44, 1  ;;  %v159_v50 = vrot.slane %v158_v45, 1 }
  0x1b   :  { %v133_v52 = vadd.f32 %v132_v46, %v131_v41  ;;  %v142_v53 = vadd.f32 %v141_v47, %v140_v42 }
  0x1c   :  { %v100_v54 = vrot.slane %v93_v48, %v279_v28  ;;  %v151_v55 = vadd.f32 %v150_v49, %v149_v44  ;;  %v160_v56 = vadd.f32 %v159_v50, %v158_v45 }
  0x1d   :  { %v165_v57 = vcombine.low %v133_v52, %v142_v53 }
  0x1e   :  { %v102_v58 = vadd.f32 %v100_v54, %v36_v51  ;;  %v166_v59 = vcombine.low %v151_v55, %v160_v56 }
  0x1f   :  { %v173_v60 = vrot.slane %v165_v57, %v279_v28 }
  0x20   :  { %107 = vst.msk [vmem:[#allocation2] sm:$0xf] %vm244_vm0, %v102_v58  ;;  %v180_v61 = vrot.slane %v166_v59, %v279_v28 }
  0x22   :  { %v181_v62 = vcombine.low %v173_v60, %v180_v61 }
  0x24   :  { %v188_v0 = vrot.slane %v181_v62, %v279_v28 }
  0x26   :  { %v190_v1 = vadd.f32 %v188_v0, %v108_v63 }
  0x27   :  { %v195_v2 = vld [vmem:[#allocation2] sm:$0xf] }
  0x28   :  { %191 = vst.msk [vmem:[#allocation3] sm:$0xf] %vm244_vm0, %v190_v1  ;;  %v196_v3 = vmul.f32 0.03125, %v195_v2 }
  0x2a   :  { %202 = vst.msk [vmem:[%s314_s1] sm:$0xf] %vm244_vm0, %v196_v3  ;;  %v199_v4 = vmul.f32 %v196_v3, %v196_v3 }
  0x2f   :  { %v197_v5 = vld [vmem:[#allocation3] sm:$0xf] }
  0x30   :  { %v198_v7 = vmul.f32 0.03125, %v197_v5 }
  0x32   :  { %v200_v8 = vsub.f32 %v198_v7, %v199_v4 }
  0x34   :  { %v201_v9 = vmax.f32 %v200_v8, 0.0 }
  0x36   :  { %v203_v10 = vadd.f32 1e-05, %v201_v9 }
  0x38   :  { %216 = vrsqrt.f32 %v203_v10 }
  0x45   :  { %v217_v28 = vpop.eup %216 }
  0x46   :  { %205 = vst.msk [vmem:[%s315_s2] sm:$0xf] %vm244_vm0, %v217_v28 }

// kernel: generator_forward.16
= control target key start
LH: loop header
LB: loop body
LE: loop exit
PB: predicated region body
PF: predicated region fallthrough
CT: control target
= control target key end

     0   :  { %v41_v0 = vlaneseq  ;;  %s430_s1 = inlined_call_operand.vmem [shape: f32[1,512], index: 1, kind: input, shape index: {}]   ;;  %s431_s2 = inlined_call_operand.vmem [shape: f32[1,512], index: 2, kind: input, shape index: {}]   ;;  %s432_s3 = inlined_call_operand.vmem [shape: f32[1,512], index: 3, kind: input, shape index: {}]   ;;  %s433_s4 = inlined_call_operand.vmem [shape: f32[1,512], index: 4, kind: input, shape index: {}]   ;;  %s434_s0 = inlined_call_operand.vmem [shape: f32[32,512], index: 0, kind: input, shape index: {}]   ;;  %s435_s5 = inlined_call_operand.vmem [shape: bf16[32,512], index: 5, kind: output, shape index: {}]  }
   0x1   :  { %v36_v1 = vld [vmem:[%s431_s2] sm:$0xf]  ;;  %v21_v12 = vld [vmem:[%s434_s0 + $0x8] sm:$0xff]  ;;  %v22_v17 = vld [vmem:[%s434_s0 + $0x10] sm:$0xff] }
   0x2   :  { %v37_v2 = vld [vmem:[%s432_s3] sm:$0xf]  ;;  %v42_v3 = vshrl.u32 %v41_v0, 7  ;;  %v23_v18 = vld [vmem:[%s434_s0 + $0x18] sm:$0xff]  ;;  %v25_v24 = vld [vmem:[%s434_s0 + $0x28] sm:$0xff] }
   0x3   :  { %v38_v4 = vmul.f32 %v37_v2, %v36_v1  ;;  %v39_v5 = vld [vmem:[%s430_s1] sm:$0xf]  ;;  %v26_v29 = vld [vmem:[%s434_s0 + $0x30] sm:$0xff]  ;;  %v27_v30 = vld [vmem:[%s434_s0 + $0x38] sm:$0xff] }
   0x4   :  { %v43_v6 = vsub.s32 0, %v42_v3  ;;  %v47_v7 = vsub.s32 1, %v42_v3  ;;  %v114_v8 = vld [vmem:[%s433_s4] sm:$0xf]  ;;  %v51_v9 = vsub.s32 2, %v42_v3  ;;  %v55_v10 = vsub.s32 3, %v42_v3 }
   0x5   :  { %v20_v11 = vld [vmem:[%s434_s0] sm:$0xff]  ;;  %v29_v56 = vld [vmem:[%s434_s0 + $0x48] sm:$0xff]  ;;  %v30_v61 = vld [vmem:[%s434_s0 + $0x50] sm:$0xff] }
   0x6   :  { %v292_v13 = vrot.slane %v39_v5, %v43_v6  ;;  %v294_v14 = vrot.slane %v39_v5, %v47_v7  ;;  %v296_v15 = vrot.slane %v38_v4, %v43_v6  ;;  %v298_v16 = vrot.slane %v38_v4, %v47_v7  ;;  %v24_v23 = vld [vmem:[%s434_s0 + $0x20] sm:$0xff]  ;;  %v31_v62 = vld [vmem:[%s434_s0 + $0x58] sm:$0xff] }
   0x7   :  { %v306_v19 = vrot.slane %v114_v8, %v43_v6  ;;  %v308_v20 = vrot.slane %v114_v8, %v47_v7  ;;  %v310_v21 = vrot.slane %v39_v5, %v51_v9  ;;  %v312_v22 = vrot.slane %v39_v5, %v55_v10  ;;  %v28_v51 = vld [vmem:[%s434_s0 + $0x40] sm:$0xff] }
   0x8   :  { %v61_v25 = vsub.f32 %v20_v11, %v292_v13  ;;  %v62_v26 = vsub.f32 %v21_v12, %v294_v14  ;;  %v322_v27 = vrot.slane %v38_v4, %v51_v9  ;;  %v324_v28 = vrot.slane %v38_v4, %v55_v10  ;;  %v32_v3 = vld [vmem:[%s434_s0 + $0x60] sm:$0xff]  ;;  %v33_v4 = vld [vmem:[%s434_s0 + $0x68] sm:$0xff] }
   0x9   :  { %v63_v31 = vsub.f32 %v22_v17, %v310_v21  ;;  %v64_v32 = vsub.f32 %v23_v18, %v312_v22  ;;  %v334_v33 = vrot.slane %v114_v8, %v51_v9  ;;  %v336_v34 = vrot.slane %v114_v8, %v55_v10  ;;  %v34_v9 = vld [vmem:[%s434_s0 + $0x70] sm:$0xff]  ;;  %v35_v18 = vld [vmem:[%s434_s0 + $0x78] sm:$0xff] }
   0xa   :  { %v98_v35 = vmul.f32 %v296_v15, %v61_v25  ;;  %v99_v36 = vmul.f32 %v298_v16, %v62_v26  ;;  %v65_v37 = vsub.f32 %v24_v23, %v292_v13  ;;  %v66_v38 = vsub.f32 %v25_v24, %v294_v14 }
   0xb   :  { %v100_v39 = vmul.f32 %v322_v27, %v63_v31  ;;  %v101_v40 = vmul.f32 %v324_v28, %v64_v32  ;;  %v67_v41 = vsub.f32 %v26_v29, %v310_v21  ;;  %v68_v42 = vsub.f32 %v27_v30, %v312_v22 }
   0xc   :  { %v136_v43 = vadd.f32 %v306_v19, %v98_v35  ;;  %v137_v44 = vadd.f32 %v308_v20, %v99_v36  ;;  %v102_v45 = vmul.f32 %v296_v15, %v65_v37  ;;  %v103_v46 = vmul.f32 %v298_v16, %v66_v38 }
   0xd   :  { %v138_v47 = vadd.f32 %v334_v33, %v100_v39  ;;  %v139_v48 = vadd.f32 %v336_v34, %v101_v40  ;;  %v104_v49 = vmul.f32 %v322_v27, %v67_v41  ;;  %v105_v50 = vmul.f32 %v324_v28, %v68_v42 }
   0xe   :  { %v152_v52 = vmax.f32 %v136_v43, 0.0  ;;  %v153_v53 = vmax.f32 %v137_v44, 0.0  ;;  %v140_v54 = vadd.f32 %v306_v19, %v102_v45  ;;  %v141_v55 = vadd.f32 %v308_v20, %v103_v46 }
   0xf   :  { %v154_v57 = vmax.f32 %v138_v47, 0.0  ;;  %v155_v58 = vmax.f32 %v139_v48, 0.0  ;;  %v142_v59 = vadd.f32 %v334_v33, %v104_v49  ;;  %v143_v60 = vadd.f32 %v336_v34, %v105_v50 }
  0x10   :  { %v236_v63 = vpack.c.bf16 %v153_v53, %v152_v52  ;;  %v156_v0 = vmax.f32 %v140_v54, 0.0  ;;  %v157_v1 = vmax.f32 %v141_v55, 0.0  ;;  %v69_v2 = vsub.f32 %v28_v51, %v292_v13 }
  0x11   :  { %v237_v5 = vpack.c.bf16 %v155_v58, %v154_v57  ;;  %v158_v6 = vmax.f32 %v142_v59, 0.0  ;;  %v159_v7 = vmax.f32 %v143_v60, 0.0  ;;  %v70_v8 = vsub.f32 %v29_v56, %v294_v14 }
  0x12   :  { %216 = vst [vmem:[%s435_s5] sm:$0xff] %v236_v63  ;;  %v238_v10 = vpack.c.bf16 %v157_v1, %v156_v0  ;;  %v106_v11 = vmul.f32 %v296_v15, %v69_v2  ;;  %v71_v12 = vsub.f32 %v30_v61, %v310_v21  ;;  %v72_v17 = vsub.f32 %v31_v62, %v312_v22 }
  0x13   :  { %217 = vst [vmem:[%s435_s5 + $0x8] sm:$0xff] %v237_v5  ;;  %v239_v23 = vpack.c.bf16 %v159_v7, %v158_v6  ;;  %v107_v24 = vmul.f32 %v298_v16, %v70_v8  ;;  %v73_v25 = vsub.f32 %v32_v3, %v292_v13  ;;  %v74_v26 = vsub.f32 %v33_v4, %v294_v14 }
  0x14   :  { %218 = vst [vmem:[%s435_s5 + $0x10] sm:$0xff] %v238_v10  ;;  %v144_v29 = vadd.f32 %v306_v19, %v106_v11  ;;  %v108_v30 = vmul.f32 %v322_v27, %v71_v12  ;;  %v109_v31 = vmul.f32 %v324_v28, %v72_v17  ;;  %v75_v32 = vsub.f32 %v34_v9, %v310_v21 }
  0x15   :  { %219 = vst [vmem:[%s435_s5 + $0x18] sm:$0xff] %v239_v23  ;;  %v145_v13 = vadd.f32 %v308_v20, %v107_v24  ;;  %v110_v14 = vmul.f32 %v296_v15, %v73_v25  ;;  %v111_v35 = vmul.f32 %v298_v16, %v74_v26  ;;  %v76_v36 = vsub.f32 %v35_v18, %v312_v22 }
  0x16   :  { %v160_v37 = vmax.f32 %v144_v29, 0.0  ;;  %v146_v38 = vadd.f32 %v334_v33, %v108_v30  ;;  %v147_v39 = vadd.f32 %v336_v34, %v109_v31  ;;  %v112_v40 = vmul.f32 %v322_v27, %v75_v32 }
  0x17   :  { %v161_v21 = vmax.f32 %v145_v13, 0.0  ;;  %v148_v41 = vadd.f32 %v306_v19, %v110_v14  ;;  %v149_v42 = vadd.f32 %v308_v20, %v111_v35  ;;  %v113_v43 = vmul.f32 %v324_v28, %v76_v36 }
  0x18   :  { %v162_v44 = vmax.f32 %v146_v38, 0.0  ;;  %v163_v15 = vmax.f32 %v147_v39, 0.0  ;;  %v150_v16 = vadd.f32 %v334_v33, %v112_v40 }
  0x19   :  { %v240_v45 = vpack.c.bf16 %v161_v21, %v160_v37  ;;  %v164_v22 = vmax.f32 %v148_v41, 0.0  ;;  %v165_v46 = vmax.f32 %v149_v42, 0.0  ;;  %v151_v47 = vadd.f32 %v336_v34, %v113_v43 }
  0x1a   :  { %v241_v48 = vpack.c.bf16 %v163_v15, %v162_v44  ;;  %v166_v49 = vmax.f32 %v150_v16, 0.0 }
  0x1b   :  { %220 = vst [vmem:[%s435_s5 + $0x20] sm:$0xff] %v240_v45  ;;  %v242_v19 = vpack.c.bf16 %v165_v46, %v164_v22  ;;  %v167_v27 = vmax.f32 %v151_v47, 0.0 }
  0x1c   :  { %221 = vst [vmem:[%s435_s5 + $0x28] sm:$0xff] %v241_v48 }
  0x1d   :  { %222 = vst [vmem:[%s435_s5 + $0x30] sm:$0xff] %v242_v19  ;;  %v243_v20 = vpack.c.bf16 %v167_v27, %v166_v49 }
  0x1f   :  { %223 = vst [vmem:[%s435_s5 + $0x38] sm:$0xff] %v243_v20 }

// kernel: generator_forward.17
= control target key start
LH: loop header
LB: loop body
LE: loop exit
PB: predicated region body
PF: predicated region fallthrough
CT: control target
= control target key end

     0   :  { %7 = vsyncpa [#allocation3], 0  ;;  %s2235_s0 = inlined_call_operand.vmem [shape: bf16[32,512], index: 0, kind: input, shape index: {}]   ;;  %s2236_s1 = inlined_call_operand.hbm [shape: bf16[512,4096], index: 1, kind: input, shape index: {}]   ;;  %s2237_s2 = inlined_call_operand.vmem [shape: f32[32,4096], index: 2, kind: output, shape index: {}]  }
   0x1   :  { %9 = vsyncpa [#allocation3 + $0x1], 0  ;;  %s1907_s9 = smov 0   ;;  %s1909_s10 = smov 0  }
   0x2   :  { %s1911_s11 = smov 0   ;;  %s1913_s12 = smov 0  }
   0x3   :  { %s1915_s13 = smov 0   ;;  %s1917_s14 = smov 0  }
   0x4 LB: > { %s1392_s15 = sadd.s32 4294967295, %s1886_s14   ;;  %s24_s16 = sadd.s32 1, %s1882_s13  ;;  %s1886_s14 = sphi %s1917_s14, %s15_s14   ;;  %s1882_s13 = sphi %s1915_s13, %s2246_s13   ;;  %s1878_s12 = sphi %s1913_s12, %s2245_s12   ;;  %s1874_s11 = sphi %s1911_s11, %s2244_s11   ;;  %s1870_s10 = sphi %s1909_s10, %s2243_s10   ;;  %s1866_s9 = sphi %s1907_s9, %s2242_s9  }
   0x5   : > { %p25_p0 = scmp.ge.s32.totalorder %s24_s16, 8  ;;  %s60_s17 = sadd.s32 1, %s1874_s11 }
   0x6   : > { %p67_p1 = scmp.ne.s32.totalorder %s1874_s11, %s1870_s10  ;;  %p68_p2 = scmp.eq.s32.totalorder %s1886_s14, 0 }
   0x7   : > { %s2248_s16 = smov (%p25_p0, %s24_s16), 0  ;;  %p73_p4 = scmp.ne.s32.totalorder %s1870_s10, %s1866_s9 }
   0x8   : > { %p1943_p3 = por %p68_p2, %p67_p1  ;;  %s57_s19 = ssub.s32 %s1882_s13, %s2248_s16 }
   0x9   : > { %p74_p5 = scmp.eq.s32.totalorder %s1392_s15, 0  ;;  %p58_p6 = scmp.eq.s32.totalorder %s57_s19, 0 }
   0xa   : > { %p99_p7 = scmp.eq.s32.totalorder %s1392_s15, 7  ;;  %p1552_p10 = scmp.lt.s32.totalorder %s1886_s14, 8 }
   0xb   : > { %p1950_p8 = por %p74_p5, %p73_p4  ;;  %s135_s23 = sand.u32 1, %s1874_s11  }
   0xc   : > { %s1955_s21 = scalar_select %p58_p6, %s1874_s11, %s60_s17  }
   0xd   : > { %p1957_p9 = por %p99_p7, %p67_p1  ;;  %s1544_s24 = sshll.u32 %s1882_s13, 8 }
   0xe   : > { %s1397_s25 = sshll.u32 %s135_s23, 10  ;;  %s145_s28 = scalar_lea.hbm %s2236_s1, %s1544_s24 }
   0xf   : > { %s139_s29 = scalar_lea.vmem [#allocation2], %s1397_s25  ;;  %p1969_p11 = pnand %p1552_p10, %p1943_p3 }
  0x10   : > { %s146_s30 = sshll.u32 %s139_s29, 4  ;;  %p1400_p12 = scmp.ge.s32.totalorder %s1886_s14, 1  ;;  %s147_s30 = int_to_ptr.vmem [resolvable:$true] %s146_s30 }
  0x11   : > { %s136_s4 = scalar_lea.sflag [#allocation3], %s135_s23  ;;  %p1810_p13 = pneg %p1969_p11 }
  0x12   : > { %s1821_s5 = scalar_lea.vmem %s147_s30, 16384  ;;  %s1888_s6 = smov [#allocation2]  }
  0x13   : > { %p1822_p0 = scmp.ne.s32.totalorder %s147_s30, %s1821_s5  ;;  %s1826_s7 = sshll.u32 %s1888_s6, 4  ;;  %s1827_s7 = int_to_ptr.vmem [resolvable:$false] %s1826_s7 }
  0x14   : > { %s1828_s8 = scalar_lea.vmem %s1827_s7, 32768  ;;  %p1829_p4 = scmp.lt.s32.totalorder %s147_s30, %s1827_s7 }
  0x15   : > { %p1824_p1 = pnand %p1822_p0, %p1810_p13  ;;  %p1830_p5 = scmp.lt.s32.totalorder %s1828_s8, %s1821_s5 }
  0x17   : > { %p1825_p2 = pneg %p1824_p1  ;;  %p1831_p3 = por %p1830_p5, %p1829_p4 }
  0x19   : > { %p1832_p6 = pnand %p1831_p3, %p1825_p2 }
  0x1b   : > { %1835 = shalt.err (!%p1832_p6)
}
  0x1c   : > { %s1889_s9 = smov 2048   ;;  %s1890_s15 = smov 256  }
  0x1d   : > { %s1891_s17 = smov 16   ;;  %p154_p7 = scmp.lt.s32.totalorder %s1886_s14, 9 }
  0x1e   : > { %1551 = dma.hbm_to_vmem [thread:$0]  (!%p1969_p11), %s145_s28, 16384, %s147_s30, %s136_s4, %s1889_s9, %s1890_s15, %s1891_s17  }
  0x1f   : > { %p155_p10 = pnand %p1400_p12, %p154_p7 }
  0x20   : > { %s1982_s18 = sand.u32 (!%p155_p10), 1, %s1870_s10  }
  0x21   : > { %158 = sbr.rel (%p155_p10) target bundleno = 387 (0x183), region = 28  ;;  %s1401_s19 = sshll.u32 (!%p155_p10), %s1982_s18, 10 }
  0x22   : > { %s161_s23 = scalar_lea.sflag (!%p155_p10), [#allocation3], %s1982_s18  ;;  %s1986_s24 = scalar_lea.vmem (!%p155_p10), [#allocation2], %s1401_s19 }
  0x26   : > { %1861 = dma.done.wait (%p1950_p8), %s161_s23, 16384  }
  0x27   : > { %1863 = vsyncadd (%p1950_p8), %s161_s23, 4294950912  ;;  %v1604_v0 = vld [vmem:[%s1986_s24 + $0xe4] ss:$16 sps:$4 sm:$0xff]   ;;  %v1608_v2 = vld [vmem:[%s1986_s24 + $0xe0] ss:$16 sps:$4 sm:$0xff]   ;;  %s1402_s19 = sshll.u32 %s1982_s18, 7 }
  0x28   : > { %v1606_v1 = vld [vmem:[%s1986_s24 + $0x2e4] ss:$16 sps:$4 sm:$0xff]   ;;  %1016 = vmatprep.subr.bf16.mxu0 %v1604_v0  ;;  %v1609_v3 = vld [vmem:[%s1986_s24 + $0x2e0] ss:$16 sps:$4 sm:$0xff]   ;;  %v2050_v51 = vld [vmem:[%s2235_s0 + $0xc] ss:$16 sps:$4 sm:$0xff]  }
  0x29   : > { %1069 = vmatprep.subr.bf16.mxu1 %v1606_v1  ;;  %v1610_v4 = vld [vmem:[%s1986_s24 + $0xc4] ss:$16 sps:$4 sm:$0xff]   ;;  %1017 = vmatpush1.bf16.msra.mxu0 %v1608_v2  ;;  %v1614_v6 = vld [vmem:[%s1986_s24 + $0xc0] ss:$16 sps:$4 sm:$0xff]   ;;  %v1708_v2 = vld [vmem:[%s1986_s24 + $0xec] ss:$16 sps:$4 sm:$0xff]  }
  0x2a   : > { %1070 = vmatpush1.bf16.msra.mxu1 %v1609_v3  ;;  %v1612_v5 = vld [vmem:[%s1986_s24 + $0x2c4] ss:$16 sps:$4 sm:$0xff]   ;;  %1018 = vmatprep.subr.bf16.mxu0 %v1610_v4  ;;  %v1615_v7 = vld [vmem:[%s1986_s24 + $0x2c0] ss:$16 sps:$4 sm:$0xff]   ;;  %v1711_v3 = vld [vmem:[%s1986_s24 + $0x2ec] ss:$16 sps:$4 sm:$0xff]  }
  0x2b   : > { %1071 = vmatprep.subr.bf16.mxu1 %v1612_v5  ;;  %v1616_v8 = vld [vmem:[%s1986_s24 + $0xa4] ss:$16 sps:$4 sm:$0xff]   ;;  %v1620_v10 = vld [vmem:[%s1986_s24 + $0xa0] ss:$16 sps:$4 sm:$0xff]   ;;  %1101 = vmatprep.mubr.bf16.mxu1 %v2050_v51  ;;  %v2078_v5 = vld [vmem:[%s2235_s0 + $0x8] ss:$16 sps:$4 sm:$0xff]  }
  0x2c   : > { %v1618_v9 = vld [vmem:[%s1986_s24 + $0x2a4] ss:$16 sps:$4 sm:$0xff]   ;;  %v1621_v11 = vld [vmem:[%s1986_s24 + $0x2a0] ss:$16 sps:$4 sm:$0xff]   ;;  %s2177_s23 = scalar_lea.vmem [#allocation4], %s1402_s19  ;;  %s1545_s18 = sshll.u32 (%p1957_p9), %s1878_s12, 5 }
  0x2d   : > { %1019 = vmatpush1.bf16.msra.mxu0 %v1614_v6  ;;  %v1622_v12 = vld [vmem:[%s1986_s24 + $0x84] ss:$16 sps:$4 sm:$0xff]   ;;  %v1626_v14 = vld [vmem:[%s1986_s24 + $0x80] ss:$16 sps:$4 sm:$0xff]   ;;  %v1706_v6 = vld [vmem:[%s1986_s24 + $0xe8] ss:$16 sps:$4 sm:$0xff]   ;;  %s1256_s25 = scalar_lea.vmem (%p1957_p9), %s2237_s2, %s1545_s18 }
  0x2e   : > { %1072 = vmatpush1.bf16.msra.mxu1 %v1615_v7  ;;  %1020 = vmatprep.subr.bf16.mxu0 %v1616_v8  ;;  %v1624_v13 = vld [vmem:[%s1986_s24 + $0x284] ss:$16 sps:$4 sm:$0xff]   ;;  %v1627_v15 = vld [vmem:[%s1986_s24 + $0x280] ss:$16 sps:$4 sm:$0xff]   ;;  %v1709_v7 = vld [vmem:[%s1986_s24 + $0x2e8] ss:$16 sps:$4 sm:$0xff]  }
  0x2f   : > { %1073 = vmatprep.subr.bf16.mxu1 %v1618_v9  ;;  %v1628_v16 = vld [vmem:[%s1986_s24 + $0x64] ss:$16 sps:$4 sm:$0xff]   ;;  %v1632_v18 = vld [vmem:[%s1986_s24 + $0x60] ss:$16 sps:$4 sm:$0xff]   ;;  %v1714_v8 = vld [vmem:[%s1986_s24 + $0xcc] ss:$16 sps:$4 sm:$0xff]  }
  0x30   : > { %v1630_v17 = vld [vmem:[%s1986_s24 + $0x264] ss:$16 sps:$4 sm:$0xff]   ;;  %v1633_v19 = vld [vmem:[%s1986_s24 + $0x260] ss:$16 sps:$4 sm:$0xff]   ;;  %v1717_v9 = vld [vmem:[%s1986_s24 + $0x2cc] ss:$16 sps:$4 sm:$0xff]  }
  0x31   : > { %1021 = vmatpush1.bf16.msra.mxu0 %v1620_v10  ;;  %v1634_v20 = vld [vmem:[%s1986_s24 + $0x44] ss:$16 sps:$4 sm:$0xff]   ;;  %v1638_v22 = vld [vmem:[%s1986_s24 + $0x40] ss:$16 sps:$4 sm:$0xff]   ;;  %v1712_v10 = vld [vmem:[%s1986_s24 + $0xc8] ss:$16 sps:$4 sm:$0xff]  }
  0x32   : > { %1074 = vmatpush1.bf16.msra.mxu1 %v1621_v11  ;;  %1022 = vmatprep.subr.bf16.mxu0 %v1622_v12  ;;  %v1636_v21 = vld [vmem:[%s1986_s24 + $0x244] ss:$16 sps:$4 sm:$0xff]   ;;  %v1639_v23 = vld [vmem:[%s1986_s24 + $0x240] ss:$16 sps:$4 sm:$0xff]   ;;  %v1715_v11 = vld [vmem:[%s1986_s24 + $0x2c8] ss:$16 sps:$4 sm:$0xff]  }
  0x33   : > { %1075 = vmatprep.subr.bf16.mxu1 %v1624_v13  ;;  %v1640_v24 = vld [vmem:[%s1986_s24 + $0x24] ss:$16 sps:$4 sm:$0xff]   ;;  %v1644_v26 = vld [vmem:[%s1986_s24 + $0x20] ss:$16 sps:$4 sm:$0xff]   ;;  %v1720_v12 = vld [vmem:[%s1986_s24 + $0xac] ss:$16 sps:$4 sm:$0xff]  }
  0x34   : > { %v1642_v25 = vld [vmem:[%s1986_s24 + $0x224] ss:$16 sps:$4 sm:$0xff]   ;;  %v1645_v27 = vld [vmem:[%s1986_s24 + $0x220] ss:$16 sps:$4 sm:$0xff]   ;;  %v1723_v13 = vld [vmem:[%s1986_s24 + $0x2ac] ss:$16 sps:$4 sm:$0xff]  }
  0x35   : > { %1023 = vmatpush1.bf16.msra.mxu0 %v1626_v14  ;;  %v1646_v28 = vld [vmem:[%s1986_s24 + $0x4] ss:$16 sps:$4 sm:$0xff]   ;;  %v1650_v30 = vld [vmem:[%s1986_s24] ss:$16 sps:$4 sm:$0xff]   ;;  %v1718_v14 = vld [vmem:[%s1986_s24 + $0xa8] ss:$16 sps:$4 sm:$0xff]  }
  0x36   : > { %1076 = vmatpush1.bf16.msra.mxu1 %v1627_v15  ;;  %1024 = vmatprep.subr.bf16.mxu0 %v1628_v16  ;;  %v1648_v29 = vld [vmem:[%s1986_s24 + $0x204] ss:$16 sps:$4 sm:$0xff]   ;;  %v1651_v31 = vld [vmem:[%s1986_s24 + $0x200] ss:$16 sps:$4 sm:$0xff]   ;;  %v1721_v15 = vld [vmem:[%s1986_s24 + $0x2a8] ss:$16 sps:$4 sm:$0xff]  }
  0x37   : > { %1077 = vmatprep.subr.bf16.mxu1 %v1630_v17  ;;  %v1652_v32 = vld [vmem:[%s1986_s24 + $0x1e4] ss:$16 sps:$4 sm:$0xff]   ;;  %v1656_v34 = vld [vmem:[%s1986_s24 + $0x1e0] ss:$16 sps:$4 sm:$0xff]   ;;  %v1726_v16 = vld [vmem:[%s1986_s24 + $0x8c] ss:$16 sps:$4 sm:$0xff]  }
  0x38   : > { %v1654_v33 = vld [vmem:[%s1986_s24 + $0x3e4] ss:$16 sps:$4 sm:$0xff]   ;;  %v1657_v35 = vld [vmem:[%s1986_s24 + $0x3e0] ss:$16 sps:$4 sm:$0xff]   ;;  %v1729_v17 = vld [vmem:[%s1986_s24 + $0x28c] ss:$16 sps:$4 sm:$0xff]  }
  0x39   : > { %1025 = vmatpush1.bf16.msra.mxu0 %v1632_v18  ;;  %v1658_v36 = vld [vmem:[%s1986_s24 + $0x1c4] ss:$16 sps:$4 sm:$0xff]   ;;  %v1662_v38 = vld [vmem:[%s1986_s24 + $0x1c0] ss:$16 sps:$4 sm:$0xff]   ;;  %v1724_v18 = vld [vmem:[%s1986_s24 + $0x88] ss:$16 sps:$4 sm:$0xff]  }
  0x3a   : > { %1078 = vmatpush1.bf16.msra.mxu1 %v1633_v19  ;;  %1026 = vmatprep.subr.bf16.mxu0 %v1634_v20  ;;  %v1660_v37 = vld [vmem:[%s1986_s24 + $0x3c4] ss:$16 sps:$4 sm:$0xff]   ;;  %v1663_v39 = vld [vmem:[%s1986_s24 + $0x3c0] ss:$16 sps:$4 sm:$0xff]   ;;  %v1727_v19 = vld [vmem:[%s1986_s24 + $0x288] ss:$16 sps:$4 sm:$0xff]  }
  0x3b   : > { %1079 = vmatprep.subr.bf16.mxu1 %v1636_v21  ;;  %v1664_v40 = vld [vmem:[%s1986_s24 + $0x1a4] ss:$16 sps:$4 sm:$0xff]   ;;  %v1668_v42 = vld [vmem:[%s1986_s24 + $0x1a0] ss:$16 sps:$4 sm:$0xff]   ;;  %v1732_v20 = vld [vmem:[%s1986_s24 + $0x6c] ss:$16 sps:$4 sm:$0xff]  }
  0x3c   : > { %v1666_v41 = vld [vmem:[%s1986_s24 + $0x3a4] ss:$16 sps:$4 sm:$0xff]   ;;  %v1669_v43 = vld [vmem:[%s1986_s24 + $0x3a0] ss:$16 sps:$4 sm:$0xff]   ;;  %v1735_v21 = vld [vmem:[%s1986_s24 + $0x26c] ss:$16 sps:$4 sm:$0xff]  }
  0x3d   : > { %1027 = vmatpush1.bf16.msra.mxu0 %v1638_v22  ;;  %v1670_v44 = vld [vmem:[%s1986_s24 + $0x184] ss:$16 sps:$4 sm:$0xff]   ;;  %v1674_v46 = vld [vmem:[%s1986_s24 + $0x180] ss:$16 sps:$4 sm:$0xff]   ;;  %v1730_v22 = vld [vmem:[%s1986_s24 + $0x68] ss:$16 sps:$4 sm:$0xff]  }
  0x3e   : > { %1080 = vmatpush1.bf16.msra.mxu1 %v1639_v23  ;;  %1028 = vmatprep.subr.bf16.mxu0 %v1640_v24  ;;  %v1672_v45 = vld [vmem:[%s1986_s24 + $0x384] ss:$16 sps:$4 sm:$0xff]   ;;  %v1675_v47 = vld [vmem:[%s1986_s24 + $0x380] ss:$16 sps:$4 sm:$0xff]   ;;  %v1733_v23 = vld [vmem:[%s1986_s24 + $0x268] ss:$16 sps:$4 sm:$0xff]  }
  0x3f   : > { %1081 = vmatprep.subr.bf16.mxu1 %v1642_v25  ;;  %v1676_v48 = vld [vmem:[%s1986_s24 + $0x164] ss:$16 sps:$4 sm:$0xff]   ;;  %v1680_v52 = vld [vmem:[%s1986_s24 + $0x160] ss:$16 sps:$4 sm:$0xff]   ;;  %v1738_v24 = vld [vmem:[%s1986_s24 + $0x4c] ss:$16 sps:$4 sm:$0xff]  }
  0x40   : > { %v2044_v49 = vld [vmem:[%s2235_s0 + $0x4] ss:$16 sps:$4 sm:$0xff]   ;;  %v1681_v53 = vld [vmem:[%s1986_s24 + $0x360] ss:$16 sps:$4 sm:$0xff]   ;;  %v1741_v25 = vld [vmem:[%s1986_s24 + $0x24c] ss:$16 sps:$4 sm:$0xff]  }
  0x41   : > { %1029 = vmatpush1.bf16.msra.mxu0 %v1644_v26  ;;  %v1678_v50 = vld [vmem:[%s1986_s24 + $0x364] ss:$16 sps:$4 sm:$0xff]   ;;  %1048 = vmatprep.mubr.bf16.mxu0 %v2044_v49  ;;  %v1686_v56 = vld [vmem:[%s1986_s24 + $0x140] ss:$16 sps:$4 sm:$0xff]  }
  0x42   : > { %1082 = vmatpush1.bf16.msra.mxu1 %v1645_v27  ;;  %1030 = vmatprep.subr.bf16.mxu0 %v1646_v28  ;;  %v1682_v54 = vld [vmem:[%s1986_s24 + $0x144] ss:$16 sps:$4 sm:$0xff]   ;;  %v1687_v57 = vld [vmem:[%s1986_s24 + $0x340] ss:$16 sps:$4 sm:$0xff]   ;;  %v2110_v27 = vld [vmem:[%s2235_s0 + $0x2c] ss:$16 sps:$4 sm:$0xff]  }
  0x43   : > { %1083 = vmatprep.subr.bf16.mxu1 %v1648_v29  ;;  %v1684_v55 = vld [vmem:[%s1986_s24 + $0x344] ss:$16 sps:$4 sm:$0xff]   ;;  %v1692_v60 = vld [vmem:[%s1986_s24 + $0x120] ss:$16 sps:$4 sm:$0xff]   ;;  %v2121_v29 = vld [vmem:[%s2235_s0 + $0x28] ss:$16 sps:$4 sm:$0xff]  }
  0x44   : > { %v1688_v58 = vld [vmem:[%s1986_s24 + $0x124] ss:$16 sps:$4 sm:$0xff]   ;;  %v1693_v61 = vld [vmem:[%s1986_s24 + $0x320] ss:$16 sps:$4 sm:$0xff]  }
  0x45   : > { %1031 = vmatpush1.bf16.msra.mxu0 %v1650_v30  ;;  %v1690_v59 = vld [vmem:[%s1986_s24 + $0x324] ss:$16 sps:$4 sm:$0xff]   ;;  %v1698_v0 = vld [vmem:[%s1986_s24 + $0x100] ss:$16 sps:$4 sm:$0xff]   ;;  %v1736_v30 = vld [vmem:[%s1986_s24 + $0x48] ss:$16 sps:$4 sm:$0xff]  }
  0x46   : > { %1084 = vmatpush1.bf16.msra.mxu1 %v1651_v31  ;;  %1032 = vmatprep.subr.bf16.mxu0 %v1652_v32  ;;  %v1694_v62 = vld [vmem:[%s1986_s24 + $0x104] ss:$16 sps:$4 sm:$0xff]   ;;  %v1699_v1 = vld [vmem:[%s1986_s24 + $0x300] ss:$16 sps:$4 sm:$0xff]   ;;  %v1739_v31 = vld [vmem:[%s1986_s24 + $0x248] ss:$16 sps:$4 sm:$0xff]  }
  0x47   : > { %1085 = vmatprep.subr.bf16.mxu1 %v1654_v33  ;;  %v1696_v63 = vld [vmem:[%s1986_s24 + $0x304] ss:$16 sps:$4 sm:$0xff]   ;;  %v2073_v4 = vld [vmem:[%s2235_s0] ss:$16 sps:$4 sm:$0xff]   ;;  %v1744_v32 = vld [vmem:[%s1986_s24 + $0x2c] ss:$16 sps:$4 sm:$0xff]  }
  0x48   : > { %v2105_v26 = vld [vmem:[%s2235_s0 + $0x24] ss:$16 sps:$4 sm:$0xff]   ;;  %v2116_v28 = vld [vmem:[%s2235_s0 + $0x20] ss:$16 sps:$4 sm:$0xff]   ;;  %v1747_v33 = vld [vmem:[%s1986_s24 + $0x22c] ss:$16 sps:$4 sm:$0xff]  }
  0x49   : > { %1033 = vmatpush2.bf16.msra.mxu0 %v1656_v34  ;;  %v1742_v34 = vld [vmem:[%s1986_s24 + $0x28] ss:$16 sps:$4 sm:$0xff]  }
  0x4a   : > { %1086 = vmatpush2.bf16.msra.mxu1 %v1657_v35  ;;  %1034 = vmatprep.subr.bf16.mxu0 %v1658_v36  ;;  %v1745_v35 = vld [vmem:[%s1986_s24 + $0x228] ss:$16 sps:$4 sm:$0xff]   ;;  %v1750_v36 = vld [vmem:[%s1986_s24 + $0xc] ss:$16 sps:$4 sm:$0xff]  }
  0x4b   : > { %1087 = vmatprep.subr.bf16.mxu1 %v1660_v37  ;;  %v1753_v37 = vld [vmem:[%s1986_s24 + $0x20c] ss:$16 sps:$4 sm:$0xff]  }
  0x4d   : > { %1035 = vmatpush2.bf16.msra.mxu0 %v1662_v38  ;;  %v1748_v38 = vld [vmem:[%s1986_s24 + $0x8] ss:$16 sps:$4 sm:$0xff]  }
  0x4e   : > { %1088 = vmatpush2.bf16.msra.mxu1 %v1663_v39  ;;  %1036 = vmatprep.subr.bf16.mxu0 %v1664_v40  ;;  %v1751_v39 = vld [vmem:[%s1986_s24 + $0x208] ss:$16 sps:$4 sm:$0xff]   ;;  %v1756_v40 = vld [vmem:[%s1986_s24 + $0x1ec] ss:$16 sps:$4 sm:$0xff]  }
  0x4f   : > { %1089 = vmatprep.subr.bf16.mxu1 %v1666_v41  ;;  %v1759_v41 = vld [vmem:[%s1986_s24 + $0x3ec] ss:$16 sps:$4 sm:$0xff]  }
  0x51   : > { %1037 = vmatpush2.bf16.msra.mxu0 %v1668_v42  ;;  %v1754_v42 = vld [vmem:[%s1986_s24 + $0x1e8] ss:$16 sps:$4 sm:$0xff]  }
  0x52   : > { %1090 = vmatpush2.bf16.msra.mxu1 %v1669_v43  ;;  %1038 = vmatprep.subr.bf16.mxu0 %v1670_v44  ;;  %v1757_v43 = vld [vmem:[%s1986_s24 + $0x3e8] ss:$16 sps:$4 sm:$0xff]   ;;  %v1762_v44 = vld [vmem:[%s1986_s24 + $0x1cc] ss:$16 sps:$4 sm:$0xff]  }
  0x53   : > { %1091 = vmatprep.subr.bf16.mxu1 %v1672_v45  ;;  %v1765_v45 = vld [vmem:[%s1986_s24 + $0x3cc] ss:$16 sps:$4 sm:$0xff]  }
  0x55   : > { %1039 = vmatpush2.bf16.msra.mxu0 %v1674_v46  ;;  %v1760_v46 = vld [vmem:[%s1986_s24 + $0x1c8] ss:$16 sps:$4 sm:$0xff]  }
  0x56   : > { %1092 = vmatpush2.bf16.msra.mxu1 %v1675_v47  ;;  %1040 = vmatprep.subr.bf16.mxu0 %v1676_v48  ;;  %v1763_v47 = vld [vmem:[%s1986_s24 + $0x3c8] ss:$16 sps:$4 sm:$0xff]   ;;  %v1768_v48 = vld [vmem:[%s1986_s24 + $0x1ac] ss:$16 sps:$4 sm:$0xff]  }
  0x57   : > { %1093 = vmatprep.subr.bf16.mxu1 %v1678_v50  ;;  %v1766_v50 = vld [vmem:[%s1986_s24 + $0x1a8] ss:$16 sps:$4 sm:$0xff]  }
  0x59   : > { %1041 = vmatpush2.bf16.msra.mxu0 %v1680_v52  ;;  %v1774_v52 = vld [vmem:[%s1986_s24 + $0x18c] ss:$16 sps:$4 sm:$0xff]  }
  0x5a   : > { %1094 = vmatpush2.bf16.msra.mxu1 %v1681_v53  ;;  %1042 = vmatprep.subr.bf16.mxu0 %v1682_v54  ;;  %v1777_v53 = vld [vmem:[%s1986_s24 + $0x38c] ss:$16 sps:$4 sm:$0xff]   ;;  %v1772_v54 = vld [vmem:[%s1986_s24 + $0x188] ss:$16 sps:$4 sm:$0xff]  }
  0x5b   : > { %1095 = vmatprep.subr.bf16.mxu1 %v1684_v55  ;;  %v1775_v55 = vld [vmem:[%s1986_s24 + $0x388] ss:$16 sps:$4 sm:$0xff]  }
  0x5d   : > { %1043 = vmatpush2.bf16.msra.mxu0 %v1686_v56  ;;  %v1780_v56 = vld [vmem:[%s1986_s24 + $0x16c] ss:$16 sps:$4 sm:$0xff]  }
  0x5e   : > { %1096 = vmatpush2.bf16.msra.mxu1 %v1687_v57  ;;  %1044 = vmatprep.subr.bf16.mxu0 %v1688_v58  ;;  %v1783_v57 = vld [vmem:[%s1986_s24 + $0x36c] ss:$16 sps:$4 sm:$0xff]   ;;  %v1778_v58 = vld [vmem:[%s1986_s24 + $0x168] ss:$16 sps:$4 sm:$0xff]  }
  0x5f   : > { %1097 = vmatprep.subr.bf16.mxu1 %v1690_v59  ;;  %v1781_v59 = vld [vmem:[%s1986_s24 + $0x368] ss:$16 sps:$4 sm:$0xff]  }
  0x61   : > { %1045 = vmatpush2.bf16.msra.mxu0 %v1692_v60  ;;  %v1792_v60 = vld [vmem:[%s1986_s24 + $0x14c] ss:$16 sps:$4 sm:$0xff]  }
  0x62   : > { %1098 = vmatpush2.bf16.msra.mxu1 %v1693_v61  ;;  %1046 = vmatprep.subr.bf16.mxu0 %v1694_v62  ;;  %v1795_v61 = vld [vmem:[%s1986_s24 + $0x34c] ss:$16 sps:$4 sm:$0xff]   ;;  %v1790_v62 = vld [vmem:[%s1986_s24 + $0x148] ss:$16 sps:$4 sm:$0xff]  }
  0x63   : > { %1099 = vmatprep.subr.bf16.mxu1 %v1696_v63  ;;  %v1793_v63 = vld [vmem:[%s1986_s24 + $0x348] ss:$16 sps:$4 sm:$0xff]  }
  0x65   : > { %1047 = vmatpush2.bf16.msra.mxu0 %v1698_v0  ;;  %v1798_v0 = vld [vmem:[%s1986_s24 + $0x12c] ss:$16 sps:$4 sm:$0xff]  }
  0x66   : > { %1100 = vmatpush2.bf16.msra.mxu1 %v1699_v1  ;;  %1122 = vmatprep.subr.bf16.mxu0 %v1708_v2  ;;  %v1801_v1 = vld [vmem:[%s1986_s24 + $0x32c] ss:$16 sps:$4 sm:$0xff]   ;;  %v1796_v2 = vld [vmem:[%s1986_s24 + $0x128] ss:$16 sps:$4 sm:$0xff]  }
  0x67   : > { %1175 = vmatprep.subr.bf16.mxu1 %v1711_v3  ;;  %v1799_v3 = vld [vmem:[%s1986_s24 + $0x328] ss:$16 sps:$4 sm:$0xff]  }
  0x68   : > { %1049 = vmatmul.mubr.bf16.vlgmr.msra.gmra.mxu0 %v2073_v4 }
  0x69   : > { %1102 = vmatmul.mubr.bf16.vlgmr.msra.gmra.mxu1 %v2078_v5  ;;  %1123 = vmatpush1.bf16.msra.mxu0 %v1706_v6  ;;  %v1804_v6 = vld [vmem:[%s1986_s24 + $0x10c] ss:$16 sps:$4 sm:$0xff]  }
  0x6a   : > { %1176 = vmatpush1.bf16.msra.mxu1 %v1709_v7  ;;  %1124 = vmatprep.subr.bf16.mxu0 %v1714_v8  ;;  %v1807_v7 = vld [vmem:[%s1986_s24 + $0x30c] ss:$16 sps:$4 sm:$0xff]   ;;  %v1802_v8 = vld [vmem:[%s1986_s24 + $0x108] ss:$16 sps:$4 sm:$0xff]  }
  0x6b   : > { %1177 = vmatprep.subr.bf16.mxu1 %v1717_v9  ;;  %1058 = vmatprep.mubr.bf16.mxu0 %v2105_v26  ;;  %v1805_v9 = vld [vmem:[%s1986_s24 + $0x308] ss:$16 sps:$4 sm:$0xff]  }
  0x6c   : > { %1111 = vmatprep.mubr.bf16.mxu1 %v2110_v27 }
  0x6d   : > { %1125 = vmatpush1.bf16.msra.mxu0 %v1712_v10 }
  0x6e   : > { %1178 = vmatpush1.bf16.msra.mxu1 %v1715_v11  ;;  %1126 = vmatprep.subr.bf16.mxu0 %v1720_v12 }
  0x6f   : > { %1179 = vmatprep.subr.bf16.mxu1 %v1723_v13 }
  0x70   : > { %1059 = vmatmul.mubr.bf16.gmra.mxu0 %v2116_v28 }
  0x71   : > { %1127 = vmatpush1.bf16.msra.mxu0 %v1718_v14  ;;  %1112 = vmatmul.mubr.bf16.gmra.mxu1 %v2121_v29 }
  0x72   : > { %1180 = vmatpush1.bf16.msra.mxu1 %v1721_v15  ;;  %1128 = vmatprep.subr.bf16.mxu0 %v1726_v16 }
  0x73   : > { %1181 = vmatprep.subr.bf16.mxu1 %v1729_v17  ;;  %1154 = vmatprep.mubr.bf16.mxu0 %v2044_v49  ;;  %v1771_v49 = vld [vmem:[%s1986_s24 + $0x3ac] ss:$16 sps:$4 sm:$0xff]  }
  0x74   : > { %1207 = vmatprep.mubr.bf16.mxu1 %v2050_v51  ;;  %v1769_v51 = vld [vmem:[%s1986_s24 + $0x3a8] ss:$16 sps:$4 sm:$0xff]  }
  0x75   : > { %1129 = vmatpush1.bf16.msra.mxu0 %v1724_v18 }
  0x76   : > { %1182 = vmatpush1.bf16.msra.mxu1 %v1727_v19  ;;  %1130 = vmatprep.subr.bf16.mxu0 %v1732_v20 }
  0x77   : > { %1183 = vmatprep.subr.bf16.mxu1 %v1735_v21 }
  0x79   : > { %1131 = vmatpush1.bf16.msra.mxu0 %v1730_v22 }
  0x7a   : > { %1184 = vmatpush1.bf16.msra.mxu1 %v1733_v23  ;;  %1132 = vmatprep.subr.bf16.mxu0 %v1738_v24 }
  0x7b   : > { %1185 = vmatprep.subr.bf16.mxu1 %v1741_v25 }
  0x7d   : > { %1133 = vmatpush1.bf16.msra.mxu0 %v1736_v30 }
  0x7e   : > { %1186 = vmatpush1.bf16.msra.mxu1 %v1739_v31  ;;  %1134 = vmatprep.subr.bf16.mxu0 %v1744_v32 }
  0x7f   : > { %1187 = vmatprep.subr.bf16.mxu1 %v1747_v33 }
  0x81   : > { %1135 = vmatpush1.bf16.msra.mxu0 %v1742_v34 }
  0x82   : > { %1188 = vmatpush1.bf16.msra.mxu1 %v1745_v35  ;;  %1136 = vmatprep.subr.bf16.mxu0 %v1750_v36 }
  0x83   : > { %1189 = vmatprep.subr.bf16.mxu1 %v1753_v37 }
  0x85   : > { %1137 = vmatpush1.bf16.msra.mxu0 %v1748_v38 }
  0x86   : > { %1190 = vmatpush1.bf16.msra.mxu1 %v1751_v39  ;;  %1138 = vmatprep.subr.bf16.mxu0 %v1756_v40 }
  0x87   : > { %1191 = vmatprep.subr.bf16.mxu1 %v1759_v41 }
  0x89   : > { %1139 = vmatpush2.bf16.msra.mxu0 %v1754_v42 }
  0x8a   : > { %1192 = vmatpush2.bf16.msra.mxu1 %v1757_v43  ;;  %1140 = vmatprep.subr.bf16.mxu0 %v1762_v44 }
  0x8b   : > { %1193 = vmatprep.subr.bf16.mxu1 %v1765_v45 }
  0x8d   : > { %1141 = vmatpush2.bf16.msra.mxu0 %v1760_v46 }
  0x8e   : > { %1194 = vmatpush2.bf16.msra.mxu1 %v1763_v47  ;;  %1142 = vmatprep.subr.bf16.mxu0 %v1768_v48 }
  0x8f   : > { %1195 = vmatprep.subr.bf16.mxu1 %v1771_v49 }
  0x91   : > { %1143 = vmatpush2.bf16.msra.mxu0 %v1766_v50 }
  0x92   : > { %1196 = vmatpush2.bf16.msra.mxu1 %v1769_v51  ;;  %1144 = vmatprep.subr.bf16.mxu0 %v1774_v52 }
  0x93   : > { %1197 = vmatprep.subr.bf16.mxu1 %v1777_v53 }
  0x95   : > { %1145 = vmatpush2.bf16.msra.mxu0 %v1772_v54 }
  0x96   : > { %1198 = vmatpush2.bf16.msra.mxu1 %v1775_v55  ;;  %1146 = vmatprep.subr.bf16.mxu0 %v1780_v56 }
  0x97   : > { %1199 = vmatprep.subr.bf16.mxu1 %v1783_v57 }
  0x99   : > { %1147 = vmatpush2.bf16.msra.mxu0 %v1778_v58 }
  0x9a   : > { %1200 = vmatpush2.bf16.msra.mxu1 %v1781_v59  ;;  %1148 = vmatprep.subr.bf16.mxu0 %v1792_v60 }
  0x9b   : > { %1201 = vmatprep.subr.bf16.mxu1 %v1795_v61 }
  0x9d   : > { %1149 = vmatpush2.bf16.msra.mxu0 %v1790_v62 }
  0x9e   : > { %1202 = vmatpush2.bf16.msra.mxu1 %v1793_v63  ;;  %1150 = vmatprep.subr.bf16.mxu0 %v1798_v0 }
  0x9f   : > { %1203 = vmatprep.subr.bf16.mxu1 %v1801_v1 }
  0xa1   : > { %1151 = vmatpush2.bf16.msra.mxu0 %v1796_v2 }
  0xa2   : > { %1204 = vmatpush2.bf16.msra.mxu1 %v1799_v3  ;;  %1152 = vmatprep.subr.bf16.mxu0 %v1804_v6 }
  0xa3   : > { %1205 = vmatprep.subr.bf16.mxu1 %v1807_v7 }
  0xa5   : > { %1153 = vmatpush2.bf16.msra.mxu0 %v1802_v8 }
  0xa6   : > { %1206 = vmatpush2.bf16.msra.mxu1 %v1805_v9 }
  0xa8   : > { %1155 = vmatmul.mubr.bf16.vlgmr.msra.gmra.mxu0 %v2073_v4 }
  0xa9   : > { %1208 = vmatmul.mubr.bf16.vlgmr.msra.gmra.mxu1 %v2078_v5  ;;  %1164 = vmatprep.mubr.bf16.mxu0 %v2105_v26 }
  0xaa   : > { %1217 = vmatprep.mubr.bf16.mxu1 %v2110_v27 }
  0xb0   : > { %1165 = vmatmul.mubr.bf16.gmra.mxu0 %v2116_v28 }
  0xb1   : > { %1218 = vmatmul.mubr.bf16.gmra.mxu1 %v2121_v29 }
 0x128   : > { %v1050_v10 = vpop.f32.mrf.mxu0 }
 0x129   : > { %v1103_v11 = vpop.f32.mrf.mxu1 }
 0x12a   : > { %v1104_v12 = vadd.f32 %v1103_v11, %v1050_v10  ;;  %v1052_v13 = vpop.f32.mrf.mxu0 }
 0x12b   : > { %v1105_v14 = vpop.f32.mrf.mxu1 }
 0x12c   : > { %1228 = vst [vmem:[%s2177_s23] sm:$0xff] %v1104_v12  ;;  %v1106_v4 = vadd.f32 %v1105_v14, %v1052_v13  ;;  %v1054_v5 = vpop.f32.mrf.mxu0 }
 0x12d   : > { %v1107_v15 = vpop.f32.mrf.mxu1 }
 0x12e   : > { %1229 = vst [vmem:[%s2177_s23 + $0x8] sm:$0xff] %v1106_v4  ;;  %v1108_v16 = vadd.f32 %v1107_v15, %v1054_v5  ;;  %v1056_v17 = vpop.f32.mrf.mxu0 }
 0x12f   : > { %v1109_v18 = vpop.f32.mrf.mxu1 }
 0x130   : > { %1232 = vst [vmem:[%s2177_s23 + $0x20] sm:$0xff] %v1108_v16  ;;  %v1110_v19 = vadd.f32 %v1109_v18, %v1056_v17  ;;  %v1060_v20 = vpop.f32.mrf.mxu0 }
 0x131   : > { %v1113_v21 = vpop.f32.mrf.mxu1 }
 0x132   : > { %1233 = vst [vmem:[%s2177_s23 + $0x28] sm:$0xff] %v1110_v19  ;;  %v1114_v22 = vadd.f32 %v1113_v21, %v1060_v20  ;;  %v1062_v23 = vpop.f32.mrf.mxu0 }
 0x133   : > { %v1115_v24 = vpop.f32.mrf.mxu1  ;;  %v1269_v56 = vld [vmem:[%s2177_s23] sm:$0xff] (%p1957_p9) }
 0x134   : > { %1236 = vst [vmem:[%s2177_s23 + $0x40] sm:$0xff] %v1114_v22  ;;  %v1116_v25 = vadd.f32 %v1115_v24, %v1062_v23  ;;  %v1064_v26 = vpop.f32.mrf.mxu0  ;;  %1270 = vst [vmem:[%s1256_s25] sm:$0xff] (%p1957_p9), %v1269_v56 }
 0x135   : > { %v1117_v27 = vpop.f32.mrf.mxu1  ;;  %v1271_v57 = vld [vmem:[%s2177_s23 + $0x8] sm:$0xff] (%p1957_p9) }
 0x136   : > { %1237 = vst [vmem:[%s2177_s23 + $0x48] sm:$0xff] %v1116_v25  ;;  %v1118_v28 = vadd.f32 %v1117_v27, %v1064_v26  ;;  %v1066_v29 = vpop.f32.mrf.mxu0  ;;  %1272 = vst [vmem:[%s1256_s25 + $0x8] sm:$0xff] (%p1957_p9), %v1271_v57 }
 0x137   : > { %v1119_v30 = vpop.f32.mrf.mxu1  ;;  %v1277_v60 = vld [vmem:[%s2177_s23 + $0x20] sm:$0xff] (%p1957_p9) }
 0x138   : > { %1240 = vst [vmem:[%s2177_s23 + $0x60] sm:$0xff] %v1118_v28  ;;  %v1120_v31 = vadd.f32 %v1119_v30, %v1066_v29  ;;  %1278 = vst [vmem:[%s1256_s25 + $0x100] sm:$0xff] (%p1957_p9), %v1277_v60 }
 0x139   : > { %v1279_v61 = vld [vmem:[%s2177_s23 + $0x28] sm:$0xff] (%p1957_p9) }
 0x13a   : > { %1241 = vst [vmem:[%s2177_s23 + $0x68] sm:$0xff] %v1120_v31  ;;  %1280 = vst [vmem:[%s1256_s25 + $0x108] sm:$0xff] (%p1957_p9), %v1279_v61 }
 0x13b   : > { %v1285_v0 = vld [vmem:[%s2177_s23 + $0x40] sm:$0xff] (%p1957_p9) }
 0x13c   : > { %1286 = vst [vmem:[%s1256_s25 + $0x200] sm:$0xff] (%p1957_p9), %v1285_v0 }
 0x13d   : > { %v1287_v1 = vld [vmem:[%s2177_s23 + $0x48] sm:$0xff] (%p1957_p9) }
 0x13e   : > { %1288 = vst [vmem:[%s1256_s25 + $0x208] sm:$0xff] (%p1957_p9), %v1287_v1 }
 0x13f   : > { %v1293_v6 = vld [vmem:[%s2177_s23 + $0x60] sm:$0xff] (%p1957_p9) }
 0x140   : > { %1294 = vst [vmem:[%s1256_s25 + $0x300] sm:$0xff] (%p1957_p9), %v1293_v6 }
 0x141   : > { %v1295_v7 = vld [vmem:[%s2177_s23 + $0x68] sm:$0xff] (%p1957_p9) }
 0x142   : > { %1296 = vst [vmem:[%s1256_s25 + $0x308] sm:$0xff] (%p1957_p9), %v1295_v7 }
 0x168   : > { %v1156_v32 = vpop.f32.mrf.mxu0 }
 0x169   : > { %v1209_v33 = vpop.f32.mrf.mxu1 }
 0x16a   : > { %v1210_v34 = vadd.f32 %v1209_v33, %v1156_v32  ;;  %v1158_v35 = vpop.f32.mrf.mxu0 }
 0x16b   : > { %v1211_v36 = vpop.f32.mrf.mxu1 }
 0x16c   : > { %1230 = vst [vmem:[%s2177_s23 + $0x10] sm:$0xff] %v1210_v34  ;;  %v1212_v37 = vadd.f32 %v1211_v36, %v1158_v35  ;;  %v1160_v38 = vpop.f32.mrf.mxu0 }
 0x16d   : > { %v1213_v39 = vpop.f32.mrf.mxu1 }
 0x16e   : > { %1231 = vst [vmem:[%s2177_s23 + $0x18] sm:$0xff] %v1212_v37  ;;  %v1214_v40 = vadd.f32 %v1213_v39, %v1160_v38  ;;  %v1162_v41 = vpop.f32.mrf.mxu0 }
 0x16f   : > { %v1215_v42 = vpop.f32.mrf.mxu1 }
 0x170   : > { %1234 = vst [vmem:[%s2177_s23 + $0x30] sm:$0xff] %v1214_v40  ;;  %v1216_v43 = vadd.f32 %v1215_v42, %v1162_v41  ;;  %v1166_v44 = vpop.f32.mrf.mxu0 }
 0x171   : > { %v1219_v45 = vpop.f32.mrf.mxu1 }
 0x172   : > { %1235 = vst [vmem:[%s2177_s23 + $0x38] sm:$0xff] %v1216_v43  ;;  %v1220_v46 = vadd.f32 %v1219_v45, %v1166_v44  ;;  %v1168_v47 = vpop.f32.mrf.mxu0 }
 0x173   : > { %v1221_v48 = vpop.f32.mrf.mxu1  ;;  %v1273_v58 = vld [vmem:[%s2177_s23 + $0x10] sm:$0xff] (%p1957_p9) }
 0x174   : > { %1238 = vst [vmem:[%s2177_s23 + $0x50] sm:$0xff] %v1220_v46  ;;  %v1222_v49 = vadd.f32 %v1221_v48, %v1168_v47  ;;  %v1170_v50 = vpop.f32.mrf.mxu0  ;;  %1274 = vst [vmem:[%s1256_s25 + $0x10] sm:$0xff] (%p1957_p9), %v1273_v58 }
 0x175   : > { %v1223_v51 = vpop.f32.mrf.mxu1  ;;  %v1275_v59 = vld [vmem:[%s2177_s23 + $0x18] sm:$0xff] (%p1957_p9) }
 0x176   : > { %1239 = vst [vmem:[%s2177_s23 + $0x58] sm:$0xff] %v1222_v49  ;;  %v1224_v52 = vadd.f32 %v1223_v51, %v1170_v50  ;;  %v1172_v53 = vpop.f32.mrf.mxu0  ;;  %1250 = sbr.rel (!%p1957_p9) target bundleno = 387 (0x183), region = 36  ;;  %1276 = vst [vmem:[%s1256_s25 + $0x18] sm:$0xff] (%p1957_p9), %v1275_v59 }
 0x177   : > { %v1225_v54 = vpop.f32.mrf.mxu1  ;;  %v1281_v62 = vld [vmem:[%s2177_s23 + $0x30] sm:$0xff] (%p1957_p9) }
 0x178   : > { %1242 = vst [vmem:[%s2177_s23 + $0x70] sm:$0xff] %v1224_v52  ;;  %v1226_v55 = vadd.f32 %v1225_v54, %v1172_v53  ;;  %1282 = vst [vmem:[%s1256_s25 + $0x110] sm:$0xff] (%p1957_p9), %v1281_v62 }
 0x179   : > { %v1283_v63 = vld [vmem:[%s2177_s23 + $0x38] sm:$0xff] (%p1957_p9) }
 0x17a   : > { %1243 = vst [vmem:[%s2177_s23 + $0x78] sm:$0xff] %v1226_v55  ;;  %1284 = vst [vmem:[%s1256_s25 + $0x118] sm:$0xff] (%p1957_p9), %v1283_v63 }
 0x17b   : > { %v1289_v2 = vld [vmem:[%s2177_s23 + $0x50] sm:$0xff] }
 0x17c   : > { %1290 = vst [vmem:[%s1256_s25 + $0x210] sm:$0xff] %v1289_v2 }
 0x17d   : > { %v1291_v3 = vld [vmem:[%s2177_s23 + $0x58] sm:$0xff] }
 0x17e   : > { %1292 = vst [vmem:[%s1256_s25 + $0x218] sm:$0xff] %v1291_v3 }
 0x17f   : > { %v1297_v8 = vld [vmem:[%s2177_s23 + $0x70] sm:$0xff] }
 0x180   : > { %1298 = vst [vmem:[%s1256_s25 + $0x310] sm:$0xff] %v1297_v8 }
 0x181   : > { %v1299_v9 = vld [vmem:[%s2177_s23 + $0x78] sm:$0xff] }
 0x182   : > { %1300 = vst [vmem:[%s1256_s25 + $0x318] sm:$0xff] %v1299_v9 }
 0x183 PF: > { %s15_s14 = sadd.s32 1, %s1886_s14   ;;  %s2242_s9 = smov %s1870_s10 }
 0x184   : > { %p12_p8 = scmp.ge.s32.totalorder %s15_s14, 10   ;;  %s2243_s10 = smov %s1874_s11 }
 0x185   : > { %s2244_s11 = smov %s1955_s21  ;;  %s2245_s12 = smov %s1882_s13 }
 0x186   : > { %s2246_s13 = smov %s2248_s16  ;;  %14 = sbr.rel (!%p12_p8) target bundleno = 4 (0x4), region = 94 }
 0x18b   :  { %1316 = vsyncpa [#allocation3], 1 }
 0x18c   :  { %1318 = vsyncpa [#allocation3 + $0x1], 1 }

// kernel: generator_forward.18
= control target key start
LH: loop header
LB: loop body
LE: loop exit
PB: predicated region body
PF: predicated region fallthrough
CT: control target
= control target key end

     0   :  { %v14_v0 = vlaneseq  ;;  %v240_v9 = vmov 0.0   ;;  %s377_s0 = inlined_call_operand.vmem [shape: f32[128,256], index: 0, kind: input, shape index: {}]   ;;  %s378_s1 = inlined_call_operand.vmem [shape: f32[1,256], index: 1, kind: output, shape index: {0}]   ;;  %s379_s2 = inlined_call_operand.vmem [shape: f32[1,256], index: 2, kind: output, shape index: {1}]  }
   0x1   :  { %v20_v1 = vld [vmem:[%s377_s0] sm:$0xff]  ;;  %v21_v2 = vld [vmem:[%s377_s0 + $0x8] sm:$0xff]  ;;  %v22_v3 = vld [vmem:[%s377_s0 + $0x10] sm:$0xff] }
   0x2   :  { %vm267_vm0 = vcmp.lt.s32.totalorder %v14_v0, 256  ;;  %v23_v5 = vld [vmem:[%s377_s0 + $0x18] sm:$0xff]  ;;  %v24_v6 = vld [vmem:[%s377_s0 + $0x20] sm:$0xff]  ;;  %v25_v7 = vld [vmem:[%s377_s0 + $0x28] sm:$0xff]  ;;  %v53_v8 = vadd.f32 %v22_v3, %v20_v1  ;;  %v120_v24 = vmul.f32 %v20_v1, %v20_v1  ;;  %v121_v27 = vmul.f32 %v21_v2, %v21_v2 }
   0x3   :  { %18 = vst.msk [vmem:[#allocation2] sm:$0x3] %vm267_vm0, %v240_v9  ;;  %19 = vst.msk [vmem:[#allocation3] sm:$0x3] %vm267_vm0, %v240_v9  ;;  %v26_v10 = vld [vmem:[%s377_s0 + $0x30] sm:$0xff]  ;;  %v74_v11 = vadd.f32 %v23_v5, %v21_v2  ;;  %v27_v12 = vld [vmem:[%s377_s0 + $0x38] sm:$0xff]  ;;  %v122_v28 = vmul.f32 %v22_v3, %v22_v3  ;;  %v123_v29 = vmul.f32 %v23_v5, %v23_v5 }
   0x4   :  { %v54_v13 = vadd.f32 %v53_v8, %v24_v6  ;;  %v28_v14 = vld [vmem:[%s377_s0 + $0x40] sm:$0xff]  ;;  %v29_v16 = vld [vmem:[%s377_s0 + $0x48] sm:$0xff]  ;;  %v30_v18 = vld [vmem:[%s377_s0 + $0x50] sm:$0xff]  ;;  %v124_v34 = vmul.f32 %v24_v6, %v24_v6  ;;  %v125_v35 = vmul.f32 %v25_v7, %v25_v7  ;;  %v126_v38 = vmul.f32 %v26_v10, %v26_v10 }
   0x5   :  { %v75_v15 = vadd.f32 %v74_v11, %v25_v7  ;;  %v31_v20 = vld [vmem:[%s377_s0 + $0x58] sm:$0xff]  ;;  %v32_v22 = vld [vmem:[%s377_s0 + $0x60] sm:$0xff]  ;;  %v33_v25 = vld [vmem:[%s377_s0 + $0x68] sm:$0xff]  ;;  %v127_v41 = vmul.f32 %v27_v12, %v27_v12  ;;  %v152_v42 = vadd.f32 %v122_v28, %v120_v24  ;;  %v173_v43 = vadd.f32 %v123_v29, %v121_v27 }
   0x6   :  { %v55_v17 = vadd.f32 %v54_v13, %v26_v10  ;;  %v34_v30 = vld [vmem:[%s377_s0 + $0x70] sm:$0xff]  ;;  %v35_v32 = vld [vmem:[%s377_s0 + $0x78] sm:$0xff]  ;;  %v36_v36 = vld [vmem:[%s377_s0 + $0x80] sm:$0xff]  ;;  %v128_v46 = vmul.f32 %v28_v14, %v28_v14  ;;  %v129_v49 = vmul.f32 %v29_v16, %v29_v16  ;;  %v130_v54 = vmul.f32 %v30_v18, %v30_v18 }
   0x7   :  { %v76_v19 = vadd.f32 %v75_v15, %v27_v12  ;;  %v37_v39 = vld [vmem:[%s377_s0 + $0x88] sm:$0xff]  ;;  %v38_v44 = vld [vmem:[%s377_s0 + $0x90] sm:$0xff]  ;;  %v39_v47 = vld [vmem:[%s377_s0 + $0x98] sm:$0xff]  ;;  %v153_v50 = vadd.f32 %v152_v42, %v124_v34  ;;  %v174_v51 = vadd.f32 %v173_v43, %v125_v35  ;;  %v131_v57 = vmul.f32 %v31_v20, %v31_v20 }
   0x8   :  { %v56_v21 = vadd.f32 %v55_v17, %v28_v14  ;;  %v40_v52 = vld [vmem:[%s377_s0 + $0xa0] sm:$0xff]  ;;  %v41_v55 = vld [vmem:[%s377_s0 + $0xa8] sm:$0xff]  ;;  %v42_v60 = vld [vmem:[%s377_s0 + $0xb0] sm:$0xff]  ;;  %v132_v62 = vmul.f32 %v32_v22, %v32_v22  ;;  %v133_v2 = vmul.f32 %v33_v25, %v33_v25  ;;  %v134_v8 = vmul.f32 %v34_v30, %v34_v30 }
   0x9   :  { %v77_v23 = vadd.f32 %v76_v19, %v29_v16  ;;  %v154_v58 = vadd.f32 %v153_v50, %v126_v38  ;;  %v175_v59 = vadd.f32 %v174_v51, %v127_v41  ;;  %v43_v63 = vld [vmem:[%s377_s0 + $0xb8] sm:$0xff]  ;;  %v44_v6 = vld [vmem:[%s377_s0 + $0xc0] sm:$0xff]  ;;  %v45_v9 = vld [vmem:[%s377_s0 + $0xc8] sm:$0xff]  ;;  %v135_v11 = vmul.f32 %v35_v32, %v35_v32 }
   0xa   :  { %v57_v26 = vadd.f32 %v56_v21, %v30_v18  ;;  %v46_v14 = vld [vmem:[%s377_s0 + $0xd0] sm:$0xff]  ;;  %v136_v16 = vmul.f32 %v36_v36, %v36_v36  ;;  %v47_v17 = vld [vmem:[%s377_s0 + $0xd8] sm:$0xff]  ;;  %v137_v19 = vmul.f32 %v37_v39, %v37_v39  ;;  %v138_v24 = vmul.f32 %v38_v44, %v38_v44 }
   0xb   :  { %v78_v31 = vadd.f32 %v77_v23, %v31_v20  ;;  %v155_v3 = vadd.f32 %v154_v58, %v128_v46  ;;  %v176_v5 = vadd.f32 %v175_v59, %v129_v49  ;;  %v139_v27 = vmul.f32 %v39_v47, %v39_v47 }
   0xc   :  { %v58_v33 = vadd.f32 %v57_v26, %v32_v22  ;;  %v48_v22 = vld [vmem:[%s377_s0 + $0xe0] sm:$0xff]  ;;  %v141_v35 = vmul.f32 %v41_v55, %v41_v55  ;;  %v143_v41 = vmul.f32 %v43_v63, %v43_v63  ;;  %v146_v51 = vmul.f32 %v46_v14, %v46_v14 }
   0xd   :  { %v79_v37 = vadd.f32 %v78_v31, %v33_v25  ;;  %v156_v12 = vadd.f32 %v155_v3, %v130_v54  ;;  %v177_v13 = vadd.f32 %v176_v5, %v131_v57  ;;  %v49_v25 = vld [vmem:[%s377_s0 + $0xe8] sm:$0xff]  ;;  %v241_v57 = vmov 1966171168  }
   0xe   :  { %v59_v40 = vadd.f32 %v58_v33, %v34_v30  ;;  %v50_v30 = vld [vmem:[%s377_s0 + $0xf0] sm:$0xff]  ;;  %v51_v33 = vld [vmem:[%s377_s0 + $0xf8] sm:$0xff]  ;;  %v99_v58 = vunpack.c.l.s4 %v241_v57  ;;  %v148_v59 = vmul.f32 %v48_v22, %v48_v22 }
   0xf   :  { %v80_v45 = vadd.f32 %v79_v37, %v35_v32  ;;  %v157_v20 = vadd.f32 %v156_v12, %v132_v62  ;;  %v178_v21 = vadd.f32 %v177_v13, %v133_v2  ;;  %v140_v32 = vmul.f32 %v40_v52, %v40_v52 }
  0x10   :  { %v60_v48 = vadd.f32 %v59_v40, %v36_v36  ;;  %v150_v2 = vmul.f32 %v50_v30, %v50_v30  ;;  %v151_v5 = vmul.f32 %v51_v33, %v51_v33 }
  0x11   :  { %v81_v53 = vadd.f32 %v80_v45, %v37_v39  ;;  %v158_v28 = vadd.f32 %v157_v20, %v134_v8  ;;  %v179_v29 = vadd.f32 %v178_v21, %v135_v11  ;;  %v142_v39 = vmul.f32 %v42_v60, %v42_v60 }
  0x12   :  { %v61_v56 = vadd.f32 %v60_v48, %v38_v44  ;;  %v144_v45 = vmul.f32 %v44_v6, %v44_v6  ;;  %v102_v8 = vshrl.u32 %v14_v0, 7 }
  0x13   :  { %v82_v61 = vadd.f32 %v81_v53, %v39_v47  ;;  %v159_v36 = vadd.f32 %v158_v28, %v136_v16  ;;  %v180_v37 = vadd.f32 %v179_v29, %v137_v19  ;;  %v145_v47 = vmul.f32 %v45_v9, %v45_v9 }
  0x14   :  { %v62_v1 = vadd.f32 %v61_v56, %v40_v52  ;;  %v147_v53 = vmul.f32 %v47_v17, %v47_v17 }
  0x15   :  { %v83_v7 = vadd.f32 %v82_v61, %v41_v55  ;;  %v160_v42 = vadd.f32 %v159_v36, %v138_v24  ;;  %v181_v43 = vadd.f32 %v180_v37, %v139_v27  ;;  %v149_v61 = vmul.f32 %v49_v25, %v49_v25 }
  0x16   :  { %v63_v10 = vadd.f32 %v62_v1, %v42_v60 }
  0x17   :  { %v84_v15 = vadd.f32 %v83_v7, %v43_v63  ;;  %v161_v48 = vadd.f32 %v160_v42, %v140_v32  ;;  %v182_v49 = vadd.f32 %v181_v43, %v141_v35 }
  0x18   :  { %v64_v18 = vadd.f32 %v63_v10, %v44_v6  ;;  %v100_v10 = vunpack.c.0.s8 %v99_v58 }
  0x19   :  { %v85_v23 = vadd.f32 %v84_v15, %v45_v9  ;;  %v162_v54 = vadd.f32 %v161_v48, %v142_v39  ;;  %v183_v55 = vadd.f32 %v182_v49, %v143_v41 }
  0x1a   :  { %v65_v26 = vadd.f32 %v64_v18, %v46_v14  ;;  %v103_v19 = vsub.s32 %v100_v10, %v102_v8 }
  0x1b   :  { %v86_v31 = vadd.f32 %v85_v23, %v47_v17  ;;  %v163_v62 = vadd.f32 %v162_v54, %v144_v45  ;;  %v184_v63 = vadd.f32 %v183_v55, %v145_v47 }
  0x1c   :  { %v66_v34 = vadd.f32 %v65_v26, %v48_v22  ;;  %v52_v26 = vld [vmem:[#allocation2] sm:$0x3] }
  0x1d   :  { %v87_v38 = vadd.f32 %v86_v31, %v49_v25  ;;  %v164_v6 = vadd.f32 %v163_v62, %v146_v51  ;;  %v185_v7 = vadd.f32 %v184_v63, %v147_v53 }
  0x1e   :  { %v67_v40 = vadd.f32 %v66_v34, %v50_v30 }
  0x1f   :  { %v88_v44 = vadd.f32 %v87_v38, %v51_v33  ;;  %v165_v12 = vadd.f32 %v164_v6, %v148_v59  ;;  %v186_v13 = vadd.f32 %v185_v7, %v149_v61  ;;  %v119_v38 = vld [vmem:[#allocation3] sm:$0x3] }
  0x20   :  { %v68_v46 = vrot.slane %v67_v40, 4 }
  0x21   :  { %v89_v50 = vrot.slane %v88_v44, 4  ;;  %v166_v16 = vadd.f32 %v165_v12, %v150_v2  ;;  %v187_v17 = vadd.f32 %v186_v13, %v151_v5 }
  0x22   :  { %v69_v52 = vadd.f32 %v68_v46, %v67_v40 }
  0x23   :  { %v90_v56 = vadd.f32 %v89_v50, %v88_v44  ;;  %v167_v20 = vrot.slane %v166_v16, 4  ;;  %v188_v21 = vrot.slane %v187_v17, 4 }
  0x24   :  { %v70_v60 = vrot.slane %v69_v52, 2 }
  0x25   :  { %v91_v1 = vrot.slane %v90_v56, 2  ;;  %v168_v23 = vadd.f32 %v167_v20, %v166_v16  ;;  %v189_v24 = vadd.f32 %v188_v21, %v187_v17 }
  0x26   :  { %v71_v3 = vadd.f32 %v70_v60, %v69_v52 }
  0x27   :  { %v92_v9 = vadd.f32 %v91_v1, %v90_v56  ;;  %v169_v27 = vrot.slane %v168_v23, 2  ;;  %v190_v0 = vrot.slane %v189_v24, 2 }
  0x28   :  { %v72_v11 = vrot.slane %v71_v3, 1 }
  0x29   :  { %v93_v14 = vrot.slane %v92_v9, 1  ;;  %v170_v29 = vadd.f32 %v169_v27, %v168_v23  ;;  %v191_v30 = vadd.f32 %v190_v0, %v189_v24 }
  0x2a   :  { %v73_v15 = vadd.f32 %v72_v11, %v71_v3 }
  0x2b   :  { %v94_v18 = vadd.f32 %v93_v14, %v92_v9  ;;  %v171_v32 = vrot.slane %v170_v29, 1  ;;  %v192_v33 = vrot.slane %v191_v30, 1 }
  0x2d   :  { %v97_v22 = vcombine.low %v73_v15, %v94_v18  ;;  %v172_v34 = vadd.f32 %v171_v32, %v170_v29  ;;  %v193_v35 = vadd.f32 %v192_v33, %v191_v30 }
  0x2f   :  { %v104_v25 = vrot.slane %v97_v22, %v103_v19  ;;  %v196_v36 = vcombine.low %v172_v34, %v193_v35 }
  0x31   :  { %v111_v28 = vrot.slane %v104_v25, %v103_v19  ;;  %v203_v37 = vrot.slane %v196_v36, %v103_v19 }
  0x33   :  { %v113_v31 = vadd.f32 %v111_v28, %v52_v26  ;;  %v210_v39 = vrot.slane %v203_v37, %v103_v19 }
  0x35   :  { %118 = vst.msk [vmem:[#allocation2] sm:$0x3] %vm267_vm0, %v113_v31  ;;  %v212_v42 = vadd.f32 %v210_v39, %v119_v38 }
  0x37   :  { %213 = vst.msk [vmem:[#allocation3] sm:$0x3] %vm267_vm0, %v212_v42 }
  0x3c   :  { %v217_v40 = vld [vmem:[#allocation2] sm:$0x3] }
  0x3d   :  { %v218_v41 = vmul.f32 0.0078125, %v217_v40 }
  0x3e   :  { %v219_v44 = vld [vmem:[#allocation3] sm:$0x3] }
  0x3f   :  { %224 = vst.msk [vmem:[%s378_s1] sm:$0x3] %vm267_vm0, %v218_v41  ;;  %v221_v43 = vmul.f32 %v218_v41, %v218_v41  ;;  %v220_v45 = vmul.f32 0.0078125, %v219_v44 }
  0x41   :  { %v222_v46 = vsub.f32 %v220_v45, %v221_v43 }
  0x43   :  { %v223_v47 = vmax.f32 %v222_v46, 0.0 }
  0x45   :  { %v225_v48 = vadd.f32 1e-05, %v223_v47 }
  0x47   :  { %238 = vrsqrt.f32 %v225_v48 }
  0x54   :  { %v239_v49 = vpop.eup %238 }
  0x55   :  { %227 = vst.msk [vmem:[%s379_s2] sm:$0x3] %vm267_vm0, %v239_v49 }

// kernel: generator_forward.20
= control target key start
LH: loop header
LB: loop body
LE: loop exit
PB: predicated region body
PF: predicated region fallthrough
CT: control target
= control target key end

     0   :  { %s1648_s9 = smov 0   ;;  %s1650_s10 = smov 0   ;;  %s2166_s0 = inlined_call_operand.vmem [shape: bf16[128,256], index: 0, kind: input, shape index: {}]   ;;  %s2167_s1 = inlined_call_operand.vmem [shape: bf16[256,2048], index: 1, kind: input, shape index: {}]   ;;  %s2168_s2 = inlined_call_operand.vmem [shape: f32[128,2048], index: 2, kind: output, shape index: {}]  }
   0x1   :  { %s1652_s11 = smov 0   ;;  %s1654_s12 = smov 0  }
   0x2   :  { %s1656_s13 = smov 0  }
   0x3 LB: > { %s21_s14 = sadd.s32 1, %s1627_s12  ;;  %s1335_s15 = sadd.s32 4294967295, %s1631_s13   ;;  %s1631_s13 = sphi %s1656_s13, %s12_s13   ;;  %s1627_s12 = sphi %s1654_s12, %s2173_s12   ;;  %s1623_s11 = sphi %s1652_s11, %s2172_s11   ;;  %s1619_s10 = sphi %s1650_s10, %s2171_s10   ;;  %s1615_s9 = sphi %s1648_s9, %s2170_s9  }
   0x4   : > { %p22_p0 = scmp.ge.s32.totalorder %s21_s14, 4  ;;  %p64_p1 = scmp.ne.s32.totalorder %s1619_s10, %s1615_s9 }
   0x5   : > { %p65_p2 = scmp.eq.s32.totalorder %s1631_s13, 0  ;;  %p96_p4 = scmp.eq.s32.totalorder %s1335_s15, 3 }
   0x6   : > { %s2175_s14 = smov (%p22_p0, %s21_s14), 0  ;;  %s57_s17 = sadd.s32 1, %s1619_s10 }
   0x7   : > { %p66_p3 = por %p65_p2, %p64_p1  ;;  %s54_s16 = ssub.s32 %s1627_s12, %s2175_s14 }
   0x8   : > { %p55_p5 = scmp.eq.s32.totalorder %s54_s16, 0  ;;  %p1683_p6 = por %p96_p4, %p64_p1 }
   0x9   : > { %p1339_p7 = scmp.ge.s32.totalorder %s1631_s13, 4 }
   0xa   : > { %s1688_s19 = scalar_select %p55_p5, %s1619_s10, %s57_s17  }
   0xb   : > { %128 = sbr.rel (%p1339_p7) target bundleno = 52 (0x34), region = 20 }
  0x10   : > { %131 = sbr.rel (!%p66_p3) target bundleno = 52 (0x34), region = 24  ;;  %s133_s20 = sand.u32 (%p66_p3), 1, %s1619_s10  }
  0x11   : > { %s1431_s21 = sshll.u32 (%p66_p3), %s1627_s12, 4  ;;  %s1340_s22 = sshll.u32 (%p66_p3), %s133_s20, 9 }
  0x12   : > { %s1696_s25 = scalar_lea.vmem (%p66_p3), %s2167_s1, %s1431_s21  ;;  %s1701_s26 = scalar_lea.vmem (%p66_p3), [#allocation2], %s1340_s22 }
  0x13   : > { %v151_v0 = vld [vmem:[%s1696_s25] sm:$0xff] (%p66_p3)  ;;  %v153_v1 = vld [vmem:[%s1696_s25 + $0x8] sm:$0xff] (%p66_p3) }
  0x14   : > { %v155_v2 = vld [vmem:[%s1696_s25 + $0x40] sm:$0xff] (%p66_p3)  ;;  %152 = vst [vmem:[%s1701_s26] sm:$0xff] (%p66_p3), %v151_v0  ;;  %154 = vst [vmem:[%s1701_s26 + $0x8] sm:$0xff] (%p66_p3), %v153_v1  ;;  %v157_v3 = vld [vmem:[%s1696_s25 + $0x48] sm:$0xff] (%p66_p3) }
  0x15   : > { %156 = vst [vmem:[%s1701_s26 + $0x10] sm:$0xff] %v155_v2  ;;  %v159_v4 = vld [vmem:[%s1696_s25 + $0x80] sm:$0xff]  ;;  %v161_v5 = vld [vmem:[%s1696_s25 + $0x88] sm:$0xff]  ;;  %158 = vst [vmem:[%s1701_s26 + $0x18] sm:$0xff] %v157_v3 }
  0x16   : > { %160 = vst [vmem:[%s1701_s26 + $0x20] sm:$0xff] %v159_v4  ;;  %162 = vst [vmem:[%s1701_s26 + $0x28] sm:$0xff] %v161_v5  ;;  %v163_v6 = vld [vmem:[%s1696_s25 + $0xc0] sm:$0xff]  ;;  %v165_v7 = vld [vmem:[%s1696_s25 + $0xc8] sm:$0xff] }
  0x17   : > { %v167_v8 = vld [vmem:[%s1696_s25 + $0x100] sm:$0xff]  ;;  %164 = vst [vmem:[%s1701_s26 + $0x30] sm:$0xff] %v163_v6  ;;  %166 = vst [vmem:[%s1701_s26 + $0x38] sm:$0xff] %v165_v7  ;;  %v169_v9 = vld [vmem:[%s1696_s25 + $0x108] sm:$0xff] }
  0x18   : > { %168 = vst [vmem:[%s1701_s26 + $0x40] sm:$0xff] %v167_v8  ;;  %v171_v10 = vld [vmem:[%s1696_s25 + $0x140] sm:$0xff]  ;;  %v173_v11 = vld [vmem:[%s1696_s25 + $0x148] sm:$0xff]  ;;  %170 = vst [vmem:[%s1701_s26 + $0x48] sm:$0xff] %v169_v9 }
  0x19   : > { %172 = vst [vmem:[%s1701_s26 + $0x50] sm:$0xff] %v171_v10  ;;  %174 = vst [vmem:[%s1701_s26 + $0x58] sm:$0xff] %v173_v11  ;;  %v175_v12 = vld [vmem:[%s1696_s25 + $0x180] sm:$0xff]  ;;  %v177_v13 = vld [vmem:[%s1696_s25 + $0x188] sm:$0xff] }
  0x1a   : > { %v179_v14 = vld [vmem:[%s1696_s25 + $0x1c0] sm:$0xff]  ;;  %176 = vst [vmem:[%s1701_s26 + $0x60] sm:$0xff] %v175_v12  ;;  %178 = vst [vmem:[%s1701_s26 + $0x68] sm:$0xff] %v177_v13  ;;  %v181_v15 = vld [vmem:[%s1696_s25 + $0x1c8] sm:$0xff] }
  0x1b   : > { %180 = vst [vmem:[%s1701_s26 + $0x70] sm:$0xff] %v179_v14  ;;  %v183_v16 = vld [vmem:[%s1696_s25 + $0x200] sm:$0xff]  ;;  %v185_v17 = vld [vmem:[%s1696_s25 + $0x208] sm:$0xff]  ;;  %182 = vst [vmem:[%s1701_s26 + $0x78] sm:$0xff] %v181_v15 }
  0x1c   : > { %184 = vst [vmem:[%s1701_s26 + $0x80] sm:$0xff] %v183_v16  ;;  %186 = vst [vmem:[%s1701_s26 + $0x88] sm:$0xff] %v185_v17  ;;  %v187_v18 = vld [vmem:[%s1696_s25 + $0x240] sm:$0xff]  ;;  %v189_v19 = vld [vmem:[%s1696_s25 + $0x248] sm:$0xff] }
  0x1d   : > { %v191_v20 = vld [vmem:[%s1696_s25 + $0x280] sm:$0xff]  ;;  %188 = vst [vmem:[%s1701_s26 + $0x90] sm:$0xff] %v187_v18  ;;  %190 = vst [vmem:[%s1701_s26 + $0x98] sm:$0xff] %v189_v19  ;;  %v193_v21 = vld [vmem:[%s1696_s25 + $0x288] sm:$0xff] }
  0x1e   : > { %192 = vst [vmem:[%s1701_s26 + $0xa0] sm:$0xff] %v191_v20  ;;  %v195_v22 = vld [vmem:[%s1696_s25 + $0x2c0] sm:$0xff]  ;;  %v197_v23 = vld [vmem:[%s1696_s25 + $0x2c8] sm:$0xff]  ;;  %194 = vst [vmem:[%s1701_s26 + $0xa8] sm:$0xff] %v193_v21 }
  0x1f   : > { %196 = vst [vmem:[%s1701_s26 + $0xb0] sm:$0xff] %v195_v22  ;;  %198 = vst [vmem:[%s1701_s26 + $0xb8] sm:$0xff] %v197_v23  ;;  %v199_v24 = vld [vmem:[%s1696_s25 + $0x300] sm:$0xff]  ;;  %v201_v25 = vld [vmem:[%s1696_s25 + $0x308] sm:$0xff] }
  0x20   : > { %v203_v26 = vld [vmem:[%s1696_s25 + $0x340] sm:$0xff]  ;;  %200 = vst [vmem:[%s1701_s26 + $0xc0] sm:$0xff] %v199_v24  ;;  %202 = vst [vmem:[%s1701_s26 + $0xc8] sm:$0xff] %v201_v25  ;;  %v205_v27 = vld [vmem:[%s1696_s25 + $0x348] sm:$0xff] }
  0x21   : > { %204 = vst [vmem:[%s1701_s26 + $0xd0] sm:$0xff] %v203_v26  ;;  %v207_v28 = vld [vmem:[%s1696_s25 + $0x380] sm:$0xff]  ;;  %v209_v29 = vld [vmem:[%s1696_s25 + $0x388] sm:$0xff]  ;;  %206 = vst [vmem:[%s1701_s26 + $0xd8] sm:$0xff] %v205_v27 }
  0x22   : > { %208 = vst [vmem:[%s1701_s26 + $0xe0] sm:$0xff] %v207_v28  ;;  %210 = vst [vmem:[%s1701_s26 + $0xe8] sm:$0xff] %v209_v29  ;;  %v211_v30 = vld [vmem:[%s1696_s25 + $0x3c0] sm:$0xff]  ;;  %v213_v31 = vld [vmem:[%s1696_s25 + $0x3c8] sm:$0xff] }
  0x23   : > { %v215_v32 = vld [vmem:[%s1696_s25 + $0x400] sm:$0xff]  ;;  %212 = vst [vmem:[%s1701_s26 + $0xf0] sm:$0xff] %v211_v30  ;;  %214 = vst [vmem:[%s1701_s26 + $0xf8] sm:$0xff] %v213_v31  ;;  %v217_v33 = vld [vmem:[%s1696_s25 + $0x408] sm:$0xff] }
  0x24   : > { %216 = vst [vmem:[%s1701_s26 + $0x100] sm:$0xff] %v215_v32  ;;  %v219_v34 = vld [vmem:[%s1696_s25 + $0x440] sm:$0xff]  ;;  %v221_v35 = vld [vmem:[%s1696_s25 + $0x448] sm:$0xff]  ;;  %218 = vst [vmem:[%s1701_s26 + $0x108] sm:$0xff] %v217_v33 }
  0x25   : > { %220 = vst [vmem:[%s1701_s26 + $0x110] sm:$0xff] %v219_v34  ;;  %222 = vst [vmem:[%s1701_s26 + $0x118] sm:$0xff] %v221_v35  ;;  %v223_v36 = vld [vmem:[%s1696_s25 + $0x480] sm:$0xff]  ;;  %v225_v37 = vld [vmem:[%s1696_s25 + $0x488] sm:$0xff] }
  0x26   : > { %v227_v38 = vld [vmem:[%s1696_s25 + $0x4c0] sm:$0xff]  ;;  %224 = vst [vmem:[%s1701_s26 + $0x120] sm:$0xff] %v223_v36  ;;  %226 = vst [vmem:[%s1701_s26 + $0x128] sm:$0xff] %v225_v37  ;;  %v229_v39 = vld [vmem:[%s1696_s25 + $0x4c8] sm:$0xff] }
  0x27   : > { %228 = vst [vmem:[%s1701_s26 + $0x130] sm:$0xff] %v227_v38  ;;  %v231_v40 = vld [vmem:[%s1696_s25 + $0x500] sm:$0xff]  ;;  %v233_v41 = vld [vmem:[%s1696_s25 + $0x508] sm:$0xff]  ;;  %230 = vst [vmem:[%s1701_s26 + $0x138] sm:$0xff] %v229_v39 }
  0x28   : > { %232 = vst [vmem:[%s1701_s26 + $0x140] sm:$0xff] %v231_v40  ;;  %234 = vst [vmem:[%s1701_s26 + $0x148] sm:$0xff] %v233_v41  ;;  %v235_v42 = vld [vmem:[%s1696_s25 + $0x540] sm:$0xff]  ;;  %v237_v43 = vld [vmem:[%s1696_s25 + $0x548] sm:$0xff] }
  0x29   : > { %v239_v44 = vld [vmem:[%s1696_s25 + $0x580] sm:$0xff]  ;;  %236 = vst [vmem:[%s1701_s26 + $0x150] sm:$0xff] %v235_v42  ;;  %238 = vst [vmem:[%s1701_s26 + $0x158] sm:$0xff] %v237_v43  ;;  %v241_v45 = vld [vmem:[%s1696_s25 + $0x588] sm:$0xff] }
  0x2a   : > { %240 = vst [vmem:[%s1701_s26 + $0x160] sm:$0xff] %v239_v44  ;;  %v243_v46 = vld [vmem:[%s1696_s25 + $0x5c0] sm:$0xff]  ;;  %v245_v47 = vld [vmem:[%s1696_s25 + $0x5c8] sm:$0xff]  ;;  %242 = vst [vmem:[%s1701_s26 + $0x168] sm:$0xff] %v241_v45 }
  0x2b   : > { %244 = vst [vmem:[%s1701_s26 + $0x170] sm:$0xff] %v243_v46  ;;  %246 = vst [vmem:[%s1701_s26 + $0x178] sm:$0xff] %v245_v47  ;;  %v247_v48 = vld [vmem:[%s1696_s25 + $0x600] sm:$0xff]  ;;  %v249_v49 = vld [vmem:[%s1696_s25 + $0x608] sm:$0xff] }
  0x2c   : > { %v251_v50 = vld [vmem:[%s1696_s25 + $0x640] sm:$0xff]  ;;  %248 = vst [vmem:[%s1701_s26 + $0x180] sm:$0xff] %v247_v48  ;;  %250 = vst [vmem:[%s1701_s26 + $0x188] sm:$0xff] %v249_v49  ;;  %v253_v51 = vld [vmem:[%s1696_s25 + $0x648] sm:$0xff] }
  0x2d   : > { %252 = vst [vmem:[%s1701_s26 + $0x190] sm:$0xff] %v251_v50  ;;  %v255_v52 = vld [vmem:[%s1696_s25 + $0x680] sm:$0xff]  ;;  %v257_v53 = vld [vmem:[%s1696_s25 + $0x688] sm:$0xff]  ;;  %254 = vst [vmem:[%s1701_s26 + $0x198] sm:$0xff] %v253_v51 }
  0x2e   : > { %256 = vst [vmem:[%s1701_s26 + $0x1a0] sm:$0xff] %v255_v52  ;;  %258 = vst [vmem:[%s1701_s26 + $0x1a8] sm:$0xff] %v257_v53  ;;  %v259_v54 = vld [vmem:[%s1696_s25 + $0x6c0] sm:$0xff]  ;;  %v261_v55 = vld [vmem:[%s1696_s25 + $0x6c8] sm:$0xff] }
  0x2f   : > { %v263_v56 = vld [vmem:[%s1696_s25 + $0x700] sm:$0xff]  ;;  %260 = vst [vmem:[%s1701_s26 + $0x1b0] sm:$0xff] %v259_v54  ;;  %262 = vst [vmem:[%s1701_s26 + $0x1b8] sm:$0xff] %v261_v55  ;;  %v265_v57 = vld [vmem:[%s1696_s25 + $0x708] sm:$0xff] }
  0x30   : > { %264 = vst [vmem:[%s1701_s26 + $0x1c0] sm:$0xff] %v263_v56  ;;  %v267_v58 = vld [vmem:[%s1696_s25 + $0x740] sm:$0xff]  ;;  %v269_v59 = vld [vmem:[%s1696_s25 + $0x748] sm:$0xff]  ;;  %266 = vst [vmem:[%s1701_s26 + $0x1c8] sm:$0xff] %v265_v57 }
  0x31   : > { %268 = vst [vmem:[%s1701_s26 + $0x1d0] sm:$0xff] %v267_v58  ;;  %270 = vst [vmem:[%s1701_s26 + $0x1d8] sm:$0xff] %v269_v59  ;;  %v271_v60 = vld [vmem:[%s1696_s25 + $0x780] sm:$0xff]  ;;  %v273_v61 = vld [vmem:[%s1696_s25 + $0x788] sm:$0xff] }
  0x32   : > { %v275_v62 = vld [vmem:[%s1696_s25 + $0x7c0] sm:$0xff]  ;;  %272 = vst [vmem:[%s1701_s26 + $0x1e0] sm:$0xff] %v271_v60  ;;  %274 = vst [vmem:[%s1701_s26 + $0x1e8] sm:$0xff] %v273_v61  ;;  %v277_v63 = vld [vmem:[%s1696_s25 + $0x7c8] sm:$0xff] }
  0x33   : > { %276 = vst [vmem:[%s1701_s26 + $0x1f0] sm:$0xff] %v275_v62  ;;  %278 = vst [vmem:[%s1701_s26 + $0x1f8] sm:$0xff] %v277_v63 }
  0x34 PF: > { %p1343_p8 = scmp.ge.s32.totalorder %s1631_s13, 1  ;;  %p283_p9 = scmp.lt.s32.totalorder %s1631_s13, 5 }
  0x36   : > { %p284_p10 = pnand %p1343_p8, %p283_p9 }
  0x37   : > { %s290_s27 = sand.u32 (!%p284_p10), 1, %s1615_s9  }
  0x38   : > { %287 = sbr.rel (%p284_p10) target bundleno = 391 (0x187), region = 47  ;;  %s1831_s28 = sshll.u32 (!%p284_p10), %s290_s27, 9 }
  0x39   : > { %s1837_s3 = scalar_lea.vmem (!%p284_p10), [#allocation2], %s1831_s28  ;;  %s1949_s21 = scalar_lea.vmem (!%p284_p10), [#allocation3], %s1831_s28 }
  0x3d   : > { %v1571_v0 = vld [vmem:[%s2166_s0 + $0x4] ss:$8 sps:$4 sm:$0xff]   ;;  %v1477_v3 = vld [vmem:[%s1837_s3 + $0xe0] ss:$16 sps:$4 sm:$0xff]   ;;  %v1478_v4 = vld [vmem:[%s1837_s3 + $0xe8] ss:$16 sps:$4 sm:$0xff]  }
  0x3e   : > { %v1473_v1 = vld [vmem:[%s1837_s3 + $0xe4] ss:$16 sps:$4 sm:$0xff]   ;;  %838 = vmatprep.mubr.bf16.mxu0 %v1571_v0  ;;  %951 = vmatprep.mubr.bf16.mxu1 %v1571_v0  ;;  %v1475_v2 = vld [vmem:[%s1837_s3 + $0xec] ss:$16 sps:$4 sm:$0xff]   ;;  %v1483_v7 = vld [vmem:[%s1837_s3 + $0xc0] ss:$16 sps:$4 sm:$0xff]  }
  0x3f   : > { %806 = vmatprep.subr.bf16.mxu0 %v1473_v1  ;;  %919 = vmatprep.subr.bf16.mxu1 %v1475_v2  ;;  %v1479_v5 = vld [vmem:[%s1837_s3 + $0xc4] ss:$16 sps:$4 sm:$0xff]   ;;  %v1481_v6 = vld [vmem:[%s1837_s3 + $0xcc] ss:$16 sps:$4 sm:$0xff]   ;;  %v1484_v8 = vld [vmem:[%s1837_s3 + $0xc8] ss:$16 sps:$4 sm:$0xff]  }
  0x40   : > { %807 = vmatpush1.bf16.msra.mxu0 %v1477_v3  ;;  %920 = vmatpush1.bf16.msra.mxu1 %v1478_v4  ;;  %v1485_v9 = vld [vmem:[%s1837_s3 + $0xa4] ss:$16 sps:$4 sm:$0xff]   ;;  %v1487_v10 = vld [vmem:[%s1837_s3 + $0xac] ss:$16 sps:$4 sm:$0xff]   ;;  %v1489_v11 = vld [vmem:[%s1837_s3 + $0xa0] ss:$16 sps:$4 sm:$0xff]  }
  0x41   : > { %808 = vmatprep.subr.bf16.mxu0 %v1479_v5  ;;  %921 = vmatprep.subr.bf16.mxu1 %v1481_v6  ;;  %v1490_v12 = vld [vmem:[%s1837_s3 + $0xa8] ss:$16 sps:$4 sm:$0xff]   ;;  %v1491_v13 = vld [vmem:[%s1837_s3 + $0x84] ss:$16 sps:$4 sm:$0xff]   ;;  %v1493_v14 = vld [vmem:[%s1837_s3 + $0x8c] ss:$16 sps:$4 sm:$0xff]  }
  0x42   : > { %v1495_v15 = vld [vmem:[%s1837_s3 + $0x80] ss:$16 sps:$4 sm:$0xff]   ;;  %v1496_v16 = vld [vmem:[%s1837_s3 + $0x88] ss:$16 sps:$4 sm:$0xff]   ;;  %v1497_v17 = vld [vmem:[%s1837_s3 + $0x64] ss:$16 sps:$4 sm:$0xff]  }
  0x43   : > { %v1499_v18 = vld [vmem:[%s1837_s3 + $0x6c] ss:$16 sps:$4 sm:$0xff]   ;;  %v1501_v19 = vld [vmem:[%s1837_s3 + $0x60] ss:$16 sps:$4 sm:$0xff]   ;;  %v1502_v20 = vld [vmem:[%s1837_s3 + $0x68] ss:$16 sps:$4 sm:$0xff]  }
  0x44   : > { %809 = vmatpush1.bf16.msra.mxu0 %v1483_v7  ;;  %922 = vmatpush1.bf16.msra.mxu1 %v1484_v8  ;;  %v1503_v21 = vld [vmem:[%s1837_s3 + $0x44] ss:$16 sps:$4 sm:$0xff]   ;;  %v1505_v22 = vld [vmem:[%s1837_s3 + $0x4c] ss:$16 sps:$4 sm:$0xff]   ;;  %v1507_v23 = vld [vmem:[%s1837_s3 + $0x40] ss:$16 sps:$4 sm:$0xff]  }
  0x45   : > { %810 = vmatprep.subr.bf16.mxu0 %v1485_v9  ;;  %923 = vmatprep.subr.bf16.mxu1 %v1487_v10  ;;  %v1508_v24 = vld [vmem:[%s1837_s3 + $0x48] ss:$16 sps:$4 sm:$0xff]   ;;  %v1509_v25 = vld [vmem:[%s1837_s3 + $0x24] ss:$16 sps:$4 sm:$0xff]   ;;  %v1511_v26 = vld [vmem:[%s1837_s3 + $0x2c] ss:$16 sps:$4 sm:$0xff]  }
  0x46   : > { %v1513_v27 = vld [vmem:[%s1837_s3 + $0x20] ss:$16 sps:$4 sm:$0xff]   ;;  %v1514_v28 = vld [vmem:[%s1837_s3 + $0x28] ss:$16 sps:$4 sm:$0xff]   ;;  %v1515_v29 = vld [vmem:[%s1837_s3 + $0x4] ss:$16 sps:$4 sm:$0xff]  }
  0x47   : > { %v1517_v30 = vld [vmem:[%s1837_s3 + $0xc] ss:$16 sps:$4 sm:$0xff]   ;;  %v1519_v31 = vld [vmem:[%s1837_s3] ss:$16 sps:$4 sm:$0xff]   ;;  %v1520_v32 = vld [vmem:[%s1837_s3 + $0x8] ss:$16 sps:$4 sm:$0xff]  }
  0x48   : > { %811 = vmatpush1.bf16.msra.mxu0 %v1489_v11  ;;  %924 = vmatpush1.bf16.msra.mxu1 %v1490_v12  ;;  %v1521_v33 = vld [vmem:[%s1837_s3 + $0x1e4] ss:$16 sps:$4 sm:$0xff]   ;;  %v1523_v34 = vld [vmem:[%s1837_s3 + $0x1ec] ss:$16 sps:$4 sm:$0xff]   ;;  %v1525_v35 = vld [vmem:[%s1837_s3 + $0x1e0] ss:$16 sps:$4 sm:$0xff]  }
  0x49   : > { %812 = vmatprep.subr.bf16.mxu0 %v1491_v13  ;;  %925 = vmatprep.subr.bf16.mxu1 %v1493_v14  ;;  %v1526_v36 = vld [vmem:[%s1837_s3 + $0x1e8] ss:$16 sps:$4 sm:$0xff]   ;;  %v1527_v37 = vld [vmem:[%s1837_s3 + $0x1c4] ss:$16 sps:$4 sm:$0xff]   ;;  %v1529_v38 = vld [vmem:[%s1837_s3 + $0x1cc] ss:$16 sps:$4 sm:$0xff]  }
  0x4a   : > { %v1531_v39 = vld [vmem:[%s1837_s3 + $0x1c0] ss:$16 sps:$4 sm:$0xff]   ;;  %v1532_v40 = vld [vmem:[%s1837_s3 + $0x1c8] ss:$16 sps:$4 sm:$0xff]   ;;  %v1533_v41 = vld [vmem:[%s1837_s3 + $0x1a4] ss:$16 sps:$4 sm:$0xff]  }
  0x4b   : > { %v1535_v42 = vld [vmem:[%s1837_s3 + $0x1ac] ss:$16 sps:$4 sm:$0xff]   ;;  %v1537_v43 = vld [vmem:[%s1837_s3 + $0x1a0] ss:$16 sps:$4 sm:$0xff]   ;;  %v1538_v44 = vld [vmem:[%s1837_s3 + $0x1a8] ss:$16 sps:$4 sm:$0xff]  }
  0x4c   : > { %813 = vmatpush1.bf16.msra.mxu0 %v1495_v15  ;;  %926 = vmatpush1.bf16.msra.mxu1 %v1496_v16  ;;  %v1539_v45 = vld [vmem:[%s1837_s3 + $0x184] ss:$16 sps:$4 sm:$0xff]   ;;  %v1541_v46 = vld [vmem:[%s1837_s3 + $0x18c] ss:$16 sps:$4 sm:$0xff]   ;;  %v1543_v47 = vld [vmem:[%s1837_s3 + $0x180] ss:$16 sps:$4 sm:$0xff]  }
  0x4d   : > { %814 = vmatprep.subr.bf16.mxu0 %v1497_v17  ;;  %927 = vmatprep.subr.bf16.mxu1 %v1499_v18  ;;  %v1544_v48 = vld [vmem:[%s1837_s3 + $0x188] ss:$16 sps:$4 sm:$0xff]   ;;  %v1545_v49 = vld [vmem:[%s1837_s3 + $0x164] ss:$16 sps:$4 sm:$0xff]   ;;  %v1547_v50 = vld [vmem:[%s1837_s3 + $0x16c] ss:$16 sps:$4 sm:$0xff]  }
  0x4e   : > { %v1549_v51 = vld [vmem:[%s1837_s3 + $0x160] ss:$16 sps:$4 sm:$0xff]   ;;  %v1550_v52 = vld [vmem:[%s1837_s3 + $0x168] ss:$16 sps:$4 sm:$0xff]   ;;  %v1551_v53 = vld [vmem:[%s1837_s3 + $0x144] ss:$16 sps:$4 sm:$0xff]  }
  0x4f   : > { %v1553_v54 = vld [vmem:[%s1837_s3 + $0x14c] ss:$16 sps:$4 sm:$0xff]   ;;  %v1555_v55 = vld [vmem:[%s1837_s3 + $0x140] ss:$16 sps:$4 sm:$0xff]   ;;  %v1556_v56 = vld [vmem:[%s1837_s3 + $0x148] ss:$16 sps:$4 sm:$0xff]  }
  0x50   : > { %815 = vmatpush1.bf16.msra.mxu0 %v1501_v19  ;;  %928 = vmatpush1.bf16.msra.mxu1 %v1502_v20  ;;  %v1557_v57 = vld [vmem:[%s1837_s3 + $0x124] ss:$16 sps:$4 sm:$0xff]   ;;  %v1559_v58 = vld [vmem:[%s1837_s3 + $0x12c] ss:$16 sps:$4 sm:$0xff]   ;;  %v1561_v59 = vld [vmem:[%s1837_s3 + $0x120] ss:$16 sps:$4 sm:$0xff]  }
  0x51   : > { %816 = vmatprep.subr.bf16.mxu0 %v1503_v21  ;;  %929 = vmatprep.subr.bf16.mxu1 %v1505_v22  ;;  %v1562_v60 = vld [vmem:[%s1837_s3 + $0x128] ss:$16 sps:$4 sm:$0xff]   ;;  %v1563_v61 = vld [vmem:[%s1837_s3 + $0x104] ss:$16 sps:$4 sm:$0xff]   ;;  %v1565_v62 = vld [vmem:[%s1837_s3 + $0x10c] ss:$16 sps:$4 sm:$0xff]  }
  0x52   : > { %v1567_v63 = vld [vmem:[%s1837_s3 + $0x100] ss:$16 sps:$4 sm:$0xff]   ;;  %v1568_v0 = vld [vmem:[%s1837_s3 + $0x108] ss:$16 sps:$4 sm:$0xff]   ;;  %v1572_v2 = vld [vmem:[%s2166_s0 + $0x14] ss:$8 sps:$4 sm:$0xff]  }
  0x53   : > { %v1569_v1 = vld [vmem:[%s2166_s0] ss:$8 sps:$4 sm:$0xff]   ;;  %v1574_v3 = vld [vmem:[%s2166_s0 + $0x10] ss:$8 sps:$4 sm:$0xff]   ;;  %v1575_v4 = vld [vmem:[%s2166_s0 + $0x24] ss:$8 sps:$4 sm:$0xff]  }
  0x54   : > { %817 = vmatpush1.bf16.msra.mxu0 %v1507_v23  ;;  %930 = vmatpush1.bf16.msra.mxu1 %v1508_v24  ;;  %v1577_v5 = vld [vmem:[%s2166_s0 + $0x20] ss:$8 sps:$4 sm:$0xff]   ;;  %v1578_v6 = vld [vmem:[%s2166_s0 + $0x34] ss:$8 sps:$4 sm:$0xff]   ;;  %v1580_v7 = vld [vmem:[%s2166_s0 + $0x30] ss:$8 sps:$4 sm:$0xff]  }
  0x55   : > { %818 = vmatprep.subr.bf16.mxu0 %v1509_v25  ;;  %931 = vmatprep.subr.bf16.mxu1 %v1511_v26  ;;  %v1581_v8 = vld [vmem:[%s2166_s0 + $0x44] ss:$8 sps:$4 sm:$0xff]   ;;  %v1583_v9 = vld [vmem:[%s2166_s0 + $0x40] ss:$8 sps:$4 sm:$0xff]   ;;  %v1584_v10 = vld [vmem:[%s2166_s0 + $0x54] ss:$8 sps:$4 sm:$0xff]  }
  0x56   : > { %v1586_v11 = vld [vmem:[%s2166_s0 + $0x50] ss:$8 sps:$4 sm:$0xff]   ;;  %v1587_v12 = vld [vmem:[%s2166_s0 + $0x64] ss:$8 sps:$4 sm:$0xff]   ;;  %v1589_v13 = vld [vmem:[%s2166_s0 + $0x60] ss:$8 sps:$4 sm:$0xff]  }
  0x57   : > { %v1590_v14 = vld [vmem:[%s2166_s0 + $0x74] ss:$8 sps:$4 sm:$0xff]   ;;  %v1592_v15 = vld [vmem:[%s2166_s0 + $0x70] ss:$8 sps:$4 sm:$0xff]   ;;  %s1432_s28 = sshll.u32 (%p1683_p6), %s1623_s11, 5 }
  0x58   : > { %819 = vmatpush1.bf16.msra.mxu0 %v1513_v27  ;;  %932 = vmatpush1.bf16.msra.mxu1 %v1514_v28  ;;  %s2024_s24 = scalar_lea.vmem (%p1683_p6), %s2168_s2, %s1432_s28 }
  0x59   : > { %820 = vmatprep.subr.bf16.mxu0 %v1515_v29  ;;  %933 = vmatprep.subr.bf16.mxu1 %v1517_v30 }
  0x5c   : > { %821 = vmatpush1.bf16.msra.mxu0 %v1519_v31  ;;  %934 = vmatpush1.bf16.msra.mxu1 %v1520_v32 }
  0x5d   : > { %822 = vmatprep.subr.bf16.mxu0 %v1521_v33  ;;  %935 = vmatprep.subr.bf16.mxu1 %v1523_v34 }
  0x60   : > { %823 = vmatpush2.bf16.msra.mxu0 %v1525_v35  ;;  %936 = vmatpush2.bf16.msra.mxu1 %v1526_v36 }
  0x61   : > { %824 = vmatprep.subr.bf16.mxu0 %v1527_v37  ;;  %937 = vmatprep.subr.bf16.mxu1 %v1529_v38 }
  0x64   : > { %825 = vmatpush2.bf16.msra.mxu0 %v1531_v39  ;;  %938 = vmatpush2.bf16.msra.mxu1 %v1532_v40 }
  0x65   : > { %826 = vmatprep.subr.bf16.mxu0 %v1533_v41  ;;  %939 = vmatprep.subr.bf16.mxu1 %v1535_v42 }
  0x68   : > { %827 = vmatpush2.bf16.msra.mxu0 %v1537_v43  ;;  %940 = vmatpush2.bf16.msra.mxu1 %v1538_v44 }
  0x69   : > { %828 = vmatprep.subr.bf16.mxu0 %v1539_v45  ;;  %941 = vmatprep.subr.bf16.mxu1 %v1541_v46 }
  0x6c   : > { %829 = vmatpush2.bf16.msra.mxu0 %v1543_v47  ;;  %942 = vmatpush2.bf16.msra.mxu1 %v1544_v48 }
  0x6d   : > { %830 = vmatprep.subr.bf16.mxu0 %v1545_v49  ;;  %943 = vmatprep.subr.bf16.mxu1 %v1547_v50 }
  0x70   : > { %831 = vmatpush2.bf16.msra.mxu0 %v1549_v51  ;;  %944 = vmatpush2.bf16.msra.mxu1 %v1550_v52 }
  0x71   : > { %832 = vmatprep.subr.bf16.mxu0 %v1551_v53  ;;  %945 = vmatprep.subr.bf16.mxu1 %v1553_v54 }
  0x74   : > { %833 = vmatpush2.bf16.msra.mxu0 %v1555_v55  ;;  %946 = vmatpush2.bf16.msra.mxu1 %v1556_v56 }
  0x75   : > { %834 = vmatprep.subr.bf16.mxu0 %v1557_v57  ;;  %947 = vmatprep.subr.bf16.mxu1 %v1559_v58 }
  0x78   : > { %835 = vmatpush2.bf16.msra.mxu0 %v1561_v59  ;;  %948 = vmatpush2.bf16.msra.mxu1 %v1562_v60 }
  0x79   : > { %836 = vmatprep.subr.bf16.mxu0 %v1563_v61  ;;  %949 = vmatprep.subr.bf16.mxu1 %v1565_v62 }
  0x7c   : > { %837 = vmatpush2.bf16.msra.mxu0 %v1567_v63  ;;  %950 = vmatpush2.bf16.msra.mxu1 %v1568_v0 }
  0x7f   : > { %839 = vmatmul.mubr.bf16.vlgmr.msra.gmra.mxu0 %v1569_v1  ;;  %952 = vmatmul.mubr.bf16.vlgmr.msra.gmra.mxu1 %v1569_v1 }
  0x80   : > { %848 = vmatprep.mubr.bf16.mxu0 %v1572_v2  ;;  %961 = vmatprep.mubr.bf16.mxu1 %v1572_v2 }
  0x87   : > { %849 = vmatmul.mubr.bf16.gmra.mxu0 %v1574_v3  ;;  %962 = vmatmul.mubr.bf16.gmra.mxu1 %v1574_v3 }
  0x88   : > { %858 = vmatprep.mubr.bf16.mxu0 %v1575_v4  ;;  %971 = vmatprep.mubr.bf16.mxu1 %v1575_v4 }
  0x8f   : > { %859 = vmatmul.mubr.bf16.gmra.mxu0 %v1577_v5  ;;  %972 = vmatmul.mubr.bf16.gmra.mxu1 %v1577_v5 }
  0x90   : > { %868 = vmatprep.mubr.bf16.mxu0 %v1578_v6  ;;  %981 = vmatprep.mubr.bf16.mxu1 %v1578_v6 }
  0x97   : > { %869 = vmatmul.mubr.bf16.gmra.mxu0 %v1580_v7  ;;  %982 = vmatmul.mubr.bf16.gmra.mxu1 %v1580_v7 }
  0x98   : > { %878 = vmatprep.mubr.bf16.mxu0 %v1581_v8  ;;  %991 = vmatprep.mubr.bf16.mxu1 %v1581_v8 }
  0x9f   : > { %879 = vmatmul.mubr.bf16.gmra.mxu0 %v1583_v9  ;;  %992 = vmatmul.mubr.bf16.gmra.mxu1 %v1583_v9 }
  0xa0   : > { %888 = vmatprep.mubr.bf16.mxu0 %v1584_v10  ;;  %1001 = vmatprep.mubr.bf16.mxu1 %v1584_v10 }
  0xa7   : > { %889 = vmatmul.mubr.bf16.gmra.mxu0 %v1586_v11  ;;  %1002 = vmatmul.mubr.bf16.gmra.mxu1 %v1586_v11 }
  0xa8   : > { %898 = vmatprep.mubr.bf16.mxu0 %v1587_v12  ;;  %1011 = vmatprep.mubr.bf16.mxu1 %v1587_v12 }
  0xaf   : > { %899 = vmatmul.mubr.bf16.gmra.mxu0 %v1589_v13  ;;  %1012 = vmatmul.mubr.bf16.gmra.mxu1 %v1589_v13 }
  0xb0   : > { %908 = vmatprep.mubr.bf16.mxu0 %v1590_v14  ;;  %1021 = vmatprep.mubr.bf16.mxu1 %v1590_v14 }
  0xb7   : > { %909 = vmatmul.mubr.bf16.gmra.mxu0 %v1592_v15  ;;  %1022 = vmatmul.mubr.bf16.gmra.mxu1 %v1592_v15 }
 0x13f   : > { %v840_v16 = vpop.f32.mrf.mxu0  ;;  %v953_v17 = vpop.f32.mrf.mxu1 }
 0x140   : > { %1032 = vst [vmem:[%s1949_s21] sm:$0xff] %v840_v16  ;;  %1034 = vst [vmem:[%s1949_s21 + $0x10] sm:$0xff] %v953_v17 }
 0x141   : > { %v842_v18 = vpop.f32.mrf.mxu0  ;;  %v955_v19 = vpop.f32.mrf.mxu1 }
 0x142   : > { %1033 = vst [vmem:[%s1949_s21 + $0x8] sm:$0xff] %v842_v18  ;;  %1035 = vst [vmem:[%s1949_s21 + $0x18] sm:$0xff] %v955_v19 }
 0x143   : > { %v844_v20 = vpop.f32.mrf.mxu0  ;;  %v957_v21 = vpop.f32.mrf.mxu1 }
 0x144   : > { %1036 = vst [vmem:[%s1949_s21 + $0x20] sm:$0xff] %v844_v20  ;;  %1038 = vst [vmem:[%s1949_s21 + $0x30] sm:$0xff] %v957_v21 }
 0x145   : > { %v846_v22 = vpop.f32.mrf.mxu0  ;;  %v959_v23 = vpop.f32.mrf.mxu1 }
 0x146   : > { %1037 = vst [vmem:[%s1949_s21 + $0x28] sm:$0xff] %v846_v22  ;;  %1039 = vst [vmem:[%s1949_s21 + $0x38] sm:$0xff] %v959_v23 }
 0x147   : > { %v850_v24 = vpop.f32.mrf.mxu0  ;;  %v963_v25 = vpop.f32.mrf.mxu1  ;;  %v1121_v16 = vld [vmem:[%s1949_s21] sm:$0xff] (%p1683_p6)  ;;  %v1125_v18 = vld [vmem:[%s1949_s21 + $0x10] sm:$0xff] (%p1683_p6) }
 0x148   : > { %1040 = vst [vmem:[%s1949_s21 + $0x40] sm:$0xff] %v850_v24  ;;  %1042 = vst [vmem:[%s1949_s21 + $0x50] sm:$0xff] %v963_v25 }
 0x149   : > { %v852_v26 = vpop.f32.mrf.mxu0  ;;  %v965_v27 = vpop.f32.mrf.mxu1  ;;  %v1123_v17 = vld [vmem:[%s1949_s21 + $0x8] sm:$0xff] (%p1683_p6)  ;;  %v1127_v19 = vld [vmem:[%s1949_s21 + $0x18] sm:$0xff] (%p1683_p6)  ;;  %1122 = vst [vmem:[%s2024_s24] sm:$0xff] (%p1683_p6), %v1121_v16  ;;  %1126 = vst [vmem:[%s2024_s24 + $0x10] sm:$0xff] (%p1683_p6), %v1125_v18 }
 0x14a   : > { %1041 = vst [vmem:[%s1949_s21 + $0x48] sm:$0xff] %v852_v26  ;;  %1043 = vst [vmem:[%s1949_s21 + $0x58] sm:$0xff] %v965_v27 }
 0x14b   : > { %v854_v28 = vpop.f32.mrf.mxu0  ;;  %v967_v29 = vpop.f32.mrf.mxu1  ;;  %v1129_v20 = vld [vmem:[%s1949_s21 + $0x20] sm:$0xff] (%p1683_p6)  ;;  %1124 = vst [vmem:[%s2024_s24 + $0x8] sm:$0xff] (%p1683_p6), %v1123_v17  ;;  %1128 = vst [vmem:[%s2024_s24 + $0x18] sm:$0xff] (%p1683_p6), %v1127_v19  ;;  %v1133_v22 = vld [vmem:[%s1949_s21 + $0x30] sm:$0xff] (%p1683_p6) }
 0x14c   : > { %1044 = vst [vmem:[%s1949_s21 + $0x60] sm:$0xff] %v854_v28  ;;  %1046 = vst [vmem:[%s1949_s21 + $0x70] sm:$0xff] %v967_v29 }
 0x14d   : > { %v856_v30 = vpop.f32.mrf.mxu0  ;;  %v969_v31 = vpop.f32.mrf.mxu1  ;;  %v1131_v21 = vld [vmem:[%s1949_s21 + $0x28] sm:$0xff] (%p1683_p6)  ;;  %1130 = vst [vmem:[%s2024_s24 + $0x80] sm:$0xff] (%p1683_p6), %v1129_v20  ;;  %v1135_v23 = vld [vmem:[%s1949_s21 + $0x38] sm:$0xff] (%p1683_p6)  ;;  %1134 = vst [vmem:[%s2024_s24 + $0x90] sm:$0xff] (%p1683_p6), %v1133_v22 }
 0x14e   : > { %1045 = vst [vmem:[%s1949_s21 + $0x68] sm:$0xff] %v856_v30  ;;  %1047 = vst [vmem:[%s1949_s21 + $0x78] sm:$0xff] %v969_v31 }
 0x14f   : > { %v860_v32 = vpop.f32.mrf.mxu0  ;;  %v973_v33 = vpop.f32.mrf.mxu1  ;;  %1132 = vst [vmem:[%s2024_s24 + $0x88] sm:$0xff] (%p1683_p6), %v1131_v21  ;;  %v1137_v24 = vld [vmem:[%s1949_s21 + $0x40] sm:$0xff] (%p1683_p6)  ;;  %1136 = vst [vmem:[%s2024_s24 + $0x98] sm:$0xff] (%p1683_p6), %v1135_v23  ;;  %v1141_v26 = vld [vmem:[%s1949_s21 + $0x50] sm:$0xff] (%p1683_p6) }
 0x150   : > { %1048 = vst [vmem:[%s1949_s21 + $0x80] sm:$0xff] %v860_v32  ;;  %1050 = vst [vmem:[%s1949_s21 + $0x90] sm:$0xff] %v973_v33 }
 0x151   : > { %v862_v34 = vpop.f32.mrf.mxu0  ;;  %v975_v35 = vpop.f32.mrf.mxu1  ;;  %1138 = vst [vmem:[%s2024_s24 + $0x100] sm:$0xff] (%p1683_p6), %v1137_v24  ;;  %v1139_v25 = vld [vmem:[%s1949_s21 + $0x48] sm:$0xff] (%p1683_p6)  ;;  %v1143_v27 = vld [vmem:[%s1949_s21 + $0x58] sm:$0xff] (%p1683_p6)  ;;  %1142 = vst [vmem:[%s2024_s24 + $0x110] sm:$0xff] (%p1683_p6), %v1141_v26 }
 0x152   : > { %1049 = vst [vmem:[%s1949_s21 + $0x88] sm:$0xff] %v862_v34  ;;  %1051 = vst [vmem:[%s1949_s21 + $0x98] sm:$0xff] %v975_v35 }
 0x153   : > { %v864_v36 = vpop.f32.mrf.mxu0  ;;  %v977_v37 = vpop.f32.mrf.mxu1  ;;  %1140 = vst [vmem:[%s2024_s24 + $0x108] sm:$0xff] (%p1683_p6), %v1139_v25  ;;  %1144 = vst [vmem:[%s2024_s24 + $0x118] sm:$0xff] (%p1683_p6), %v1143_v27  ;;  %v1145_v28 = vld [vmem:[%s1949_s21 + $0x60] sm:$0xff] (%p1683_p6)  ;;  %v1149_v30 = vld [vmem:[%s1949_s21 + $0x70] sm:$0xff] (%p1683_p6) }
 0x154   : > { %1052 = vst [vmem:[%s1949_s21 + $0xa0] sm:$0xff] %v864_v36  ;;  %1054 = vst [vmem:[%s1949_s21 + $0xb0] sm:$0xff] %v977_v37 }
 0x155   : > { %v866_v38 = vpop.f32.mrf.mxu0  ;;  %v979_v39 = vpop.f32.mrf.mxu1  ;;  %v1147_v29 = vld [vmem:[%s1949_s21 + $0x68] sm:$0xff] (%p1683_p6)  ;;  %1146 = vst [vmem:[%s2024_s24 + $0x180] sm:$0xff] (%p1683_p6), %v1145_v28  ;;  %1150 = vst [vmem:[%s2024_s24 + $0x190] sm:$0xff] (%p1683_p6), %v1149_v30  ;;  %v1151_v31 = vld [vmem:[%s1949_s21 + $0x78] sm:$0xff] (%p1683_p6) }
 0x156   : > { %1053 = vst [vmem:[%s1949_s21 + $0xa8] sm:$0xff] %v866_v38  ;;  %1055 = vst [vmem:[%s1949_s21 + $0xb8] sm:$0xff] %v979_v39 }
 0x157   : > { %v870_v40 = vpop.f32.mrf.mxu0  ;;  %v983_v41 = vpop.f32.mrf.mxu1  ;;  %1148 = vst [vmem:[%s2024_s24 + $0x188] sm:$0xff] (%p1683_p6), %v1147_v29  ;;  %v1153_v32 = vld [vmem:[%s1949_s21 + $0x80] sm:$0xff] (%p1683_p6)  ;;  %1152 = vst [vmem:[%s2024_s24 + $0x198] sm:$0xff] (%p1683_p6), %v1151_v31  ;;  %v1157_v34 = vld [vmem:[%s1949_s21 + $0x90] sm:$0xff] (%p1683_p6) }
 0x158   : > { %1056 = vst [vmem:[%s1949_s21 + $0xc0] sm:$0xff] %v870_v40  ;;  %1058 = vst [vmem:[%s1949_s21 + $0xd0] sm:$0xff] %v983_v41 }
 0x159   : > { %v872_v42 = vpop.f32.mrf.mxu0  ;;  %v985_v43 = vpop.f32.mrf.mxu1  ;;  %v1155_v33 = vld [vmem:[%s1949_s21 + $0x88] sm:$0xff] (%p1683_p6)  ;;  %1154 = vst [vmem:[%s2024_s24 + $0x200] sm:$0xff] (%p1683_p6), %v1153_v32  ;;  %v1159_v35 = vld [vmem:[%s1949_s21 + $0x98] sm:$0xff] (%p1683_p6)  ;;  %1158 = vst [vmem:[%s2024_s24 + $0x210] sm:$0xff] (%p1683_p6), %v1157_v34 }
 0x15a   : > { %1057 = vst [vmem:[%s1949_s21 + $0xc8] sm:$0xff] %v872_v42  ;;  %1059 = vst [vmem:[%s1949_s21 + $0xd8] sm:$0xff] %v985_v43 }
 0x15b   : > { %v874_v44 = vpop.f32.mrf.mxu0  ;;  %v987_v45 = vpop.f32.mrf.mxu1  ;;  %1156 = vst [vmem:[%s2024_s24 + $0x208] sm:$0xff] (%p1683_p6), %v1155_v33  ;;  %v1161_v36 = vld [vmem:[%s1949_s21 + $0xa0] sm:$0xff] (%p1683_p6)  ;;  %1160 = vst [vmem:[%s2024_s24 + $0x218] sm:$0xff] (%p1683_p6), %v1159_v35  ;;  %v1165_v38 = vld [vmem:[%s1949_s21 + $0xb0] sm:$0xff] (%p1683_p6) }
 0x15c   : > { %1060 = vst [vmem:[%s1949_s21 + $0xe0] sm:$0xff] %v874_v44  ;;  %1062 = vst [vmem:[%s1949_s21 + $0xf0] sm:$0xff] %v987_v45 }
 0x15d   : > { %v876_v46 = vpop.f32.mrf.mxu0  ;;  %v989_v47 = vpop.f32.mrf.mxu1  ;;  %1162 = vst [vmem:[%s2024_s24 + $0x280] sm:$0xff] (%p1683_p6), %v1161_v36  ;;  %v1163_v37 = vld [vmem:[%s1949_s21 + $0xa8] sm:$0xff] (%p1683_p6)  ;;  %v1167_v39 = vld [vmem:[%s1949_s21 + $0xb8] sm:$0xff] (%p1683_p6)  ;;  %1166 = vst [vmem:[%s2024_s24 + $0x290] sm:$0xff] (%p1683_p6), %v1165_v38 }
 0x15e   : > { %1061 = vst [vmem:[%s1949_s21 + $0xe8] sm:$0xff] %v876_v46  ;;  %1063 = vst [vmem:[%s1949_s21 + $0xf8] sm:$0xff] %v989_v47 }
 0x15f   : > { %v880_v48 = vpop.f32.mrf.mxu0  ;;  %v993_v49 = vpop.f32.mrf.mxu1  ;;  %1164 = vst [vmem:[%s2024_s24 + $0x288] sm:$0xff] (%p1683_p6), %v1163_v37  ;;  %1168 = vst [vmem:[%s2024_s24 + $0x298] sm:$0xff] (%p1683_p6), %v1167_v39  ;;  %v1169_v40 = vld [vmem:[%s1949_s21 + $0xc0] sm:$0xff] (%p1683_p6)  ;;  %v1173_v42 = vld [vmem:[%s1949_s21 + $0xd0] sm:$0xff] (%p1683_p6) }
 0x160   : > { %1064 = vst [vmem:[%s1949_s21 + $0x100] sm:$0xff] %v880_v48  ;;  %1066 = vst [vmem:[%s1949_s21 + $0x110] sm:$0xff] %v993_v49 }
 0x161   : > { %v882_v50 = vpop.f32.mrf.mxu0  ;;  %v995_v51 = vpop.f32.mrf.mxu1  ;;  %v1171_v41 = vld [vmem:[%s1949_s21 + $0xc8] sm:$0xff] (%p1683_p6)  ;;  %1170 = vst [vmem:[%s2024_s24 + $0x300] sm:$0xff] (%p1683_p6), %v1169_v40  ;;  %1174 = vst [vmem:[%s2024_s24 + $0x310] sm:$0xff] (%p1683_p6), %v1173_v42  ;;  %v1175_v43 = vld [vmem:[%s1949_s21 + $0xd8] sm:$0xff] (%p1683_p6) }
 0x162   : > { %1065 = vst [vmem:[%s1949_s21 + $0x108] sm:$0xff] %v882_v50  ;;  %1067 = vst [vmem:[%s1949_s21 + $0x118] sm:$0xff] %v995_v51 }
 0x163   : > { %v884_v52 = vpop.f32.mrf.mxu0  ;;  %v997_v53 = vpop.f32.mrf.mxu1  ;;  %1172 = vst [vmem:[%s2024_s24 + $0x308] sm:$0xff] (%p1683_p6), %v1171_v41  ;;  %v1177_v44 = vld [vmem:[%s1949_s21 + $0xe0] sm:$0xff] (%p1683_p6)  ;;  %1176 = vst [vmem:[%s2024_s24 + $0x318] sm:$0xff] (%p1683_p6), %v1175_v43  ;;  %v1181_v46 = vld [vmem:[%s1949_s21 + $0xf0] sm:$0xff] (%p1683_p6) }
 0x164   : > { %1068 = vst [vmem:[%s1949_s21 + $0x120] sm:$0xff] %v884_v52  ;;  %1070 = vst [vmem:[%s1949_s21 + $0x130] sm:$0xff] %v997_v53 }
 0x165   : > { %v886_v54 = vpop.f32.mrf.mxu0  ;;  %v999_v55 = vpop.f32.mrf.mxu1  ;;  %v1179_v45 = vld [vmem:[%s1949_s21 + $0xe8] sm:$0xff] (%p1683_p6)  ;;  %1178 = vst [vmem:[%s2024_s24 + $0x380] sm:$0xff] (%p1683_p6), %v1177_v44  ;;  %v1183_v47 = vld [vmem:[%s1949_s21 + $0xf8] sm:$0xff] (%p1683_p6)  ;;  %1182 = vst [vmem:[%s2024_s24 + $0x390] sm:$0xff] (%p1683_p6), %v1181_v46 }
 0x166   : > { %1069 = vst [vmem:[%s1949_s21 + $0x128] sm:$0xff] %v886_v54  ;;  %1071 = vst [vmem:[%s1949_s21 + $0x138] sm:$0xff] %v999_v55 }
 0x167   : > { %v890_v56 = vpop.f32.mrf.mxu0  ;;  %v1003_v57 = vpop.f32.mrf.mxu1  ;;  %1180 = vst [vmem:[%s2024_s24 + $0x388] sm:$0xff] (%p1683_p6), %v1179_v45  ;;  %v1185_v48 = vld [vmem:[%s1949_s21 + $0x100] sm:$0xff] (%p1683_p6)  ;;  %1184 = vst [vmem:[%s2024_s24 + $0x398] sm:$0xff] (%p1683_p6), %v1183_v47  ;;  %v1189_v50 = vld [vmem:[%s1949_s21 + $0x110] sm:$0xff] (%p1683_p6) }
 0x168   : > { %1072 = vst [vmem:[%s1949_s21 + $0x140] sm:$0xff] %v890_v56  ;;  %1074 = vst [vmem:[%s1949_s21 + $0x150] sm:$0xff] %v1003_v57 }
 0x169   : > { %v892_v58 = vpop.f32.mrf.mxu0  ;;  %v1005_v59 = vpop.f32.mrf.mxu1  ;;  %1186 = vst [vmem:[%s2024_s24 + $0x400] sm:$0xff] (%p1683_p6), %v1185_v48  ;;  %v1187_v49 = vld [vmem:[%s1949_s21 + $0x108] sm:$0xff] (%p1683_p6)  ;;  %v1191_v51 = vld [vmem:[%s1949_s21 + $0x118] sm:$0xff] (%p1683_p6)  ;;  %1190 = vst [vmem:[%s2024_s24 + $0x410] sm:$0xff] (%p1683_p6), %v1189_v50 }
 0x16a   : > { %1073 = vst [vmem:[%s1949_s21 + $0x148] sm:$0xff] %v892_v58  ;;  %1075 = vst [vmem:[%s1949_s21 + $0x158] sm:$0xff] %v1005_v59 }
 0x16b   : > { %v894_v60 = vpop.f32.mrf.mxu0  ;;  %v1007_v61 = vpop.f32.mrf.mxu1  ;;  %1188 = vst [vmem:[%s2024_s24 + $0x408] sm:$0xff] (%p1683_p6), %v1187_v49  ;;  %1192 = vst [vmem:[%s2024_s24 + $0x418] sm:$0xff] (%p1683_p6), %v1191_v51  ;;  %v1193_v52 = vld [vmem:[%s1949_s21 + $0x120] sm:$0xff] (%p1683_p6)  ;;  %v1197_v54 = vld [vmem:[%s1949_s21 + $0x130] sm:$0xff] (%p1683_p6) }
 0x16c   : > { %1076 = vst [vmem:[%s1949_s21 + $0x160] sm:$0xff] %v894_v60  ;;  %1078 = vst [vmem:[%s1949_s21 + $0x170] sm:$0xff] %v1007_v61 }
 0x16d   : > { %v896_v62 = vpop.f32.mrf.mxu0  ;;  %v1009_v63 = vpop.f32.mrf.mxu1  ;;  %v1195_v53 = vld [vmem:[%s1949_s21 + $0x128] sm:$0xff] (%p1683_p6)  ;;  %1194 = vst [vmem:[%s2024_s24 + $0x480] sm:$0xff] (%p1683_p6), %v1193_v52  ;;  %1198 = vst [vmem:[%s2024_s24 + $0x490] sm:$0xff] (%p1683_p6), %v1197_v54  ;;  %v1199_v55 = vld [vmem:[%s1949_s21 + $0x138] sm:$0xff] (%p1683_p6) }
 0x16e   : > { %1077 = vst [vmem:[%s1949_s21 + $0x168] sm:$0xff] %v896_v62  ;;  %1079 = vst [vmem:[%s1949_s21 + $0x178] sm:$0xff] %v1009_v63 }
 0x16f   : > { %v900_v0 = vpop.f32.mrf.mxu0  ;;  %v1013_v1 = vpop.f32.mrf.mxu1  ;;  %1196 = vst [vmem:[%s2024_s24 + $0x488] sm:$0xff] (%p1683_p6), %v1195_v53  ;;  %v1201_v56 = vld [vmem:[%s1949_s21 + $0x140] sm:$0xff] (%p1683_p6)  ;;  %1200 = vst [vmem:[%s2024_s24 + $0x498] sm:$0xff] (%p1683_p6), %v1199_v55  ;;  %v1205_v58 = vld [vmem:[%s1949_s21 + $0x150] sm:$0xff] (%p1683_p6) }
 0x170   : > { %1080 = vst [vmem:[%s1949_s21 + $0x180] sm:$0xff] %v900_v0  ;;  %1082 = vst [vmem:[%s1949_s21 + $0x190] sm:$0xff] %v1013_v1 }
 0x171   : > { %v902_v2 = vpop.f32.mrf.mxu0  ;;  %v1015_v3 = vpop.f32.mrf.mxu1  ;;  %v1203_v57 = vld [vmem:[%s1949_s21 + $0x148] sm:$0xff] (%p1683_p6)  ;;  %1202 = vst [vmem:[%s2024_s24 + $0x500] sm:$0xff] (%p1683_p6), %v1201_v56  ;;  %v1207_v59 = vld [vmem:[%s1949_s21 + $0x158] sm:$0xff] (%p1683_p6)  ;;  %1206 = vst [vmem:[%s2024_s24 + $0x510] sm:$0xff] (%p1683_p6), %v1205_v58 }
 0x172   : > { %1081 = vst [vmem:[%s1949_s21 + $0x188] sm:$0xff] %v902_v2  ;;  %1083 = vst [vmem:[%s1949_s21 + $0x198] sm:$0xff] %v1015_v3 }
 0x173   : > { %v904_v4 = vpop.f32.mrf.mxu0  ;;  %v1017_v5 = vpop.f32.mrf.mxu1  ;;  %1204 = vst [vmem:[%s2024_s24 + $0x508] sm:$0xff] (%p1683_p6), %v1203_v57  ;;  %v1209_v60 = vld [vmem:[%s1949_s21 + $0x160] sm:$0xff] (%p1683_p6)  ;;  %1208 = vst [vmem:[%s2024_s24 + $0x518] sm:$0xff] (%p1683_p6), %v1207_v59  ;;  %v1213_v62 = vld [vmem:[%s1949_s21 + $0x170] sm:$0xff] (%p1683_p6) }
 0x174   : > { %1084 = vst [vmem:[%s1949_s21 + $0x1a0] sm:$0xff] %v904_v4  ;;  %1086 = vst [vmem:[%s1949_s21 + $0x1b0] sm:$0xff] %v1017_v5 }
 0x175   : > { %v906_v6 = vpop.f32.mrf.mxu0  ;;  %v1019_v7 = vpop.f32.mrf.mxu1  ;;  %1210 = vst [vmem:[%s2024_s24 + $0x580] sm:$0xff] (%p1683_p6), %v1209_v60  ;;  %v1211_v61 = vld [vmem:[%s1949_s21 + $0x168] sm:$0xff] (%p1683_p6)  ;;  %v1215_v63 = vld [vmem:[%s1949_s21 + $0x178] sm:$0xff] (%p1683_p6)  ;;  %1214 = vst [vmem:[%s2024_s24 + $0x590] sm:$0xff] (%p1683_p6), %v1213_v62 }
 0x176   : > { %1085 = vst [vmem:[%s1949_s21 + $0x1a8] sm:$0xff] %v906_v6  ;;  %1087 = vst [vmem:[%s1949_s21 + $0x1b8] sm:$0xff] %v1019_v7 }
 0x177   : > { %v910_v8 = vpop.f32.mrf.mxu0  ;;  %v1023_v9 = vpop.f32.mrf.mxu1  ;;  %1212 = vst [vmem:[%s2024_s24 + $0x588] sm:$0xff] (%p1683_p6), %v1211_v61  ;;  %1216 = vst [vmem:[%s2024_s24 + $0x598] sm:$0xff] (%p1683_p6), %v1215_v63  ;;  %v1217_v0 = vld [vmem:[%s1949_s21 + $0x180] sm:$0xff] (%p1683_p6)  ;;  %v1221_v2 = vld [vmem:[%s1949_s21 + $0x190] sm:$0xff] (%p1683_p6) }
 0x178   : > { %1088 = vst [vmem:[%s1949_s21 + $0x1c0] sm:$0xff] %v910_v8  ;;  %1090 = vst [vmem:[%s1949_s21 + $0x1d0] sm:$0xff] %v1023_v9 }
 0x179   : > { %v912_v10 = vpop.f32.mrf.mxu0  ;;  %v1025_v11 = vpop.f32.mrf.mxu1  ;;  %v1219_v1 = vld [vmem:[%s1949_s21 + $0x188] sm:$0xff] (%p1683_p6)  ;;  %1218 = vst [vmem:[%s2024_s24 + $0x600] sm:$0xff] (%p1683_p6), %v1217_v0  ;;  %1222 = vst [vmem:[%s2024_s24 + $0x610] sm:$0xff] (%p1683_p6), %v1221_v2  ;;  %v1223_v3 = vld [vmem:[%s1949_s21 + $0x198] sm:$0xff] (%p1683_p6) }
 0x17a   : > { %1089 = vst [vmem:[%s1949_s21 + $0x1c8] sm:$0xff] %v912_v10  ;;  %1091 = vst [vmem:[%s1949_s21 + $0x1d8] sm:$0xff] %v1025_v11  ;;  %1102 = sbr.rel (!%p1683_p6) target bundleno = 391 (0x187), region = 55 }
 0x17b   : > { %v914_v12 = vpop.f32.mrf.mxu0  ;;  %v1027_v13 = vpop.f32.mrf.mxu1  ;;  %1220 = vst [vmem:[%s2024_s24 + $0x608] sm:$0xff] (%p1683_p6), %v1219_v1  ;;  %v1225_v4 = vld [vmem:[%s1949_s21 + $0x1a0] sm:$0xff] (%p1683_p6)  ;;  %1224 = vst [vmem:[%s2024_s24 + $0x618] sm:$0xff] (%p1683_p6), %v1223_v3  ;;  %v1229_v6 = vld [vmem:[%s1949_s21 + $0x1b0] sm:$0xff] (%p1683_p6) }
 0x17c   : > { %1092 = vst [vmem:[%s1949_s21 + $0x1e0] sm:$0xff] %v914_v12  ;;  %1094 = vst [vmem:[%s1949_s21 + $0x1f0] sm:$0xff] %v1027_v13 }
 0x17d   : > { %v916_v14 = vpop.f32.mrf.mxu0  ;;  %v1029_v15 = vpop.f32.mrf.mxu1  ;;  %v1227_v5 = vld [vmem:[%s1949_s21 + $0x1a8] sm:$0xff] (%p1683_p6)  ;;  %1226 = vst [vmem:[%s2024_s24 + $0x680] sm:$0xff] (%p1683_p6), %v1225_v4  ;;  %v1231_v7 = vld [vmem:[%s1949_s21 + $0x1b8] sm:$0xff] (%p1683_p6)  ;;  %1230 = vst [vmem:[%s2024_s24 + $0x690] sm:$0xff] (%p1683_p6), %v1229_v6 }
 0x17e   : > { %1093 = vst [vmem:[%s1949_s21 + $0x1e8] sm:$0xff] %v916_v14  ;;  %1095 = vst [vmem:[%s1949_s21 + $0x1f8] sm:$0xff] %v1029_v15 }
 0x17f   : > { %1228 = vst [vmem:[%s2024_s24 + $0x688] sm:$0xff] %v1227_v5  ;;  %v1233_v8 = vld [vmem:[%s1949_s21 + $0x1c0] sm:$0xff]  ;;  %1232 = vst [vmem:[%s2024_s24 + $0x698] sm:$0xff] %v1231_v7  ;;  %v1237_v10 = vld [vmem:[%s1949_s21 + $0x1d0] sm:$0xff] }
 0x180   : > { %1234 = vst [vmem:[%s2024_s24 + $0x700] sm:$0xff] %v1233_v8  ;;  %1238 = vst [vmem:[%s2024_s24 + $0x710] sm:$0xff] %v1237_v10 }
 0x181   : > { %v1235_v9 = vld [vmem:[%s1949_s21 + $0x1c8] sm:$0xff]  ;;  %v1239_v11 = vld [vmem:[%s1949_s21 + $0x1d8] sm:$0xff] }
 0x182   : > { %1236 = vst [vmem:[%s2024_s24 + $0x708] sm:$0xff] %v1235_v9  ;;  %1240 = vst [vmem:[%s2024_s24 + $0x718] sm:$0xff] %v1239_v11 }
 0x183   : > { %v1241_v12 = vld [vmem:[%s1949_s21 + $0x1e0] sm:$0xff]  ;;  %v1245_v14 = vld [vmem:[%s1949_s21 + $0x1f0] sm:$0xff] }
 0x184   : > { %1242 = vst [vmem:[%s2024_s24 + $0x780] sm:$0xff] %v1241_v12  ;;  %1246 = vst [vmem:[%s2024_s24 + $0x790] sm:$0xff] %v1245_v14 }
 0x185   : > { %v1243_v13 = vld [vmem:[%s1949_s21 + $0x1e8] sm:$0xff]  ;;  %v1247_v15 = vld [vmem:[%s1949_s21 + $0x1f8] sm:$0xff] }
 0x186   : > { %1244 = vst [vmem:[%s2024_s24 + $0x788] sm:$0xff] %v1243_v13  ;;  %1248 = vst [vmem:[%s2024_s24 + $0x798] sm:$0xff] %v1247_v15 }
 0x187 PF: > { %s12_s13 = sadd.s32 1, %s1631_s13   ;;  %s2170_s9 = smov %s1619_s10 }
 0x188   : > { %p9_p11 = scmp.ge.s32.totalorder %s12_s13, 6   ;;  %s2171_s10 = smov %s1688_s19 }
 0x189   : > { %s2172_s11 = smov %s1627_s12  ;;  %s2173_s12 = smov %s2175_s14 }
 0x18a   :  { %11 = sbr.rel (!%p9_p11) target bundleno = 3 (0x3), region = 112 }

// kernel: generator_forward.19
= control target key start
LH: loop header
LB: loop body
LE: loop exit
PB: predicated region body
PF: predicated region fallthrough
CT: control target
= control target key end

     0   :  { %v57_v0 = vlaneseq  ;;  %s660_s1 = inlined_call_operand.vmem [shape: f32[1,256], index: 1, kind: input, shape index: {}]   ;;  %s661_s2 = inlined_call_operand.vmem [shape: f32[1,256], index: 2, kind: input, shape index: {}]   ;;  %s662_s3 = inlined_call_operand.vmem [shape: f32[1,256], index: 3, kind: input, shape index: {}]   ;;  %s663_s0 = inlined_call_operand.vmem [shape: f32[128,256], index: 0, kind: input, shape index: {}]   ;;  %s664_s4 = inlined_call_operand.vmem [shape: f32[1,256], index: 4, kind: input, shape index: {}]   ;;  %s665_s5 = inlined_call_operand.vmem [shape: bf16[128,256], index: 5, kind: output, shape index: {}]  }
   0x1   :  { %v52_v1 = vld [vmem:[%s661_s2] sm:$0x3]  ;;  %v21_v7 = vld [vmem:[%s663_s0 + $0x8] sm:$0xff]  ;;  %v22_v11 = vld [vmem:[%s663_s0 + $0x10] sm:$0xff] }
   0x2   :  { %v53_v2 = vld [vmem:[%s662_s3] sm:$0x3]  ;;  %v58_v3 = vshrl.u32 %v57_v0, 7  ;;  %v23_v12 = vld [vmem:[%s663_s0 + $0x18] sm:$0xff]  ;;  %v25_v18 = vld [vmem:[%s663_s0 + $0x28] sm:$0xff] }
   0x3   :  { %v54_v4 = vmul.f32 %v53_v2, %v52_v1  ;;  %v55_v5 = vld [vmem:[%s660_s1] sm:$0x3]  ;;  %v26_v19 = vld [vmem:[%s663_s0 + $0x30] sm:$0xff]  ;;  %v27_v20 = vld [vmem:[%s663_s0 + $0x38] sm:$0xff] }
   0x4   :  { %v20_v6 = vld [vmem:[%s663_s0] sm:$0xff]  ;;  %v59_v8 = vsub.s32 0, %v58_v3  ;;  %v63_v9 = vsub.s32 1, %v58_v3  ;;  %v29_v48 = vld [vmem:[%s663_s0 + $0x48] sm:$0xff]  ;;  %v30_v53 = vld [vmem:[%s663_s0 + $0x50] sm:$0xff] }
   0x5   :  { %v142_v10 = vld [vmem:[%s664_s4] sm:$0x3]  ;;  %v31_v54 = vld [vmem:[%s663_s0 + $0x58] sm:$0xff]  ;;  %v33_v60 = vld [vmem:[%s663_s0 + $0x68] sm:$0xff] }
   0x6   :  { %v24_v13 = vld [vmem:[%s663_s0 + $0x20] sm:$0xff]  ;;  %v423_v14 = vrot.slane %v55_v5, %v59_v8  ;;  %v425_v15 = vrot.slane %v55_v5, %v63_v9  ;;  %v427_v16 = vrot.slane %v54_v4, %v59_v8  ;;  %v429_v17 = vrot.slane %v54_v4, %v63_v9  ;;  %v34_v1 = vld [vmem:[%s663_s0 + $0x70] sm:$0xff]  ;;  %v35_v2 = vld [vmem:[%s663_s0 + $0x78] sm:$0xff] }
   0x7   :  { %v440_v21 = vrot.slane %v142_v10, %v59_v8  ;;  %v442_v22 = vrot.slane %v142_v10, %v63_v9  ;;  %v28_v47 = vld [vmem:[%s663_s0 + $0x40] sm:$0xff] }
   0x8   :  { %v67_v23 = vsub.f32 %v20_v6, %v423_v14  ;;  %v68_v24 = vsub.f32 %v21_v7, %v425_v15  ;;  %v69_v25 = vsub.f32 %v22_v11, %v423_v14  ;;  %v70_v26 = vsub.f32 %v23_v12, %v425_v15  ;;  %v32_v59 = vld [vmem:[%s663_s0 + $0x60] sm:$0xff] }
   0x9   :  { %v71_v27 = vsub.f32 %v24_v13, %v423_v14  ;;  %v72_v28 = vsub.f32 %v25_v18, %v425_v15  ;;  %v73_v29 = vsub.f32 %v26_v19, %v423_v14  ;;  %v74_v30 = vsub.f32 %v27_v20, %v425_v15 }
   0xa   :  { %v110_v31 = vmul.f32 %v427_v16, %v67_v23  ;;  %v111_v32 = vmul.f32 %v429_v17, %v68_v24  ;;  %v112_v33 = vmul.f32 %v427_v16, %v69_v25  ;;  %v113_v34 = vmul.f32 %v429_v17, %v70_v26 }
   0xb   :  { %v114_v35 = vmul.f32 %v427_v16, %v71_v27  ;;  %v115_v36 = vmul.f32 %v429_v17, %v72_v28  ;;  %v116_v37 = vmul.f32 %v427_v16, %v73_v29  ;;  %v117_v38 = vmul.f32 %v429_v17, %v74_v30  ;;  %v36_v29 = vld [vmem:[%s663_s0 + $0x80] sm:$0xff] }
   0xc   :  { %v154_v39 = vadd.f32 %v440_v21, %v110_v31  ;;  %v155_v40 = vadd.f32 %v442_v22, %v111_v32  ;;  %v156_v41 = vadd.f32 %v440_v21, %v112_v33  ;;  %v157_v42 = vadd.f32 %v442_v22, %v113_v34  ;;  %v37_v34 = vld [vmem:[%s663_s0 + $0x88] sm:$0xff] }
   0xd   :  { %v158_v43 = vadd.f32 %v440_v21, %v114_v35  ;;  %v159_v44 = vadd.f32 %v442_v22, %v115_v36  ;;  %v160_v45 = vadd.f32 %v440_v21, %v116_v37  ;;  %v161_v46 = vadd.f32 %v442_v22, %v117_v38 }
   0xe   :  { %v186_v49 = vmax.f32 %v154_v39, 0.0  ;;  %v187_v50 = vmax.f32 %v155_v40, 0.0  ;;  %v188_v51 = vmax.f32 %v156_v41, 0.0  ;;  %v189_v52 = vmax.f32 %v157_v42, 0.0  ;;  %v38_v39 = vld [vmem:[%s663_s0 + $0x90] sm:$0xff]  ;;  %v39_v40 = vld [vmem:[%s663_s0 + $0x98] sm:$0xff] }
   0xf   :  { %v190_v55 = vmax.f32 %v158_v43, 0.0  ;;  %v191_v56 = vmax.f32 %v159_v44, 0.0  ;;  %v192_v57 = vmax.f32 %v160_v45, 0.0  ;;  %v193_v58 = vmax.f32 %v161_v46, 0.0  ;;  %v40_v45 = vld [vmem:[%s663_s0 + $0xa0] sm:$0xff]  ;;  %v41_v46 = vld [vmem:[%s663_s0 + $0xa8] sm:$0xff] }
  0x10   :  { %v350_v61 = vpack.c.bf16 %v187_v50, %v186_v49  ;;  %v351_v62 = vpack.c.bf16 %v189_v52, %v188_v51  ;;  %v75_v63 = vsub.f32 %v28_v47, %v423_v14  ;;  %v76_v0 = vsub.f32 %v29_v48, %v425_v15  ;;  %v42_v51 = vld [vmem:[%s663_s0 + $0xb0] sm:$0xff] }
  0x11   :  { %v352_v3 = vpack.c.bf16 %v191_v56, %v190_v55  ;;  %v353_v4 = vpack.c.bf16 %v193_v58, %v192_v57  ;;  %v77_v5 = vsub.f32 %v30_v53, %v423_v14  ;;  %v78_v6 = vsub.f32 %v31_v54, %v425_v15  ;;  %v43_v56 = vld [vmem:[%s663_s0 + $0xb8] sm:$0xff] }
  0x12   :  { %314 = vst [vmem:[%s665_s5] sm:$0xff] %v350_v61  ;;  %315 = vst [vmem:[%s665_s5 + $0x8] sm:$0xff] %v351_v62  ;;  %v118_v7 = vmul.f32 %v427_v16, %v75_v63  ;;  %v119_v8 = vmul.f32 %v429_v17, %v76_v0  ;;  %v79_v9 = vsub.f32 %v32_v59, %v423_v14 }
  0x13   :  { %v80_v10 = vsub.f32 %v33_v60, %v425_v15  ;;  %316 = vst [vmem:[%s665_s5 + $0x10] sm:$0xff] %v352_v3  ;;  %317 = vst [vmem:[%s665_s5 + $0x18] sm:$0xff] %v353_v4  ;;  %v120_v11 = vmul.f32 %v427_v16, %v77_v5  ;;  %v121_v12 = vmul.f32 %v429_v17, %v78_v6  ;;  %v44_v5 = vld [vmem:[%s663_s0 + $0xc0] sm:$0xff] }
  0x14   :  { %v81_v13 = vsub.f32 %v34_v1, %v423_v14  ;;  %v82_v18 = vsub.f32 %v35_v2, %v425_v15  ;;  %v162_v19 = vadd.f32 %v440_v21, %v118_v7  ;;  %v163_v20 = vadd.f32 %v442_v22, %v119_v8 }
  0x15   :  { %v122_v23 = vmul.f32 %v427_v16, %v79_v9  ;;  %v123_v24 = vmul.f32 %v429_v17, %v80_v10  ;;  %v164_v25 = vadd.f32 %v440_v21, %v120_v11  ;;  %v165_v26 = vadd.f32 %v442_v22, %v121_v12 }
  0x16   :  { %v124_v27 = vmul.f32 %v427_v16, %v81_v13  ;;  %v125_v28 = vmul.f32 %v429_v17, %v82_v18  ;;  %v194_v30 = vmax.f32 %v162_v19, 0.0  ;;  %v195_v31 = vmax.f32 %v163_v20, 0.0  ;;  %v45_v18 = vld [vmem:[%s663_s0 + $0xc8] sm:$0xff] }
  0x17   :  { %v166_v32 = vadd.f32 %v440_v21, %v122_v23  ;;  %v167_v33 = vadd.f32 %v442_v22, %v123_v24  ;;  %v196_v35 = vmax.f32 %v164_v25, 0.0  ;;  %v197_v36 = vmax.f32 %v165_v26, 0.0  ;;  %v46_v25 = vld [vmem:[%s663_s0 + $0xd0] sm:$0xff]  ;;  %v47_v26 = vld [vmem:[%s663_s0 + $0xd8] sm:$0xff] }
  0x18   :  { %v168_v37 = vadd.f32 %v440_v21, %v124_v27  ;;  %v169_v38 = vadd.f32 %v442_v22, %v125_v28  ;;  %v354_v41 = vpack.c.bf16 %v195_v31, %v194_v30  ;;  %v83_v44 = vsub.f32 %v36_v29, %v423_v14  ;;  %v48_v31 = vld [vmem:[%s663_s0 + $0xe0] sm:$0xff] }
  0x19   :  { %v198_v42 = vmax.f32 %v166_v32, 0.0  ;;  %v199_v43 = vmax.f32 %v167_v33, 0.0  ;;  %v355_v47 = vpack.c.bf16 %v197_v36, %v196_v35  ;;  %v84_v50 = vsub.f32 %v37_v34, %v425_v15  ;;  %v49_v32 = vld [vmem:[%s663_s0 + $0xe8] sm:$0xff] }
  0x1a   :  { %v200_v48 = vmax.f32 %v168_v37, 0.0  ;;  %v201_v49 = vmax.f32 %v169_v38, 0.0  ;;  %318 = vst [vmem:[%s665_s5 + $0x20] sm:$0xff] %v354_v41  ;;  %v126_v53 = vmul.f32 %v427_v16, %v83_v44  ;;  %v85_v54 = vsub.f32 %v38_v39, %v423_v14  ;;  %v50_v37 = vld [vmem:[%s663_s0 + $0xf0] sm:$0xff] }
  0x1b   :  { %v356_v52 = vpack.c.bf16 %v199_v43, %v198_v42  ;;  %v86_v55 = vsub.f32 %v39_v40, %v425_v15  ;;  %319 = vst [vmem:[%s665_s5 + $0x28] sm:$0xff] %v355_v47  ;;  %v127_v58 = vmul.f32 %v429_v17, %v84_v50  ;;  %v87_v59 = vsub.f32 %v40_v45, %v423_v14 }
  0x1c   :  { %v357_v57 = vpack.c.bf16 %v201_v49, %v200_v48  ;;  %v88_v60 = vsub.f32 %v41_v46, %v425_v15  ;;  %v170_v61 = vadd.f32 %v440_v21, %v126_v53  ;;  %v128_v62 = vmul.f32 %v427_v16, %v85_v54  ;;  %v51_v46 = vld [vmem:[%s663_s0 + $0xf8] sm:$0xff] }
  0x1d   :  { %320 = vst [vmem:[%s665_s5 + $0x30] sm:$0xff] %v356_v52  ;;  %v129_v63 = vmul.f32 %v429_v17, %v86_v55  ;;  %v89_v0 = vsub.f32 %v42_v51, %v423_v14  ;;  %v171_v1 = vadd.f32 %v442_v22, %v127_v58  ;;  %v130_v2 = vmul.f32 %v427_v16, %v87_v59 }
  0x1e   :  { %321 = vst [vmem:[%s665_s5 + $0x38] sm:$0xff] %v357_v57  ;;  %v131_v3 = vmul.f32 %v429_v17, %v88_v60  ;;  %v90_v4 = vsub.f32 %v43_v56, %v425_v15  ;;  %v202_v6 = vmax.f32 %v170_v61, 0.0  ;;  %v172_v7 = vadd.f32 %v440_v21, %v128_v62 }
  0x1f   :  { %v173_v8 = vadd.f32 %v442_v22, %v129_v63  ;;  %v132_v9 = vmul.f32 %v427_v16, %v89_v0  ;;  %v203_v10 = vmax.f32 %v171_v1, 0.0  ;;  %v174_v11 = vadd.f32 %v440_v21, %v130_v2 }
  0x20   :  { %v175_v12 = vadd.f32 %v442_v22, %v131_v3  ;;  %v133_v13 = vmul.f32 %v429_v17, %v90_v4  ;;  %v204_v19 = vmax.f32 %v172_v7, 0.0  ;;  %v91_v24 = vsub.f32 %v44_v5, %v423_v14 }
  0x21   :  { %v205_v20 = vmax.f32 %v173_v8, 0.0  ;;  %v176_v23 = vadd.f32 %v440_v21, %v132_v9  ;;  %v358_v27 = vpack.c.bf16 %v203_v10, %v202_v6  ;;  %v206_v28 = vmax.f32 %v174_v11, 0.0 }
  0x22   :  { %v207_v29 = vmax.f32 %v175_v12, 0.0  ;;  %v177_v30 = vadd.f32 %v442_v22, %v133_v13  ;;  %v92_v35 = vsub.f32 %v45_v18, %v425_v15  ;;  %v134_v36 = vmul.f32 %v427_v16, %v91_v24 }
  0x23   :  { %v359_v33 = vpack.c.bf16 %v205_v20, %v204_v19  ;;  %v208_v34 = vmax.f32 %v176_v23, 0.0  ;;  %322 = vst [vmem:[%s665_s5 + $0x40] sm:$0xff] %v358_v27  ;;  %v93_v40 = vsub.f32 %v46_v25, %v423_v14  ;;  %v94_v41 = vsub.f32 %v47_v26, %v425_v15 }
  0x24   :  { %v360_v38 = vpack.c.bf16 %v207_v29, %v206_v28  ;;  %v209_v39 = vmax.f32 %v177_v30, 0.0  ;;  %v135_v42 = vmul.f32 %v429_v17, %v92_v35  ;;  %v178_v43 = vadd.f32 %v440_v21, %v134_v36 }
  0x25   :  { %323 = vst [vmem:[%s665_s5 + $0x48] sm:$0xff] %v359_v33  ;;  %v95_v44 = vsub.f32 %v48_v31, %v423_v14  ;;  %v96_v45 = vsub.f32 %v49_v32, %v425_v15  ;;  %v136_v48 = vmul.f32 %v427_v16, %v93_v40  ;;  %v137_v49 = vmul.f32 %v429_v17, %v94_v41 }
  0x26   :  { %324 = vst [vmem:[%s665_s5 + $0x50] sm:$0xff] %v360_v38  ;;  %v361_v47 = vpack.c.bf16 %v209_v39, %v208_v34  ;;  %v97_v50 = vsub.f32 %v50_v37, %v423_v14  ;;  %v179_v51 = vadd.f32 %v442_v22, %v135_v42  ;;  %v210_v52 = vmax.f32 %v178_v43, 0.0 }
  0x27   :  { %v138_v53 = vmul.f32 %v427_v16, %v95_v44  ;;  %v139_v54 = vmul.f32 %v429_v17, %v96_v45  ;;  %v180_v55 = vadd.f32 %v440_v21, %v136_v48  ;;  %v181_v56 = vadd.f32 %v442_v22, %v137_v49 }
  0x28   :  { %325 = vst [vmem:[%s665_s5 + $0x58] sm:$0xff] %v361_v47  ;;  %v98_v57 = vsub.f32 %v51_v46, %v425_v15  ;;  %v140_v58 = vmul.f32 %v427_v16, %v97_v50  ;;  %v211_v14 = vmax.f32 %v179_v51, 0.0 }
  0x29   :  { %v182_v59 = vadd.f32 %v440_v21, %v138_v53  ;;  %v183_v60 = vadd.f32 %v442_v22, %v139_v54  ;;  %v212_v61 = vmax.f32 %v180_v55, 0.0  ;;  %v213_v62 = vmax.f32 %v181_v56, 0.0 }
  0x2a   :  { %v141_v63 = vmul.f32 %v429_v17, %v98_v57  ;;  %v184_v0 = vadd.f32 %v440_v21, %v140_v58  ;;  %v362_v1 = vpack.c.bf16 %v211_v14, %v210_v52 }
  0x2b   :  { %v214_v2 = vmax.f32 %v182_v59, 0.0  ;;  %v215_v3 = vmax.f32 %v183_v60, 0.0  ;;  %v363_v4 = vpack.c.bf16 %v213_v62, %v212_v61 }
  0x2c   :  { %v185_v5 = vadd.f32 %v442_v22, %v141_v63  ;;  %v216_v15 = vmax.f32 %v184_v0, 0.0  ;;  %326 = vst [vmem:[%s665_s5 + $0x60] sm:$0xff] %v362_v1 }
  0x2d   :  { %v364_v16 = vpack.c.bf16 %v215_v3, %v214_v2  ;;  %327 = vst [vmem:[%s665_s5 + $0x68] sm:$0xff] %v363_v4 }
  0x2e   :  { %v217_v6 = vmax.f32 %v185_v5, 0.0 }
  0x2f   :  { %328 = vst [vmem:[%s665_s5 + $0x70] sm:$0xff] %v364_v16 }
  0x30   :  { %v365_v17 = vpack.c.bf16 %v217_v6, %v216_v15 }
  0x32   :  { %329 = vst [vmem:[%s665_s5 + $0x78] sm:$0xff] %v365_v17 }

// kernel: generator_forward.21
= control target key start
LH: loop header
LB: loop body
LE: loop exit
PB: predicated region body
PF: predicated region fallthrough
CT: control target
= control target key end

     0   :  { %v313_v0 = vmov 0.0   ;;  %s527_s0 = inlined_call_operand.vmem [shape: f32[512,128], index: 0, kind: input, shape index: {}]   ;;  %s528_s1 = inlined_call_operand.vmem [shape: f32[1,128], index: 1, kind: output, shape index: {0}]   ;;  %s529_s2 = inlined_call_operand.vmem [shape: f32[1,128], index: 2, kind: output, shape index: {1}]  }
   0x1   :  { %14 = vst [vmem:[#allocation2] sm:$0x1] %v313_v0  ;;  %15 = vst [vmem:[#allocation3] sm:$0x1] %v313_v0  ;;  %v16_v1 = vld [vmem:[%s527_s0] sm:$0xff]  ;;  %v17_v2 = vld [vmem:[%s527_s0 + $0x8] sm:$0xff] }
   0x2   :  { %v18_v3 = vld [vmem:[%s527_s0 + $0x10] sm:$0xff]  ;;  %v19_v4 = vld [vmem:[%s527_s0 + $0x18] sm:$0xff]  ;;  %v81_v5 = vadd.f32 %v17_v2, %v16_v1  ;;  %v153_v6 = vmul.f32 %v16_v1, %v16_v1  ;;  %v154_v7 = vmul.f32 %v17_v2, %v17_v2  ;;  %v20_v9 = vld [vmem:[%s527_s0 + $0x20] sm:$0xff] }
   0x3   :  { %v155_v8 = vmul.f32 %v18_v3, %v18_v3  ;;  %v156_v11 = vmul.f32 %v19_v4, %v19_v4  ;;  %v21_v13 = vld [vmem:[%s527_s0 + $0x28] sm:$0xff]  ;;  %v157_v15 = vmul.f32 %v20_v9, %v20_v9  ;;  %v22_v17 = vld [vmem:[%s527_s0 + $0x30] sm:$0xff]  ;;  %v23_v21 = vld [vmem:[%s527_s0 + $0x38] sm:$0xff] }
   0x4   :  { %v82_v10 = vadd.f32 %v81_v5, %v18_v3  ;;  %v217_v12 = vadd.f32 %v154_v7, %v153_v6  ;;  %v158_v19 = vmul.f32 %v21_v13, %v21_v13  ;;  %v159_v23 = vmul.f32 %v22_v17, %v22_v17  ;;  %v24_v25 = vld [vmem:[%s527_s0 + $0x40] sm:$0xff]  ;;  %v25_v29 = vld [vmem:[%s527_s0 + $0x48] sm:$0xff]  ;;  %v26_v33 = vld [vmem:[%s527_s0 + $0x50] sm:$0xff] }
   0x5   :  { %v160_v27 = vmul.f32 %v23_v21, %v23_v21  ;;  %v161_v31 = vmul.f32 %v24_v25, %v24_v25  ;;  %v162_v35 = vmul.f32 %v25_v29, %v25_v29  ;;  %v27_v37 = vld [vmem:[%s527_s0 + $0x58] sm:$0xff]  ;;  %v163_v39 = vmul.f32 %v26_v33, %v26_v33  ;;  %v28_v41 = vld [vmem:[%s527_s0 + $0x60] sm:$0xff]  ;;  %v29_v45 = vld [vmem:[%s527_s0 + $0x68] sm:$0xff] }
   0x6   :  { %v83_v14 = vadd.f32 %v82_v10, %v19_v4  ;;  %v218_v16 = vadd.f32 %v217_v12, %v155_v8  ;;  %v164_v43 = vmul.f32 %v27_v37, %v27_v37  ;;  %v165_v47 = vmul.f32 %v28_v41, %v28_v41  ;;  %v30_v49 = vld [vmem:[%s527_s0 + $0x70] sm:$0xff]  ;;  %v31_v53 = vld [vmem:[%s527_s0 + $0x78] sm:$0xff]  ;;  %v32_v57 = vld [vmem:[%s527_s0 + $0x80] sm:$0xff] }
   0x7   :  { %v166_v51 = vmul.f32 %v29_v45, %v29_v45  ;;  %v167_v55 = vmul.f32 %v30_v49, %v30_v49  ;;  %v168_v59 = vmul.f32 %v31_v53, %v31_v53  ;;  %v33_v61 = vld [vmem:[%s527_s0 + $0x88] sm:$0xff]  ;;  %v169_v63 = vmul.f32 %v32_v57, %v32_v57  ;;  %v34_v1 = vld [vmem:[%s527_s0 + $0x90] sm:$0xff]  ;;  %v35_v5 = vld [vmem:[%s527_s0 + $0x98] sm:$0xff] }
   0x8   :  { %v84_v18 = vadd.f32 %v83_v14, %v20_v9  ;;  %v219_v20 = vadd.f32 %v218_v16, %v156_v11  ;;  %v170_v3 = vmul.f32 %v33_v61, %v33_v61  ;;  %v171_v7 = vmul.f32 %v34_v1, %v34_v1  ;;  %v36_v9 = vld [vmem:[%s527_s0 + $0xa0] sm:$0xff] }
   0x9   :  { %v172_v11 = vmul.f32 %v35_v5, %v35_v5 }
   0xa   :  { %v85_v22 = vadd.f32 %v84_v18, %v21_v13  ;;  %v220_v24 = vadd.f32 %v219_v20, %v157_v15  ;;  %v37_v13 = vld [vmem:[%s527_s0 + $0xa8] sm:$0xff]  ;;  %v173_v15 = vmul.f32 %v36_v9, %v36_v9 }
   0xc   :  { %v86_v26 = vadd.f32 %v85_v22, %v22_v17  ;;  %v221_v28 = vadd.f32 %v220_v24, %v158_v19  ;;  %v38_v17 = vld [vmem:[%s527_s0 + $0xb0] sm:$0xff]  ;;  %v174_v19 = vmul.f32 %v37_v13, %v37_v13 }
   0xe   :  { %v87_v30 = vadd.f32 %v86_v26, %v23_v21  ;;  %v222_v32 = vadd.f32 %v221_v28, %v159_v23  ;;  %v39_v21 = vld [vmem:[%s527_s0 + $0xb8] sm:$0xff]  ;;  %v175_v23 = vmul.f32 %v38_v17, %v38_v17 }
  0x10   :  { %v88_v34 = vadd.f32 %v87_v30, %v24_v25  ;;  %v223_v36 = vadd.f32 %v222_v32, %v160_v27  ;;  %v40_v25 = vld [vmem:[%s527_s0 + $0xc0] sm:$0xff]  ;;  %v176_v27 = vmul.f32 %v39_v21, %v39_v21 }
  0x12   :  { %v89_v38 = vadd.f32 %v88_v34, %v25_v29  ;;  %v224_v40 = vadd.f32 %v223_v36, %v161_v31  ;;  %v41_v29 = vld [vmem:[%s527_s0 + $0xc8] sm:$0xff]  ;;  %v177_v31 = vmul.f32 %v40_v25, %v40_v25 }
  0x14   :  { %v90_v42 = vadd.f32 %v89_v38, %v26_v33  ;;  %v225_v44 = vadd.f32 %v224_v40, %v162_v35  ;;  %v42_v33 = vld [vmem:[%s527_s0 + $0xd0] sm:$0xff]  ;;  %v178_v35 = vmul.f32 %v41_v29, %v41_v29 }
  0x16   :  { %v91_v46 = vadd.f32 %v90_v42, %v27_v37  ;;  %v226_v48 = vadd.f32 %v225_v44, %v163_v39  ;;  %v43_v37 = vld [vmem:[%s527_s0 + $0xd8] sm:$0xff]  ;;  %v179_v39 = vmul.f32 %v42_v33, %v42_v33 }
  0x18   :  { %v92_v50 = vadd.f32 %v91_v46, %v28_v41  ;;  %v227_v52 = vadd.f32 %v226_v48, %v164_v43  ;;  %v44_v41 = vld [vmem:[%s527_s0 + $0xe0] sm:$0xff]  ;;  %v180_v43 = vmul.f32 %v43_v37, %v43_v37 }
  0x1a   :  { %v93_v54 = vadd.f32 %v92_v50, %v29_v45  ;;  %v228_v56 = vadd.f32 %v227_v52, %v165_v47  ;;  %v45_v45 = vld [vmem:[%s527_s0 + $0xe8] sm:$0xff]  ;;  %v181_v47 = vmul.f32 %v44_v41, %v44_v41 }
  0x1c   :  { %v94_v58 = vadd.f32 %v93_v54, %v30_v49  ;;  %v229_v60 = vadd.f32 %v228_v56, %v166_v51  ;;  %v46_v49 = vld [vmem:[%s527_s0 + $0xf0] sm:$0xff]  ;;  %v182_v51 = vmul.f32 %v45_v45, %v45_v45 }
  0x1e   :  { %v95_v62 = vadd.f32 %v94_v58, %v31_v53  ;;  %v230_v0 = vadd.f32 %v229_v60, %v167_v55  ;;  %v47_v53 = vld [vmem:[%s527_s0 + $0xf8] sm:$0xff]  ;;  %v183_v55 = vmul.f32 %v46_v49, %v46_v49 }
  0x20   :  { %v96_v2 = vadd.f32 %v95_v62, %v32_v57  ;;  %v231_v4 = vadd.f32 %v230_v0, %v168_v59  ;;  %v48_v57 = vld [vmem:[%s527_s0 + $0x100] sm:$0xff]  ;;  %v184_v59 = vmul.f32 %v47_v53, %v47_v53 }
  0x22   :  { %v97_v6 = vadd.f32 %v96_v2, %v33_v61  ;;  %v232_v8 = vadd.f32 %v231_v4, %v169_v63  ;;  %v49_v61 = vld [vmem:[%s527_s0 + $0x108] sm:$0xff]  ;;  %v185_v63 = vmul.f32 %v48_v57, %v48_v57 }
  0x24   :  { %v98_v10 = vadd.f32 %v97_v6, %v34_v1  ;;  %v233_v12 = vadd.f32 %v232_v8, %v170_v3  ;;  %v50_v1 = vld [vmem:[%s527_s0 + $0x110] sm:$0xff]  ;;  %v186_v3 = vmul.f32 %v49_v61, %v49_v61 }
  0x26   :  { %v99_v14 = vadd.f32 %v98_v10, %v35_v5  ;;  %v234_v16 = vadd.f32 %v233_v12, %v171_v7  ;;  %v51_v5 = vld [vmem:[%s527_s0 + $0x118] sm:$0xff]  ;;  %v187_v7 = vmul.f32 %v50_v1, %v50_v1 }
  0x28   :  { %v100_v18 = vadd.f32 %v99_v14, %v36_v9  ;;  %v235_v20 = vadd.f32 %v234_v16, %v172_v11  ;;  %v52_v9 = vld [vmem:[%s527_s0 + $0x120] sm:$0xff]  ;;  %v188_v11 = vmul.f32 %v51_v5, %v51_v5 }
  0x2a   :  { %v101_v22 = vadd.f32 %v100_v18, %v37_v13  ;;  %v236_v24 = vadd.f32 %v235_v20, %v173_v15  ;;  %v53_v13 = vld [vmem:[%s527_s0 + $0x128] sm:$0xff]  ;;  %v189_v15 = vmul.f32 %v52_v9, %v52_v9 }
  0x2c   :  { %v102_v26 = vadd.f32 %v101_v22, %v38_v17  ;;  %v237_v28 = vadd.f32 %v236_v24, %v174_v19  ;;  %v54_v17 = vld [vmem:[%s527_s0 + $0x130] sm:$0xff]  ;;  %v190_v19 = vmul.f32 %v53_v13, %v53_v13 }
  0x2e   :  { %v103_v30 = vadd.f32 %v102_v26, %v39_v21  ;;  %v238_v32 = vadd.f32 %v237_v28, %v175_v23  ;;  %v55_v21 = vld [vmem:[%s527_s0 + $0x138] sm:$0xff]  ;;  %v191_v23 = vmul.f32 %v54_v17, %v54_v17 }
  0x30   :  { %v104_v34 = vadd.f32 %v103_v30, %v40_v25  ;;  %v239_v36 = vadd.f32 %v238_v32, %v176_v27  ;;  %v56_v25 = vld [vmem:[%s527_s0 + $0x140] sm:$0xff]  ;;  %v192_v27 = vmul.f32 %v55_v21, %v55_v21 }
  0x32   :  { %v105_v38 = vadd.f32 %v104_v34, %v41_v29  ;;  %v240_v40 = vadd.f32 %v239_v36, %v177_v31  ;;  %v57_v29 = vld [vmem:[%s527_s0 + $0x148] sm:$0xff]  ;;  %v193_v31 = vmul.f32 %v56_v25, %v56_v25 }
  0x34   :  { %v106_v42 = vadd.f32 %v105_v38, %v42_v33  ;;  %v241_v44 = vadd.f32 %v240_v40, %v178_v35  ;;  %v58_v33 = vld [vmem:[%s527_s0 + $0x150] sm:$0xff]  ;;  %v194_v35 = vmul.f32 %v57_v29, %v57_v29 }
  0x36   :  { %v107_v46 = vadd.f32 %v106_v42, %v43_v37  ;;  %v242_v48 = vadd.f32 %v241_v44, %v179_v39  ;;  %v59_v37 = vld [vmem:[%s527_s0 + $0x158] sm:$0xff]  ;;  %v195_v39 = vmul.f32 %v58_v33, %v58_v33 }
  0x38   :  { %v108_v50 = vadd.f32 %v107_v46, %v44_v41  ;;  %v243_v52 = vadd.f32 %v242_v48, %v180_v43  ;;  %v60_v41 = vld [vmem:[%s527_s0 + $0x160] sm:$0xff]  ;;  %v196_v43 = vmul.f32 %v59_v37, %v59_v37 }
  0x3a   :  { %v109_v54 = vadd.f32 %v108_v50, %v45_v45  ;;  %v244_v56 = vadd.f32 %v243_v52, %v181_v47  ;;  %v61_v45 = vld [vmem:[%s527_s0 + $0x168] sm:$0xff]  ;;  %v197_v47 = vmul.f32 %v60_v41, %v60_v41 }
  0x3c   :  { %v110_v58 = vadd.f32 %v109_v54, %v46_v49  ;;  %v245_v60 = vadd.f32 %v244_v56, %v182_v51  ;;  %v62_v49 = vld [vmem:[%s527_s0 + $0x170] sm:$0xff]  ;;  %v198_v51 = vmul.f32 %v61_v45, %v61_v45 }
  0x3e   :  { %v111_v62 = vadd.f32 %v110_v58, %v47_v53  ;;  %v246_v0 = vadd.f32 %v245_v60, %v183_v55  ;;  %v63_v53 = vld [vmem:[%s527_s0 + $0x178] sm:$0xff]  ;;  %v199_v55 = vmul.f32 %v62_v49, %v62_v49 }
  0x40   :  { %v112_v2 = vadd.f32 %v111_v62, %v48_v57  ;;  %v247_v4 = vadd.f32 %v246_v0, %v184_v59  ;;  %v64_v57 = vld [vmem:[%s527_s0 + $0x180] sm:$0xff]  ;;  %v200_v59 = vmul.f32 %v63_v53, %v63_v53 }
  0x42   :  { %v113_v6 = vadd.f32 %v112_v2, %v49_v61  ;;  %v248_v8 = vadd.f32 %v247_v4, %v185_v63  ;;  %v65_v61 = vld [vmem:[%s527_s0 + $0x188] sm:$0xff]  ;;  %v201_v63 = vmul.f32 %v64_v57, %v64_v57 }
  0x44   :  { %v114_v10 = vadd.f32 %v113_v6, %v50_v1  ;;  %v249_v12 = vadd.f32 %v248_v8, %v186_v3  ;;  %v66_v1 = vld [vmem:[%s527_s0 + $0x190] sm:$0xff]  ;;  %v202_v3 = vmul.f32 %v65_v61, %v65_v61 }
  0x46   :  { %v115_v14 = vadd.f32 %v114_v10, %v51_v5  ;;  %v250_v16 = vadd.f32 %v249_v12, %v187_v7  ;;  %v67_v5 = vld [vmem:[%s527_s0 + $0x198] sm:$0xff]  ;;  %v203_v7 = vmul.f32 %v66_v1, %v66_v1 }
  0x48   :  { %v116_v18 = vadd.f32 %v115_v14, %v52_v9  ;;  %v251_v20 = vadd.f32 %v250_v16, %v188_v11  ;;  %v68_v9 = vld [vmem:[%s527_s0 + $0x1a0] sm:$0xff]  ;;  %v204_v11 = vmul.f32 %v67_v5, %v67_v5 }
  0x4a   :  { %v117_v22 = vadd.f32 %v116_v18, %v53_v13  ;;  %v252_v24 = vadd.f32 %v251_v20, %v189_v15  ;;  %v69_v13 = vld [vmem:[%s527_s0 + $0x1a8] sm:$0xff]  ;;  %v205_v15 = vmul.f32 %v68_v9, %v68_v9 }
  0x4c   :  { %v118_v26 = vadd.f32 %v117_v22, %v54_v17  ;;  %v253_v28 = vadd.f32 %v252_v24, %v190_v19  ;;  %v70_v17 = vld [vmem:[%s527_s0 + $0x1b0] sm:$0xff]  ;;  %v206_v19 = vmul.f32 %v69_v13, %v69_v13 }
  0x4e   :  { %v119_v30 = vadd.f32 %v118_v26, %v55_v21  ;;  %v254_v32 = vadd.f32 %v253_v28, %v191_v23  ;;  %v71_v21 = vld [vmem:[%s527_s0 + $0x1b8] sm:$0xff]  ;;  %v207_v23 = vmul.f32 %v70_v17, %v70_v17 }
  0x50   :  { %v120_v34 = vadd.f32 %v119_v30, %v56_v25  ;;  %v255_v36 = vadd.f32 %v254_v32, %v192_v27  ;;  %v72_v25 = vld [vmem:[%s527_s0 + $0x1c0] sm:$0xff]  ;;  %v208_v27 = vmul.f32 %v71_v21, %v71_v21 }
  0x52   :  { %v121_v38 = vadd.f32 %v120_v34, %v57_v29  ;;  %v256_v40 = vadd.f32 %v255_v36, %v193_v31  ;;  %v73_v29 = vld [vmem:[%s527_s0 + $0x1c8] sm:$0xff]  ;;  %v209_v31 = vmul.f32 %v72_v25, %v72_v25 }
  0x54   :  { %v122_v42 = vadd.f32 %v121_v38, %v58_v33  ;;  %v257_v44 = vadd.f32 %v256_v40, %v194_v35  ;;  %v74_v33 = vld [vmem:[%s527_s0 + $0x1d0] sm:$0xff]  ;;  %v210_v35 = vmul.f32 %v73_v29, %v73_v29 }
  0x56   :  { %v123_v46 = vadd.f32 %v122_v42, %v59_v37  ;;  %v258_v48 = vadd.f32 %v257_v44, %v195_v39  ;;  %v75_v37 = vld [vmem:[%s527_s0 + $0x1d8] sm:$0xff]  ;;  %v211_v39 = vmul.f32 %v74_v33, %v74_v33 }
  0x58   :  { %v124_v50 = vadd.f32 %v123_v46, %v60_v41  ;;  %v259_v52 = vadd.f32 %v258_v48, %v196_v43  ;;  %v76_v41 = vld [vmem:[%s527_s0 + $0x1e0] sm:$0xff]  ;;  %v212_v43 = vmul.f32 %v75_v37, %v75_v37 }
  0x5a   :  { %v125_v54 = vadd.f32 %v124_v50, %v61_v45  ;;  %v260_v56 = vadd.f32 %v259_v52, %v197_v47  ;;  %v77_v45 = vld [vmem:[%s527_s0 + $0x1e8] sm:$0xff]  ;;  %v213_v47 = vmul.f32 %v76_v41, %v76_v41 }
  0x5c   :  { %v126_v58 = vadd.f32 %v125_v54, %v62_v49  ;;  %v261_v60 = vadd.f32 %v260_v56, %v198_v51  ;;  %v78_v49 = vld [vmem:[%s527_s0 + $0x1f0] sm:$0xff]  ;;  %v214_v51 = vmul.f32 %v77_v45, %v77_v45 }
  0x5e   :  { %v127_v62 = vadd.f32 %v126_v58, %v63_v53  ;;  %v262_v0 = vadd.f32 %v261_v60, %v199_v55  ;;  %v79_v53 = vld [vmem:[%s527_s0 + $0x1f8] sm:$0xff]  ;;  %v215_v55 = vmul.f32 %v78_v49, %v78_v49 }
  0x5f   :  { %v216_v58 = vmul.f32 %v79_v53, %v79_v53 }
  0x60   :  { %v128_v2 = vadd.f32 %v127_v62, %v64_v57  ;;  %v263_v4 = vadd.f32 %v262_v0, %v200_v59 }
  0x62   :  { %v129_v6 = vadd.f32 %v128_v2, %v65_v61  ;;  %v264_v8 = vadd.f32 %v263_v4, %v201_v63 }
  0x64   :  { %v130_v10 = vadd.f32 %v129_v6, %v66_v1  ;;  %v265_v12 = vadd.f32 %v264_v8, %v202_v3 }
  0x66   :  { %v131_v14 = vadd.f32 %v130_v10, %v67_v5  ;;  %v266_v16 = vadd.f32 %v265_v12, %v203_v7  ;;  %v80_v7 = vld [vmem:[#allocation2] sm:$0x1]  ;;  %v152_v12 = vld [vmem:[#allocation3] sm:$0x1] }
  0x68   :  { %v132_v18 = vadd.f32 %v131_v14, %v68_v9  ;;  %v267_v20 = vadd.f32 %v266_v16, %v204_v11 }
  0x6a   :  { %v133_v22 = vadd.f32 %v132_v18, %v69_v13  ;;  %v268_v24 = vadd.f32 %v267_v20, %v205_v15 }
  0x6c   :  { %v134_v26 = vadd.f32 %v133_v22, %v70_v17  ;;  %v269_v28 = vadd.f32 %v268_v24, %v206_v19 }
  0x6e   :  { %v135_v30 = vadd.f32 %v134_v26, %v71_v21  ;;  %v270_v32 = vadd.f32 %v269_v28, %v207_v23 }
  0x70   :  { %v136_v34 = vadd.f32 %v135_v30, %v72_v25  ;;  %v271_v36 = vadd.f32 %v270_v32, %v208_v27 }
  0x72   :  { %v137_v38 = vadd.f32 %v136_v34, %v73_v29  ;;  %v272_v40 = vadd.f32 %v271_v36, %v209_v31 }
  0x74   :  { %v138_v42 = vadd.f32 %v137_v38, %v74_v33  ;;  %v273_v44 = vadd.f32 %v272_v40, %v210_v35 }
  0x76   :  { %v139_v46 = vadd.f32 %v138_v42, %v75_v37  ;;  %v274_v48 = vadd.f32 %v273_v44, %v211_v39 }
  0x78   :  { %v140_v50 = vadd.f32 %v139_v46, %v76_v41  ;;  %v275_v52 = vadd.f32 %v274_v48, %v212_v43 }
  0x7a   :  { %v141_v54 = vadd.f32 %v140_v50, %v77_v45  ;;  %v276_v56 = vadd.f32 %v275_v52, %v213_v47 }
  0x7c   :  { %v142_v57 = vadd.f32 %v141_v54, %v78_v49  ;;  %v277_v59 = vadd.f32 %v276_v56, %v214_v51 }
  0x7e   :  { %v143_v60 = vadd.f32 %v142_v57, %v79_v53  ;;  %v278_v61 = vadd.f32 %v277_v59, %v215_v55 }
  0x80   :  { %v144_v62 = vrot.slane %v143_v60, 4  ;;  %v279_v63 = vadd.f32 %v278_v61, %v216_v58 }
  0x82   :  { %v145_v0 = vadd.f32 %v144_v62, %v143_v60  ;;  %v280_v1 = vrot.slane %v279_v63, 4 }
  0x84   :  { %v146_v2 = vrot.slane %v145_v0, 2  ;;  %v281_v3 = vadd.f32 %v280_v1, %v279_v63 }
  0x86   :  { %v147_v4 = vadd.f32 %v146_v2, %v145_v0  ;;  %v282_v5 = vrot.slane %v281_v3, 2 }
  0x88   :  { %v148_v6 = vrot.slane %v147_v4, 1  ;;  %v283_v8 = vadd.f32 %v282_v5, %v281_v3 }
  0x8a   :  { %v149_v9 = vadd.f32 %v148_v6, %v147_v4  ;;  %v284_v10 = vrot.slane %v283_v8, 1 }
  0x8c   :  { %v150_v11 = vadd.f32 %v149_v9, %v80_v7  ;;  %v285_v13 = vadd.f32 %v284_v10, %v283_v8 }
  0x8e   :  { %151 = vst [vmem:[#allocation2] sm:$0x1] %v150_v11  ;;  %v286_v14 = vadd.f32 %v285_v13, %v152_v12 }
  0x90   :  { %287 = vst [vmem:[#allocation3] sm:$0x1] %v286_v14 }
  0x95   :  { %v291_v15 = vld [vmem:[#allocation2] sm:$0x1] }
  0x96   :  { %v292_v16 = vmul.f32 0.001953125, %v291_v15 }
  0x97   :  { %v293_v17 = vld [vmem:[#allocation3] sm:$0x1] }
  0x98   :  { %v295_v18 = vmul.f32 %v292_v16, %v292_v16  ;;  %298 = vst [vmem:[%s528_s1] sm:$0x1] %v292_v16  ;;  %v294_v19 = vmul.f32 0.001953125, %v293_v17 }
  0x9a   :  { %v296_v20 = vsub.f32 %v294_v19, %v295_v18 }
  0x9c   :  { %v297_v21 = vmax.f32 %v296_v20, 0.0 }
  0x9e   :  { %v299_v22 = vadd.f32 1e-05, %v297_v21 }
  0xa0   :  { %311 = vrsqrt.f32 %v299_v22 }
  0xad   :  { %v312_v23 = vpop.eup %311 }
  0xae   :  { %301 = vst [vmem:[%s529_s2] sm:$0x1] %v312_v23 }

// kernel: generator_forward.22
= control target key start
LH: loop header
LB: loop body
LE: loop exit
PB: predicated region body
PF: predicated region fallthrough
CT: control target
= control target key end

     0   :  { %v159_v0 = vlaneseq  ;;  %s1536_s0 = inlined_call_operand.vmem [shape: f32[512,128], index: 0, kind: input, shape index: {}]   ;;  %s1537_s1 = inlined_call_operand.vmem [shape: f32[1,128], index: 1, kind: input, shape index: {}]   ;;  %s1538_s2 = inlined_call_operand.vmem [shape: f32[1,128], index: 2, kind: input, shape index: {}]   ;;  %s1539_s3 = inlined_call_operand.vmem [shape: f32[1,128], index: 3, kind: input, shape index: {}]   ;;  %s1540_s4 = inlined_call_operand.vmem [shape: f32[1,128], index: 4, kind: input, shape index: {}]   ;;  %s1541_s5 = inlined_call_operand.vmem [shape: bf16[512,128], index: 5, kind: output, shape index: {}]  }
   0x1   :  { %v20_v1 = vld [vmem:[%s1536_s0] sm:$0xff]  ;;  %v21_v2 = vld [vmem:[%s1536_s0 + $0x8] sm:$0xff]  ;;  %v22_v7 = vld [vmem:[%s1536_s0 + $0x10] sm:$0xff] }
   0x2   :  { %v84_v3 = vld [vmem:[%s1538_s2] sm:$0x1]  ;;  %v160_v6 = vshrl.u32 %v159_v0, 7  ;;  %v23_v10 = vld [vmem:[%s1536_s0 + $0x18] sm:$0xff]  ;;  %v25_v16 = vld [vmem:[%s1536_s0 + $0x28] sm:$0xff] }
   0x3   :  { %v85_v4 = vld [vmem:[%s1539_s3] sm:$0x1]  ;;  %v26_v17 = vld [vmem:[%s1536_s0 + $0x30] sm:$0xff]  ;;  %v27_v18 = vld [vmem:[%s1536_s0 + $0x38] sm:$0xff] }
   0x4   :  { %v1053_v5 = vld [vmem:[%s1537_s1] ss:$0 sm:$0xff]  ;;  %v86_v8 = vmul.f32 %v85_v4, %v84_v3  ;;  %v161_v13 = vsub.s32 0, %v160_v6  ;;  %v29_v24 = vld [vmem:[%s1536_s0 + $0x48] sm:$0xff]  ;;  %v30_v25 = vld [vmem:[%s1536_s0 + $0x50] sm:$0xff] }
   0x5   :  { %v94_v9 = vsub.f32 %v20_v1, %v1053_v5  ;;  %v24_v11 = vld [vmem:[%s1536_s0 + $0x20] sm:$0xff]  ;;  %v95_v12 = vsub.f32 %v21_v2, %v1053_v5  ;;  %v96_v14 = vsub.f32 %v22_v7, %v1053_v5  ;;  %v97_v15 = vsub.f32 %v23_v10, %v1053_v5  ;;  %v31_v29 = vld [vmem:[%s1536_s0 + $0x58] sm:$0xff]  ;;  %v33_v31 = vld [vmem:[%s1536_s0 + $0x68] sm:$0xff] }
   0x6   :  { %v98_v19 = vsub.f32 %v24_v11, %v1053_v5  ;;  %v99_v20 = vsub.f32 %v25_v16, %v1053_v5  ;;  %v100_v21 = vsub.f32 %v26_v17, %v1053_v5  ;;  %v101_v22 = vsub.f32 %v27_v18, %v1053_v5  ;;  %v28_v23 = vld [vmem:[%s1536_s0 + $0x40] sm:$0xff]  ;;  %v34_v1 = vld [vmem:[%s1536_s0 + $0x70] sm:$0xff]  ;;  %v35_v2 = vld [vmem:[%s1536_s0 + $0x78] sm:$0xff] }
   0x7   :  { %v1090_v26 = vrot.slane %v86_v8, %v161_v13  ;;  %v102_v27 = vsub.f32 %v28_v23, %v1053_v5  ;;  %v103_v28 = vsub.f32 %v29_v24, %v1053_v5  ;;  %v32_v30 = vld [vmem:[%s1536_s0 + $0x60] sm:$0xff]  ;;  %v104_v33 = vsub.f32 %v30_v25, %v1053_v5 }
   0x8   :  { %v1106_v32 = vld [vmem:[%s1540_s4] ss:$0 sm:$0xff]  ;;  %v105_v34 = vsub.f32 %v31_v29, %v1053_v5  ;;  %v106_v35 = vsub.f32 %v32_v30, %v1053_v5  ;;  %v107_v36 = vsub.f32 %v33_v31, %v1053_v5 }
   0x9   :  { %v164_v37 = vmul.f32 %v1090_v26, %v94_v9  ;;  %v165_v38 = vmul.f32 %v1090_v26, %v95_v12  ;;  %v166_v39 = vmul.f32 %v1090_v26, %v96_v14  ;;  %v167_v40 = vmul.f32 %v1090_v26, %v97_v15  ;;  %v36_v16 = vld [vmem:[%s1536_s0 + $0x80] sm:$0xff] }
   0xa   :  { %v168_v41 = vmul.f32 %v1090_v26, %v98_v19  ;;  %v169_v42 = vmul.f32 %v1090_v26, %v99_v20  ;;  %v170_v43 = vmul.f32 %v1090_v26, %v100_v21  ;;  %v171_v44 = vmul.f32 %v1090_v26, %v101_v22  ;;  %v37_v21 = vld [vmem:[%s1536_s0 + $0x88] sm:$0xff] }
   0xb   :  { %v235_v45 = vadd.f32 %v1106_v32, %v164_v37  ;;  %v236_v46 = vadd.f32 %v1106_v32, %v165_v38  ;;  %v237_v47 = vadd.f32 %v1106_v32, %v166_v39  ;;  %v238_v48 = vadd.f32 %v1106_v32, %v167_v40  ;;  %v41_v39 = vld [vmem:[%s1536_s0 + $0xa8] sm:$0xff] }
   0xc   :  { %v239_v49 = vadd.f32 %v1106_v32, %v168_v41  ;;  %v240_v50 = vadd.f32 %v1106_v32, %v169_v42  ;;  %v241_v51 = vadd.f32 %v1106_v32, %v170_v43  ;;  %v242_v52 = vadd.f32 %v1106_v32, %v171_v44  ;;  %v42_v44 = vld [vmem:[%s1536_s0 + $0xb0] sm:$0xff] }
   0xd   :  { %v299_v53 = vmax.f32 %v235_v45, 0.0  ;;  %v300_v54 = vmax.f32 %v236_v46, 0.0  ;;  %v301_v55 = vmax.f32 %v237_v47, 0.0  ;;  %v302_v56 = vmax.f32 %v238_v48, 0.0 }
   0xe   :  { %v303_v57 = vmax.f32 %v239_v49, 0.0  ;;  %v304_v58 = vmax.f32 %v240_v50, 0.0  ;;  %v305_v59 = vmax.f32 %v241_v51, 0.0  ;;  %v306_v60 = vmax.f32 %v242_v52, 0.0 }
   0xf   :  { %v820_v61 = vpack.c.bf16 %v300_v54, %v299_v53  ;;  %v825_v62 = vpack.c.bf16 %v302_v56, %v301_v55  ;;  %v172_v63 = vmul.f32 %v1090_v26, %v102_v27  ;;  %v173_v0 = vmul.f32 %v1090_v26, %v103_v28  ;;  %v38_v27 = vld [vmem:[%s1536_s0 + $0x90] sm:$0xff]  ;;  %v39_v28 = vld [vmem:[%s1536_s0 + $0x98] sm:$0xff] }
  0x10   :  { %v830_v3 = vpack.c.bf16 %v304_v58, %v303_v57  ;;  %v835_v4 = vpack.c.bf16 %v306_v60, %v305_v59  ;;  %v174_v6 = vmul.f32 %v1090_v26, %v104_v33  ;;  %v175_v7 = vmul.f32 %v1090_v26, %v105_v34  ;;  %v40_v34 = vld [vmem:[%s1536_s0 + $0xa0] sm:$0xff]  ;;  %v43_v53 = vld [vmem:[%s1536_s0 + $0xb8] sm:$0xff] }
  0x11   :  { %821 = vst [vmem:[%s1541_s5] sm:$0xff] %v820_v61   ;;  %977 = vst [vmem:[%s1541_s5 + $0x8] sm:$0xff] %v825_v62   ;;  %v243_v8 = vadd.f32 %v1106_v32, %v172_v63  ;;  %v244_v9 = vadd.f32 %v1106_v32, %v173_v0  ;;  %v176_v10 = vmul.f32 %v1090_v26, %v106_v35  ;;  %v44_v58 = vld [vmem:[%s1536_s0 + $0xc0] sm:$0xff] }
  0x12   :  { %v177_v11 = vmul.f32 %v1090_v26, %v107_v36  ;;  %978 = vst [vmem:[%s1541_s5 + $0x10] sm:$0xff] %v830_v3   ;;  %979 = vst [vmem:[%s1541_s5 + $0x18] sm:$0xff] %v835_v4   ;;  %v245_v12 = vadd.f32 %v1106_v32, %v174_v6  ;;  %v246_v13 = vadd.f32 %v1106_v32, %v175_v7  ;;  %v45_v3 = vld [vmem:[%s1536_s0 + $0xc8] sm:$0xff] }
  0x13   :  { %v108_v14 = vsub.f32 %v34_v1, %v1053_v5  ;;  %v109_v15 = vsub.f32 %v35_v2, %v1053_v5  ;;  %v307_v17 = vmax.f32 %v243_v8, 0.0  ;;  %v308_v18 = vmax.f32 %v244_v9, 0.0  ;;  %v46_v9 = vld [vmem:[%s1536_s0 + $0xd0] sm:$0xff] }
  0x14   :  { %v247_v19 = vadd.f32 %v1106_v32, %v176_v10  ;;  %v248_v20 = vadd.f32 %v1106_v32, %v177_v11  ;;  %v309_v22 = vmax.f32 %v245_v12, 0.0  ;;  %v310_v23 = vmax.f32 %v246_v13, 0.0  ;;  %v47_v10 = vld [vmem:[%s1536_s0 + $0xd8] sm:$0xff] }
  0x15   :  { %v178_v24 = vmul.f32 %v1090_v26, %v108_v14  ;;  %v179_v25 = vmul.f32 %v1090_v26, %v109_v15  ;;  %v840_v29 = vpack.c.bf16 %v308_v18, %v307_v17  ;;  %v110_v33 = vsub.f32 %v36_v16, %v1053_v5  ;;  %v48_v15 = vld [vmem:[%s1536_s0 + $0xe0] sm:$0xff] }
  0x16   :  { %v311_v30 = vmax.f32 %v247_v19, 0.0  ;;  %v312_v31 = vmax.f32 %v248_v20, 0.0  ;;  %v845_v35 = vpack.c.bf16 %v310_v23, %v309_v22  ;;  %v111_v38 = vsub.f32 %v37_v21, %v1053_v5  ;;  %v49_v20 = vld [vmem:[%s1536_s0 + $0xe8] sm:$0xff] }
  0x17   :  { %v249_v36 = vadd.f32 %v1106_v32, %v178_v24  ;;  %v250_v37 = vadd.f32 %v1106_v32, %v179_v25  ;;  %980 = vst [vmem:[%s1541_s5 + $0x20] sm:$0xff] %v840_v29   ;;  %v180_v41 = vmul.f32 %v1090_v26, %v110_v33  ;;  %v112_v42 = vsub.f32 %v38_v27, %v1053_v5  ;;  %v50_v25 = vld [vmem:[%s1536_s0 + $0xf0] sm:$0xff] }
  0x18   :  { %v850_v40 = vpack.c.bf16 %v312_v31, %v311_v30  ;;  %v113_v43 = vsub.f32 %v39_v28, %v1053_v5  ;;  %981 = vst [vmem:[%s1541_s5 + $0x28] sm:$0xff] %v845_v35   ;;  %v181_v47 = vmul.f32 %v1090_v26, %v111_v38  ;;  %v114_v48 = vsub.f32 %v40_v34, %v1053_v5 }
  0x19   :  { %v313_v45 = vmax.f32 %v249_v36, 0.0  ;;  %v314_v46 = vmax.f32 %v250_v37, 0.0  ;;  %v251_v49 = vadd.f32 %v1106_v32, %v180_v41  ;;  %v182_v50 = vmul.f32 %v1090_v26, %v112_v42  ;;  %v51_v36 = vld [vmem:[%s1536_s0 + $0xf8] sm:$0xff]  ;;  %v52_v41 = vld [vmem:[%s1536_s0 + $0x100] sm:$0xff] }
  0x1a   :  { %982 = vst [vmem:[%s1541_s5 + $0x30] sm:$0xff] %v850_v40   ;;  %v183_v51 = vmul.f32 %v1090_v26, %v113_v43  ;;  %v115_v52 = vsub.f32 %v41_v39, %v1053_v5  ;;  %v252_v55 = vadd.f32 %v1106_v32, %v181_v47  ;;  %v184_v56 = vmul.f32 %v1090_v26, %v114_v48 }
  0x1b   :  { %v855_v54 = vpack.c.bf16 %v314_v46, %v313_v45  ;;  %v116_v57 = vsub.f32 %v42_v44, %v1053_v5  ;;  %v315_v59 = vmax.f32 %v251_v49, 0.0  ;;  %v253_v60 = vadd.f32 %v1106_v32, %v182_v50  ;;  %v53_v50 = vld [vmem:[%s1536_s0 + $0x108] sm:$0xff] }
  0x1c   :  { %v254_v61 = vadd.f32 %v1106_v32, %v183_v51  ;;  %v185_v62 = vmul.f32 %v1090_v26, %v115_v52  ;;  %v316_v63 = vmax.f32 %v252_v55, 0.0  ;;  %v255_v0 = vadd.f32 %v1106_v32, %v184_v56  ;;  %v54_v55 = vld [vmem:[%s1536_s0 + $0x110] sm:$0xff]  ;;  %v55_v56 = vld [vmem:[%s1536_s0 + $0x118] sm:$0xff] }
  0x1d   :  { %983 = vst [vmem:[%s1541_s5 + $0x38] sm:$0xff] %v855_v54   ;;  %v117_v1 = vsub.f32 %v43_v53, %v1053_v5  ;;  %v186_v2 = vmul.f32 %v1090_v26, %v116_v57  ;;  %v317_v4 = vmax.f32 %v253_v60, 0.0  ;;  %v118_v8 = vsub.f32 %v44_v58, %v1053_v5 }
  0x1e   :  { %v318_v6 = vmax.f32 %v254_v61, 0.0  ;;  %v256_v7 = vadd.f32 %v1106_v32, %v185_v62  ;;  %v860_v11 = vpack.c.bf16 %v316_v63, %v315_v59  ;;  %v319_v12 = vmax.f32 %v255_v0, 0.0  ;;  %v56_v61 = vld [vmem:[%s1536_s0 + $0x120] sm:$0xff] }
  0x1f   :  { %v187_v13 = vmul.f32 %v1090_v26, %v117_v1  ;;  %v257_v14 = vadd.f32 %v1106_v32, %v186_v2  ;;  %v119_v18 = vsub.f32 %v45_v3, %v1053_v5  ;;  %v188_v19 = vmul.f32 %v1090_v26, %v118_v8  ;;  %v57_v2 = vld [vmem:[%s1536_s0 + $0x128] sm:$0xff]  ;;  %v58_v8 = vld [vmem:[%s1536_s0 + $0x130] sm:$0xff] }
  0x20   :  { %v865_v16 = vpack.c.bf16 %v318_v6, %v317_v4  ;;  %v320_v17 = vmax.f32 %v256_v7, 0.0  ;;  %984 = vst [vmem:[%s1541_s5 + $0x40] sm:$0xff] %v860_v11   ;;  %v120_v23 = vsub.f32 %v46_v9, %v1053_v5  ;;  %v121_v24 = vsub.f32 %v47_v10, %v1053_v5 }
  0x21   :  { %v258_v21 = vadd.f32 %v1106_v32, %v187_v13  ;;  %v321_v22 = vmax.f32 %v257_v14, 0.0  ;;  %v189_v28 = vmul.f32 %v1090_v26, %v119_v18  ;;  %v259_v29 = vadd.f32 %v1106_v32, %v188_v19 }
  0x22   :  { %985 = vst [vmem:[%s1541_s5 + $0x48] sm:$0xff] %v865_v16   ;;  %v870_v27 = vpack.c.bf16 %v320_v17, %v319_v12  ;;  %v122_v30 = vsub.f32 %v48_v15, %v1053_v5  ;;  %v190_v33 = vmul.f32 %v1090_v26, %v120_v23  ;;  %v191_v34 = vmul.f32 %v1090_v26, %v121_v24  ;;  %v59_v17 = vld [vmem:[%s1536_s0 + $0x138] sm:$0xff] }
  0x23   :  { %v322_v31 = vmax.f32 %v258_v21, 0.0  ;;  %v123_v35 = vsub.f32 %v49_v20, %v1053_v5  ;;  %v260_v37 = vadd.f32 %v1106_v32, %v189_v28  ;;  %v323_v38 = vmax.f32 %v259_v29, 0.0 }
  0x24   :  { %986 = vst [vmem:[%s1541_s5 + $0x50] sm:$0xff] %v870_v27   ;;  %v192_v39 = vmul.f32 %v1090_v26, %v122_v30  ;;  %v124_v40 = vsub.f32 %v50_v25, %v1053_v5  ;;  %v261_v43 = vadd.f32 %v1106_v32, %v190_v33  ;;  %v262_v44 = vadd.f32 %v1106_v32, %v191_v34  ;;  %v61_v33 = vld [vmem:[%s1536_s0 + $0x148] sm:$0xff] }
  0x25   :  { %v875_v42 = vpack.c.bf16 %v322_v31, %v321_v22  ;;  %v193_v45 = vmul.f32 %v1090_v26, %v123_v35  ;;  %v324_v46 = vmax.f32 %v260_v37, 0.0  ;;  %v125_v48 = vsub.f32 %v51_v36, %v1053_v5  ;;  %v60_v22 = vld [vmem:[%s1536_s0 + $0x140] sm:$0xff] }
  0x26   :  { %v263_v47 = vadd.f32 %v1106_v32, %v192_v39  ;;  %v194_v49 = vmul.f32 %v1090_v26, %v124_v40  ;;  %v325_v51 = vmax.f32 %v261_v43, 0.0  ;;  %v326_v52 = vmax.f32 %v262_v44, 0.0  ;;  %v63_v39 = vld [vmem:[%s1536_s0 + $0x158] sm:$0xff]  ;;  %v64_v44 = vld [vmem:[%s1536_s0 + $0x160] sm:$0xff] }
  0x27   :  { %987 = vst [vmem:[%s1541_s5 + $0x58] sm:$0xff] %v875_v42   ;;  %v264_v53 = vadd.f32 %v1106_v32, %v193_v45  ;;  %v126_v54 = vsub.f32 %v52_v41, %v1053_v5  ;;  %v880_v57 = vpack.c.bf16 %v324_v46, %v323_v38  ;;  %v195_v59 = vmul.f32 %v1090_v26, %v125_v48  ;;  %v62_v38 = vld [vmem:[%s1536_s0 + $0x150] sm:$0xff] }
  0x28   :  { %v327_v58 = vmax.f32 %v263_v47, 0.0  ;;  %v265_v60 = vadd.f32 %v1106_v32, %v194_v49  ;;  %v885_v62 = vpack.c.bf16 %v326_v52, %v325_v51  ;;  %v127_v0 = vsub.f32 %v53_v50, %v1053_v5  ;;  %v65_v49 = vld [vmem:[%s1536_s0 + $0x168] sm:$0xff] }
  0x29   :  { %v328_v63 = vmax.f32 %v264_v53, 0.0  ;;  %v196_v1 = vmul.f32 %v1090_v26, %v126_v54  ;;  %988 = vst [vmem:[%s1541_s5 + $0x60] sm:$0xff] %v880_v57   ;;  %v266_v3 = vadd.f32 %v1106_v32, %v195_v59  ;;  %v128_v6 = vsub.f32 %v54_v55, %v1053_v5  ;;  %v66_v54 = vld [vmem:[%s1536_s0 + $0x170] sm:$0xff] }
  0x2a   :  { %v329_v4 = vmax.f32 %v265_v60, 0.0  ;;  %v129_v7 = vsub.f32 %v55_v56, %v1053_v5  ;;  %989 = vst [vmem:[%s1541_s5 + $0x68] sm:$0xff] %v885_v62   ;;  %v197_v10 = vmul.f32 %v1090_v26, %v127_v0  ;;  %v130_v12 = vsub.f32 %v56_v61, %v1053_v5 }
  0x2b   :  { %v890_v9 = vpack.c.bf16 %v328_v63, %v327_v58  ;;  %v267_v11 = vadd.f32 %v1106_v32, %v196_v1  ;;  %v330_v13 = vmax.f32 %v266_v3, 0.0  ;;  %v198_v14 = vmul.f32 %v1090_v26, %v128_v6  ;;  %v67_v63 = vld [vmem:[%s1536_s0 + $0x178] sm:$0xff] }
  0x2c   :  { %v199_v15 = vmul.f32 %v1090_v26, %v129_v7  ;;  %v131_v16 = vsub.f32 %v57_v2, %v1053_v5  ;;  %v268_v18 = vadd.f32 %v1106_v32, %v197_v10  ;;  %v200_v20 = vmul.f32 %v1090_v26, %v130_v12 }
  0x2d   :  { %990 = vst [vmem:[%s1541_s5 + $0x70] sm:$0xff] %v890_v9   ;;  %v331_v19 = vmax.f32 %v267_v11, 0.0  ;;  %v132_v21 = vsub.f32 %v58_v8, %v1053_v5  ;;  %v895_v23 = vpack.c.bf16 %v330_v13, %v329_v4  ;;  %v269_v24 = vadd.f32 %v1106_v32, %v198_v14  ;;  %v68_v4 = vld [vmem:[%s1536_s0 + $0x180] sm:$0xff]  ;;  %v69_v14 = vld [vmem:[%s1536_s0 + $0x188] sm:$0xff] }
  0x2e   :  { %v270_v25 = vadd.f32 %v1106_v32, %v199_v15  ;;  %v201_v27 = vmul.f32 %v1090_v26, %v131_v16  ;;  %v332_v28 = vmax.f32 %v268_v18, 0.0  ;;  %v271_v29 = vadd.f32 %v1106_v32, %v200_v20  ;;  %v71_v20 = vld [vmem:[%s1536_s0 + $0x198] sm:$0xff] }
  0x2f   :  { %v133_v30 = vsub.f32 %v59_v17, %v1053_v5  ;;  %v202_v31 = vmul.f32 %v1090_v26, %v132_v21  ;;  %991 = vst [vmem:[%s1541_s5 + $0x78] sm:$0xff] %v895_v23   ;;  %v333_v34 = vmax.f32 %v269_v24, 0.0  ;;  %v134_v37 = vsub.f32 %v60_v22, %v1053_v5 }
  0x30   :  { %v334_v35 = vmax.f32 %v270_v25, 0.0  ;;  %v272_v36 = vadd.f32 %v1106_v32, %v201_v27  ;;  %v900_v40 = vpack.c.bf16 %v332_v28, %v331_v19  ;;  %v335_v41 = vmax.f32 %v271_v29, 0.0  ;;  %v70_v19 = vld [vmem:[%s1536_s0 + $0x190] sm:$0xff]  ;;  %v72_v25 = vld [vmem:[%s1536_s0 + $0x1a0] sm:$0xff] }
  0x31   :  { %v203_v42 = vmul.f32 %v1090_v26, %v133_v30  ;;  %v273_v43 = vadd.f32 %v1106_v32, %v202_v31  ;;  %v135_v47 = vsub.f32 %v61_v33, %v1053_v5  ;;  %v204_v48 = vmul.f32 %v1090_v26, %v134_v37  ;;  %v73_v31 = vld [vmem:[%s1536_s0 + $0x1a8] sm:$0xff]  ;;  %v74_v37 = vld [vmem:[%s1536_s0 + $0x1b0] sm:$0xff] }
  0x32   :  { %v905_v45 = vpack.c.bf16 %v334_v35, %v333_v34  ;;  %v336_v46 = vmax.f32 %v272_v36, 0.0  ;;  %992 = vst [vmem:[%s1541_s5 + $0x80] sm:$0xff] %v900_v40   ;;  %v136_v52 = vsub.f32 %v62_v38, %v1053_v5  ;;  %v137_v53 = vsub.f32 %v63_v39, %v1053_v5 }
  0x33   :  { %v274_v50 = vadd.f32 %v1106_v32, %v203_v42  ;;  %v337_v51 = vmax.f32 %v273_v43, 0.0  ;;  %v205_v56 = vmul.f32 %v1090_v26, %v135_v47  ;;  %v275_v57 = vadd.f32 %v1106_v32, %v204_v48 }
  0x34   :  { %993 = vst [vmem:[%s1541_s5 + $0x88] sm:$0xff] %v905_v45   ;;  %v910_v55 = vpack.c.bf16 %v336_v46, %v335_v41  ;;  %v138_v58 = vsub.f32 %v64_v44, %v1053_v5  ;;  %v206_v60 = vmul.f32 %v1090_v26, %v136_v52  ;;  %v207_v61 = vmul.f32 %v1090_v26, %v137_v53  ;;  %v75_v46 = vld [vmem:[%s1536_s0 + $0x1b8] sm:$0xff] }
  0x35   :  { %v338_v59 = vmax.f32 %v274_v50, 0.0  ;;  %v139_v62 = vsub.f32 %v65_v49, %v1053_v5  ;;  %v276_v0 = vadd.f32 %v1106_v32, %v205_v56  ;;  %v339_v1 = vmax.f32 %v275_v57, 0.0 }
  0x36   :  { %994 = vst [vmem:[%s1541_s5 + $0x90] sm:$0xff] %v910_v55   ;;  %v208_v2 = vmul.f32 %v1090_v26, %v138_v58  ;;  %v140_v3 = vsub.f32 %v66_v54, %v1053_v5  ;;  %v277_v7 = vadd.f32 %v1106_v32, %v206_v60  ;;  %v278_v8 = vadd.f32 %v1106_v32, %v207_v61  ;;  %v77_v60 = vld [vmem:[%s1536_s0 + $0x1c8] sm:$0xff] }
  0x37   :  { %v915_v6 = vpack.c.bf16 %v338_v59, %v337_v51  ;;  %v209_v9 = vmul.f32 %v1090_v26, %v139_v62  ;;  %v340_v10 = vmax.f32 %v276_v0, 0.0  ;;  %v141_v12 = vsub.f32 %v67_v63, %v1053_v5  ;;  %v76_v51 = vld [vmem:[%s1536_s0 + $0x1c0] sm:$0xff] }
  0x38   :  { %v279_v11 = vadd.f32 %v1106_v32, %v208_v2  ;;  %v210_v13 = vmul.f32 %v1090_v26, %v140_v3  ;;  %v341_v15 = vmax.f32 %v277_v7, 0.0  ;;  %v342_v16 = vmax.f32 %v278_v8, 0.0  ;;  %v79_v2 = vld [vmem:[%s1536_s0 + $0x1d8] sm:$0xff]  ;;  %v80_v8 = vld [vmem:[%s1536_s0 + $0x1e0] sm:$0xff] }
  0x39   :  { %995 = vst [vmem:[%s1541_s5 + $0x98] sm:$0xff] %v915_v6   ;;  %v280_v17 = vadd.f32 %v1106_v32, %v209_v9  ;;  %v142_v18 = vsub.f32 %v68_v4, %v1053_v5  ;;  %v920_v21 = vpack.c.bf16 %v340_v10, %v339_v1  ;;  %v211_v23 = vmul.f32 %v1090_v26, %v141_v12  ;;  %v78_v1 = vld [vmem:[%s1536_s0 + $0x1d0] sm:$0xff] }
  0x3a   :  { %v343_v22 = vmax.f32 %v279_v11, 0.0  ;;  %v281_v24 = vadd.f32 %v1106_v32, %v210_v13  ;;  %v925_v27 = vpack.c.bf16 %v342_v16, %v341_v15  ;;  %v143_v29 = vsub.f32 %v69_v14, %v1053_v5  ;;  %v81_v13 = vld [vmem:[%s1536_s0 + $0x1e8] sm:$0xff] }
  0x3b   :  { %v344_v28 = vmax.f32 %v280_v17, 0.0  ;;  %v212_v30 = vmul.f32 %v1090_v26, %v142_v18  ;;  %996 = vst [vmem:[%s1541_s5 + $0xa0] sm:$0xff] %v920_v21   ;;  %v282_v33 = vadd.f32 %v1106_v32, %v211_v23  ;;  %v144_v35 = vsub.f32 %v70_v19, %v1053_v5  ;;  %v82_v18 = vld [vmem:[%s1536_s0 + $0x1f0] sm:$0xff] }
  0x3c   :  { %v345_v34 = vmax.f32 %v281_v24, 0.0  ;;  %v145_v36 = vsub.f32 %v71_v20, %v1053_v5  ;;  %997 = vst [vmem:[%s1541_s5 + $0xa8] sm:$0xff] %v925_v27   ;;  %v213_v39 = vmul.f32 %v1090_v26, %v143_v29  ;;  %v146_v41 = vsub.f32 %v72_v25, %v1053_v5 }
  0x3d   :  { %v930_v38 = vpack.c.bf16 %v344_v28, %v343_v22  ;;  %v283_v40 = vadd.f32 %v1106_v32, %v212_v30  ;;  %v346_v42 = vmax.f32 %v282_v33, 0.0  ;;  %v214_v43 = vmul.f32 %v1090_v26, %v144_v35  ;;  %v83_v28 = vld [vmem:[%s1536_s0 + $0x1f8] sm:$0xff] }
  0x3e   :  { %v215_v44 = vmul.f32 %v1090_v26, %v145_v36  ;;  %v147_v45 = vsub.f32 %v73_v31, %v1053_v5  ;;  %v284_v47 = vadd.f32 %v1106_v32, %v213_v39  ;;  %v216_v49 = vmul.f32 %v1090_v26, %v146_v41 }
  0x3f   :  { %998 = vst [vmem:[%s1541_s5 + $0xb0] sm:$0xff] %v930_v38   ;;  %v347_v48 = vmax.f32 %v283_v40, 0.0  ;;  %v148_v50 = vsub.f32 %v74_v37, %v1053_v5  ;;  %v935_v52 = vpack.c.bf16 %v346_v42, %v345_v34  ;;  %v285_v53 = vadd.f32 %v1106_v32, %v214_v43 }
  0x40   :  { %v286_v54 = vadd.f32 %v1106_v32, %v215_v44  ;;  %v217_v55 = vmul.f32 %v1090_v26, %v147_v45  ;;  %v348_v56 = vmax.f32 %v284_v47, 0.0  ;;  %v287_v57 = vadd.f32 %v1106_v32, %v216_v49 }
  0x41   :  { %v149_v58 = vsub.f32 %v75_v46, %v1053_v5  ;;  %v218_v59 = vmul.f32 %v1090_v26, %v148_v50  ;;  %999 = vst [vmem:[%s1541_s5 + $0xb8] sm:$0xff] %v935_v52   ;;  %v349_v61 = vmax.f32 %v285_v53, 0.0  ;;  %v150_v0 = vsub.f32 %v76_v51, %v1053_v5 }
  0x42   :  { %v350_v62 = vmax.f32 %v286_v54, 0.0  ;;  %v288_v63 = vadd.f32 %v1106_v32, %v217_v55  ;;  %v940_v3 = vpack.c.bf16 %v348_v56, %v347_v48  ;;  %v351_v4 = vmax.f32 %v287_v57, 0.0 }
  0x43   :  { %v219_v6 = vmul.f32 %v1090_v26, %v149_v58  ;;  %v289_v7 = vadd.f32 %v1106_v32, %v218_v59  ;;  %v151_v11 = vsub.f32 %v77_v60, %v1053_v5  ;;  %v220_v12 = vmul.f32 %v1090_v26, %v150_v0 }
  0x44   :  { %v945_v9 = vpack.c.bf16 %v350_v62, %v349_v61  ;;  %v352_v10 = vmax.f32 %v288_v63, 0.0  ;;  %1000 = vst [vmem:[%s1541_s5 + $0xc0] sm:$0xff] %v940_v3   ;;  %v152_v16 = vsub.f32 %v78_v1, %v1053_v5  ;;  %v153_v17 = vsub.f32 %v79_v2, %v1053_v5 }
  0x45   :  { %v290_v14 = vadd.f32 %v1106_v32, %v219_v6  ;;  %v353_v15 = vmax.f32 %v289_v7, 0.0  ;;  %v221_v20 = vmul.f32 %v1090_v26, %v151_v11  ;;  %v291_v21 = vadd.f32 %v1106_v32, %v220_v12 }
  0x46   :  { %1001 = vst [vmem:[%s1541_s5 + $0xc8] sm:$0xff] %v945_v9   ;;  %v950_v19 = vpack.c.bf16 %v352_v10, %v351_v4  ;;  %v154_v22 = vsub.f32 %v80_v8, %v1053_v5  ;;  %v222_v24 = vmul.f32 %v1090_v26, %v152_v16  ;;  %v223_v25 = vmul.f32 %v1090_v26, %v153_v17 }
  0x47   :  { %v354_v23 = vmax.f32 %v290_v14, 0.0  ;;  %v155_v27 = vsub.f32 %v81_v13, %v1053_v5  ;;  %v292_v29 = vadd.f32 %v1106_v32, %v221_v20  ;;  %v355_v30 = vmax.f32 %v291_v21, 0.0 }
  0x48   :  { %1002 = vst [vmem:[%s1541_s5 + $0xd0] sm:$0xff] %v950_v19   ;;  %v224_v31 = vmul.f32 %v1090_v26, %v154_v22  ;;  %v156_v33 = vsub.f32 %v82_v18, %v1053_v5  ;;  %v293_v35 = vadd.f32 %v1106_v32, %v222_v24  ;;  %v294_v36 = vadd.f32 %v1106_v32, %v223_v25 }
  0x49   :  { %v955_v34 = vpack.c.bf16 %v354_v23, %v353_v15  ;;  %v225_v37 = vmul.f32 %v1090_v26, %v155_v27  ;;  %v356_v38 = vmax.f32 %v292_v29, 0.0  ;;  %v157_v40 = vsub.f32 %v83_v28, %v1053_v5 }
  0x4a   :  { %v295_v39 = vadd.f32 %v1106_v32, %v224_v31  ;;  %v226_v41 = vmul.f32 %v1090_v26, %v156_v33  ;;  %v357_v42 = vmax.f32 %v293_v35, 0.0  ;;  %v358_v43 = vmax.f32 %v294_v36, 0.0 }
  0x4b   :  { %1003 = vst [vmem:[%s1541_s5 + $0xd8] sm:$0xff] %v955_v34   ;;  %v296_v44 = vadd.f32 %v1106_v32, %v225_v37  ;;  %v960_v45 = vpack.c.bf16 %v356_v38, %v355_v30  ;;  %v227_v47 = vmul.f32 %v1090_v26, %v157_v40 }
  0x4c   :  { %v359_v46 = vmax.f32 %v295_v39, 0.0  ;;  %v297_v48 = vadd.f32 %v1106_v32, %v226_v41  ;;  %v965_v49 = vpack.c.bf16 %v358_v43, %v357_v42 }
  0x4d   :  { %v360_v50 = vmax.f32 %v296_v44, 0.0  ;;  %1004 = vst [vmem:[%s1541_s5 + $0xe0] sm:$0xff] %v960_v45   ;;  %v298_v5 = vadd.f32 %v1106_v32, %v227_v47 }
  0x4e   :  { %v361_v51 = vmax.f32 %v297_v48, 0.0  ;;  %1005 = vst [vmem:[%s1541_s5 + $0xe8] sm:$0xff] %v965_v49  }
  0x4f   :  { %v970_v52 = vpack.c.bf16 %v360_v50, %v359_v46  ;;  %v362_v53 = vmax.f32 %v298_v5, 0.0 }
  0x51   :  { %1006 = vst [vmem:[%s1541_s5 + $0xf0] sm:$0xff] %v970_v52   ;;  %v975_v26 = vpack.c.bf16 %v362_v53, %v361_v51 }
  0x53   :  { %1007 = vst [vmem:[%s1541_s5 + $0xf8] sm:$0xff] %v975_v26  }

// kernel: generator_forward.23
= control target key start
LH: loop header
LB: loop body
LE: loop exit
PB: predicated region body
PF: predicated region fallthrough
CT: control target
= control target key end

     0   :  { %s2552_s9 = smov 0   ;;  %s2554_s10 = smov 0   ;;  %s3662_s0 = inlined_call_operand.vmem [shape: bf16[512,128], index: 0, kind: input, shape index: {}]   ;;  %s3663_s1 = inlined_call_operand.vmem [shape: bf16[128,1024], index: 1, kind: input, shape index: {}]   ;;  %s3664_s2 = inlined_call_operand.vmem [shape: f32[512,1024], index: 2, kind: output, shape index: {}]  }
   0x1   :  { %s2556_s11 = smov 0   ;;  %s2558_s12 = smov 0  }
   0x2   :  { %s2560_s13 = smov 0  }
   0x3 LB: > { %s21_s14 = sadd.s32 1, %s2530_s12  ;;  %s2293_s15 = sadd.s32 4294967295, %s2534_s13   ;;  %s2534_s13 = sphi %s2560_s13, %s12_s13   ;;  %s2530_s12 = sphi %s2558_s12, %s3669_s12   ;;  %s2526_s11 = sphi %s2556_s11, %s3668_s11   ;;  %s2522_s10 = sphi %s2554_s10, %s3667_s10   ;;  %s2518_s9 = sphi %s2552_s9, %s3666_s9  }
   0x4   : > { %p22_p0 = scmp.ge.s32.totalorder %s21_s14, 2  ;;  %p64_p1 = scmp.ne.s32.totalorder %s2522_s10, %s2518_s9 }
   0x5   : > { %p65_p2 = scmp.eq.s32.totalorder %s2534_s13, 0  ;;  %p96_p4 = scmp.eq.s32.totalorder %s2293_s15, 1 }
   0x6   : > { %s3671_s14 = smov (%p22_p0, %s21_s14), 0  ;;  %s57_s17 = sadd.s32 1, %s2522_s10 }
   0x7   : > { %p66_p3 = por %p65_p2, %p64_p1  ;;  %s54_s16 = ssub.s32 %s2530_s12, %s3671_s14 }
   0x8   : > { %p55_p5 = scmp.eq.s32.totalorder %s54_s16, 0  ;;  %p2587_p6 = por %p96_p4, %p64_p1 }
   0x9   : > { %p2297_p7 = scmp.ge.s32.totalorder %s2534_s13, 2 }
   0xa   : > { %s2592_s19 = scalar_select %p55_p5, %s2522_s10, %s57_s17  }
   0xb   : > { %127 = sbr.rel (%p2297_p7) target bundleno = 36 (0x24), region = 20 }
  0x10   : > { %130 = sbr.rel (!%p66_p3) target bundleno = 36 (0x24), region = 24  ;;  %s132_s20 = sand.u32 (%p66_p3), 1, %s2522_s10  }
  0x11   : > { %s2373_s21 = sshll.u32 (%p66_p3), %s2530_s12, 4  ;;  %s2298_s22 = sshll.u32 (%p66_p3), %s132_s20, 8 }
  0x12   : > { %s2600_s25 = scalar_lea.vmem (%p66_p3), %s3663_s1, %s2373_s21  ;;  %s2605_s26 = scalar_lea.vmem (%p66_p3), [#allocation2], %s2298_s22 }
  0x13   : > { %v150_v0 = vld [vmem:[%s2600_s25] sm:$0xff] (%p66_p3)  ;;  %v152_v1 = vld [vmem:[%s2600_s25 + $0x8] sm:$0xff] (%p66_p3) }
  0x14   : > { %v154_v2 = vld [vmem:[%s2600_s25 + $0x20] sm:$0xff] (%p66_p3)  ;;  %151 = vst [vmem:[%s2605_s26] sm:$0xff] (%p66_p3), %v150_v0  ;;  %153 = vst [vmem:[%s2605_s26 + $0x8] sm:$0xff] (%p66_p3), %v152_v1  ;;  %v156_v3 = vld [vmem:[%s2600_s25 + $0x28] sm:$0xff] (%p66_p3) }
  0x15   : > { %155 = vst [vmem:[%s2605_s26 + $0x10] sm:$0xff] %v154_v2  ;;  %v158_v4 = vld [vmem:[%s2600_s25 + $0x40] sm:$0xff]  ;;  %v160_v5 = vld [vmem:[%s2600_s25 + $0x48] sm:$0xff]  ;;  %157 = vst [vmem:[%s2605_s26 + $0x18] sm:$0xff] %v156_v3 }
  0x16   : > { %159 = vst [vmem:[%s2605_s26 + $0x20] sm:$0xff] %v158_v4  ;;  %161 = vst [vmem:[%s2605_s26 + $0x28] sm:$0xff] %v160_v5  ;;  %v162_v6 = vld [vmem:[%s2600_s25 + $0x60] sm:$0xff]  ;;  %v164_v7 = vld [vmem:[%s2600_s25 + $0x68] sm:$0xff] }
  0x17   : > { %v166_v8 = vld [vmem:[%s2600_s25 + $0x80] sm:$0xff]  ;;  %163 = vst [vmem:[%s2605_s26 + $0x30] sm:$0xff] %v162_v6  ;;  %165 = vst [vmem:[%s2605_s26 + $0x38] sm:$0xff] %v164_v7  ;;  %v168_v9 = vld [vmem:[%s2600_s25 + $0x88] sm:$0xff] }
  0x18   : > { %167 = vst [vmem:[%s2605_s26 + $0x40] sm:$0xff] %v166_v8  ;;  %v170_v10 = vld [vmem:[%s2600_s25 + $0xa0] sm:$0xff]  ;;  %v172_v11 = vld [vmem:[%s2600_s25 + $0xa8] sm:$0xff]  ;;  %169 = vst [vmem:[%s2605_s26 + $0x48] sm:$0xff] %v168_v9 }
  0x19   : > { %171 = vst [vmem:[%s2605_s26 + $0x50] sm:$0xff] %v170_v10  ;;  %173 = vst [vmem:[%s2605_s26 + $0x58] sm:$0xff] %v172_v11  ;;  %v174_v12 = vld [vmem:[%s2600_s25 + $0xc0] sm:$0xff]  ;;  %v176_v13 = vld [vmem:[%s2600_s25 + $0xc8] sm:$0xff] }
  0x1a   : > { %v178_v14 = vld [vmem:[%s2600_s25 + $0xe0] sm:$0xff]  ;;  %175 = vst [vmem:[%s2605_s26 + $0x60] sm:$0xff] %v174_v12  ;;  %177 = vst [vmem:[%s2605_s26 + $0x68] sm:$0xff] %v176_v13  ;;  %v180_v15 = vld [vmem:[%s2600_s25 + $0xe8] sm:$0xff] }
  0x1b   : > { %179 = vst [vmem:[%s2605_s26 + $0x70] sm:$0xff] %v178_v14  ;;  %v182_v16 = vld [vmem:[%s2600_s25 + $0x100] sm:$0xff]  ;;  %v184_v17 = vld [vmem:[%s2600_s25 + $0x108] sm:$0xff]  ;;  %181 = vst [vmem:[%s2605_s26 + $0x78] sm:$0xff] %v180_v15 }
  0x1c   : > { %183 = vst [vmem:[%s2605_s26 + $0x80] sm:$0xff] %v182_v16  ;;  %185 = vst [vmem:[%s2605_s26 + $0x88] sm:$0xff] %v184_v17  ;;  %v186_v18 = vld [vmem:[%s2600_s25 + $0x120] sm:$0xff]  ;;  %v188_v19 = vld [vmem:[%s2600_s25 + $0x128] sm:$0xff] }
  0x1d   : > { %v190_v20 = vld [vmem:[%s2600_s25 + $0x140] sm:$0xff]  ;;  %187 = vst [vmem:[%s2605_s26 + $0x90] sm:$0xff] %v186_v18  ;;  %189 = vst [vmem:[%s2605_s26 + $0x98] sm:$0xff] %v188_v19  ;;  %v192_v21 = vld [vmem:[%s2600_s25 + $0x148] sm:$0xff] }
  0x1e   : > { %191 = vst [vmem:[%s2605_s26 + $0xa0] sm:$0xff] %v190_v20  ;;  %v194_v22 = vld [vmem:[%s2600_s25 + $0x160] sm:$0xff]  ;;  %v196_v23 = vld [vmem:[%s2600_s25 + $0x168] sm:$0xff]  ;;  %193 = vst [vmem:[%s2605_s26 + $0xa8] sm:$0xff] %v192_v21 }
  0x1f   : > { %195 = vst [vmem:[%s2605_s26 + $0xb0] sm:$0xff] %v194_v22  ;;  %197 = vst [vmem:[%s2605_s26 + $0xb8] sm:$0xff] %v196_v23  ;;  %v198_v24 = vld [vmem:[%s2600_s25 + $0x180] sm:$0xff]  ;;  %v200_v25 = vld [vmem:[%s2600_s25 + $0x188] sm:$0xff] }
  0x20   : > { %v202_v26 = vld [vmem:[%s2600_s25 + $0x1a0] sm:$0xff]  ;;  %199 = vst [vmem:[%s2605_s26 + $0xc0] sm:$0xff] %v198_v24  ;;  %201 = vst [vmem:[%s2605_s26 + $0xc8] sm:$0xff] %v200_v25  ;;  %v204_v27 = vld [vmem:[%s2600_s25 + $0x1a8] sm:$0xff] }
  0x21   : > { %203 = vst [vmem:[%s2605_s26 + $0xd0] sm:$0xff] %v202_v26  ;;  %v206_v28 = vld [vmem:[%s2600_s25 + $0x1c0] sm:$0xff]  ;;  %v208_v29 = vld [vmem:[%s2600_s25 + $0x1c8] sm:$0xff]  ;;  %205 = vst [vmem:[%s2605_s26 + $0xd8] sm:$0xff] %v204_v27 }
  0x22   : > { %207 = vst [vmem:[%s2605_s26 + $0xe0] sm:$0xff] %v206_v28  ;;  %209 = vst [vmem:[%s2605_s26 + $0xe8] sm:$0xff] %v208_v29  ;;  %v210_v30 = vld [vmem:[%s2600_s25 + $0x1e0] sm:$0xff]  ;;  %v212_v31 = vld [vmem:[%s2600_s25 + $0x1e8] sm:$0xff] }
  0x23   : > { %211 = vst [vmem:[%s2605_s26 + $0xf0] sm:$0xff] %v210_v30  ;;  %213 = vst [vmem:[%s2605_s26 + $0xf8] sm:$0xff] %v212_v31 }
  0x24 PF: > { %p2301_p8 = scmp.ge.s32.totalorder %s2534_s13, 1  ;;  %p218_p9 = scmp.lt.s32.totalorder %s2534_s13, 3 }
  0x26   : > { %p219_p10 = pnand %p2301_p8, %p218_p9 }
  0x27   : > { %s225_s27 = sand.u32 (!%p219_p10), 1, %s2518_s9  }
  0x28   : > { %222 = sbr.rel (%p219_p10) target bundleno = 624 (0x270), region = 47  ;;  %s2302_s28 = sshll.u32 (!%p219_p10), %s225_s27, 8 }
  0x29   : > { %s2675_s29 = scalar_lea.vmem (!%p219_p10), [#allocation2], %s2302_s28  ;;  %s2303_s20 = sshll.u32 (!%p219_p10), %s225_s27, 11 }
  0x2a   : > { %s2834_s23 = scalar_lea.vmem (!%p219_p10), [#allocation3], %s2303_s20 }
  0x2d   : > { %v2536_v32 = vmov 0   ;;  %v2416_v33 = vld [vmem:[%s2675_s29 + $0xe4] ss:$16 sps:$4 sm:$0xff]   ;;  %v2418_v34 = vld [vmem:[%s2675_s29 + $0xec] ss:$16 sps:$4 sm:$0xff]   ;;  %s2374_s15 = sshll.u32 (%p2587_p6), %s2526_s11, 5 }
  0x2e   : > { %740 = vmatprep.mubr.bf16.mxu0 %v2536_v32  ;;  %1093 = vmatprep.mubr.bf16.mxu1 %v2536_v32  ;;  %v2420_v35 = vld [vmem:[%s2675_s29 + $0xe0] ss:$16 sps:$4 sm:$0xff]   ;;  %v2421_v36 = vld [vmem:[%s2675_s29 + $0xe8] ss:$16 sps:$4 sm:$0xff]   ;;  %v2422_v37 = vld [vmem:[%s2675_s29 + $0xc4] ss:$16 sps:$4 sm:$0xff]   ;;  %s3136_s20 = scalar_lea.vmem (%p2587_p6), %s3664_s2, %s2374_s15 }
  0x2f   : > { %708 = vmatprep.subr.bf16.mxu0 %v2416_v33  ;;  %1061 = vmatprep.subr.bf16.mxu1 %v2418_v34  ;;  %v2424_v38 = vld [vmem:[%s2675_s29 + $0xcc] ss:$16 sps:$4 sm:$0xff]   ;;  %v2426_v39 = vld [vmem:[%s2675_s29 + $0xc0] ss:$16 sps:$4 sm:$0xff]   ;;  %v2427_v40 = vld [vmem:[%s2675_s29 + $0xc8] ss:$16 sps:$4 sm:$0xff]  }
  0x30   : > { %709 = vmatpush1.bf16.msra.mxu0 %v2420_v35  ;;  %1062 = vmatpush1.bf16.msra.mxu1 %v2421_v36  ;;  %v2428_v41 = vld [vmem:[%s2675_s29 + $0xa4] ss:$16 sps:$4 sm:$0xff]   ;;  %v2430_v42 = vld [vmem:[%s2675_s29 + $0xac] ss:$16 sps:$4 sm:$0xff]   ;;  %v2432_v43 = vld [vmem:[%s2675_s29 + $0xa0] ss:$16 sps:$4 sm:$0xff]  }
  0x31   : > { %710 = vmatprep.subr.bf16.mxu0 %v2422_v37  ;;  %1063 = vmatprep.subr.bf16.mxu1 %v2424_v38  ;;  %v2433_v44 = vld [vmem:[%s2675_s29 + $0xa8] ss:$16 sps:$4 sm:$0xff]   ;;  %v2434_v45 = vld [vmem:[%s2675_s29 + $0x84] ss:$16 sps:$4 sm:$0xff]   ;;  %v2436_v46 = vld [vmem:[%s2675_s29 + $0x8c] ss:$16 sps:$4 sm:$0xff]  }
  0x32   : > { %v2438_v47 = vld [vmem:[%s2675_s29 + $0x80] ss:$16 sps:$4 sm:$0xff]   ;;  %v2439_v48 = vld [vmem:[%s2675_s29 + $0x88] ss:$16 sps:$4 sm:$0xff]   ;;  %v2440_v49 = vld [vmem:[%s2675_s29 + $0x64] ss:$16 sps:$4 sm:$0xff]  }
  0x33   : > { %v2442_v50 = vld [vmem:[%s2675_s29 + $0x6c] ss:$16 sps:$4 sm:$0xff]   ;;  %v2444_v51 = vld [vmem:[%s2675_s29 + $0x60] ss:$16 sps:$4 sm:$0xff]   ;;  %v2445_v52 = vld [vmem:[%s2675_s29 + $0x68] ss:$16 sps:$4 sm:$0xff]  }
  0x34   : > { %711 = vmatpush1.bf16.msra.mxu0 %v2426_v39  ;;  %1064 = vmatpush1.bf16.msra.mxu1 %v2427_v40  ;;  %v2446_v53 = vld [vmem:[%s2675_s29 + $0x44] ss:$16 sps:$4 sm:$0xff]   ;;  %v2448_v54 = vld [vmem:[%s2675_s29 + $0x4c] ss:$16 sps:$4 sm:$0xff]   ;;  %v2450_v55 = vld [vmem:[%s2675_s29 + $0x40] ss:$16 sps:$4 sm:$0xff]  }
  0x35   : > { %712 = vmatprep.subr.bf16.mxu0 %v2428_v41  ;;  %1065 = vmatprep.subr.bf16.mxu1 %v2430_v42  ;;  %v2451_v56 = vld [vmem:[%s2675_s29 + $0x48] ss:$16 sps:$4 sm:$0xff]   ;;  %v2452_v57 = vld [vmem:[%s2675_s29 + $0x24] ss:$16 sps:$4 sm:$0xff]   ;;  %v2454_v58 = vld [vmem:[%s2675_s29 + $0x2c] ss:$16 sps:$4 sm:$0xff]  }
  0x36   : > { %v2456_v59 = vld [vmem:[%s2675_s29 + $0x20] ss:$16 sps:$4 sm:$0xff]   ;;  %v2457_v60 = vld [vmem:[%s2675_s29 + $0x28] ss:$16 sps:$4 sm:$0xff]   ;;  %v2458_v61 = vld [vmem:[%s2675_s29 + $0x4] ss:$16 sps:$4 sm:$0xff]  }
  0x37   : > { %v2460_v62 = vld [vmem:[%s2675_s29 + $0xc] ss:$16 sps:$4 sm:$0xff]   ;;  %v2462_v63 = vld [vmem:[%s2675_s29] ss:$16 sps:$4 sm:$0xff]   ;;  %v2463_v0 = vld [vmem:[%s2675_s29 + $0x8] ss:$16 sps:$4 sm:$0xff]  }
  0x38   : > { %713 = vmatpush1.bf16.msra.mxu0 %v2432_v43  ;;  %1066 = vmatpush1.bf16.msra.mxu1 %v2433_v44  ;;  %v2464_v1 = vld [vmem:[%s3662_s0] sm:$0xff]   ;;  %v2465_v2 = vld [vmem:[%s3662_s0 + $0x8] sm:$0xff]   ;;  %v2466_v3 = vld [vmem:[%s3662_s0 + $0x10] sm:$0xff]  }
  0x39   : > { %714 = vmatprep.subr.bf16.mxu0 %v2434_v45  ;;  %1067 = vmatprep.subr.bf16.mxu1 %v2436_v46  ;;  %v2467_v4 = vld [vmem:[%s3662_s0 + $0x18] sm:$0xff]   ;;  %v2468_v5 = vld [vmem:[%s3662_s0 + $0x20] sm:$0xff]   ;;  %v2469_v6 = vld [vmem:[%s3662_s0 + $0x28] sm:$0xff]  }
  0x3a   : > { %v2470_v7 = vld [vmem:[%s3662_s0 + $0x30] sm:$0xff]   ;;  %v2471_v8 = vld [vmem:[%s3662_s0 + $0x38] sm:$0xff]   ;;  %v2472_v9 = vld [vmem:[%s3662_s0 + $0x40] sm:$0xff]  }
  0x3b   : > { %v2473_v10 = vld [vmem:[%s3662_s0 + $0x48] sm:$0xff]   ;;  %v2474_v11 = vld [vmem:[%s3662_s0 + $0x50] sm:$0xff]   ;;  %v2475_v12 = vld [vmem:[%s3662_s0 + $0x58] sm:$0xff]  }
  0x3c   : > { %715 = vmatpush1.bf16.msra.mxu0 %v2438_v47  ;;  %1068 = vmatpush1.bf16.msra.mxu1 %v2439_v48  ;;  %v2476_v13 = vld [vmem:[%s3662_s0 + $0x60] sm:$0xff]   ;;  %v2477_v14 = vld [vmem:[%s3662_s0 + $0x68] sm:$0xff]   ;;  %v2478_v15 = vld [vmem:[%s3662_s0 + $0x70] sm:$0xff]  }
  0x3d   : > { %716 = vmatprep.subr.bf16.mxu0 %v2440_v49  ;;  %1069 = vmatprep.subr.bf16.mxu1 %v2442_v50  ;;  %v2479_v16 = vld [vmem:[%s3662_s0 + $0x78] sm:$0xff]   ;;  %v2480_v17 = vld [vmem:[%s3662_s0 + $0x80] sm:$0xff]   ;;  %v2481_v18 = vld [vmem:[%s3662_s0 + $0x88] sm:$0xff]  }
  0x3e   : > { %v2482_v19 = vld [vmem:[%s3662_s0 + $0x90] sm:$0xff]   ;;  %v2483_v20 = vld [vmem:[%s3662_s0 + $0x98] sm:$0xff]   ;;  %v2484_v21 = vld [vmem:[%s3662_s0 + $0xa0] sm:$0xff]  }
  0x3f   : > { %v2485_v22 = vld [vmem:[%s3662_s0 + $0xa8] sm:$0xff]   ;;  %v2486_v23 = vld [vmem:[%s3662_s0 + $0xb0] sm:$0xff]   ;;  %v2487_v24 = vld [vmem:[%s3662_s0 + $0xb8] sm:$0xff]  }
  0x40   : > { %717 = vmatpush1.bf16.msra.mxu0 %v2444_v51  ;;  %1070 = vmatpush1.bf16.msra.mxu1 %v2445_v52  ;;  %v2488_v25 = vld [vmem:[%s3662_s0 + $0xc0] sm:$0xff]   ;;  %v2489_v33 = vld [vmem:[%s3662_s0 + $0xc8] sm:$0xff]   ;;  %v2490_v42 = vld [vmem:[%s3662_s0 + $0xd0] sm:$0xff]  }
  0x41   : > { %718 = vmatprep.subr.bf16.mxu0 %v2446_v53  ;;  %1071 = vmatprep.subr.bf16.mxu1 %v2448_v54  ;;  %v2491_v51 = vld [vmem:[%s3662_s0 + $0xd8] sm:$0xff]  }
  0x44   : > { %719 = vmatpush1.bf16.msra.mxu0 %v2450_v55  ;;  %1072 = vmatpush1.bf16.msra.mxu1 %v2451_v56 }
  0x45   : > { %720 = vmatprep.subr.bf16.mxu0 %v2452_v57  ;;  %1073 = vmatprep.subr.bf16.mxu1 %v2454_v58 }
  0x48   : > { %721 = vmatpush1.bf16.msra.mxu0 %v2456_v59  ;;  %1074 = vmatpush1.bf16.msra.mxu1 %v2457_v60  ;;  %v2492_v60 = vld [vmem:[%s3662_s0 + $0xe0] sm:$0xff]  }
  0x49   : > { %722 = vmatprep.subr.bf16.mxu0 %v2458_v61  ;;  %1075 = vmatprep.subr.bf16.mxu1 %v2460_v62 }
  0x4c   : > { %723 = vmatpush1.bf16.msra.mxu0 %v2462_v63  ;;  %1076 = vmatpush1.bf16.msra.mxu1 %v2463_v0 }
  0x4f   : > { %741 = vmatmul.mubr.bf16.vlgmr.msra.gmra.mxu0 %v2464_v1  ;;  %1094 = vmatmul.mubr.bf16.vlgmr.msra.gmra.mxu1 %v2464_v1 }
  0x50   : > { %750 = vmatprep.mubr.bf16.mxu0 %v2536_v32  ;;  %1103 = vmatprep.mubr.bf16.mxu1 %v2536_v32 }
  0x57   : > { %751 = vmatmul.mubr.bf16.gmra.mxu0 %v2465_v2  ;;  %1104 = vmatmul.mubr.bf16.gmra.mxu1 %v2465_v2 }
  0x58   : > { %760 = vmatprep.mubr.bf16.mxu0 %v2536_v32  ;;  %1113 = vmatprep.mubr.bf16.mxu1 %v2536_v32 }
  0x5f   : > { %761 = vmatmul.mubr.bf16.gmra.mxu0 %v2466_v3  ;;  %1114 = vmatmul.mubr.bf16.gmra.mxu1 %v2466_v3 }
  0x60   : > { %770 = vmatprep.mubr.bf16.mxu0 %v2536_v32  ;;  %1123 = vmatprep.mubr.bf16.mxu1 %v2536_v32 }
  0x67   : > { %771 = vmatmul.mubr.bf16.gmra.mxu0 %v2467_v4  ;;  %1124 = vmatmul.mubr.bf16.gmra.mxu1 %v2467_v4 }
  0x68   : > { %780 = vmatprep.mubr.bf16.mxu0 %v2536_v32  ;;  %1133 = vmatprep.mubr.bf16.mxu1 %v2536_v32 }
  0x6f   : > { %781 = vmatmul.mubr.bf16.gmra.mxu0 %v2468_v5  ;;  %1134 = vmatmul.mubr.bf16.gmra.mxu1 %v2468_v5  ;;  %v2493_v5 = vld [vmem:[%s3662_s0 + $0xe8] sm:$0xff]  }
  0x70   : > { %790 = vmatprep.mubr.bf16.mxu0 %v2536_v32  ;;  %1143 = vmatprep.mubr.bf16.mxu1 %v2536_v32 }
  0x77   : > { %791 = vmatmul.mubr.bf16.gmra.mxu0 %v2469_v6  ;;  %1144 = vmatmul.mubr.bf16.gmra.mxu1 %v2469_v6 }
  0x78   : > { %800 = vmatprep.mubr.bf16.mxu0 %v2536_v32  ;;  %1153 = vmatprep.mubr.bf16.mxu1 %v2536_v32 }
  0x7f   : > { %801 = vmatmul.mubr.bf16.gmra.mxu0 %v2470_v7  ;;  %1154 = vmatmul.mubr.bf16.gmra.mxu1 %v2470_v7 }
  0x80   : > { %810 = vmatprep.mubr.bf16.mxu0 %v2536_v32  ;;  %1163 = vmatprep.mubr.bf16.mxu1 %v2536_v32 }
  0x87   : > { %811 = vmatmul.mubr.bf16.gmra.mxu0 %v2471_v8  ;;  %1164 = vmatmul.mubr.bf16.gmra.mxu1 %v2471_v8 }
  0x88   : > { %820 = vmatprep.mubr.bf16.mxu0 %v2536_v32  ;;  %1173 = vmatprep.mubr.bf16.mxu1 %v2536_v32 }
  0x8f   : > { %821 = vmatmul.mubr.bf16.gmra.mxu0 %v2472_v9  ;;  %1174 = vmatmul.mubr.bf16.gmra.mxu1 %v2472_v9 }
  0x90   : > { %830 = vmatprep.mubr.bf16.mxu0 %v2536_v32  ;;  %1183 = vmatprep.mubr.bf16.mxu1 %v2536_v32 }
  0x97   : > { %831 = vmatmul.mubr.bf16.gmra.mxu0 %v2473_v10  ;;  %1184 = vmatmul.mubr.bf16.gmra.mxu1 %v2473_v10 }
  0x98   : > { %840 = vmatprep.mubr.bf16.mxu0 %v2536_v32  ;;  %1193 = vmatprep.mubr.bf16.mxu1 %v2536_v32 }
  0x9f   : > { %841 = vmatmul.mubr.bf16.gmra.mxu0 %v2474_v11  ;;  %1194 = vmatmul.mubr.bf16.gmra.mxu1 %v2474_v11 }
  0xa0   : > { %850 = vmatprep.mubr.bf16.mxu0 %v2536_v32  ;;  %1203 = vmatprep.mubr.bf16.mxu1 %v2536_v32 }
  0xa7   : > { %851 = vmatmul.mubr.bf16.gmra.mxu0 %v2475_v12  ;;  %1204 = vmatmul.mubr.bf16.gmra.mxu1 %v2475_v12 }
  0xa8   : > { %860 = vmatprep.mubr.bf16.mxu0 %v2536_v32  ;;  %1213 = vmatprep.mubr.bf16.mxu1 %v2536_v32 }
  0xaf   : > { %861 = vmatmul.mubr.bf16.gmra.mxu0 %v2476_v13  ;;  %1214 = vmatmul.mubr.bf16.gmra.mxu1 %v2476_v13 }
  0xb0   : > { %870 = vmatprep.mubr.bf16.mxu0 %v2536_v32  ;;  %1223 = vmatprep.mubr.bf16.mxu1 %v2536_v32 }
  0xb7   : > { %871 = vmatmul.mubr.bf16.gmra.mxu0 %v2477_v14  ;;  %1224 = vmatmul.mubr.bf16.gmra.mxu1 %v2477_v14  ;;  %v2494_v14 = vld [vmem:[%s3662_s0 + $0xf0] sm:$0xff]  }
  0xb8   : > { %880 = vmatprep.mubr.bf16.mxu0 %v2536_v32  ;;  %1233 = vmatprep.mubr.bf16.mxu1 %v2536_v32 }
  0xbf   : > { %881 = vmatmul.mubr.bf16.gmra.mxu0 %v2478_v15  ;;  %1234 = vmatmul.mubr.bf16.gmra.mxu1 %v2478_v15 }
  0xc0   : > { %890 = vmatprep.mubr.bf16.mxu0 %v2536_v32  ;;  %1243 = vmatprep.mubr.bf16.mxu1 %v2536_v32 }
  0xc7   : > { %891 = vmatmul.mubr.bf16.gmra.mxu0 %v2479_v16  ;;  %1244 = vmatmul.mubr.bf16.gmra.mxu1 %v2479_v16 }
  0xc8   : > { %900 = vmatprep.mubr.bf16.mxu0 %v2536_v32  ;;  %1253 = vmatprep.mubr.bf16.mxu1 %v2536_v32 }
  0xcf   : > { %901 = vmatmul.mubr.bf16.gmra.mxu0 %v2480_v17  ;;  %1254 = vmatmul.mubr.bf16.gmra.mxu1 %v2480_v17 }
  0xd0   : > { %910 = vmatprep.mubr.bf16.mxu0 %v2536_v32  ;;  %1263 = vmatprep.mubr.bf16.mxu1 %v2536_v32 }
  0xd7   : > { %911 = vmatmul.mubr.bf16.gmra.mxu0 %v2481_v18  ;;  %1264 = vmatmul.mubr.bf16.gmra.mxu1 %v2481_v18 }
  0xd8   : > { %920 = vmatprep.mubr.bf16.mxu0 %v2536_v32  ;;  %1273 = vmatprep.mubr.bf16.mxu1 %v2536_v32 }
  0xdf   : > { %921 = vmatmul.mubr.bf16.gmra.mxu0 %v2482_v19  ;;  %1274 = vmatmul.mubr.bf16.gmra.mxu1 %v2482_v19 }
  0xe0   : > { %930 = vmatprep.mubr.bf16.mxu0 %v2536_v32  ;;  %1283 = vmatprep.mubr.bf16.mxu1 %v2536_v32 }
  0xe7   : > { %931 = vmatmul.mubr.bf16.gmra.mxu0 %v2483_v20  ;;  %1284 = vmatmul.mubr.bf16.gmra.mxu1 %v2483_v20 }
  0xe8   : > { %940 = vmatprep.mubr.bf16.mxu0 %v2536_v32  ;;  %1293 = vmatprep.mubr.bf16.mxu1 %v2536_v32 }
  0xef   : > { %941 = vmatmul.mubr.bf16.gmra.mxu0 %v2484_v21  ;;  %1294 = vmatmul.mubr.bf16.gmra.mxu1 %v2484_v21 }
  0xf0   : > { %950 = vmatprep.mubr.bf16.mxu0 %v2536_v32  ;;  %1303 = vmatprep.mubr.bf16.mxu1 %v2536_v32 }
  0xf7   : > { %951 = vmatmul.mubr.bf16.gmra.mxu0 %v2485_v22  ;;  %1304 = vmatmul.mubr.bf16.gmra.mxu1 %v2485_v22 }
  0xf8   : > { %960 = vmatprep.mubr.bf16.mxu0 %v2536_v32  ;;  %1313 = vmatprep.mubr.bf16.mxu1 %v2536_v32 }
  0xff   : > { %961 = vmatmul.mubr.bf16.gmra.mxu0 %v2486_v23  ;;  %1314 = vmatmul.mubr.bf16.gmra.mxu1 %v2486_v23  ;;  %v2495_v23 = vld [vmem:[%s3662_s0 + $0xf8] sm:$0xff]  }
 0x100   : > { %970 = vmatprep.mubr.bf16.mxu0 %v2536_v32  ;;  %1323 = vmatprep.mubr.bf16.mxu1 %v2536_v32 }
 0x107   : > { %971 = vmatmul.mubr.bf16.gmra.mxu0 %v2487_v24  ;;  %1324 = vmatmul.mubr.bf16.gmra.mxu1 %v2487_v24 }
 0x108   : > { %980 = vmatprep.mubr.bf16.mxu0 %v2536_v32  ;;  %1333 = vmatprep.mubr.bf16.mxu1 %v2536_v32 }
 0x10f   : > { %v742_v26 = vpop.f32.mrf.mxu0  ;;  %981 = vmatmul.mubr.bf16.gmra.mxu0 %v2488_v25  ;;  %v1095_v27 = vpop.f32.mrf.mxu1  ;;  %1334 = vmatmul.mubr.bf16.gmra.mxu1 %v2488_v25 }
 0x110   : > { %1414 = vst [vmem:[%s2834_s23] sm:$0xff] %v742_v26  ;;  %1416 = vst [vmem:[%s2834_s23 + $0x10] sm:$0xff] %v1095_v27  ;;  %990 = vmatprep.mubr.bf16.mxu0 %v2536_v32  ;;  %1343 = vmatprep.mubr.bf16.mxu1 %v2536_v32 }
 0x111   : > { %v744_v28 = vpop.f32.mrf.mxu0  ;;  %v1097_v29 = vpop.f32.mrf.mxu1 }
 0x112   : > { %1415 = vst [vmem:[%s2834_s23 + $0x8] sm:$0xff] %v744_v28  ;;  %1417 = vst [vmem:[%s2834_s23 + $0x18] sm:$0xff] %v1097_v29 }
 0x113   : > { %v746_v30 = vpop.f32.mrf.mxu0  ;;  %v1099_v31 = vpop.f32.mrf.mxu1 }
 0x114   : > { %1418 = vst [vmem:[%s2834_s23 + $0x20] sm:$0xff] %v746_v30  ;;  %1420 = vst [vmem:[%s2834_s23 + $0x30] sm:$0xff] %v1099_v31 }
 0x115   : > { %v748_v34 = vpop.f32.mrf.mxu0  ;;  %v1101_v35 = vpop.f32.mrf.mxu1 }
 0x116   : > { %1419 = vst [vmem:[%s2834_s23 + $0x28] sm:$0xff] %v748_v34  ;;  %1421 = vst [vmem:[%s2834_s23 + $0x38] sm:$0xff] %v1101_v35 }
 0x117   : > { %v752_v36 = vpop.f32.mrf.mxu0  ;;  %991 = vmatmul.mubr.bf16.gmra.mxu0 %v2489_v33  ;;  %v1105_v37 = vpop.f32.mrf.mxu1  ;;  %1344 = vmatmul.mubr.bf16.gmra.mxu1 %v2489_v33 }
 0x118   : > { %1422 = vst [vmem:[%s2834_s23 + $0x40] sm:$0xff] %v752_v36  ;;  %1424 = vst [vmem:[%s2834_s23 + $0x50] sm:$0xff] %v1105_v37  ;;  %1000 = vmatprep.mubr.bf16.mxu0 %v2536_v32  ;;  %1353 = vmatprep.mubr.bf16.mxu1 %v2536_v32 }
 0x119   : > { %v754_v38 = vpop.f32.mrf.mxu0  ;;  %v1107_v39 = vpop.f32.mrf.mxu1 }
 0x11a   : > { %1423 = vst [vmem:[%s2834_s23 + $0x48] sm:$0xff] %v754_v38  ;;  %1425 = vst [vmem:[%s2834_s23 + $0x58] sm:$0xff] %v1107_v39 }
 0x11b   : > { %v756_v40 = vpop.f32.mrf.mxu0  ;;  %v1109_v41 = vpop.f32.mrf.mxu1 }
 0x11c   : > { %1426 = vst [vmem:[%s2834_s23 + $0x60] sm:$0xff] %v756_v40  ;;  %1428 = vst [vmem:[%s2834_s23 + $0x70] sm:$0xff] %v1109_v41 }
 0x11d   : > { %v758_v43 = vpop.f32.mrf.mxu0  ;;  %v1111_v44 = vpop.f32.mrf.mxu1 }
 0x11e   : > { %1427 = vst [vmem:[%s2834_s23 + $0x68] sm:$0xff] %v758_v43  ;;  %1429 = vst [vmem:[%s2834_s23 + $0x78] sm:$0xff] %v1111_v44 }
 0x11f   : > { %v762_v45 = vpop.f32.mrf.mxu0  ;;  %1001 = vmatmul.mubr.bf16.gmra.mxu0 %v2490_v42  ;;  %v1115_v46 = vpop.f32.mrf.mxu1  ;;  %1354 = vmatmul.mubr.bf16.gmra.mxu1 %v2490_v42 }
 0x120   : > { %1430 = vst [vmem:[%s2834_s23 + $0x80] sm:$0xff] %v762_v45  ;;  %1432 = vst [vmem:[%s2834_s23 + $0x90] sm:$0xff] %v1115_v46  ;;  %1010 = vmatprep.mubr.bf16.mxu0 %v2536_v32  ;;  %1363 = vmatprep.mubr.bf16.mxu1 %v2536_v32 }
 0x121   : > { %v764_v47 = vpop.f32.mrf.mxu0  ;;  %v1117_v48 = vpop.f32.mrf.mxu1 }
 0x122   : > { %1431 = vst [vmem:[%s2834_s23 + $0x88] sm:$0xff] %v764_v47  ;;  %1433 = vst [vmem:[%s2834_s23 + $0x98] sm:$0xff] %v1117_v48 }
 0x123   : > { %v766_v49 = vpop.f32.mrf.mxu0  ;;  %v1119_v50 = vpop.f32.mrf.mxu1 }
 0x124   : > { %1434 = vst [vmem:[%s2834_s23 + $0xa0] sm:$0xff] %v766_v49  ;;  %1436 = vst [vmem:[%s2834_s23 + $0xb0] sm:$0xff] %v1119_v50 }
 0x125   : > { %v768_v52 = vpop.f32.mrf.mxu0  ;;  %v1121_v53 = vpop.f32.mrf.mxu1 }
 0x126   : > { %1435 = vst [vmem:[%s2834_s23 + $0xa8] sm:$0xff] %v768_v52  ;;  %1437 = vst [vmem:[%s2834_s23 + $0xb8] sm:$0xff] %v1121_v53 }
 0x127   : > { %v772_v54 = vpop.f32.mrf.mxu0  ;;  %1011 = vmatmul.mubr.bf16.gmra.mxu0 %v2491_v51  ;;  %v1125_v55 = vpop.f32.mrf.mxu1  ;;  %1364 = vmatmul.mubr.bf16.gmra.mxu1 %v2491_v51 }
 0x128   : > { %1438 = vst [vmem:[%s2834_s23 + $0xc0] sm:$0xff] %v772_v54  ;;  %1440 = vst [vmem:[%s2834_s23 + $0xd0] sm:$0xff] %v1125_v55  ;;  %1020 = vmatprep.mubr.bf16.mxu0 %v2536_v32  ;;  %1373 = vmatprep.mubr.bf16.mxu1 %v2536_v32 }
 0x129   : > { %v774_v56 = vpop.f32.mrf.mxu0  ;;  %v1127_v57 = vpop.f32.mrf.mxu1 }
 0x12a   : > { %1439 = vst [vmem:[%s2834_s23 + $0xc8] sm:$0xff] %v774_v56  ;;  %1441 = vst [vmem:[%s2834_s23 + $0xd8] sm:$0xff] %v1127_v57 }
 0x12b   : > { %v776_v58 = vpop.f32.mrf.mxu0  ;;  %v1129_v59 = vpop.f32.mrf.mxu1 }
 0x12c   : > { %1442 = vst [vmem:[%s2834_s23 + $0xe0] sm:$0xff] %v776_v58  ;;  %1444 = vst [vmem:[%s2834_s23 + $0xf0] sm:$0xff] %v1129_v59 }
 0x12d   : > { %v778_v61 = vpop.f32.mrf.mxu0  ;;  %v1131_v62 = vpop.f32.mrf.mxu1 }
 0x12e   : > { %1443 = vst [vmem:[%s2834_s23 + $0xe8] sm:$0xff] %v778_v61  ;;  %1445 = vst [vmem:[%s2834_s23 + $0xf8] sm:$0xff] %v1131_v62 }
 0x12f   : > { %v782_v63 = vpop.f32.mrf.mxu0  ;;  %1021 = vmatmul.mubr.bf16.gmra.mxu0 %v2492_v60  ;;  %v1135_v0 = vpop.f32.mrf.mxu1  ;;  %1374 = vmatmul.mubr.bf16.gmra.mxu1 %v2492_v60 }
 0x130   : > { %1446 = vst [vmem:[%s2834_s23 + $0x100] sm:$0xff] %v782_v63  ;;  %1448 = vst [vmem:[%s2834_s23 + $0x110] sm:$0xff] %v1135_v0  ;;  %1030 = vmatprep.mubr.bf16.mxu0 %v2536_v32  ;;  %1383 = vmatprep.mubr.bf16.mxu1 %v2536_v32 }
 0x131   : > { %v784_v1 = vpop.f32.mrf.mxu0  ;;  %v1137_v2 = vpop.f32.mrf.mxu1 }
 0x132   : > { %1447 = vst [vmem:[%s2834_s23 + $0x108] sm:$0xff] %v784_v1  ;;  %1449 = vst [vmem:[%s2834_s23 + $0x118] sm:$0xff] %v1137_v2 }
 0x133   : > { %v786_v3 = vpop.f32.mrf.mxu0  ;;  %v1139_v4 = vpop.f32.mrf.mxu1 }
 0x134   : > { %1450 = vst [vmem:[%s2834_s23 + $0x120] sm:$0xff] %v786_v3  ;;  %1452 = vst [vmem:[%s2834_s23 + $0x130] sm:$0xff] %v1139_v4 }
 0x135   : > { %v788_v6 = vpop.f32.mrf.mxu0  ;;  %v1141_v7 = vpop.f32.mrf.mxu1 }
 0x136   : > { %1451 = vst [vmem:[%s2834_s23 + $0x128] sm:$0xff] %v788_v6  ;;  %1453 = vst [vmem:[%s2834_s23 + $0x138] sm:$0xff] %v1141_v7 }
 0x137   : > { %v792_v8 = vpop.f32.mrf.mxu0  ;;  %1031 = vmatmul.mubr.bf16.gmra.mxu0 %v2493_v5  ;;  %v1145_v9 = vpop.f32.mrf.mxu1  ;;  %1384 = vmatmul.mubr.bf16.gmra.mxu1 %v2493_v5 }
 0x138   : > { %1454 = vst [vmem:[%s2834_s23 + $0x140] sm:$0xff] %v792_v8  ;;  %1456 = vst [vmem:[%s2834_s23 + $0x150] sm:$0xff] %v1145_v9  ;;  %1040 = vmatprep.mubr.bf16.mxu0 %v2536_v32  ;;  %1393 = vmatprep.mubr.bf16.mxu1 %v2536_v32 }
 0x139   : > { %v794_v10 = vpop.f32.mrf.mxu0  ;;  %v1147_v11 = vpop.f32.mrf.mxu1 }
 0x13a   : > { %1455 = vst [vmem:[%s2834_s23 + $0x148] sm:$0xff] %v794_v10  ;;  %1457 = vst [vmem:[%s2834_s23 + $0x158] sm:$0xff] %v1147_v11 }
 0x13b   : > { %v796_v12 = vpop.f32.mrf.mxu0  ;;  %v1149_v13 = vpop.f32.mrf.mxu1 }
 0x13c   : > { %1458 = vst [vmem:[%s2834_s23 + $0x160] sm:$0xff] %v796_v12  ;;  %1460 = vst [vmem:[%s2834_s23 + $0x170] sm:$0xff] %v1149_v13 }
 0x13d   : > { %v798_v15 = vpop.f32.mrf.mxu0  ;;  %v1151_v16 = vpop.f32.mrf.mxu1 }
 0x13e   : > { %1459 = vst [vmem:[%s2834_s23 + $0x168] sm:$0xff] %v798_v15  ;;  %1461 = vst [vmem:[%s2834_s23 + $0x178] sm:$0xff] %v1151_v16 }
 0x13f   : > { %v802_v17 = vpop.f32.mrf.mxu0  ;;  %1041 = vmatmul.mubr.bf16.gmra.mxu0 %v2494_v14  ;;  %v1155_v18 = vpop.f32.mrf.mxu1  ;;  %1394 = vmatmul.mubr.bf16.gmra.mxu1 %v2494_v14 }
 0x140   : > { %1462 = vst [vmem:[%s2834_s23 + $0x180] sm:$0xff] %v802_v17  ;;  %1464 = vst [vmem:[%s2834_s23 + $0x190] sm:$0xff] %v1155_v18  ;;  %1050 = vmatprep.mubr.bf16.mxu0 %v2536_v32  ;;  %1403 = vmatprep.mubr.bf16.mxu1 %v2536_v32 }
 0x141   : > { %v804_v19 = vpop.f32.mrf.mxu0  ;;  %v1157_v20 = vpop.f32.mrf.mxu1 }
 0x142   : > { %1463 = vst [vmem:[%s2834_s23 + $0x188] sm:$0xff] %v804_v19  ;;  %1465 = vst [vmem:[%s2834_s23 + $0x198] sm:$0xff] %v1157_v20 }
 0x143   : > { %v806_v21 = vpop.f32.mrf.mxu0  ;;  %v1159_v22 = vpop.f32.mrf.mxu1 }
 0x144   : > { %1466 = vst [vmem:[%s2834_s23 + $0x1a0] sm:$0xff] %v806_v21  ;;  %1468 = vst [vmem:[%s2834_s23 + $0x1b0] sm:$0xff] %v1159_v22 }
 0x145   : > { %v808_v24 = vpop.f32.mrf.mxu0  ;;  %v1161_v25 = vpop.f32.mrf.mxu1 }
 0x146   : > { %1467 = vst [vmem:[%s2834_s23 + $0x1a8] sm:$0xff] %v808_v24  ;;  %1469 = vst [vmem:[%s2834_s23 + $0x1b8] sm:$0xff] %v1161_v25 }
 0x147   : > { %v812_v32 = vpop.f32.mrf.mxu0  ;;  %1051 = vmatmul.mubr.bf16.gmra.mxu0 %v2495_v23  ;;  %v1165_v26 = vpop.f32.mrf.mxu1  ;;  %1404 = vmatmul.mubr.bf16.gmra.mxu1 %v2495_v23 }
 0x148   : > { %1470 = vst [vmem:[%s2834_s23 + $0x1c0] sm:$0xff] %v812_v32  ;;  %1472 = vst [vmem:[%s2834_s23 + $0x1d0] sm:$0xff] %v1165_v26 }
 0x149   : > { %v814_v27 = vpop.f32.mrf.mxu0  ;;  %v1167_v28 = vpop.f32.mrf.mxu1 }
 0x14a   : > { %1471 = vst [vmem:[%s2834_s23 + $0x1c8] sm:$0xff] %v814_v27  ;;  %1473 = vst [vmem:[%s2834_s23 + $0x1d8] sm:$0xff] %v1167_v28 }
 0x14b   : > { %v816_v29 = vpop.f32.mrf.mxu0  ;;  %v1169_v30 = vpop.f32.mrf.mxu1 }
 0x14c   : > { %1474 = vst [vmem:[%s2834_s23 + $0x1e0] sm:$0xff] %v816_v29  ;;  %1476 = vst [vmem:[%s2834_s23 + $0x1f0] sm:$0xff] %v1169_v30 }
 0x14d   : > { %v818_v31 = vpop.f32.mrf.mxu0  ;;  %v1171_v33 = vpop.f32.mrf.mxu1 }
 0x14e   : > { %1475 = vst [vmem:[%s2834_s23 + $0x1e8] sm:$0xff] %v818_v31  ;;  %1477 = vst [vmem:[%s2834_s23 + $0x1f8] sm:$0xff] %v1171_v33 }
 0x14f   : > { %v822_v34 = vpop.f32.mrf.mxu0  ;;  %v1175_v35 = vpop.f32.mrf.mxu1 }
 0x150   : > { %1478 = vst [vmem:[%s2834_s23 + $0x200] sm:$0xff] %v822_v34  ;;  %1480 = vst [vmem:[%s2834_s23 + $0x210] sm:$0xff] %v1175_v35 }
 0x151   : > { %v824_v36 = vpop.f32.mrf.mxu0  ;;  %v1177_v37 = vpop.f32.mrf.mxu1 }
 0x152   : > { %1479 = vst [vmem:[%s2834_s23 + $0x208] sm:$0xff] %v824_v36  ;;  %1481 = vst [vmem:[%s2834_s23 + $0x218] sm:$0xff] %v1177_v37 }
 0x153   : > { %v826_v38 = vpop.f32.mrf.mxu0  ;;  %v1179_v39 = vpop.f32.mrf.mxu1 }
 0x154   : > { %1482 = vst [vmem:[%s2834_s23 + $0x220] sm:$0xff] %v826_v38  ;;  %1484 = vst [vmem:[%s2834_s23 + $0x230] sm:$0xff] %v1179_v39 }
 0x155   : > { %v828_v40 = vpop.f32.mrf.mxu0  ;;  %v1181_v41 = vpop.f32.mrf.mxu1 }
 0x156   : > { %1483 = vst [vmem:[%s2834_s23 + $0x228] sm:$0xff] %v828_v40  ;;  %1485 = vst [vmem:[%s2834_s23 + $0x238] sm:$0xff] %v1181_v41 }
 0x157   : > { %v832_v42 = vpop.f32.mrf.mxu0  ;;  %v1185_v43 = vpop.f32.mrf.mxu1 }
 0x158   : > { %1486 = vst [vmem:[%s2834_s23 + $0x240] sm:$0xff] %v832_v42  ;;  %1488 = vst [vmem:[%s2834_s23 + $0x250] sm:$0xff] %v1185_v43 }
 0x159   : > { %v834_v44 = vpop.f32.mrf.mxu0  ;;  %v1187_v45 = vpop.f32.mrf.mxu1 }
 0x15a   : > { %1487 = vst [vmem:[%s2834_s23 + $0x248] sm:$0xff] %v834_v44  ;;  %1489 = vst [vmem:[%s2834_s23 + $0x258] sm:$0xff] %v1187_v45 }
 0x15b   : > { %v836_v46 = vpop.f32.mrf.mxu0  ;;  %v1189_v47 = vpop.f32.mrf.mxu1 }
 0x15c   : > { %1490 = vst [vmem:[%s2834_s23 + $0x260] sm:$0xff] %v836_v46  ;;  %1492 = vst [vmem:[%s2834_s23 + $0x270] sm:$0xff] %v1189_v47 }
 0x15d   : > { %v838_v48 = vpop.f32.mrf.mxu0  ;;  %v1191_v49 = vpop.f32.mrf.mxu1 }
 0x15e   : > { %1491 = vst [vmem:[%s2834_s23 + $0x268] sm:$0xff] %v838_v48  ;;  %1493 = vst [vmem:[%s2834_s23 + $0x278] sm:$0xff] %v1191_v49 }
 0x15f   : > { %v842_v50 = vpop.f32.mrf.mxu0  ;;  %v1195_v51 = vpop.f32.mrf.mxu1 }
 0x160   : > { %1494 = vst [vmem:[%s2834_s23 + $0x280] sm:$0xff] %v842_v50  ;;  %1496 = vst [vmem:[%s2834_s23 + $0x290] sm:$0xff] %v1195_v51 }
 0x161   : > { %v844_v52 = vpop.f32.mrf.mxu0  ;;  %v1197_v53 = vpop.f32.mrf.mxu1 }
 0x162   : > { %1495 = vst [vmem:[%s2834_s23 + $0x288] sm:$0xff] %v844_v52  ;;  %1497 = vst [vmem:[%s2834_s23 + $0x298] sm:$0xff] %v1197_v53 }
 0x163   : > { %v846_v54 = vpop.f32.mrf.mxu0  ;;  %v1199_v55 = vpop.f32.mrf.mxu1 }
 0x164   : > { %1498 = vst [vmem:[%s2834_s23 + $0x2a0] sm:$0xff] %v846_v54  ;;  %1500 = vst [vmem:[%s2834_s23 + $0x2b0] sm:$0xff] %v1199_v55 }
 0x165   : > { %v848_v56 = vpop.f32.mrf.mxu0  ;;  %v1201_v57 = vpop.f32.mrf.mxu1 }
 0x166   : > { %1499 = vst [vmem:[%s2834_s23 + $0x2a8] sm:$0xff] %v848_v56  ;;  %1501 = vst [vmem:[%s2834_s23 + $0x2b8] sm:$0xff] %v1201_v57 }
 0x167   : > { %v852_v58 = vpop.f32.mrf.mxu0  ;;  %v1205_v59 = vpop.f32.mrf.mxu1 }
 0x168   : > { %1502 = vst [vmem:[%s2834_s23 + $0x2c0] sm:$0xff] %v852_v58  ;;  %1504 = vst [vmem:[%s2834_s23 + $0x2d0] sm:$0xff] %v1205_v59 }
 0x169   : > { %v854_v60 = vpop.f32.mrf.mxu0  ;;  %v1207_v61 = vpop.f32.mrf.mxu1 }
 0x16a   : > { %1503 = vst [vmem:[%s2834_s23 + $0x2c8] sm:$0xff] %v854_v60  ;;  %1505 = vst [vmem:[%s2834_s23 + $0x2d8] sm:$0xff] %v1207_v61 }
 0x16b   : > { %v856_v62 = vpop.f32.mrf.mxu0  ;;  %v1209_v63 = vpop.f32.mrf.mxu1 }
 0x16c   : > { %1506 = vst [vmem:[%s2834_s23 + $0x2e0] sm:$0xff] %v856_v62  ;;  %1508 = vst [vmem:[%s2834_s23 + $0x2f0] sm:$0xff] %v1209_v63 }
 0x16d   : > { %v858_v0 = vpop.f32.mrf.mxu0  ;;  %v1211_v1 = vpop.f32.mrf.mxu1 }
 0x16e   : > { %1507 = vst [vmem:[%s2834_s23 + $0x2e8] sm:$0xff] %v858_v0  ;;  %1509 = vst [vmem:[%s2834_s23 + $0x2f8] sm:$0xff] %v1211_v1 }
 0x16f   : > { %v862_v2 = vpop.f32.mrf.mxu0  ;;  %v1215_v3 = vpop.f32.mrf.mxu1 }
 0x170   : > { %1510 = vst [vmem:[%s2834_s23 + $0x300] sm:$0xff] %v862_v2  ;;  %1512 = vst [vmem:[%s2834_s23 + $0x310] sm:$0xff] %v1215_v3 }
 0x171   : > { %v864_v4 = vpop.f32.mrf.mxu0  ;;  %v1217_v5 = vpop.f32.mrf.mxu1 }
 0x172   : > { %1511 = vst [vmem:[%s2834_s23 + $0x308] sm:$0xff] %v864_v4  ;;  %1513 = vst [vmem:[%s2834_s23 + $0x318] sm:$0xff] %v1217_v5 }
 0x173   : > { %v866_v6 = vpop.f32.mrf.mxu0  ;;  %v1219_v7 = vpop.f32.mrf.mxu1 }
 0x174   : > { %1514 = vst [vmem:[%s2834_s23 + $0x320] sm:$0xff] %v866_v6  ;;  %1516 = vst [vmem:[%s2834_s23 + $0x330] sm:$0xff] %v1219_v7 }
 0x175   : > { %v868_v8 = vpop.f32.mrf.mxu0  ;;  %v1221_v9 = vpop.f32.mrf.mxu1 }
 0x176   : > { %1515 = vst [vmem:[%s2834_s23 + $0x328] sm:$0xff] %v868_v8  ;;  %1517 = vst [vmem:[%s2834_s23 + $0x338] sm:$0xff] %v1221_v9 }
 0x177   : > { %v872_v10 = vpop.f32.mrf.mxu0  ;;  %v1225_v11 = vpop.f32.mrf.mxu1 }
 0x178   : > { %1518 = vst [vmem:[%s2834_s23 + $0x340] sm:$0xff] %v872_v10  ;;  %1520 = vst [vmem:[%s2834_s23 + $0x350] sm:$0xff] %v1225_v11 }
 0x179   : > { %v874_v12 = vpop.f32.mrf.mxu0  ;;  %v1227_v13 = vpop.f32.mrf.mxu1 }
 0x17a   : > { %1519 = vst [vmem:[%s2834_s23 + $0x348] sm:$0xff] %v874_v12  ;;  %1521 = vst [vmem:[%s2834_s23 + $0x358] sm:$0xff] %v1227_v13 }
 0x17b   : > { %v876_v14 = vpop.f32.mrf.mxu0  ;;  %v1229_v15 = vpop.f32.mrf.mxu1 }
 0x17c   : > { %1522 = vst [vmem:[%s2834_s23 + $0x360] sm:$0xff] %v876_v14  ;;  %1524 = vst [vmem:[%s2834_s23 + $0x370] sm:$0xff] %v1229_v15 }
 0x17d   : > { %v878_v16 = vpop.f32.mrf.mxu0  ;;  %v1231_v17 = vpop.f32.mrf.mxu1 }
 0x17e   : > { %1523 = vst [vmem:[%s2834_s23 + $0x368] sm:$0xff] %v878_v16  ;;  %1525 = vst [vmem:[%s2834_s23 + $0x378] sm:$0xff] %v1231_v17 }
 0x17f   : > { %v882_v18 = vpop.f32.mrf.mxu0  ;;  %v1235_v19 = vpop.f32.mrf.mxu1 }
 0x180   : > { %1526 = vst [vmem:[%s2834_s23 + $0x380] sm:$0xff] %v882_v18  ;;  %1528 = vst [vmem:[%s2834_s23 + $0x390] sm:$0xff] %v1235_v19 }
 0x181   : > { %v884_v20 = vpop.f32.mrf.mxu0  ;;  %v1237_v21 = vpop.f32.mrf.mxu1 }
 0x182   : > { %1527 = vst [vmem:[%s2834_s23 + $0x388] sm:$0xff] %v884_v20  ;;  %1529 = vst [vmem:[%s2834_s23 + $0x398] sm:$0xff] %v1237_v21 }
 0x183   : > { %v886_v22 = vpop.f32.mrf.mxu0  ;;  %v1239_v23 = vpop.f32.mrf.mxu1 }
 0x184   : > { %1530 = vst [vmem:[%s2834_s23 + $0x3a0] sm:$0xff] %v886_v22  ;;  %1532 = vst [vmem:[%s2834_s23 + $0x3b0] sm:$0xff] %v1239_v23 }
 0x185   : > { %v888_v24 = vpop.f32.mrf.mxu0  ;;  %v1241_v25 = vpop.f32.mrf.mxu1 }
 0x186   : > { %1531 = vst [vmem:[%s2834_s23 + $0x3a8] sm:$0xff] %v888_v24  ;;  %1533 = vst [vmem:[%s2834_s23 + $0x3b8] sm:$0xff] %v1241_v25 }
 0x187   : > { %v892_v32 = vpop.f32.mrf.mxu0  ;;  %v1245_v26 = vpop.f32.mrf.mxu1 }
 0x188   : > { %1534 = vst [vmem:[%s2834_s23 + $0x3c0] sm:$0xff] %v892_v32  ;;  %1536 = vst [vmem:[%s2834_s23 + $0x3d0] sm:$0xff] %v1245_v26 }
 0x189   : > { %v894_v27 = vpop.f32.mrf.mxu0  ;;  %v1247_v28 = vpop.f32.mrf.mxu1 }
 0x18a   : > { %1535 = vst [vmem:[%s2834_s23 + $0x3c8] sm:$0xff] %v894_v27  ;;  %1537 = vst [vmem:[%s2834_s23 + $0x3d8] sm:$0xff] %v1247_v28 }
 0x18b   : > { %v896_v29 = vpop.f32.mrf.mxu0  ;;  %v1249_v30 = vpop.f32.mrf.mxu1 }
 0x18c   : > { %1538 = vst [vmem:[%s2834_s23 + $0x3e0] sm:$0xff] %v896_v29  ;;  %1540 = vst [vmem:[%s2834_s23 + $0x3f0] sm:$0xff] %v1249_v30 }
 0x18d   : > { %v898_v31 = vpop.f32.mrf.mxu0  ;;  %v1251_v33 = vpop.f32.mrf.mxu1 }
 0x18e   : > { %1539 = vst [vmem:[%s2834_s23 + $0x3e8] sm:$0xff] %v898_v31  ;;  %1541 = vst [vmem:[%s2834_s23 + $0x3f8] sm:$0xff] %v1251_v33 }
 0x18f   : > { %v902_v34 = vpop.f32.mrf.mxu0  ;;  %v1255_v35 = vpop.f32.mrf.mxu1 }
 0x190   : > { %1542 = vst [vmem:[%s2834_s23 + $0x400] sm:$0xff] %v902_v34  ;;  %1544 = vst [vmem:[%s2834_s23 + $0x410] sm:$0xff] %v1255_v35 }
 0x191   : > { %v904_v36 = vpop.f32.mrf.mxu0  ;;  %v1257_v37 = vpop.f32.mrf.mxu1 }
 0x192   : > { %1543 = vst [vmem:[%s2834_s23 + $0x408] sm:$0xff] %v904_v36  ;;  %1545 = vst [vmem:[%s2834_s23 + $0x418] sm:$0xff] %v1257_v37 }
 0x193   : > { %v906_v38 = vpop.f32.mrf.mxu0  ;;  %v1259_v39 = vpop.f32.mrf.mxu1 }
 0x194   : > { %1546 = vst [vmem:[%s2834_s23 + $0x420] sm:$0xff] %v906_v38  ;;  %1548 = vst [vmem:[%s2834_s23 + $0x430] sm:$0xff] %v1259_v39 }
 0x195   : > { %v908_v40 = vpop.f32.mrf.mxu0  ;;  %v1261_v41 = vpop.f32.mrf.mxu1 }
 0x196   : > { %1547 = vst [vmem:[%s2834_s23 + $0x428] sm:$0xff] %v908_v40  ;;  %1549 = vst [vmem:[%s2834_s23 + $0x438] sm:$0xff] %v1261_v41 }
 0x197   : > { %v912_v42 = vpop.f32.mrf.mxu0  ;;  %v1265_v43 = vpop.f32.mrf.mxu1 }
 0x198   : > { %1550 = vst [vmem:[%s2834_s23 + $0x440] sm:$0xff] %v912_v42  ;;  %1552 = vst [vmem:[%s2834_s23 + $0x450] sm:$0xff] %v1265_v43 }
 0x199   : > { %v914_v44 = vpop.f32.mrf.mxu0  ;;  %v1267_v45 = vpop.f32.mrf.mxu1 }
 0x19a   : > { %1551 = vst [vmem:[%s2834_s23 + $0x448] sm:$0xff] %v914_v44  ;;  %1553 = vst [vmem:[%s2834_s23 + $0x458] sm:$0xff] %v1267_v45 }
 0x19b   : > { %v916_v46 = vpop.f32.mrf.mxu0  ;;  %v1269_v47 = vpop.f32.mrf.mxu1 }
 0x19c   : > { %1554 = vst [vmem:[%s2834_s23 + $0x460] sm:$0xff] %v916_v46  ;;  %1556 = vst [vmem:[%s2834_s23 + $0x470] sm:$0xff] %v1269_v47 }
 0x19d   : > { %v918_v48 = vpop.f32.mrf.mxu0  ;;  %v1271_v49 = vpop.f32.mrf.mxu1 }
 0x19e   : > { %1555 = vst [vmem:[%s2834_s23 + $0x468] sm:$0xff] %v918_v48  ;;  %1557 = vst [vmem:[%s2834_s23 + $0x478] sm:$0xff] %v1271_v49 }
 0x19f   : > { %v922_v50 = vpop.f32.mrf.mxu0  ;;  %v1275_v51 = vpop.f32.mrf.mxu1 }
 0x1a0   : > { %1558 = vst [vmem:[%s2834_s23 + $0x480] sm:$0xff] %v922_v50  ;;  %1560 = vst [vmem:[%s2834_s23 + $0x490] sm:$0xff] %v1275_v51 }
 0x1a1   : > { %v924_v52 = vpop.f32.mrf.mxu0  ;;  %v1277_v53 = vpop.f32.mrf.mxu1 }
 0x1a2   : > { %1559 = vst [vmem:[%s2834_s23 + $0x488] sm:$0xff] %v924_v52  ;;  %1561 = vst [vmem:[%s2834_s23 + $0x498] sm:$0xff] %v1277_v53 }
 0x1a3   : > { %v926_v54 = vpop.f32.mrf.mxu0  ;;  %v1279_v55 = vpop.f32.mrf.mxu1 }
 0x1a4   : > { %1562 = vst [vmem:[%s2834_s23 + $0x4a0] sm:$0xff] %v926_v54  ;;  %1564 = vst [vmem:[%s2834_s23 + $0x4b0] sm:$0xff] %v1279_v55 }
 0x1a5   : > { %v928_v56 = vpop.f32.mrf.mxu0  ;;  %v1281_v57 = vpop.f32.mrf.mxu1 }
 0x1a6   : > { %1563 = vst [vmem:[%s2834_s23 + $0x4a8] sm:$0xff] %v928_v56  ;;  %1565 = vst [vmem:[%s2834_s23 + $0x4b8] sm:$0xff] %v1281_v57 }
 0x1a7   : > { %v932_v58 = vpop.f32.mrf.mxu0  ;;  %v1285_v59 = vpop.f32.mrf.mxu1 }
 0x1a8   : > { %1566 = vst [vmem:[%s2834_s23 + $0x4c0] sm:$0xff] %v932_v58  ;;  %1568 = vst [vmem:[%s2834_s23 + $0x4d0] sm:$0xff] %v1285_v59 }
 0x1a9   : > { %v934_v60 = vpop.f32.mrf.mxu0  ;;  %v1287_v61 = vpop.f32.mrf.mxu1 }
 0x1aa   : > { %1567 = vst [vmem:[%s2834_s23 + $0x4c8] sm:$0xff] %v934_v60  ;;  %1569 = vst [vmem:[%s2834_s23 + $0x4d8] sm:$0xff] %v1287_v61 }
 0x1ab   : > { %v936_v62 = vpop.f32.mrf.mxu0  ;;  %v1289_v63 = vpop.f32.mrf.mxu1 }
 0x1ac   : > { %1570 = vst [vmem:[%s2834_s23 + $0x4e0] sm:$0xff] %v936_v62  ;;  %1572 = vst [vmem:[%s2834_s23 + $0x4f0] sm:$0xff] %v1289_v63 }
 0x1ad   : > { %v938_v0 = vpop.f32.mrf.mxu0  ;;  %v1291_v1 = vpop.f32.mrf.mxu1 }
 0x1ae   : > { %1571 = vst [vmem:[%s2834_s23 + $0x4e8] sm:$0xff] %v938_v0  ;;  %1573 = vst [vmem:[%s2834_s23 + $0x4f8] sm:$0xff] %v1291_v1 }
 0x1af   : > { %v942_v2 = vpop.f32.mrf.mxu0  ;;  %v1295_v3 = vpop.f32.mrf.mxu1 }
 0x1b0   : > { %1574 = vst [vmem:[%s2834_s23 + $0x500] sm:$0xff] %v942_v2  ;;  %1576 = vst [vmem:[%s2834_s23 + $0x510] sm:$0xff] %v1295_v3 }
 0x1b1   : > { %v944_v4 = vpop.f32.mrf.mxu0  ;;  %v1297_v5 = vpop.f32.mrf.mxu1 }
 0x1b2   : > { %1575 = vst [vmem:[%s2834_s23 + $0x508] sm:$0xff] %v944_v4  ;;  %1577 = vst [vmem:[%s2834_s23 + $0x518] sm:$0xff] %v1297_v5 }
 0x1b3   : > { %v946_v6 = vpop.f32.mrf.mxu0  ;;  %v1299_v7 = vpop.f32.mrf.mxu1 }
 0x1b4   : > { %1578 = vst [vmem:[%s2834_s23 + $0x520] sm:$0xff] %v946_v6  ;;  %1580 = vst [vmem:[%s2834_s23 + $0x530] sm:$0xff] %v1299_v7 }
 0x1b5   : > { %v948_v8 = vpop.f32.mrf.mxu0  ;;  %v1301_v9 = vpop.f32.mrf.mxu1 }
 0x1b6   : > { %1579 = vst [vmem:[%s2834_s23 + $0x528] sm:$0xff] %v948_v8  ;;  %1581 = vst [vmem:[%s2834_s23 + $0x538] sm:$0xff] %v1301_v9 }
 0x1b7   : > { %v952_v10 = vpop.f32.mrf.mxu0  ;;  %v1305_v11 = vpop.f32.mrf.mxu1 }
 0x1b8   : > { %1582 = vst [vmem:[%s2834_s23 + $0x540] sm:$0xff] %v952_v10  ;;  %1584 = vst [vmem:[%s2834_s23 + $0x550] sm:$0xff] %v1305_v11 }
 0x1b9   : > { %v954_v12 = vpop.f32.mrf.mxu0  ;;  %v1307_v13 = vpop.f32.mrf.mxu1 }
 0x1ba   : > { %1583 = vst [vmem:[%s2834_s23 + $0x548] sm:$0xff] %v954_v12  ;;  %1585 = vst [vmem:[%s2834_s23 + $0x558] sm:$0xff] %v1307_v13 }
 0x1bb   : > { %v956_v14 = vpop.f32.mrf.mxu0  ;;  %v1309_v15 = vpop.f32.mrf.mxu1 }
 0x1bc   : > { %1586 = vst [vmem:[%s2834_s23 + $0x560] sm:$0xff] %v956_v14  ;;  %1588 = vst [vmem:[%s2834_s23 + $0x570] sm:$0xff] %v1309_v15 }
 0x1bd   : > { %v958_v16 = vpop.f32.mrf.mxu0  ;;  %v1311_v17 = vpop.f32.mrf.mxu1 }
 0x1be   : > { %1587 = vst [vmem:[%s2834_s23 + $0x568] sm:$0xff] %v958_v16  ;;  %1589 = vst [vmem:[%s2834_s23 + $0x578] sm:$0xff] %v1311_v17 }
 0x1bf   : > { %v962_v18 = vpop.f32.mrf.mxu0  ;;  %v1315_v19 = vpop.f32.mrf.mxu1 }
 0x1c0   : > { %1590 = vst [vmem:[%s2834_s23 + $0x580] sm:$0xff] %v962_v18  ;;  %1592 = vst [vmem:[%s2834_s23 + $0x590] sm:$0xff] %v1315_v19 }
 0x1c1   : > { %v964_v20 = vpop.f32.mrf.mxu0  ;;  %v1317_v21 = vpop.f32.mrf.mxu1 }
 0x1c2   : > { %1591 = vst [vmem:[%s2834_s23 + $0x588] sm:$0xff] %v964_v20  ;;  %1593 = vst [vmem:[%s2834_s23 + $0x598] sm:$0xff] %v1317_v21 }
 0x1c3   : > { %v966_v22 = vpop.f32.mrf.mxu0  ;;  %v1319_v23 = vpop.f32.mrf.mxu1 }
 0x1c4   : > { %1594 = vst [vmem:[%s2834_s23 + $0x5a0] sm:$0xff] %v966_v22  ;;  %1596 = vst [vmem:[%s2834_s23 + $0x5b0] sm:$0xff] %v1319_v23 }
 0x1c5   : > { %v968_v24 = vpop.f32.mrf.mxu0  ;;  %v1321_v25 = vpop.f32.mrf.mxu1 }
 0x1c6   : > { %1595 = vst [vmem:[%s2834_s23 + $0x5a8] sm:$0xff] %v968_v24  ;;  %1597 = vst [vmem:[%s2834_s23 + $0x5b8] sm:$0xff] %v1321_v25 }
 0x1c7   : > { %v972_v32 = vpop.f32.mrf.mxu0  ;;  %v1325_v26 = vpop.f32.mrf.mxu1 }
 0x1c8   : > { %1598 = vst [vmem:[%s2834_s23 + $0x5c0] sm:$0xff] %v972_v32  ;;  %1600 = vst [vmem:[%s2834_s23 + $0x5d0] sm:$0xff] %v1325_v26 }
 0x1c9   : > { %v974_v27 = vpop.f32.mrf.mxu0  ;;  %v1327_v28 = vpop.f32.mrf.mxu1 }
 0x1ca   : > { %1599 = vst [vmem:[%s2834_s23 + $0x5c8] sm:$0xff] %v974_v27  ;;  %1601 = vst [vmem:[%s2834_s23 + $0x5d8] sm:$0xff] %v1327_v28 }
 0x1cb   : > { %v976_v29 = vpop.f32.mrf.mxu0  ;;  %v1329_v30 = vpop.f32.mrf.mxu1 }
 0x1cc   : > { %1602 = vst [vmem:[%s2834_s23 + $0x5e0] sm:$0xff] %v976_v29  ;;  %1604 = vst [vmem:[%s2834_s23 + $0x5f0] sm:$0xff] %v1329_v30 }
 0x1cd   : > { %v978_v31 = vpop.f32.mrf.mxu0  ;;  %v1331_v33 = vpop.f32.mrf.mxu1 }
 0x1ce   : > { %1603 = vst [vmem:[%s2834_s23 + $0x5e8] sm:$0xff] %v978_v31  ;;  %1605 = vst [vmem:[%s2834_s23 + $0x5f8] sm:$0xff] %v1331_v33 }
 0x1cf   : > { %v982_v34 = vpop.f32.mrf.mxu0  ;;  %v1335_v35 = vpop.f32.mrf.mxu1 }
 0x1d0   : > { %1606 = vst [vmem:[%s2834_s23 + $0x600] sm:$0xff] %v982_v34  ;;  %1608 = vst [vmem:[%s2834_s23 + $0x610] sm:$0xff] %v1335_v35  ;;  %v1695_v34 = vld [vmem:[%s2834_s23] sm:$0xff] (%p2587_p6)  ;;  %v1697_v35 = vld [vmem:[%s2834_s23 + $0x8] sm:$0xff] (%p2587_p6) }
 0x1d1   : > { %v984_v36 = vpop.f32.mrf.mxu0  ;;  %v1337_v37 = vpop.f32.mrf.mxu1  ;;  %1696 = vst [vmem:[%s3136_s20] sm:$0xff] (%p2587_p6), %v1695_v34  ;;  %1698 = vst [vmem:[%s3136_s20 + $0x8] sm:$0xff] (%p2587_p6), %v1697_v35  ;;  %v1823_v34 = vld [vmem:[%s2834_s23 + $0x200] sm:$0xff] (%p2587_p6)  ;;  %v1825_v35 = vld [vmem:[%s2834_s23 + $0x208] sm:$0xff] (%p2587_p6) }
 0x1d2   : > { %1607 = vst [vmem:[%s2834_s23 + $0x608] sm:$0xff] %v984_v36  ;;  %1609 = vst [vmem:[%s2834_s23 + $0x618] sm:$0xff] %v1337_v37  ;;  %v1699_v36 = vld [vmem:[%s2834_s23 + $0x10] sm:$0xff] (%p2587_p6)  ;;  %v1701_v37 = vld [vmem:[%s2834_s23 + $0x18] sm:$0xff] (%p2587_p6) }
 0x1d3   : > { %v986_v38 = vpop.f32.mrf.mxu0  ;;  %v1339_v39 = vpop.f32.mrf.mxu1  ;;  %1700 = vst [vmem:[%s3136_s20 + $0x10] sm:$0xff] (%p2587_p6), %v1699_v36  ;;  %1702 = vst [vmem:[%s3136_s20 + $0x18] sm:$0xff] (%p2587_p6), %v1701_v37  ;;  %v1827_v36 = vld [vmem:[%s2834_s23 + $0x210] sm:$0xff] (%p2587_p6)  ;;  %v1829_v37 = vld [vmem:[%s2834_s23 + $0x218] sm:$0xff] (%p2587_p6) }
 0x1d4   : > { %1610 = vst [vmem:[%s2834_s23 + $0x620] sm:$0xff] %v986_v38  ;;  %1612 = vst [vmem:[%s2834_s23 + $0x630] sm:$0xff] %v1339_v39  ;;  %v1703_v38 = vld [vmem:[%s2834_s23 + $0x20] sm:$0xff] (%p2587_p6)  ;;  %v1705_v39 = vld [vmem:[%s2834_s23 + $0x28] sm:$0xff] (%p2587_p6) }
 0x1d5   : > { %v988_v40 = vpop.f32.mrf.mxu0  ;;  %v1341_v41 = vpop.f32.mrf.mxu1  ;;  %1704 = vst [vmem:[%s3136_s20 + $0x40] sm:$0xff] (%p2587_p6), %v1703_v38  ;;  %1706 = vst [vmem:[%s3136_s20 + $0x48] sm:$0xff] (%p2587_p6), %v1705_v39  ;;  %v1831_v38 = vld [vmem:[%s2834_s23 + $0x220] sm:$0xff] (%p2587_p6)  ;;  %v1833_v39 = vld [vmem:[%s2834_s23 + $0x228] sm:$0xff] (%p2587_p6) }
 0x1d6   : > { %1611 = vst [vmem:[%s2834_s23 + $0x628] sm:$0xff] %v988_v40  ;;  %1613 = vst [vmem:[%s2834_s23 + $0x638] sm:$0xff] %v1341_v41  ;;  %v1707_v40 = vld [vmem:[%s2834_s23 + $0x30] sm:$0xff] (%p2587_p6)  ;;  %v1709_v41 = vld [vmem:[%s2834_s23 + $0x38] sm:$0xff] (%p2587_p6) }
 0x1d7   : > { %v992_v42 = vpop.f32.mrf.mxu0  ;;  %v1345_v43 = vpop.f32.mrf.mxu1  ;;  %1708 = vst [vmem:[%s3136_s20 + $0x50] sm:$0xff] (%p2587_p6), %v1707_v40  ;;  %1710 = vst [vmem:[%s3136_s20 + $0x58] sm:$0xff] (%p2587_p6), %v1709_v41  ;;  %v1835_v40 = vld [vmem:[%s2834_s23 + $0x230] sm:$0xff] (%p2587_p6)  ;;  %v1837_v41 = vld [vmem:[%s2834_s23 + $0x238] sm:$0xff] (%p2587_p6) }
 0x1d8   : > { %1614 = vst [vmem:[%s2834_s23 + $0x640] sm:$0xff] %v992_v42  ;;  %1616 = vst [vmem:[%s2834_s23 + $0x650] sm:$0xff] %v1345_v43  ;;  %v1711_v42 = vld [vmem:[%s2834_s23 + $0x40] sm:$0xff] (%p2587_p6)  ;;  %v1713_v43 = vld [vmem:[%s2834_s23 + $0x48] sm:$0xff] (%p2587_p6) }
 0x1d9   : > { %v994_v44 = vpop.f32.mrf.mxu0  ;;  %v1347_v45 = vpop.f32.mrf.mxu1  ;;  %1712 = vst [vmem:[%s3136_s20 + $0x80] sm:$0xff] (%p2587_p6), %v1711_v42  ;;  %1714 = vst [vmem:[%s3136_s20 + $0x88] sm:$0xff] (%p2587_p6), %v1713_v43  ;;  %v1839_v42 = vld [vmem:[%s2834_s23 + $0x240] sm:$0xff] (%p2587_p6)  ;;  %v1841_v43 = vld [vmem:[%s2834_s23 + $0x248] sm:$0xff] (%p2587_p6) }
 0x1da   : > { %1615 = vst [vmem:[%s2834_s23 + $0x648] sm:$0xff] %v994_v44  ;;  %1617 = vst [vmem:[%s2834_s23 + $0x658] sm:$0xff] %v1347_v45  ;;  %v1715_v44 = vld [vmem:[%s2834_s23 + $0x50] sm:$0xff] (%p2587_p6)  ;;  %v1717_v45 = vld [vmem:[%s2834_s23 + $0x58] sm:$0xff] (%p2587_p6) }
 0x1db   : > { %v996_v46 = vpop.f32.mrf.mxu0  ;;  %v1349_v47 = vpop.f32.mrf.mxu1  ;;  %1716 = vst [vmem:[%s3136_s20 + $0x90] sm:$0xff] (%p2587_p6), %v1715_v44  ;;  %1718 = vst [vmem:[%s3136_s20 + $0x98] sm:$0xff] (%p2587_p6), %v1717_v45  ;;  %v1843_v44 = vld [vmem:[%s2834_s23 + $0x250] sm:$0xff] (%p2587_p6)  ;;  %v1845_v45 = vld [vmem:[%s2834_s23 + $0x258] sm:$0xff] (%p2587_p6) }
 0x1dc   : > { %1618 = vst [vmem:[%s2834_s23 + $0x660] sm:$0xff] %v996_v46  ;;  %1620 = vst [vmem:[%s2834_s23 + $0x670] sm:$0xff] %v1349_v47  ;;  %v1719_v46 = vld [vmem:[%s2834_s23 + $0x60] sm:$0xff] (%p2587_p6)  ;;  %v1721_v47 = vld [vmem:[%s2834_s23 + $0x68] sm:$0xff] (%p2587_p6) }
 0x1dd   : > { %v998_v48 = vpop.f32.mrf.mxu0  ;;  %v1351_v49 = vpop.f32.mrf.mxu1  ;;  %1720 = vst [vmem:[%s3136_s20 + $0xc0] sm:$0xff] (%p2587_p6), %v1719_v46  ;;  %1722 = vst [vmem:[%s3136_s20 + $0xc8] sm:$0xff] (%p2587_p6), %v1721_v47  ;;  %v1847_v46 = vld [vmem:[%s2834_s23 + $0x260] sm:$0xff] (%p2587_p6)  ;;  %v1849_v47 = vld [vmem:[%s2834_s23 + $0x268] sm:$0xff] (%p2587_p6) }
 0x1de   : > { %1619 = vst [vmem:[%s2834_s23 + $0x668] sm:$0xff] %v998_v48  ;;  %1621 = vst [vmem:[%s2834_s23 + $0x678] sm:$0xff] %v1351_v49  ;;  %v1723_v48 = vld [vmem:[%s2834_s23 + $0x70] sm:$0xff] (%p2587_p6)  ;;  %v1725_v49 = vld [vmem:[%s2834_s23 + $0x78] sm:$0xff] (%p2587_p6) }
 0x1df   : > { %v1002_v50 = vpop.f32.mrf.mxu0  ;;  %v1355_v51 = vpop.f32.mrf.mxu1  ;;  %1724 = vst [vmem:[%s3136_s20 + $0xd0] sm:$0xff] (%p2587_p6), %v1723_v48  ;;  %1726 = vst [vmem:[%s3136_s20 + $0xd8] sm:$0xff] (%p2587_p6), %v1725_v49  ;;  %v1851_v48 = vld [vmem:[%s2834_s23 + $0x270] sm:$0xff] (%p2587_p6)  ;;  %v1853_v49 = vld [vmem:[%s2834_s23 + $0x278] sm:$0xff] (%p2587_p6) }
 0x1e0   : > { %1622 = vst [vmem:[%s2834_s23 + $0x680] sm:$0xff] %v1002_v50  ;;  %1624 = vst [vmem:[%s2834_s23 + $0x690] sm:$0xff] %v1355_v51  ;;  %v1727_v50 = vld [vmem:[%s2834_s23 + $0x80] sm:$0xff] (%p2587_p6)  ;;  %v1729_v51 = vld [vmem:[%s2834_s23 + $0x88] sm:$0xff] (%p2587_p6) }
 0x1e1   : > { %v1004_v52 = vpop.f32.mrf.mxu0  ;;  %v1357_v53 = vpop.f32.mrf.mxu1  ;;  %1728 = vst [vmem:[%s3136_s20 + $0x100] sm:$0xff] (%p2587_p6), %v1727_v50  ;;  %1730 = vst [vmem:[%s3136_s20 + $0x108] sm:$0xff] (%p2587_p6), %v1729_v51  ;;  %v1855_v50 = vld [vmem:[%s2834_s23 + $0x280] sm:$0xff] (%p2587_p6)  ;;  %v1857_v51 = vld [vmem:[%s2834_s23 + $0x288] sm:$0xff] (%p2587_p6) }
 0x1e2   : > { %1623 = vst [vmem:[%s2834_s23 + $0x688] sm:$0xff] %v1004_v52  ;;  %1625 = vst [vmem:[%s2834_s23 + $0x698] sm:$0xff] %v1357_v53  ;;  %v1731_v52 = vld [vmem:[%s2834_s23 + $0x90] sm:$0xff] (%p2587_p6)  ;;  %v1733_v53 = vld [vmem:[%s2834_s23 + $0x98] sm:$0xff] (%p2587_p6) }
 0x1e3   : > { %v1006_v54 = vpop.f32.mrf.mxu0  ;;  %v1359_v55 = vpop.f32.mrf.mxu1  ;;  %1732 = vst [vmem:[%s3136_s20 + $0x110] sm:$0xff] (%p2587_p6), %v1731_v52  ;;  %1734 = vst [vmem:[%s3136_s20 + $0x118] sm:$0xff] (%p2587_p6), %v1733_v53  ;;  %v1859_v52 = vld [vmem:[%s2834_s23 + $0x290] sm:$0xff] (%p2587_p6)  ;;  %v1861_v53 = vld [vmem:[%s2834_s23 + $0x298] sm:$0xff] (%p2587_p6) }
 0x1e4   : > { %1626 = vst [vmem:[%s2834_s23 + $0x6a0] sm:$0xff] %v1006_v54  ;;  %1628 = vst [vmem:[%s2834_s23 + $0x6b0] sm:$0xff] %v1359_v55  ;;  %v1735_v54 = vld [vmem:[%s2834_s23 + $0xa0] sm:$0xff] (%p2587_p6)  ;;  %v1737_v55 = vld [vmem:[%s2834_s23 + $0xa8] sm:$0xff] (%p2587_p6) }
 0x1e5   : > { %v1008_v56 = vpop.f32.mrf.mxu0  ;;  %v1361_v57 = vpop.f32.mrf.mxu1  ;;  %1736 = vst [vmem:[%s3136_s20 + $0x140] sm:$0xff] (%p2587_p6), %v1735_v54  ;;  %1738 = vst [vmem:[%s3136_s20 + $0x148] sm:$0xff] (%p2587_p6), %v1737_v55  ;;  %v1863_v54 = vld [vmem:[%s2834_s23 + $0x2a0] sm:$0xff] (%p2587_p6)  ;;  %v1865_v55 = vld [vmem:[%s2834_s23 + $0x2a8] sm:$0xff] (%p2587_p6) }
 0x1e6   : > { %1627 = vst [vmem:[%s2834_s23 + $0x6a8] sm:$0xff] %v1008_v56  ;;  %1629 = vst [vmem:[%s2834_s23 + $0x6b8] sm:$0xff] %v1361_v57  ;;  %v1739_v56 = vld [vmem:[%s2834_s23 + $0xb0] sm:$0xff] (%p2587_p6)  ;;  %v1741_v57 = vld [vmem:[%s2834_s23 + $0xb8] sm:$0xff] (%p2587_p6) }
 0x1e7   : > { %v1012_v58 = vpop.f32.mrf.mxu0  ;;  %v1365_v59 = vpop.f32.mrf.mxu1  ;;  %1740 = vst [vmem:[%s3136_s20 + $0x150] sm:$0xff] (%p2587_p6), %v1739_v56  ;;  %1742 = vst [vmem:[%s3136_s20 + $0x158] sm:$0xff] (%p2587_p6), %v1741_v57  ;;  %v1867_v56 = vld [vmem:[%s2834_s23 + $0x2b0] sm:$0xff] (%p2587_p6)  ;;  %v1869_v57 = vld [vmem:[%s2834_s23 + $0x2b8] sm:$0xff] (%p2587_p6) }
 0x1e8   : > { %1630 = vst [vmem:[%s2834_s23 + $0x6c0] sm:$0xff] %v1012_v58  ;;  %1632 = vst [vmem:[%s2834_s23 + $0x6d0] sm:$0xff] %v1365_v59  ;;  %v1743_v58 = vld [vmem:[%s2834_s23 + $0xc0] sm:$0xff] (%p2587_p6)  ;;  %v1745_v59 = vld [vmem:[%s2834_s23 + $0xc8] sm:$0xff] (%p2587_p6) }
 0x1e9   : > { %v1014_v60 = vpop.f32.mrf.mxu0  ;;  %v1367_v61 = vpop.f32.mrf.mxu1  ;;  %1744 = vst [vmem:[%s3136_s20 + $0x180] sm:$0xff] (%p2587_p6), %v1743_v58  ;;  %1746 = vst [vmem:[%s3136_s20 + $0x188] sm:$0xff] (%p2587_p6), %v1745_v59  ;;  %v1871_v58 = vld [vmem:[%s2834_s23 + $0x2c0] sm:$0xff] (%p2587_p6)  ;;  %v1873_v59 = vld [vmem:[%s2834_s23 + $0x2c8] sm:$0xff] (%p2587_p6) }
 0x1ea   : > { %1631 = vst [vmem:[%s2834_s23 + $0x6c8] sm:$0xff] %v1014_v60  ;;  %1633 = vst [vmem:[%s2834_s23 + $0x6d8] sm:$0xff] %v1367_v61  ;;  %v1747_v60 = vld [vmem:[%s2834_s23 + $0xd0] sm:$0xff] (%p2587_p6)  ;;  %v1749_v61 = vld [vmem:[%s2834_s23 + $0xd8] sm:$0xff] (%p2587_p6) }
 0x1eb   : > { %v1016_v62 = vpop.f32.mrf.mxu0  ;;  %v1369_v63 = vpop.f32.mrf.mxu1  ;;  %1748 = vst [vmem:[%s3136_s20 + $0x190] sm:$0xff] (%p2587_p6), %v1747_v60  ;;  %1750 = vst [vmem:[%s3136_s20 + $0x198] sm:$0xff] (%p2587_p6), %v1749_v61  ;;  %v1875_v60 = vld [vmem:[%s2834_s23 + $0x2d0] sm:$0xff] (%p2587_p6)  ;;  %v1877_v61 = vld [vmem:[%s2834_s23 + $0x2d8] sm:$0xff] (%p2587_p6) }
 0x1ec   : > { %1634 = vst [vmem:[%s2834_s23 + $0x6e0] sm:$0xff] %v1016_v62  ;;  %1636 = vst [vmem:[%s2834_s23 + $0x6f0] sm:$0xff] %v1369_v63  ;;  %v1751_v62 = vld [vmem:[%s2834_s23 + $0xe0] sm:$0xff] (%p2587_p6)  ;;  %v1753_v63 = vld [vmem:[%s2834_s23 + $0xe8] sm:$0xff] (%p2587_p6) }
 0x1ed   : > { %v1018_v0 = vpop.f32.mrf.mxu0  ;;  %v1371_v1 = vpop.f32.mrf.mxu1  ;;  %1752 = vst [vmem:[%s3136_s20 + $0x1c0] sm:$0xff] (%p2587_p6), %v1751_v62  ;;  %1754 = vst [vmem:[%s3136_s20 + $0x1c8] sm:$0xff] (%p2587_p6), %v1753_v63  ;;  %v1879_v62 = vld [vmem:[%s2834_s23 + $0x2e0] sm:$0xff] (%p2587_p6)  ;;  %v1881_v63 = vld [vmem:[%s2834_s23 + $0x2e8] sm:$0xff] (%p2587_p6) }
 0x1ee   : > { %1635 = vst [vmem:[%s2834_s23 + $0x6e8] sm:$0xff] %v1018_v0  ;;  %1637 = vst [vmem:[%s2834_s23 + $0x6f8] sm:$0xff] %v1371_v1  ;;  %v1755_v0 = vld [vmem:[%s2834_s23 + $0xf0] sm:$0xff] (%p2587_p6)  ;;  %v1757_v1 = vld [vmem:[%s2834_s23 + $0xf8] sm:$0xff] (%p2587_p6) }
 0x1ef   : > { %v1022_v2 = vpop.f32.mrf.mxu0  ;;  %v1375_v3 = vpop.f32.mrf.mxu1  ;;  %1756 = vst [vmem:[%s3136_s20 + $0x1d0] sm:$0xff] (%p2587_p6), %v1755_v0  ;;  %1758 = vst [vmem:[%s3136_s20 + $0x1d8] sm:$0xff] (%p2587_p6), %v1757_v1  ;;  %v1883_v0 = vld [vmem:[%s2834_s23 + $0x2f0] sm:$0xff] (%p2587_p6)  ;;  %v1885_v1 = vld [vmem:[%s2834_s23 + $0x2f8] sm:$0xff] (%p2587_p6) }
 0x1f0   : > { %1638 = vst [vmem:[%s2834_s23 + $0x700] sm:$0xff] %v1022_v2  ;;  %1640 = vst [vmem:[%s2834_s23 + $0x710] sm:$0xff] %v1375_v3  ;;  %v1759_v2 = vld [vmem:[%s2834_s23 + $0x100] sm:$0xff] (%p2587_p6)  ;;  %v1761_v3 = vld [vmem:[%s2834_s23 + $0x108] sm:$0xff] (%p2587_p6) }
 0x1f1   : > { %v1024_v4 = vpop.f32.mrf.mxu0  ;;  %v1377_v5 = vpop.f32.mrf.mxu1  ;;  %1760 = vst [vmem:[%s3136_s20 + $0x200] sm:$0xff] (%p2587_p6), %v1759_v2  ;;  %1762 = vst [vmem:[%s3136_s20 + $0x208] sm:$0xff] (%p2587_p6), %v1761_v3  ;;  %v1887_v2 = vld [vmem:[%s2834_s23 + $0x300] sm:$0xff] (%p2587_p6)  ;;  %v1889_v3 = vld [vmem:[%s2834_s23 + $0x308] sm:$0xff] (%p2587_p6) }
 0x1f2   : > { %1639 = vst [vmem:[%s2834_s23 + $0x708] sm:$0xff] %v1024_v4  ;;  %1641 = vst [vmem:[%s2834_s23 + $0x718] sm:$0xff] %v1377_v5  ;;  %v1763_v4 = vld [vmem:[%s2834_s23 + $0x110] sm:$0xff] (%p2587_p6)  ;;  %v1765_v5 = vld [vmem:[%s2834_s23 + $0x118] sm:$0xff] (%p2587_p6) }
 0x1f3   : > { %v1026_v6 = vpop.f32.mrf.mxu0  ;;  %v1379_v7 = vpop.f32.mrf.mxu1  ;;  %1764 = vst [vmem:[%s3136_s20 + $0x210] sm:$0xff] (%p2587_p6), %v1763_v4  ;;  %1766 = vst [vmem:[%s3136_s20 + $0x218] sm:$0xff] (%p2587_p6), %v1765_v5  ;;  %v1891_v4 = vld [vmem:[%s2834_s23 + $0x310] sm:$0xff] (%p2587_p6)  ;;  %v1893_v5 = vld [vmem:[%s2834_s23 + $0x318] sm:$0xff] (%p2587_p6) }
 0x1f4   : > { %1642 = vst [vmem:[%s2834_s23 + $0x720] sm:$0xff] %v1026_v6  ;;  %1644 = vst [vmem:[%s2834_s23 + $0x730] sm:$0xff] %v1379_v7  ;;  %v1767_v6 = vld [vmem:[%s2834_s23 + $0x120] sm:$0xff] (%p2587_p6)  ;;  %v1769_v7 = vld [vmem:[%s2834_s23 + $0x128] sm:$0xff] (%p2587_p6) }
 0x1f5   : > { %v1028_v8 = vpop.f32.mrf.mxu0  ;;  %v1381_v9 = vpop.f32.mrf.mxu1  ;;  %1768 = vst [vmem:[%s3136_s20 + $0x240] sm:$0xff] (%p2587_p6), %v1767_v6  ;;  %1770 = vst [vmem:[%s3136_s20 + $0x248] sm:$0xff] (%p2587_p6), %v1769_v7  ;;  %v1895_v6 = vld [vmem:[%s2834_s23 + $0x320] sm:$0xff] (%p2587_p6)  ;;  %v1897_v7 = vld [vmem:[%s2834_s23 + $0x328] sm:$0xff] (%p2587_p6) }
 0x1f6   : > { %1643 = vst [vmem:[%s2834_s23 + $0x728] sm:$0xff] %v1028_v8  ;;  %1645 = vst [vmem:[%s2834_s23 + $0x738] sm:$0xff] %v1381_v9  ;;  %v1771_v8 = vld [vmem:[%s2834_s23 + $0x130] sm:$0xff] (%p2587_p6)  ;;  %v1773_v9 = vld [vmem:[%s2834_s23 + $0x138] sm:$0xff] (%p2587_p6) }
 0x1f7   : > { %v1032_v10 = vpop.f32.mrf.mxu0  ;;  %v1385_v11 = vpop.f32.mrf.mxu1  ;;  %1772 = vst [vmem:[%s3136_s20 + $0x250] sm:$0xff] (%p2587_p6), %v1771_v8  ;;  %1774 = vst [vmem:[%s3136_s20 + $0x258] sm:$0xff] (%p2587_p6), %v1773_v9  ;;  %v1899_v8 = vld [vmem:[%s2834_s23 + $0x330] sm:$0xff] (%p2587_p6)  ;;  %v1901_v9 = vld [vmem:[%s2834_s23 + $0x338] sm:$0xff] (%p2587_p6) }
 0x1f8   : > { %1646 = vst [vmem:[%s2834_s23 + $0x740] sm:$0xff] %v1032_v10  ;;  %1648 = vst [vmem:[%s2834_s23 + $0x750] sm:$0xff] %v1385_v11  ;;  %v1775_v10 = vld [vmem:[%s2834_s23 + $0x140] sm:$0xff] (%p2587_p6)  ;;  %v1777_v11 = vld [vmem:[%s2834_s23 + $0x148] sm:$0xff] (%p2587_p6) }
 0x1f9   : > { %v1034_v12 = vpop.f32.mrf.mxu0  ;;  %v1387_v13 = vpop.f32.mrf.mxu1  ;;  %1776 = vst [vmem:[%s3136_s20 + $0x280] sm:$0xff] (%p2587_p6), %v1775_v10  ;;  %1778 = vst [vmem:[%s3136_s20 + $0x288] sm:$0xff] (%p2587_p6), %v1777_v11  ;;  %v1903_v10 = vld [vmem:[%s2834_s23 + $0x340] sm:$0xff] (%p2587_p6)  ;;  %v1905_v11 = vld [vmem:[%s2834_s23 + $0x348] sm:$0xff] (%p2587_p6) }
 0x1fa   : > { %1647 = vst [vmem:[%s2834_s23 + $0x748] sm:$0xff] %v1034_v12  ;;  %1649 = vst [vmem:[%s2834_s23 + $0x758] sm:$0xff] %v1387_v13  ;;  %v1779_v12 = vld [vmem:[%s2834_s23 + $0x150] sm:$0xff] (%p2587_p6)  ;;  %v1781_v13 = vld [vmem:[%s2834_s23 + $0x158] sm:$0xff] (%p2587_p6) }
 0x1fb   : > { %v1036_v14 = vpop.f32.mrf.mxu0  ;;  %v1389_v15 = vpop.f32.mrf.mxu1  ;;  %1780 = vst [vmem:[%s3136_s20 + $0x290] sm:$0xff] (%p2587_p6), %v1779_v12  ;;  %1782 = vst [vmem:[%s3136_s20 + $0x298] sm:$0xff] (%p2587_p6), %v1781_v13  ;;  %v1907_v12 = vld [vmem:[%s2834_s23 + $0x350] sm:$0xff] (%p2587_p6)  ;;  %v1909_v13 = vld [vmem:[%s2834_s23 + $0x358] sm:$0xff] (%p2587_p6) }
 0x1fc   : > { %1650 = vst [vmem:[%s2834_s23 + $0x760] sm:$0xff] %v1036_v14  ;;  %1652 = vst [vmem:[%s2834_s23 + $0x770] sm:$0xff] %v1389_v15  ;;  %v1783_v14 = vld [vmem:[%s2834_s23 + $0x160] sm:$0xff] (%p2587_p6)  ;;  %v1785_v15 = vld [vmem:[%s2834_s23 + $0x168] sm:$0xff] (%p2587_p6) }
 0x1fd   : > { %v1038_v16 = vpop.f32.mrf.mxu0  ;;  %v1391_v17 = vpop.f32.mrf.mxu1  ;;  %1784 = vst [vmem:[%s3136_s20 + $0x2c0] sm:$0xff] (%p2587_p6), %v1783_v14  ;;  %1786 = vst [vmem:[%s3136_s20 + $0x2c8] sm:$0xff] (%p2587_p6), %v1785_v15  ;;  %v1911_v14 = vld [vmem:[%s2834_s23 + $0x360] sm:$0xff] (%p2587_p6)  ;;  %v1913_v15 = vld [vmem:[%s2834_s23 + $0x368] sm:$0xff] (%p2587_p6) }
 0x1fe   : > { %1651 = vst [vmem:[%s2834_s23 + $0x768] sm:$0xff] %v1038_v16  ;;  %1653 = vst [vmem:[%s2834_s23 + $0x778] sm:$0xff] %v1391_v17  ;;  %v1787_v16 = vld [vmem:[%s2834_s23 + $0x170] sm:$0xff] (%p2587_p6)  ;;  %v1789_v17 = vld [vmem:[%s2834_s23 + $0x178] sm:$0xff] (%p2587_p6) }
 0x1ff   : > { %v1042_v18 = vpop.f32.mrf.mxu0  ;;  %v1395_v19 = vpop.f32.mrf.mxu1  ;;  %1788 = vst [vmem:[%s3136_s20 + $0x2d0] sm:$0xff] (%p2587_p6), %v1787_v16  ;;  %1790 = vst [vmem:[%s3136_s20 + $0x2d8] sm:$0xff] (%p2587_p6), %v1789_v17  ;;  %v1915_v16 = vld [vmem:[%s2834_s23 + $0x370] sm:$0xff] (%p2587_p6)  ;;  %v1917_v17 = vld [vmem:[%s2834_s23 + $0x378] sm:$0xff] (%p2587_p6) }
 0x200   : > { %1654 = vst [vmem:[%s2834_s23 + $0x780] sm:$0xff] %v1042_v18  ;;  %1656 = vst [vmem:[%s2834_s23 + $0x790] sm:$0xff] %v1395_v19  ;;  %v1791_v18 = vld [vmem:[%s2834_s23 + $0x180] sm:$0xff] (%p2587_p6)  ;;  %v1793_v19 = vld [vmem:[%s2834_s23 + $0x188] sm:$0xff] (%p2587_p6) }
 0x201   : > { %v1044_v20 = vpop.f32.mrf.mxu0  ;;  %v1397_v21 = vpop.f32.mrf.mxu1  ;;  %1792 = vst [vmem:[%s3136_s20 + $0x300] sm:$0xff] (%p2587_p6), %v1791_v18  ;;  %1794 = vst [vmem:[%s3136_s20 + $0x308] sm:$0xff] (%p2587_p6), %v1793_v19  ;;  %v1919_v18 = vld [vmem:[%s2834_s23 + $0x380] sm:$0xff] (%p2587_p6)  ;;  %v1921_v19 = vld [vmem:[%s2834_s23 + $0x388] sm:$0xff] (%p2587_p6) }
 0x202   : > { %1655 = vst [vmem:[%s2834_s23 + $0x788] sm:$0xff] %v1044_v20  ;;  %1657 = vst [vmem:[%s2834_s23 + $0x798] sm:$0xff] %v1397_v21  ;;  %v1795_v20 = vld [vmem:[%s2834_s23 + $0x190] sm:$0xff] (%p2587_p6)  ;;  %v1797_v21 = vld [vmem:[%s2834_s23 + $0x198] sm:$0xff] (%p2587_p6) }
 0x203   : > { %v1046_v22 = vpop.f32.mrf.mxu0  ;;  %v1399_v23 = vpop.f32.mrf.mxu1  ;;  %1796 = vst [vmem:[%s3136_s20 + $0x310] sm:$0xff] (%p2587_p6), %v1795_v20  ;;  %1798 = vst [vmem:[%s3136_s20 + $0x318] sm:$0xff] (%p2587_p6), %v1797_v21  ;;  %v1923_v20 = vld [vmem:[%s2834_s23 + $0x390] sm:$0xff] (%p2587_p6)  ;;  %v1925_v21 = vld [vmem:[%s2834_s23 + $0x398] sm:$0xff] (%p2587_p6) }
 0x204   : > { %1658 = vst [vmem:[%s2834_s23 + $0x7a0] sm:$0xff] %v1046_v22  ;;  %1660 = vst [vmem:[%s2834_s23 + $0x7b0] sm:$0xff] %v1399_v23  ;;  %v1799_v22 = vld [vmem:[%s2834_s23 + $0x1a0] sm:$0xff] (%p2587_p6)  ;;  %v1801_v23 = vld [vmem:[%s2834_s23 + $0x1a8] sm:$0xff] (%p2587_p6) }
 0x205   : > { %v1048_v24 = vpop.f32.mrf.mxu0  ;;  %v1401_v25 = vpop.f32.mrf.mxu1  ;;  %1800 = vst [vmem:[%s3136_s20 + $0x340] sm:$0xff] (%p2587_p6), %v1799_v22  ;;  %1802 = vst [vmem:[%s3136_s20 + $0x348] sm:$0xff] (%p2587_p6), %v1801_v23  ;;  %v1927_v22 = vld [vmem:[%s2834_s23 + $0x3a0] sm:$0xff] (%p2587_p6)  ;;  %v1929_v23 = vld [vmem:[%s2834_s23 + $0x3a8] sm:$0xff] (%p2587_p6) }
 0x206   : > { %1659 = vst [vmem:[%s2834_s23 + $0x7a8] sm:$0xff] %v1048_v24  ;;  %1661 = vst [vmem:[%s2834_s23 + $0x7b8] sm:$0xff] %v1401_v25  ;;  %v1803_v24 = vld [vmem:[%s2834_s23 + $0x1b0] sm:$0xff] (%p2587_p6)  ;;  %v1805_v25 = vld [vmem:[%s2834_s23 + $0x1b8] sm:$0xff] (%p2587_p6) }
 0x207   : > { %v1052_v32 = vpop.f32.mrf.mxu0  ;;  %v1405_v26 = vpop.f32.mrf.mxu1  ;;  %1804 = vst [vmem:[%s3136_s20 + $0x350] sm:$0xff] (%p2587_p6), %v1803_v24  ;;  %1806 = vst [vmem:[%s3136_s20 + $0x358] sm:$0xff] (%p2587_p6), %v1805_v25  ;;  %v1931_v24 = vld [vmem:[%s2834_s23 + $0x3b0] sm:$0xff] (%p2587_p6)  ;;  %v1933_v25 = vld [vmem:[%s2834_s23 + $0x3b8] sm:$0xff] (%p2587_p6) }
 0x208   : > { %1662 = vst [vmem:[%s2834_s23 + $0x7c0] sm:$0xff] %v1052_v32  ;;  %1664 = vst [vmem:[%s2834_s23 + $0x7d0] sm:$0xff] %v1405_v26  ;;  %v1807_v32 = vld [vmem:[%s2834_s23 + $0x1c0] sm:$0xff] (%p2587_p6)  ;;  %v1809_v26 = vld [vmem:[%s2834_s23 + $0x1c8] sm:$0xff] (%p2587_p6) }
 0x209   : > { %v1054_v27 = vpop.f32.mrf.mxu0  ;;  %v1407_v28 = vpop.f32.mrf.mxu1  ;;  %1808 = vst [vmem:[%s3136_s20 + $0x380] sm:$0xff] (%p2587_p6), %v1807_v32  ;;  %1810 = vst [vmem:[%s3136_s20 + $0x388] sm:$0xff] (%p2587_p6), %v1809_v26  ;;  %v1935_v32 = vld [vmem:[%s2834_s23 + $0x3c0] sm:$0xff] (%p2587_p6)  ;;  %v1937_v26 = vld [vmem:[%s2834_s23 + $0x3c8] sm:$0xff] (%p2587_p6) }
 0x20a   : > { %1663 = vst [vmem:[%s2834_s23 + $0x7c8] sm:$0xff] %v1054_v27  ;;  %1665 = vst [vmem:[%s2834_s23 + $0x7d8] sm:$0xff] %v1407_v28  ;;  %1676 = sbr.rel (!%p2587_p6) target bundleno = 624 (0x270), region = 55  ;;  %v1811_v27 = vld [vmem:[%s2834_s23 + $0x1d0] sm:$0xff] (%p2587_p6)  ;;  %v1813_v28 = vld [vmem:[%s2834_s23 + $0x1d8] sm:$0xff] (%p2587_p6) }
 0x20b   : > { %v1056_v29 = vpop.f32.mrf.mxu0  ;;  %v1409_v30 = vpop.f32.mrf.mxu1  ;;  %1812 = vst [vmem:[%s3136_s20 + $0x390] sm:$0xff] (%p2587_p6), %v1811_v27  ;;  %1814 = vst [vmem:[%s3136_s20 + $0x398] sm:$0xff] (%p2587_p6), %v1813_v28  ;;  %v1939_v27 = vld [vmem:[%s2834_s23 + $0x3d0] sm:$0xff] (%p2587_p6)  ;;  %v1941_v28 = vld [vmem:[%s2834_s23 + $0x3d8] sm:$0xff] (%p2587_p6) }
 0x20c   : > { %1666 = vst [vmem:[%s2834_s23 + $0x7e0] sm:$0xff] %v1056_v29  ;;  %1668 = vst [vmem:[%s2834_s23 + $0x7f0] sm:$0xff] %v1409_v30  ;;  %v1815_v29 = vld [vmem:[%s2834_s23 + $0x1e0] sm:$0xff] (%p2587_p6)  ;;  %v1817_v30 = vld [vmem:[%s2834_s23 + $0x1e8] sm:$0xff] (%p2587_p6) }
 0x20d   : > { %v1058_v31 = vpop.f32.mrf.mxu0  ;;  %v1411_v33 = vpop.f32.mrf.mxu1  ;;  %1816 = vst [vmem:[%s3136_s20 + $0x3c0] sm:$0xff] (%p2587_p6), %v1815_v29  ;;  %1818 = vst [vmem:[%s3136_s20 + $0x3c8] sm:$0xff] (%p2587_p6), %v1817_v30  ;;  %v1943_v29 = vld [vmem:[%s2834_s23 + $0x3e0] sm:$0xff] (%p2587_p6)  ;;  %v1945_v30 = vld [vmem:[%s2834_s23 + $0x3e8] sm:$0xff] (%p2587_p6) }
 0x20e   : > { %1667 = vst [vmem:[%s2834_s23 + $0x7e8] sm:$0xff] %v1058_v31  ;;  %1669 = vst [vmem:[%s2834_s23 + $0x7f8] sm:$0xff] %v1411_v33  ;;  %v1819_v31 = vld [vmem:[%s2834_s23 + $0x1f0] sm:$0xff] (%p2587_p6)  ;;  %v1821_v33 = vld [vmem:[%s2834_s23 + $0x1f8] sm:$0xff] (%p2587_p6) }
 0x20f   : > { %1820 = vst [vmem:[%s3136_s20 + $0x3d0] sm:$0xff] %v1819_v31  ;;  %1822 = vst [vmem:[%s3136_s20 + $0x3d8] sm:$0xff] %v1821_v33  ;;  %v1947_v31 = vld [vmem:[%s2834_s23 + $0x3f0] sm:$0xff]  ;;  %v1949_v33 = vld [vmem:[%s2834_s23 + $0x3f8] sm:$0xff] }
 0x210   : > { %1824 = vst [vmem:[%s3136_s20 + $0x400] sm:$0xff] %v1823_v34  ;;  %1826 = vst [vmem:[%s3136_s20 + $0x408] sm:$0xff] %v1825_v35  ;;  %v1951_v34 = vld [vmem:[%s2834_s23 + $0x400] sm:$0xff]  ;;  %v1953_v35 = vld [vmem:[%s2834_s23 + $0x408] sm:$0xff] }
 0x211   : > { %1828 = vst [vmem:[%s3136_s20 + $0x410] sm:$0xff] %v1827_v36  ;;  %1830 = vst [vmem:[%s3136_s20 + $0x418] sm:$0xff] %v1829_v37  ;;  %v1955_v36 = vld [vmem:[%s2834_s23 + $0x410] sm:$0xff]  ;;  %v1957_v37 = vld [vmem:[%s2834_s23 + $0x418] sm:$0xff] }
 0x212   : > { %1832 = vst [vmem:[%s3136_s20 + $0x440] sm:$0xff] %v1831_v38  ;;  %1834 = vst [vmem:[%s3136_s20 + $0x448] sm:$0xff] %v1833_v39  ;;  %v1959_v38 = vld [vmem:[%s2834_s23 + $0x420] sm:$0xff]  ;;  %v1961_v39 = vld [vmem:[%s2834_s23 + $0x428] sm:$0xff] }
 0x213   : > { %1836 = vst [vmem:[%s3136_s20 + $0x450] sm:$0xff] %v1835_v40  ;;  %1838 = vst [vmem:[%s3136_s20 + $0x458] sm:$0xff] %v1837_v41  ;;  %v1963_v40 = vld [vmem:[%s2834_s23 + $0x430] sm:$0xff]  ;;  %v1965_v41 = vld [vmem:[%s2834_s23 + $0x438] sm:$0xff] }
 0x214   : > { %1840 = vst [vmem:[%s3136_s20 + $0x480] sm:$0xff] %v1839_v42  ;;  %1842 = vst [vmem:[%s3136_s20 + $0x488] sm:$0xff] %v1841_v43  ;;  %v1967_v42 = vld [vmem:[%s2834_s23 + $0x440] sm:$0xff]  ;;  %v1969_v43 = vld [vmem:[%s2834_s23 + $0x448] sm:$0xff] }
 0x215   : > { %1844 = vst [vmem:[%s3136_s20 + $0x490] sm:$0xff] %v1843_v44  ;;  %1846 = vst [vmem:[%s3136_s20 + $0x498] sm:$0xff] %v1845_v45  ;;  %v1971_v44 = vld [vmem:[%s2834_s23 + $0x450] sm:$0xff]  ;;  %v1973_v45 = vld [vmem:[%s2834_s23 + $0x458] sm:$0xff] }
 0x216   : > { %1848 = vst [vmem:[%s3136_s20 + $0x4c0] sm:$0xff] %v1847_v46  ;;  %1850 = vst [vmem:[%s3136_s20 + $0x4c8] sm:$0xff] %v1849_v47  ;;  %v1975_v46 = vld [vmem:[%s2834_s23 + $0x460] sm:$0xff]  ;;  %v1977_v47 = vld [vmem:[%s2834_s23 + $0x468] sm:$0xff] }
 0x217   : > { %1852 = vst [vmem:[%s3136_s20 + $0x4d0] sm:$0xff] %v1851_v48  ;;  %1854 = vst [vmem:[%s3136_s20 + $0x4d8] sm:$0xff] %v1853_v49  ;;  %v1979_v48 = vld [vmem:[%s2834_s23 + $0x470] sm:$0xff]  ;;  %v1981_v49 = vld [vmem:[%s2834_s23 + $0x478] sm:$0xff] }
 0x218   : > { %1856 = vst [vmem:[%s3136_s20 + $0x500] sm:$0xff] %v1855_v50  ;;  %1858 = vst [vmem:[%s3136_s20 + $0x508] sm:$0xff] %v1857_v51  ;;  %v1983_v50 = vld [vmem:[%s2834_s23 + $0x480] sm:$0xff]  ;;  %v1985_v51 = vld [vmem:[%s2834_s23 + $0x488] sm:$0xff] }
 0x219   : > { %1860 = vst [vmem:[%s3136_s20 + $0x510] sm:$0xff] %v1859_v52  ;;  %1862 = vst [vmem:[%s3136_s20 + $0x518] sm:$0xff] %v1861_v53  ;;  %v1987_v52 = vld [vmem:[%s2834_s23 + $0x490] sm:$0xff]  ;;  %v1989_v53 = vld [vmem:[%s2834_s23 + $0x498] sm:$0xff] }
 0x21a   : > { %1864 = vst [vmem:[%s3136_s20 + $0x540] sm:$0xff] %v1863_v54  ;;  %1866 = vst [vmem:[%s3136_s20 + $0x548] sm:$0xff] %v1865_v55  ;;  %v1991_v54 = vld [vmem:[%s2834_s23 + $0x4a0] sm:$0xff]  ;;  %v1993_v55 = vld [vmem:[%s2834_s23 + $0x4a8] sm:$0xff] }
 0x21b   : > { %1868 = vst [vmem:[%s3136_s20 + $0x550] sm:$0xff] %v1867_v56  ;;  %1870 = vst [vmem:[%s3136_s20 + $0x558] sm:$0xff] %v1869_v57  ;;  %v1995_v56 = vld [vmem:[%s2834_s23 + $0x4b0] sm:$0xff]  ;;  %v1997_v57 = vld [vmem:[%s2834_s23 + $0x4b8] sm:$0xff] }
 0x21c   : > { %1872 = vst [vmem:[%s3136_s20 + $0x580] sm:$0xff] %v1871_v58  ;;  %1874 = vst [vmem:[%s3136_s20 + $0x588] sm:$0xff] %v1873_v59  ;;  %v1999_v58 = vld [vmem:[%s2834_s23 + $0x4c0] sm:$0xff]  ;;  %v2001_v59 = vld [vmem:[%s2834_s23 + $0x4c8] sm:$0xff] }
 0x21d   : > { %1876 = vst [vmem:[%s3136_s20 + $0x590] sm:$0xff] %v1875_v60  ;;  %1878 = vst [vmem:[%s3136_s20 + $0x598] sm:$0xff] %v1877_v61  ;;  %v2003_v60 = vld [vmem:[%s2834_s23 + $0x4d0] sm:$0xff]  ;;  %v2005_v61 = vld [vmem:[%s2834_s23 + $0x4d8] sm:$0xff] }
 0x21e   : > { %1880 = vst [vmem:[%s3136_s20 + $0x5c0] sm:$0xff] %v1879_v62  ;;  %1882 = vst [vmem:[%s3136_s20 + $0x5c8] sm:$0xff] %v1881_v63  ;;  %v2007_v62 = vld [vmem:[%s2834_s23 + $0x4e0] sm:$0xff]  ;;  %v2009_v63 = vld [vmem:[%s2834_s23 + $0x4e8] sm:$0xff] }
 0x21f   : > { %1884 = vst [vmem:[%s3136_s20 + $0x5d0] sm:$0xff] %v1883_v0  ;;  %1886 = vst [vmem:[%s3136_s20 + $0x5d8] sm:$0xff] %v1885_v1  ;;  %v2011_v0 = vld [vmem:[%s2834_s23 + $0x4f0] sm:$0xff]  ;;  %v2013_v1 = vld [vmem:[%s2834_s23 + $0x4f8] sm:$0xff] }
 0x220   : > { %1888 = vst [vmem:[%s3136_s20 + $0x600] sm:$0xff] %v1887_v2  ;;  %1890 = vst [vmem:[%s3136_s20 + $0x608] sm:$0xff] %v1889_v3  ;;  %v2015_v2 = vld [vmem:[%s2834_s23 + $0x500] sm:$0xff]  ;;  %v2017_v3 = vld [vmem:[%s2834_s23 + $0x508] sm:$0xff] }
 0x221   : > { %1892 = vst [vmem:[%s3136_s20 + $0x610] sm:$0xff] %v1891_v4  ;;  %1894 = vst [vmem:[%s3136_s20 + $0x618] sm:$0xff] %v1893_v5  ;;  %v2019_v4 = vld [vmem:[%s2834_s23 + $0x510] sm:$0xff]  ;;  %v2021_v5 = vld [vmem:[%s2834_s23 + $0x518] sm:$0xff] }
 0x222   : > { %1896 = vst [vmem:[%s3136_s20 + $0x640] sm:$0xff] %v1895_v6  ;;  %1898 = vst [vmem:[%s3136_s20 + $0x648] sm:$0xff] %v1897_v7  ;;  %v2023_v6 = vld [vmem:[%s2834_s23 + $0x520] sm:$0xff]  ;;  %v2025_v7 = vld [vmem:[%s2834_s23 + $0x528] sm:$0xff] }
 0x223   : > { %1900 = vst [vmem:[%s3136_s20 + $0x650] sm:$0xff] %v1899_v8  ;;  %1902 = vst [vmem:[%s3136_s20 + $0x658] sm:$0xff] %v1901_v9  ;;  %v2027_v8 = vld [vmem:[%s2834_s23 + $0x530] sm:$0xff]  ;;  %v2029_v9 = vld [vmem:[%s2834_s23 + $0x538] sm:$0xff] }
 0x224   : > { %1904 = vst [vmem:[%s3136_s20 + $0x680] sm:$0xff] %v1903_v10  ;;  %1906 = vst [vmem:[%s3136_s20 + $0x688] sm:$0xff] %v1905_v11  ;;  %v2031_v10 = vld [vmem:[%s2834_s23 + $0x540] sm:$0xff]  ;;  %v2033_v11 = vld [vmem:[%s2834_s23 + $0x548] sm:$0xff] }
 0x225   : > { %1908 = vst [vmem:[%s3136_s20 + $0x690] sm:$0xff] %v1907_v12  ;;  %1910 = vst [vmem:[%s3136_s20 + $0x698] sm:$0xff] %v1909_v13  ;;  %v2035_v12 = vld [vmem:[%s2834_s23 + $0x550] sm:$0xff]  ;;  %v2037_v13 = vld [vmem:[%s2834_s23 + $0x558] sm:$0xff] }
 0x226   : > { %1912 = vst [vmem:[%s3136_s20 + $0x6c0] sm:$0xff] %v1911_v14  ;;  %1914 = vst [vmem:[%s3136_s20 + $0x6c8] sm:$0xff] %v1913_v15  ;;  %v2039_v14 = vld [vmem:[%s2834_s23 + $0x560] sm:$0xff]  ;;  %v2041_v15 = vld [vmem:[%s2834_s23 + $0x568] sm:$0xff] }
 0x227   : > { %1916 = vst [vmem:[%s3136_s20 + $0x6d0] sm:$0xff] %v1915_v16  ;;  %1918 = vst [vmem:[%s3136_s20 + $0x6d8] sm:$0xff] %v1917_v17  ;;  %v2043_v16 = vld [vmem:[%s2834_s23 + $0x570] sm:$0xff]  ;;  %v2045_v17 = vld [vmem:[%s2834_s23 + $0x578] sm:$0xff] }
 0x228   : > { %1920 = vst [vmem:[%s3136_s20 + $0x700] sm:$0xff] %v1919_v18  ;;  %1922 = vst [vmem:[%s3136_s20 + $0x708] sm:$0xff] %v1921_v19  ;;  %v2047_v18 = vld [vmem:[%s2834_s23 + $0x580] sm:$0xff]  ;;  %v2049_v19 = vld [vmem:[%s2834_s23 + $0x588] sm:$0xff] }
 0x229   : > { %1924 = vst [vmem:[%s3136_s20 + $0x710] sm:$0xff] %v1923_v20  ;;  %1926 = vst [vmem:[%s3136_s20 + $0x718] sm:$0xff] %v1925_v21  ;;  %v2051_v20 = vld [vmem:[%s2834_s23 + $0x590] sm:$0xff]  ;;  %v2053_v21 = vld [vmem:[%s2834_s23 + $0x598] sm:$0xff] }
 0x22a   : > { %1928 = vst [vmem:[%s3136_s20 + $0x740] sm:$0xff] %v1927_v22  ;;  %1930 = vst [vmem:[%s3136_s20 + $0x748] sm:$0xff] %v1929_v23  ;;  %v2055_v22 = vld [vmem:[%s2834_s23 + $0x5a0] sm:$0xff]  ;;  %v2057_v23 = vld [vmem:[%s2834_s23 + $0x5a8] sm:$0xff] }
 0x22b   : > { %1932 = vst [vmem:[%s3136_s20 + $0x750] sm:$0xff] %v1931_v24  ;;  %1934 = vst [vmem:[%s3136_s20 + $0x758] sm:$0xff] %v1933_v25  ;;  %v2059_v24 = vld [vmem:[%s2834_s23 + $0x5b0] sm:$0xff]  ;;  %v2061_v25 = vld [vmem:[%s2834_s23 + $0x5b8] sm:$0xff] }
 0x22c   : > { %1936 = vst [vmem:[%s3136_s20 + $0x780] sm:$0xff] %v1935_v32  ;;  %1938 = vst [vmem:[%s3136_s20 + $0x788] sm:$0xff] %v1937_v26  ;;  %v2063_v32 = vld [vmem:[%s2834_s23 + $0x5c0] sm:$0xff]  ;;  %v2065_v26 = vld [vmem:[%s2834_s23 + $0x5c8] sm:$0xff] }
 0x22d   : > { %1940 = vst [vmem:[%s3136_s20 + $0x790] sm:$0xff] %v1939_v27  ;;  %1942 = vst [vmem:[%s3136_s20 + $0x798] sm:$0xff] %v1941_v28  ;;  %v2067_v27 = vld [vmem:[%s2834_s23 + $0x5d0] sm:$0xff]  ;;  %v2069_v28 = vld [vmem:[%s2834_s23 + $0x5d8] sm:$0xff] }
 0x22e   : > { %1944 = vst [vmem:[%s3136_s20 + $0x7c0] sm:$0xff] %v1943_v29  ;;  %1946 = vst [vmem:[%s3136_s20 + $0x7c8] sm:$0xff] %v1945_v30  ;;  %v2071_v29 = vld [vmem:[%s2834_s23 + $0x5e0] sm:$0xff]  ;;  %v2073_v30 = vld [vmem:[%s2834_s23 + $0x5e8] sm:$0xff] }
 0x22f   : > { %1948 = vst [vmem:[%s3136_s20 + $0x7d0] sm:$0xff] %v1947_v31  ;;  %1950 = vst [vmem:[%s3136_s20 + $0x7d8] sm:$0xff] %v1949_v33  ;;  %v2075_v31 = vld [vmem:[%s2834_s23 + $0x5f0] sm:$0xff]  ;;  %v2077_v33 = vld [vmem:[%s2834_s23 + $0x5f8] sm:$0xff] }
 0x230   : > { %1952 = vst [vmem:[%s3136_s20 + $0x800] sm:$0xff] %v1951_v34  ;;  %1954 = vst [vmem:[%s3136_s20 + $0x808] sm:$0xff] %v1953_v35  ;;  %v2079_v34 = vld [vmem:[%s2834_s23 + $0x600] sm:$0xff]  ;;  %v2081_v35 = vld [vmem:[%s2834_s23 + $0x608] sm:$0xff] }
 0x231   : > { %1956 = vst [vmem:[%s3136_s20 + $0x810] sm:$0xff] %v1955_v36  ;;  %1958 = vst [vmem:[%s3136_s20 + $0x818] sm:$0xff] %v1957_v37  ;;  %v2083_v36 = vld [vmem:[%s2834_s23 + $0x610] sm:$0xff]  ;;  %v2085_v37 = vld [vmem:[%s2834_s23 + $0x618] sm:$0xff] }
 0x232   : > { %1960 = vst [vmem:[%s3136_s20 + $0x840] sm:$0xff] %v1959_v38  ;;  %1962 = vst [vmem:[%s3136_s20 + $0x848] sm:$0xff] %v1961_v39  ;;  %v2087_v38 = vld [vmem:[%s2834_s23 + $0x620] sm:$0xff]  ;;  %v2089_v39 = vld [vmem:[%s2834_s23 + $0x628] sm:$0xff] }
 0x233   : > { %1964 = vst [vmem:[%s3136_s20 + $0x850] sm:$0xff] %v1963_v40  ;;  %1966 = vst [vmem:[%s3136_s20 + $0x858] sm:$0xff] %v1965_v41  ;;  %v2091_v40 = vld [vmem:[%s2834_s23 + $0x630] sm:$0xff]  ;;  %v2093_v41 = vld [vmem:[%s2834_s23 + $0x638] sm:$0xff] }
 0x234   : > { %1968 = vst [vmem:[%s3136_s20 + $0x880] sm:$0xff] %v1967_v42  ;;  %1970 = vst [vmem:[%s3136_s20 + $0x888] sm:$0xff] %v1969_v43  ;;  %v2095_v42 = vld [vmem:[%s2834_s23 + $0x640] sm:$0xff]  ;;  %v2097_v43 = vld [vmem:[%s2834_s23 + $0x648] sm:$0xff] }
 0x235   : > { %1972 = vst [vmem:[%s3136_s20 + $0x890] sm:$0xff] %v1971_v44  ;;  %1974 = vst [vmem:[%s3136_s20 + $0x898] sm:$0xff] %v1973_v45  ;;  %v2099_v44 = vld [vmem:[%s2834_s23 + $0x650] sm:$0xff]  ;;  %v2101_v45 = vld [vmem:[%s2834_s23 + $0x658] sm:$0xff] }
 0x236   : > { %1976 = vst [vmem:[%s3136_s20 + $0x8c0] sm:$0xff] %v1975_v46  ;;  %1978 = vst [vmem:[%s3136_s20 + $0x8c8] sm:$0xff] %v1977_v47  ;;  %v2103_v46 = vld [vmem:[%s2834_s23 + $0x660] sm:$0xff]  ;;  %v2105_v47 = vld [vmem:[%s2834_s23 + $0x668] sm:$0xff] }
 0x237   : > { %1980 = vst [vmem:[%s3136_s20 + $0x8d0] sm:$0xff] %v1979_v48  ;;  %1982 = vst [vmem:[%s3136_s20 + $0x8d8] sm:$0xff] %v1981_v49  ;;  %v2107_v48 = vld [vmem:[%s2834_s23 + $0x670] sm:$0xff]  ;;  %v2109_v49 = vld [vmem:[%s2834_s23 + $0x678] sm:$0xff] }
 0x238   : > { %1984 = vst [vmem:[%s3136_s20 + $0x900] sm:$0xff] %v1983_v50  ;;  %1986 = vst [vmem:[%s3136_s20 + $0x908] sm:$0xff] %v1985_v51  ;;  %v2111_v50 = vld [vmem:[%s2834_s23 + $0x680] sm:$0xff]  ;;  %v2113_v51 = vld [vmem:[%s2834_s23 + $0x688] sm:$0xff] }
 0x239   : > { %1988 = vst [vmem:[%s3136_s20 + $0x910] sm:$0xff] %v1987_v52  ;;  %1990 = vst [vmem:[%s3136_s20 + $0x918] sm:$0xff] %v1989_v53  ;;  %v2115_v52 = vld [vmem:[%s2834_s23 + $0x690] sm:$0xff]  ;;  %v2117_v53 = vld [vmem:[%s2834_s23 + $0x698] sm:$0xff] }
 0x23a   : > { %1992 = vst [vmem:[%s3136_s20 + $0x940] sm:$0xff] %v1991_v54  ;;  %1994 = vst [vmem:[%s3136_s20 + $0x948] sm:$0xff] %v1993_v55  ;;  %v2119_v54 = vld [vmem:[%s2834_s23 + $0x6a0] sm:$0xff]  ;;  %v2121_v55 = vld [vmem:[%s2834_s23 + $0x6a8] sm:$0xff] }
 0x23b   : > { %1996 = vst [vmem:[%s3136_s20 + $0x950] sm:$0xff] %v1995_v56  ;;  %1998 = vst [vmem:[%s3136_s20 + $0x958] sm:$0xff] %v1997_v57  ;;  %v2123_v56 = vld [vmem:[%s2834_s23 + $0x6b0] sm:$0xff]  ;;  %v2125_v57 = vld [vmem:[%s2834_s23 + $0x6b8] sm:$0xff] }
 0x23c   : > { %2000 = vst [vmem:[%s3136_s20 + $0x980] sm:$0xff] %v1999_v58  ;;  %2002 = vst [vmem:[%s3136_s20 + $0x988] sm:$0xff] %v2001_v59  ;;  %v2127_v58 = vld [vmem:[%s2834_s23 + $0x6c0] sm:$0xff]  ;;  %v2129_v59 = vld [vmem:[%s2834_s23 + $0x6c8] sm:$0xff] }
 0x23d   : > { %2004 = vst [vmem:[%s3136_s20 + $0x990] sm:$0xff] %v2003_v60  ;;  %2006 = vst [vmem:[%s3136_s20 + $0x998] sm:$0xff] %v2005_v61  ;;  %v2131_v60 = vld [vmem:[%s2834_s23 + $0x6d0] sm:$0xff]  ;;  %v2133_v61 = vld [vmem:[%s2834_s23 + $0x6d8] sm:$0xff] }
 0x23e   : > { %2008 = vst [vmem:[%s3136_s20 + $0x9c0] sm:$0xff] %v2007_v62  ;;  %2010 = vst [vmem:[%s3136_s20 + $0x9c8] sm:$0xff] %v2009_v63  ;;  %v2135_v62 = vld [vmem:[%s2834_s23 + $0x6e0] sm:$0xff]  ;;  %v2137_v63 = vld [vmem:[%s2834_s23 + $0x6e8] sm:$0xff] }
 0x23f   : > { %2012 = vst [vmem:[%s3136_s20 + $0x9d0] sm:$0xff] %v2011_v0  ;;  %2014 = vst [vmem:[%s3136_s20 + $0x9d8] sm:$0xff] %v2013_v1  ;;  %v2139_v0 = vld [vmem:[%s2834_s23 + $0x6f0] sm:$0xff]  ;;  %v2141_v1 = vld [vmem:[%s2834_s23 + $0x6f8] sm:$0xff] }
 0x240   : > { %2016 = vst [vmem:[%s3136_s20 + $0xa00] sm:$0xff] %v2015_v2  ;;  %2018 = vst [vmem:[%s3136_s20 + $0xa08] sm:$0xff] %v2017_v3  ;;  %v2143_v2 = vld [vmem:[%s2834_s23 + $0x700] sm:$0xff]  ;;  %v2145_v3 = vld [vmem:[%s2834_s23 + $0x708] sm:$0xff] }
 0x241   : > { %2020 = vst [vmem:[%s3136_s20 + $0xa10] sm:$0xff] %v2019_v4  ;;  %2022 = vst [vmem:[%s3136_s20 + $0xa18] sm:$0xff] %v2021_v5  ;;  %v2147_v4 = vld [vmem:[%s2834_s23 + $0x710] sm:$0xff]  ;;  %v2149_v5 = vld [vmem:[%s2834_s23 + $0x718] sm:$0xff] }
 0x242   : > { %2024 = vst [vmem:[%s3136_s20 + $0xa40] sm:$0xff] %v2023_v6  ;;  %2026 = vst [vmem:[%s3136_s20 + $0xa48] sm:$0xff] %v2025_v7  ;;  %v2151_v6 = vld [vmem:[%s2834_s23 + $0x720] sm:$0xff]  ;;  %v2153_v7 = vld [vmem:[%s2834_s23 + $0x728] sm:$0xff] }
 0x243   : > { %2028 = vst [vmem:[%s3136_s20 + $0xa50] sm:$0xff] %v2027_v8  ;;  %2030 = vst [vmem:[%s3136_s20 + $0xa58] sm:$0xff] %v2029_v9  ;;  %v2155_v8 = vld [vmem:[%s2834_s23 + $0x730] sm:$0xff]  ;;  %v2157_v9 = vld [vmem:[%s2834_s23 + $0x738] sm:$0xff] }
 0x244   : > { %2032 = vst [vmem:[%s3136_s20 + $0xa80] sm:$0xff] %v2031_v10  ;;  %2034 = vst [vmem:[%s3136_s20 + $0xa88] sm:$0xff] %v2033_v11  ;;  %v2159_v10 = vld [vmem:[%s2834_s23 + $0x740] sm:$0xff]  ;;  %v2161_v11 = vld [vmem:[%s2834_s23 + $0x748] sm:$0xff] }
 0x245   : > { %2036 = vst [vmem:[%s3136_s20 + $0xa90] sm:$0xff] %v2035_v12  ;;  %2038 = vst [vmem:[%s3136_s20 + $0xa98] sm:$0xff] %v2037_v13  ;;  %v2163_v12 = vld [vmem:[%s2834_s23 + $0x750] sm:$0xff]  ;;  %v2165_v13 = vld [vmem:[%s2834_s23 + $0x758] sm:$0xff] }
 0x246   : > { %2040 = vst [vmem:[%s3136_s20 + $0xac0] sm:$0xff] %v2039_v14  ;;  %2042 = vst [vmem:[%s3136_s20 + $0xac8] sm:$0xff] %v2041_v15  ;;  %v2167_v14 = vld [vmem:[%s2834_s23 + $0x760] sm:$0xff]  ;;  %v2169_v15 = vld [vmem:[%s2834_s23 + $0x768] sm:$0xff] }
 0x247   : > { %2044 = vst [vmem:[%s3136_s20 + $0xad0] sm:$0xff] %v2043_v16  ;;  %2046 = vst [vmem:[%s3136_s20 + $0xad8] sm:$0xff] %v2045_v17  ;;  %v2171_v16 = vld [vmem:[%s2834_s23 + $0x770] sm:$0xff]  ;;  %v2173_v17 = vld [vmem:[%s2834_s23 + $0x778] sm:$0xff] }
 0x248   : > { %2048 = vst [vmem:[%s3136_s20 + $0xb00] sm:$0xff] %v2047_v18  ;;  %2050 = vst [vmem:[%s3136_s20 + $0xb08] sm:$0xff] %v2049_v19  ;;  %v2175_v18 = vld [vmem:[%s2834_s23 + $0x780] sm:$0xff]  ;;  %v2177_v19 = vld [vmem:[%s2834_s23 + $0x788] sm:$0xff] }
 0x249   : > { %2052 = vst [vmem:[%s3136_s20 + $0xb10] sm:$0xff] %v2051_v20  ;;  %2054 = vst [vmem:[%s3136_s20 + $0xb18] sm:$0xff] %v2053_v21  ;;  %v2179_v20 = vld [vmem:[%s2834_s23 + $0x790] sm:$0xff]  ;;  %v2181_v21 = vld [vmem:[%s2834_s23 + $0x798] sm:$0xff] }
 0x24a   : > { %2056 = vst [vmem:[%s3136_s20 + $0xb40] sm:$0xff] %v2055_v22  ;;  %2058 = vst [vmem:[%s3136_s20 + $0xb48] sm:$0xff] %v2057_v23  ;;  %v2183_v22 = vld [vmem:[%s2834_s23 + $0x7a0] sm:$0xff]  ;;  %v2185_v23 = vld [vmem:[%s2834_s23 + $0x7a8] sm:$0xff] }
 0x24b   : > { %2060 = vst [vmem:[%s3136_s20 + $0xb50] sm:$0xff] %v2059_v24  ;;  %2062 = vst [vmem:[%s3136_s20 + $0xb58] sm:$0xff] %v2061_v25  ;;  %v2187_v24 = vld [vmem:[%s2834_s23 + $0x7b0] sm:$0xff]  ;;  %v2189_v25 = vld [vmem:[%s2834_s23 + $0x7b8] sm:$0xff] }
 0x24c   : > { %2064 = vst [vmem:[%s3136_s20 + $0xb80] sm:$0xff] %v2063_v32  ;;  %2066 = vst [vmem:[%s3136_s20 + $0xb88] sm:$0xff] %v2065_v26  ;;  %v2191_v32 = vld [vmem:[%s2834_s23 + $0x7c0] sm:$0xff]  ;;  %v2193_v26 = vld [vmem:[%s2834_s23 + $0x7c8] sm:$0xff] }
 0x24d   : > { %2068 = vst [vmem:[%s3136_s20 + $0xb90] sm:$0xff] %v2067_v27  ;;  %2070 = vst [vmem:[%s3136_s20 + $0xb98] sm:$0xff] %v2069_v28  ;;  %v2195_v27 = vld [vmem:[%s2834_s23 + $0x7d0] sm:$0xff]  ;;  %v2197_v28 = vld [vmem:[%s2834_s23 + $0x7d8] sm:$0xff] }
 0x24e   : > { %2072 = vst [vmem:[%s3136_s20 + $0xbc0] sm:$0xff] %v2071_v29  ;;  %2074 = vst [vmem:[%s3136_s20 + $0xbc8] sm:$0xff] %v2073_v30  ;;  %v2199_v29 = vld [vmem:[%s2834_s23 + $0x7e0] sm:$0xff]  ;;  %v2201_v30 = vld [vmem:[%s2834_s23 + $0x7e8] sm:$0xff] }
 0x24f   : > { %2076 = vst [vmem:[%s3136_s20 + $0xbd0] sm:$0xff] %v2075_v31  ;;  %2078 = vst [vmem:[%s3136_s20 + $0xbd8] sm:$0xff] %v2077_v33  ;;  %v2203_v31 = vld [vmem:[%s2834_s23 + $0x7f0] sm:$0xff]  ;;  %v2205_v33 = vld [vmem:[%s2834_s23 + $0x7f8] sm:$0xff] }
 0x250   : > { %2080 = vst [vmem:[%s3136_s20 + $0xc00] sm:$0xff] %v2079_v34  ;;  %2082 = vst [vmem:[%s3136_s20 + $0xc08] sm:$0xff] %v2081_v35 }
 0x251   : > { %2084 = vst [vmem:[%s3136_s20 + $0xc10] sm:$0xff] %v2083_v36  ;;  %2086 = vst [vmem:[%s3136_s20 + $0xc18] sm:$0xff] %v2085_v37 }
 0x252   : > { %2088 = vst [vmem:[%s3136_s20 + $0xc40] sm:$0xff] %v2087_v38  ;;  %2090 = vst [vmem:[%s3136_s20 + $0xc48] sm:$0xff] %v2089_v39 }
 0x253   : > { %2092 = vst [vmem:[%s3136_s20 + $0xc50] sm:$0xff] %v2091_v40  ;;  %2094 = vst [vmem:[%s3136_s20 + $0xc58] sm:$0xff] %v2093_v41 }
 0x254   : > { %2096 = vst [vmem:[%s3136_s20 + $0xc80] sm:$0xff] %v2095_v42  ;;  %2098 = vst [vmem:[%s3136_s20 + $0xc88] sm:$0xff] %v2097_v43 }
 0x255   : > { %2100 = vst [vmem:[%s3136_s20 + $0xc90] sm:$0xff] %v2099_v44  ;;  %2102 = vst [vmem:[%s3136_s20 + $0xc98] sm:$0xff] %v2101_v45 }
 0x256   : > { %2104 = vst [vmem:[%s3136_s20 + $0xcc0] sm:$0xff] %v2103_v46  ;;  %2106 = vst [vmem:[%s3136_s20 + $0xcc8] sm:$0xff] %v2105_v47 }
 0x257   : > { %2108 = vst [vmem:[%s3136_s20 + $0xcd0] sm:$0xff] %v2107_v48  ;;  %2110 = vst [vmem:[%s3136_s20 + $0xcd8] sm:$0xff] %v2109_v49 }
 0x258   : > { %2112 = vst [vmem:[%s3136_s20 + $0xd00] sm:$0xff] %v2111_v50  ;;  %2114 = vst [vmem:[%s3136_s20 + $0xd08] sm:$0xff] %v2113_v51 }
 0x259   : > { %2116 = vst [vmem:[%s3136_s20 + $0xd10] sm:$0xff] %v2115_v52  ;;  %2118 = vst [vmem:[%s3136_s20 + $0xd18] sm:$0xff] %v2117_v53 }
 0x25a   : > { %2120 = vst [vmem:[%s3136_s20 + $0xd40] sm:$0xff] %v2119_v54  ;;  %2122 = vst [vmem:[%s3136_s20 + $0xd48] sm:$0xff] %v2121_v55 }
 0x25b   : > { %2124 = vst [vmem:[%s3136_s20 + $0xd50] sm:$0xff] %v2123_v56  ;;  %2126 = vst [vmem:[%s3136_s20 + $0xd58] sm:$0xff] %v2125_v57 }
 0x25c   : > { %2128 = vst [vmem:[%s3136_s20 + $0xd80] sm:$0xff] %v2127_v58  ;;  %2130 = vst [vmem:[%s3136_s20 + $0xd88] sm:$0xff] %v2129_v59 }
 0x25d   : > { %2132 = vst [vmem:[%s3136_s20 + $0xd90] sm:$0xff] %v2131_v60  ;;  %2134 = vst [vmem:[%s3136_s20 + $0xd98] sm:$0xff] %v2133_v61 }
 0x25e   : > { %2136 = vst [vmem:[%s3136_s20 + $0xdc0] sm:$0xff] %v2135_v62  ;;  %2138 = vst [vmem:[%s3136_s20 + $0xdc8] sm:$0xff] %v2137_v63 }
 0x25f   : > { %2140 = vst [vmem:[%s3136_s20 + $0xdd0] sm:$0xff] %v2139_v0  ;;  %2142 = vst [vmem:[%s3136_s20 + $0xdd8] sm:$0xff] %v2141_v1 }
 0x260   : > { %2144 = vst [vmem:[%s3136_s20 + $0xe00] sm:$0xff] %v2143_v2  ;;  %2146 = vst [vmem:[%s3136_s20 + $0xe08] sm:$0xff] %v2145_v3 }
 0x261   : > { %2148 = vst [vmem:[%s3136_s20 + $0xe10] sm:$0xff] %v2147_v4  ;;  %2150 = vst [vmem:[%s3136_s20 + $0xe18] sm:$0xff] %v2149_v5 }
 0x262   : > { %2152 = vst [vmem:[%s3136_s20 + $0xe40] sm:$0xff] %v2151_v6  ;;  %2154 = vst [vmem:[%s3136_s20 + $0xe48] sm:$0xff] %v2153_v7 }
 0x263   : > { %2156 = vst [vmem:[%s3136_s20 + $0xe50] sm:$0xff] %v2155_v8  ;;  %2158 = vst [vmem:[%s3136_s20 + $0xe58] sm:$0xff] %v2157_v9 }
 0x264   : > { %2160 = vst [vmem:[%s3136_s20 + $0xe80] sm:$0xff] %v2159_v10  ;;  %2162 = vst [vmem:[%s3136_s20 + $0xe88] sm:$0xff] %v2161_v11 }
 0x265   : > { %2164 = vst [vmem:[%s3136_s20 + $0xe90] sm:$0xff] %v2163_v12  ;;  %2166 = vst [vmem:[%s3136_s20 + $0xe98] sm:$0xff] %v2165_v13 }
 0x266   : > { %2168 = vst [vmem:[%s3136_s20 + $0xec0] sm:$0xff] %v2167_v14  ;;  %2170 = vst [vmem:[%s3136_s20 + $0xec8] sm:$0xff] %v2169_v15 }
 0x267   : > { %2172 = vst [vmem:[%s3136_s20 + $0xed0] sm:$0xff] %v2171_v16  ;;  %2174 = vst [vmem:[%s3136_s20 + $0xed8] sm:$0xff] %v2173_v17 }
 0x268   : > { %2176 = vst [vmem:[%s3136_s20 + $0xf00] sm:$0xff] %v2175_v18  ;;  %2178 = vst [vmem:[%s3136_s20 + $0xf08] sm:$0xff] %v2177_v19 }
 0x269   : > { %2180 = vst [vmem:[%s3136_s20 + $0xf10] sm:$0xff] %v2179_v20  ;;  %2182 = vst [vmem:[%s3136_s20 + $0xf18] sm:$0xff] %v2181_v21 }
 0x26a   : > { %2184 = vst [vmem:[%s3136_s20 + $0xf40] sm:$0xff] %v2183_v22  ;;  %2186 = vst [vmem:[%s3136_s20 + $0xf48] sm:$0xff] %v2185_v23 }
 0x26b   : > { %2188 = vst [vmem:[%s3136_s20 + $0xf50] sm:$0xff] %v2187_v24  ;;  %2190 = vst [vmem:[%s3136_s20 + $0xf58] sm:$0xff] %v2189_v25 }
 0x26c   : > { %2192 = vst [vmem:[%s3136_s20 + $0xf80] sm:$0xff] %v2191_v32  ;;  %2194 = vst [vmem:[%s3136_s20 + $0xf88] sm:$0xff] %v2193_v26 }
 0x26d   : > { %2196 = vst [vmem:[%s3136_s20 + $0xf90] sm:$0xff] %v2195_v27  ;;  %2198 = vst [vmem:[%s3136_s20 + $0xf98] sm:$0xff] %v2197_v28 }
 0x26e   : > { %2200 = vst [vmem:[%s3136_s20 + $0xfc0] sm:$0xff] %v2199_v29  ;;  %2202 = vst [vmem:[%s3136_s20 + $0xfc8] sm:$0xff] %v2201_v30 }
 0x26f   : > { %2204 = vst [vmem:[%s3136_s20 + $0xfd0] sm:$0xff] %v2203_v31  ;;  %2206 = vst [vmem:[%s3136_s20 + $0xfd8] sm:$0xff] %v2205_v33 }
 0x270 PF: > { %s12_s13 = sadd.s32 1, %s2534_s13   ;;  %s3666_s9 = smov %s2522_s10 }
 0x271   : > { %p9_p11 = scmp.ge.s32.totalorder %s12_s13, 4   ;;  %s3667_s10 = smov %s2592_s19 }
 0x272   : > { %s3668_s11 = smov %s2530_s12  ;;  %s3669_s12 = smov %s3671_s14 }
 0x273   :  { %11 = sbr.rel (!%p9_p11) target bundleno = 3 (0x3), region = 112 }

// kernel: generator_forward.24
= control target key start
LH: loop header
LB: loop body
LE: loop exit
PB: predicated region body
PF: predicated region fallthrough
CT: control target
= control target key end

     0   :  { %s632_s9 = smov 0   ;;  %s1145_s0 = inlined_call_operand.vmem [shape: f32[2048,64], index: 0, kind: input, shape index: {}]   ;;  %s1146_s1 = inlined_call_operand.vmem [shape: f32[1,64], index: 1, kind: output, shape index: {0}]   ;;  %s1147_s2 = inlined_call_operand.vmem [shape: f32[1,64], index: 2, kind: output, shape index: {1}]  }
   0x1 LB: > { %s638_s10 = sadd.s32 4294967295, %s614_s9   ;;  %p590_p0 = scmp.ge.s32.totalorder %s614_s9, 1  ;;  %s614_s9 = sphi %s632_s9, %s13_s9  }
   0x2   : > { %p106_p1 = scmp.lt.s32.totalorder %s614_s9, 5 }
   0x4   : > { %p107_p2 = pnand %p590_p0, %p106_p1 }
   0x5   : > { %s591_s11 = sshll.u32 (!%p107_p2), %s638_s10, 6  ;;  %p593_p4 = scmp.ne.s32.totalorder (!%p107_p2), %s638_s10, 0 }
   0x6   : > { %110 = sbr.rel (%p107_p2) target bundleno = 212 (0xd4), region = 24  ;;  %p124_p3 = scmp.lt.s32.totalorder (!%p107_p2), %s591_s11, 255 }
   0xb   : > { %s1149_s11 = smov (!%p124_p3, %s591_s11), 255  ;;  %132 = sbr.rel (%p593_p4) target bundleno = 18 (0x12), region = 28 }
   0xc   : > { %s592_s12 = sshll.u32 %s1149_s11, 3 }
   0xd   : > { %s646_s15 = scalar_lea.vmem %s1145_s0, %s592_s12 }
  0x10   : > { %vm133_vm0 = vcmask 516096   ;;  %v616_v0 = vmov 0.0  }
  0x11   : > { %134 = vst.msk [vmem:[#allocation2] sm:$0x1] %vm133_vm0, %v616_v0  ;;  %135 = vst.msk [vmem:[#allocation3] sm:$0x1] %vm133_vm0, %v616_v0 }
  0x12 PF: > { %v136_v1 = vld [vmem:[%s646_s15] sm:$0xff]  ;;  %v137_v2 = vld [vmem:[%s646_s15 + $0x8] sm:$0xff]  ;;  %v138_v3 = vld [vmem:[%s646_s15 + $0x10] sm:$0xff]  ;;  %vm201_vm1 = vcmask 523264   ;;  %vm336_vm2 = vcmask 516096   ;;  %p594_p5 = scmp.ne.s32.totalorder %s638_s10, 3 }
  0x13   : > { %v202_v4 = vsel %vm201_vm1, %v136_v1, 0.0  ;;  %v203_v5 = vsel %vm201_vm1, %v137_v2, 0.0  ;;  %v205_v6 = vsel %vm201_vm1, %v138_v3, 0.0  ;;  %v139_v7 = vld [vmem:[%s646_s15 + $0x18] sm:$0xff]  ;;  %v140_v10 = vld [vmem:[%s646_s15 + $0x20] sm:$0xff]  ;;  %v141_v13 = vld [vmem:[%s646_s15 + $0x28] sm:$0xff]  ;;  %v339_v55 = vmul.f32 %v136_v1, %v136_v1 }
  0x14   : > { %v204_v8 = vadd.f32 %v203_v5, %v202_v4  ;;  %v207_v9 = vsel %vm201_vm1, %v139_v7, 0.0  ;;  %v209_v12 = vsel %vm201_vm1, %v140_v10, 0.0  ;;  %v211_v15 = vsel %vm201_vm1, %v141_v13, 0.0  ;;  %v662_v16 = vld [vmem:[%s646_s15 + $0x30] sm:$0xff]  ;;  %v667_v19 = vld [vmem:[%s646_s15 + $0x38] sm:$0xff]  ;;  %v672_v22 = vld [vmem:[%s646_s15 + $0x40] sm:$0xff] }
  0x15   : > { %v213_v18 = vsel %vm201_vm1, %v662_v16, 0.0  ;;  %v215_v21 = vsel %vm201_vm1, %v667_v19, 0.0  ;;  %v217_v24 = vsel %vm201_vm1, %v672_v22, 0.0  ;;  %v677_v25 = vld [vmem:[%s646_s15 + $0x48] sm:$0xff]  ;;  %v682_v28 = vld [vmem:[%s646_s15 + $0x50] sm:$0xff]  ;;  %v687_v31 = vld [vmem:[%s646_s15 + $0x58] sm:$0xff]  ;;  %v340_v58 = vmul.f32 %v137_v2, %v137_v2 }
  0x16   : > { %v206_v11 = vadd.f32 %v205_v6, %v204_v8  ;;  %v219_v27 = vsel %vm201_vm1, %v677_v25, 0.0  ;;  %v221_v30 = vsel %vm201_vm1, %v682_v28, 0.0  ;;  %v223_v33 = vsel %vm201_vm1, %v687_v31, 0.0  ;;  %v692_v34 = vld [vmem:[%s646_s15 + $0x60] sm:$0xff]  ;;  %v697_v37 = vld [vmem:[%s646_s15 + $0x68] sm:$0xff]  ;;  %v702_v40 = vld [vmem:[%s646_s15 + $0x70] sm:$0xff] }
  0x17   : > { %v225_v36 = vsel %vm201_vm1, %v692_v34, 0.0  ;;  %v227_v39 = vsel %vm201_vm1, %v697_v37, 0.0  ;;  %v229_v42 = vsel %vm201_vm1, %v702_v40, 0.0  ;;  %v707_v43 = vld [vmem:[%s646_s15 + $0x78] sm:$0xff]  ;;  %v712_v46 = vld [vmem:[%s646_s15 + $0x80] sm:$0xff]  ;;  %v717_v49 = vld [vmem:[%s646_s15 + $0x88] sm:$0xff]  ;;  %v341_v59 = vmul.f32 %v138_v3, %v138_v3 }
  0x18   : > { %v208_v14 = vadd.f32 %v207_v9, %v206_v11  ;;  %v231_v45 = vsel %vm201_vm1, %v707_v43, 0.0  ;;  %v233_v48 = vsel %vm201_vm1, %v712_v46, 0.0  ;;  %v235_v51 = vsel %vm201_vm1, %v717_v49, 0.0  ;;  %v722_v52 = vld [vmem:[%s646_s15 + $0x90] sm:$0xff]  ;;  %v727_v56 = vld [vmem:[%s646_s15 + $0x98] sm:$0xff]  ;;  %v732_v61 = vld [vmem:[%s646_s15 + $0xa0] sm:$0xff] }
  0x19   : > { %v237_v54 = vsel %vm201_vm1, %v722_v52, 0.0  ;;  %v239_v60 = vsel %vm201_vm1, %v727_v56, 0.0  ;;  %v342_v63 = vmul.f32 %v139_v7, %v139_v7  ;;  %v241_v0 = vsel %vm201_vm1, %v732_v61, 0.0  ;;  %v738_v1 = vld [vmem:[%s646_s15 + $0xa8] sm:$0xff]  ;;  %v745_v7 = vld [vmem:[%s646_s15 + $0xb0] sm:$0xff] }
  0x1a   : > { %v210_v17 = vadd.f32 %v209_v12, %v208_v14  ;;  %v403_v4 = vsel %vm201_vm1, %v339_v55, 0.0  ;;  %v343_v6 = vmul.f32 %v140_v10, %v140_v10  ;;  %v404_v2 = vsel %vm201_vm1, %v340_v58, 0.0 }
  0x1b   : > { %v406_v3 = vsel %vm201_vm1, %v341_v59, 0.0  ;;  %v243_v8 = vsel %vm201_vm1, %v738_v1, 0.0  ;;  %v405_v9 = vadd.f32 %v404_v2, %v403_v4  ;;  %v344_v12 = vmul.f32 %v141_v13, %v141_v13 }
  0x1c   : > { %v212_v20 = vadd.f32 %v211_v15, %v210_v17  ;;  %v408_v14 = vsel %vm201_vm1, %v342_v63, 0.0  ;;  %v245_v15 = vsel %vm201_vm1, %v745_v7, 0.0  ;;  %v751_v17 = vld [vmem:[%s646_s15 + $0xb8] sm:$0xff]  ;;  %v351_v63 = vmul.f32 %v692_v34, %v692_v34 }
  0x1d   : > { %v407_v10 = vadd.f32 %v406_v3, %v405_v9  ;;  %v352_v2 = vmul.f32 %v697_v37, %v697_v37  ;;  %v815_v9 = vld [vmem:[%s646_s15 + $0xf8] sm:$0xff] }
  0x1e   : > { %v214_v23 = vadd.f32 %v213_v18, %v212_v20  ;;  %v345_v20 = vmul.f32 %v662_v16, %v662_v16 }
  0x1f   : > { %v409_v13 = vadd.f32 %v408_v14, %v407_v10  ;;  %v426_v14 = vsel %vm201_vm1, %v351_v63, 0.0  ;;  %v823_v10 = vld [vmem:[%s646_s15 + $0x100] sm:$0xff]  ;;  %v360_v63 = vmul.f32 %v738_v1, %v738_v1 }
  0x20   : > { %v216_v26 = vadd.f32 %v215_v21, %v214_v23  ;;  %v410_v21 = vsel %vm201_vm1, %v343_v6, 0.0  ;;  %v247_v23 = vsel %vm201_vm1, %v751_v17, 0.0 }
  0x21   : > { %v411_v16 = vadd.f32 %v410_v21, %v409_v13  ;;  %v428_v21 = vsel %vm201_vm1, %v352_v2, 0.0  ;;  %v831_v13 = vld [vmem:[%s646_s15 + $0x108] sm:$0xff]  ;;  %v361_v2 = vmul.f32 %v745_v7, %v745_v7 }
  0x22   : > { %v218_v29 = vadd.f32 %v217_v24, %v216_v26  ;;  %v759_v24 = vld [vmem:[%s646_s15 + $0xc0] sm:$0xff] }
  0x24   : > { %v220_v32 = vadd.f32 %v219_v27, %v218_v29  ;;  %v346_v27 = vmul.f32 %v667_v19, %v667_v19  ;;  %v412_v29 = vsel %vm201_vm1, %v344_v12, 0.0  ;;  %v353_v12 = vmul.f32 %v702_v40, %v702_v40 }
  0x25   : > { %v413_v19 = vadd.f32 %v412_v29, %v411_v16  ;;  %v839_v16 = vld [vmem:[%s646_s15 + $0x110] sm:$0xff] }
  0x26   : > { %v222_v35 = vadd.f32 %v221_v30, %v220_v32  ;;  %v249_v30 = vsel %vm201_vm1, %v759_v24, 0.0  ;;  %v767_v32 = vld [vmem:[%s646_s15 + $0xc8] sm:$0xff]  ;;  %v430_v29 = vsel %vm201_vm1, %v353_v12, 0.0  ;;  %v362_v12 = vmul.f32 %v751_v17, %v751_v17 }
  0x28   : > { %v224_v38 = vadd.f32 %v223_v33, %v222_v35  ;;  %v347_v35 = vmul.f32 %v672_v22, %v672_v22 }
  0x2a   : > { %v226_v41 = vadd.f32 %v225_v36, %v224_v38  ;;  %v414_v36 = vsel %vm201_vm1, %v345_v20, 0.0  ;;  %v251_v38 = vsel %vm201_vm1, %v767_v32, 0.0  ;;  %v354_v20 = vmul.f32 %v707_v43, %v707_v43 }
  0x2b   : > { %v415_v22 = vadd.f32 %v414_v36, %v413_v19  ;;  %v847_v19 = vld [vmem:[%s646_s15 + $0x118] sm:$0xff] }
  0x2c   : > { %v228_v44 = vadd.f32 %v227_v39, %v226_v41  ;;  %v775_v39 = vld [vmem:[%s646_s15 + $0xd0] sm:$0xff]  ;;  %v432_v36 = vsel %vm201_vm1, %v354_v20, 0.0  ;;  %v363_v20 = vmul.f32 %v759_v24, %v759_v24 }
  0x2e   : > { %v230_v47 = vadd.f32 %v229_v42, %v228_v44  ;;  %v348_v42 = vmul.f32 %v677_v25, %v677_v25  ;;  %v416_v44 = vsel %vm201_vm1, %v346_v27, 0.0  ;;  %v355_v27 = vmul.f32 %v712_v46, %v712_v46 }
  0x2f   : > { %v417_v25 = vadd.f32 %v416_v44, %v415_v22  ;;  %v855_v22 = vld [vmem:[%s646_s15 + $0x120] sm:$0xff] }
  0x30   : > { %v232_v50 = vadd.f32 %v231_v45, %v230_v47  ;;  %v253_v45 = vsel %vm201_vm1, %v775_v39, 0.0  ;;  %v783_v47 = vld [vmem:[%s646_s15 + $0xd8] sm:$0xff]  ;;  %v420_v58 = vsel %vm201_vm1, %v348_v42, 0.0  ;;  %v357_v42 = vmul.f32 %v722_v52, %v722_v52 }
  0x31   : > { %v434_v44 = vsel %vm201_vm1, %v355_v27, 0.0  ;;  %v364_v27 = vmul.f32 %v767_v32, %v767_v32 }
  0x32   : > { %v234_v53 = vadd.f32 %v233_v48, %v232_v50  ;;  %v349_v50 = vmul.f32 %v682_v28, %v682_v28 }
  0x34   : > { %v236_v57 = vadd.f32 %v235_v51, %v234_v53  ;;  %v418_v51 = vsel %vm201_vm1, %v347_v35, 0.0  ;;  %v255_v53 = vsel %vm201_vm1, %v783_v47, 0.0  ;;  %v356_v35 = vmul.f32 %v717_v49, %v717_v49 }
  0x35   : > { %v419_v28 = vadd.f32 %v418_v51, %v417_v25  ;;  %v863_v25 = vld [vmem:[%s646_s15 + $0x128] sm:$0xff] }
  0x36   : > { %v238_v62 = vadd.f32 %v237_v54, %v236_v57  ;;  %v791_v54 = vld [vmem:[%s646_s15 + $0xe0] sm:$0xff]  ;;  %v350_v57 = vmul.f32 %v687_v31, %v687_v31  ;;  %v436_v51 = vsel %vm201_vm1, %v356_v35, 0.0  ;;  %v365_v35 = vmul.f32 %v775_v39, %v775_v39 }
  0x37   : > { %v257_v59 = vsel %vm201_vm1, %v791_v54, 0.0  ;;  %v421_v31 = vadd.f32 %v420_v58, %v419_v28  ;;  %v438_v58 = vsel %vm201_vm1, %v357_v42, 0.0  ;;  %v871_v28 = vld [vmem:[%s646_s15 + $0x130] sm:$0xff]  ;;  %v366_v42 = vmul.f32 %v783_v47, %v783_v47 }
  0x38   : > { %v240_v5 = vadd.f32 %v239_v60, %v238_v62  ;;  %v799_v60 = vld [vmem:[%s646_s15 + $0xe8] sm:$0xff]  ;;  %v424_v3 = vsel %vm201_vm1, %v350_v57, 0.0  ;;  %v359_v57 = vmul.f32 %v732_v61, %v732_v61 }
  0x39   : > { %v259_v4 = vsel %vm201_vm1, %v799_v60, 0.0 }
  0x3a   : > { %v242_v11 = vadd.f32 %v241_v0, %v240_v5  ;;  %v422_v0 = vsel %vm201_vm1, %v349_v50, 0.0  ;;  %v807_v5 = vld [vmem:[%s646_s15 + $0xf0] sm:$0xff]  ;;  %v358_v50 = vmul.f32 %v727_v56, %v727_v56 }
  0x3b   : > { %v423_v34 = vadd.f32 %v422_v0, %v421_v31  ;;  %v879_v31 = vld [vmem:[%s646_s15 + $0x138] sm:$0xff] }
  0x3c   : > { %v244_v18 = vadd.f32 %v243_v8, %v242_v11  ;;  %v261_v8 = vsel %vm201_vm1, %v807_v5, 0.0  ;;  %v440_v0 = vsel %vm201_vm1, %v358_v50, 0.0  ;;  %v367_v50 = vmul.f32 %v791_v54, %v791_v54 }
  0x3d   : > { %v425_v37 = vadd.f32 %v424_v3, %v423_v34  ;;  %v442_v3 = vsel %vm201_vm1, %v359_v57, 0.0  ;;  %v887_v34 = vld [vmem:[%s646_s15 + $0x140] sm:$0xff]  ;;  %v368_v57 = vmul.f32 %v799_v60, %v799_v60 }
  0x3e   : > { %v246_v26 = vadd.f32 %v245_v15, %v244_v18  ;;  %v263_v15 = vsel %vm201_vm1, %v815_v9, 0.0 }
  0x3f   : > { %v427_v40 = vadd.f32 %v426_v14, %v425_v37  ;;  %v444_v14 = vsel %vm201_vm1, %v360_v63, 0.0  ;;  %v895_v37 = vld [vmem:[%s646_s15 + $0x148] sm:$0xff]  ;;  %v369_v63 = vmul.f32 %v807_v5, %v807_v5 }
  0x40   : > { %v248_v33 = vadd.f32 %v247_v23, %v246_v26  ;;  %v265_v23 = vsel %vm201_vm1, %v823_v10, 0.0 }
  0x41   : > { %v429_v43 = vadd.f32 %v428_v21, %v427_v40  ;;  %v446_v21 = vsel %vm201_vm1, %v361_v2, 0.0  ;;  %v903_v40 = vld [vmem:[%s646_s15 + $0x150] sm:$0xff]  ;;  %v370_v2 = vmul.f32 %v815_v9, %v815_v9 }
  0x42   : > { %v250_v41 = vadd.f32 %v249_v30, %v248_v33  ;;  %v267_v30 = vsel %vm201_vm1, %v831_v13, 0.0 }
  0x43   : > { %v431_v46 = vadd.f32 %v430_v29, %v429_v43  ;;  %v448_v29 = vsel %vm201_vm1, %v362_v12, 0.0  ;;  %v911_v43 = vld [vmem:[%s646_s15 + $0x158] sm:$0xff]  ;;  %v371_v12 = vmul.f32 %v823_v10, %v823_v10 }
  0x44   : > { %v252_v48 = vadd.f32 %v251_v38, %v250_v41  ;;  %v269_v38 = vsel %vm201_vm1, %v839_v16, 0.0 }
  0x45   : > { %v433_v49 = vadd.f32 %v432_v36, %v431_v46  ;;  %v450_v36 = vsel %vm201_vm1, %v363_v20, 0.0  ;;  %v919_v46 = vld [vmem:[%s646_s15 + $0x160] sm:$0xff]  ;;  %v372_v20 = vmul.f32 %v831_v13, %v831_v13 }
  0x46   : > { %v254_v55 = vadd.f32 %v253_v45, %v252_v48  ;;  %v271_v45 = vsel %vm201_vm1, %v847_v19, 0.0 }
  0x47   : > { %v435_v52 = vadd.f32 %v434_v44, %v433_v49  ;;  %v452_v44 = vsel %vm201_vm1, %v364_v27, 0.0  ;;  %v927_v49 = vld [vmem:[%s646_s15 + $0x168] sm:$0xff]  ;;  %v373_v27 = vmul.f32 %v839_v16, %v839_v16 }
  0x48   : > { %v256_v62 = vadd.f32 %v255_v53, %v254_v55  ;;  %v273_v53 = vsel %vm201_vm1, %v855_v22, 0.0 }
  0x49   : > { %v437_v56 = vadd.f32 %v436_v51, %v435_v52  ;;  %v454_v51 = vsel %vm201_vm1, %v365_v35, 0.0  ;;  %v935_v52 = vld [vmem:[%s646_s15 + $0x170] sm:$0xff]  ;;  %v374_v35 = vmul.f32 %v847_v19, %v847_v19 }
  0x4a   : > { %v258_v6 = vadd.f32 %v257_v59, %v256_v62  ;;  %v275_v59 = vsel %vm201_vm1, %v863_v25, 0.0 }
  0x4b   : > { %v439_v61 = vadd.f32 %v438_v58, %v437_v56  ;;  %v456_v58 = vsel %vm201_vm1, %v366_v42, 0.0  ;;  %v943_v56 = vld [vmem:[%s646_s15 + $0x178] sm:$0xff]  ;;  %v375_v42 = vmul.f32 %v855_v22, %v855_v22 }
  0x4c   : > { %v260_v11 = vadd.f32 %v259_v4, %v258_v6  ;;  %v277_v4 = vsel %vm201_vm1, %v871_v28, 0.0 }
  0x4d   : > { %v441_v1 = vadd.f32 %v440_v0, %v439_v61  ;;  %v458_v0 = vsel %vm201_vm1, %v367_v50, 0.0  ;;  %v951_v61 = vld [vmem:[%s646_s15 + $0x180] sm:$0xff]  ;;  %v376_v50 = vmul.f32 %v863_v25, %v863_v25 }
  0x4e   : > { %v262_v18 = vadd.f32 %v261_v8, %v260_v11  ;;  %v279_v8 = vsel %vm201_vm1, %v879_v31, 0.0 }
  0x4f   : > { %v443_v7 = vadd.f32 %v442_v3, %v441_v1  ;;  %v460_v3 = vsel %vm201_vm1, %v368_v57, 0.0  ;;  %v959_v1 = vld [vmem:[%s646_s15 + $0x188] sm:$0xff]  ;;  %v377_v57 = vmul.f32 %v871_v28, %v871_v28 }
  0x50   : > { %v264_v26 = vadd.f32 %v263_v15, %v262_v18  ;;  %v281_v15 = vsel %vm201_vm1, %v887_v34, 0.0 }
  0x51   : > { %v445_v17 = vadd.f32 %v444_v14, %v443_v7  ;;  %v462_v14 = vsel %vm201_vm1, %v369_v63, 0.0  ;;  %v967_v7 = vld [vmem:[%s646_s15 + $0x190] sm:$0xff]  ;;  %v378_v63 = vmul.f32 %v879_v31, %v879_v31 }
  0x52   : > { %v266_v33 = vadd.f32 %v265_v23, %v264_v26  ;;  %v283_v23 = vsel %vm201_vm1, %v895_v37, 0.0 }
  0x53   : > { %v447_v24 = vadd.f32 %v446_v21, %v445_v17  ;;  %v464_v21 = vsel %vm201_vm1, %v370_v2, 0.0  ;;  %v975_v17 = vld [vmem:[%s646_s15 + $0x198] sm:$0xff]  ;;  %v379_v2 = vmul.f32 %v887_v34, %v887_v34 }
  0x54   : > { %v268_v41 = vadd.f32 %v267_v30, %v266_v33  ;;  %v285_v30 = vsel %vm201_vm1, %v903_v40, 0.0 }
  0x55   : > { %v449_v32 = vadd.f32 %v448_v29, %v447_v24  ;;  %v466_v29 = vsel %vm201_vm1, %v371_v12, 0.0  ;;  %v983_v24 = vld [vmem:[%s646_s15 + $0x1a0] sm:$0xff]  ;;  %v380_v12 = vmul.f32 %v895_v37, %v895_v37 }
  0x56   : > { %v270_v48 = vadd.f32 %v269_v38, %v268_v41  ;;  %v287_v38 = vsel %vm201_vm1, %v911_v43, 0.0 }
  0x57   : > { %v451_v39 = vadd.f32 %v450_v36, %v449_v32  ;;  %v468_v36 = vsel %vm201_vm1, %v372_v20, 0.0  ;;  %v991_v32 = vld [vmem:[%s646_s15 + $0x1a8] sm:$0xff]  ;;  %v381_v20 = vmul.f32 %v903_v40, %v903_v40 }
  0x58   : > { %v272_v55 = vadd.f32 %v271_v45, %v270_v48  ;;  %v289_v45 = vsel %vm201_vm1, %v919_v46, 0.0 }
  0x59   : > { %v453_v47 = vadd.f32 %v452_v44, %v451_v39  ;;  %v470_v44 = vsel %vm201_vm1, %v373_v27, 0.0  ;;  %v999_v39 = vld [vmem:[%s646_s15 + $0x1b0] sm:$0xff]  ;;  %v382_v27 = vmul.f32 %v911_v43, %v911_v43 }
  0x5a   : > { %v274_v62 = vadd.f32 %v273_v53, %v272_v55  ;;  %v291_v53 = vsel %vm201_vm1, %v927_v49, 0.0  ;;  %v1063_v43 = vld [vmem:[%s646_s15 + $0x1f0] sm:$0xff] }
  0x5b   : > { %v455_v54 = vadd.f32 %v454_v51, %v453_v47  ;;  %v472_v51 = vsel %vm201_vm1, %v374_v35, 0.0  ;;  %v1007_v47 = vld [vmem:[%s646_s15 + $0x1b8] sm:$0xff]  ;;  %v383_v35 = vmul.f32 %v919_v46, %v919_v46 }
  0x5c   : > { %v276_v6 = vadd.f32 %v275_v59, %v274_v62  ;;  %v293_v59 = vsel %vm201_vm1, %v935_v52, 0.0 }
  0x5d   : > { %v457_v60 = vadd.f32 %v456_v58, %v455_v54  ;;  %v474_v58 = vsel %vm201_vm1, %v375_v42, 0.0  ;;  %v1015_v54 = vld [vmem:[%s646_s15 + $0x1c0] sm:$0xff]  ;;  %v384_v42 = vmul.f32 %v927_v49, %v927_v49  ;;  %v386_v49 = vmul.f32 %v943_v56, %v943_v56 }
  0x5e   : > { %v278_v11 = vadd.f32 %v277_v4, %v276_v6  ;;  %v295_v4 = vsel %vm201_vm1, %v943_v56, 0.0  ;;  %v389_v56 = vmul.f32 %v967_v7, %v967_v7 }
  0x5f   : > { %v459_v5 = vadd.f32 %v458_v0, %v457_v60  ;;  %v476_v0 = vsel %vm201_vm1, %v376_v50, 0.0  ;;  %v1023_v60 = vld [vmem:[%s646_s15 + $0x1c8] sm:$0xff]  ;;  %v385_v50 = vmul.f32 %v935_v52, %v935_v52 }
  0x60   : > { %v280_v18 = vadd.f32 %v279_v8, %v278_v11  ;;  %v297_v8 = vsel %vm201_vm1, %v951_v61, 0.0 }
  0x61   : > { %v461_v9 = vadd.f32 %v460_v3, %v459_v5  ;;  %v478_v3 = vsel %vm201_vm1, %v377_v57, 0.0  ;;  %v1031_v5 = vld [vmem:[%s646_s15 + $0x1d0] sm:$0xff]  ;;  %v492_v57 = vsel %vm201_vm1, %v384_v42, 0.0 }
  0x62   : > { %v282_v26 = vadd.f32 %v281_v15, %v280_v18  ;;  %v299_v15 = vsel %vm201_vm1, %v959_v1, 0.0 }
  0x63   : > { %v463_v10 = vadd.f32 %v462_v14, %v461_v9  ;;  %v480_v14 = vsel %vm201_vm1, %v378_v63, 0.0  ;;  %v1039_v9 = vld [vmem:[%s646_s15 + $0x1d8] sm:$0xff] }
  0x64   : > { %v284_v33 = vadd.f32 %v283_v23, %v282_v26  ;;  %v301_v23 = vsel %vm201_vm1, %v967_v7, 0.0  ;;  %v392_v7 = vmul.f32 %v991_v32, %v991_v32 }
  0x65   : > { %v465_v13 = vadd.f32 %v464_v21, %v463_v10  ;;  %v482_v21 = vsel %vm201_vm1, %v379_v2, 0.0  ;;  %v1047_v10 = vld [vmem:[%s646_s15 + $0x1e0] sm:$0xff] }
  0x66   : > { %v286_v41 = vadd.f32 %v285_v30, %v284_v33  ;;  %v303_v30 = vsel %vm201_vm1, %v975_v17, 0.0 }
  0x67   : > { %v467_v16 = vadd.f32 %v466_v29, %v465_v13  ;;  %v484_v29 = vsel %vm201_vm1, %v380_v12, 0.0  ;;  %v1055_v13 = vld [vmem:[%s646_s15 + $0x1e8] sm:$0xff] }
  0x68   : > { %v288_v48 = vadd.f32 %v287_v38, %v286_v41  ;;  %v305_v38 = vsel %vm201_vm1, %v983_v24, 0.0 }
  0x69   : > { %v469_v19 = vadd.f32 %v468_v36, %v467_v16  ;;  %v486_v36 = vsel %vm201_vm1, %v381_v20, 0.0  ;;  %v200_v20 = vld [vmem:[#allocation2] sm:$0x1] }
  0x6a   : > { %v290_v55 = vadd.f32 %v289_v45, %v288_v48  ;;  %v307_v45 = vsel %vm201_vm1, %v991_v32, 0.0  ;;  %v395_v32 = vmul.f32 %v1015_v54, %v1015_v54 }
  0x6b   : > { %v471_v22 = vadd.f32 %v470_v44, %v469_v19  ;;  %v488_v44 = vsel %vm201_vm1, %v382_v27, 0.0  ;;  %v394_v27 = vmul.f32 %v1007_v47, %v1007_v47 }
  0x6c   : > { %v292_v62 = vadd.f32 %v291_v53, %v290_v55  ;;  %v309_v53 = vsel %vm201_vm1, %v999_v39, 0.0 }
  0x6d   : > { %v473_v25 = vadd.f32 %v472_v51, %v471_v22  ;;  %v490_v51 = vsel %vm201_vm1, %v383_v35, 0.0  ;;  %v512_v35 = vsel %vm201_vm1, %v394_v27, 0.0 }
  0x6e   : > { %v294_v6 = vadd.f32 %v293_v59, %v292_v62  ;;  %v311_v59 = vsel %vm201_vm1, %v1007_v47, 0.0  ;;  %v397_v47 = vmul.f32 %v1031_v5, %v1031_v5 }
  0x6f   : > { %v475_v28 = vadd.f32 %v474_v58, %v473_v25  ;;  %v387_v25 = vmul.f32 %v951_v61, %v951_v61  ;;  %v390_v61 = vmul.f32 %v975_v17, %v975_v17  ;;  %v393_v17 = vmul.f32 %v999_v39, %v999_v39 }
  0x70   : > { %v296_v11 = vadd.f32 %v295_v4, %v294_v6  ;;  %v313_v4 = vsel %vm201_vm1, %v1015_v54, 0.0  ;;  %v396_v39 = vmul.f32 %v1023_v60, %v1023_v60 }
  0x71   : > { %v477_v31 = vadd.f32 %v476_v0, %v475_v28  ;;  %v388_v0 = vmul.f32 %v959_v1, %v959_v1  ;;  %v498_v2 = vsel %vm201_vm1, %v387_v25, 0.0  ;;  %v391_v1 = vmul.f32 %v983_v24, %v983_v24 }
  0x72   : > { %v298_v18 = vadd.f32 %v297_v8, %v296_v11  ;;  %v315_v8 = vsel %vm201_vm1, %v1023_v60, 0.0  ;;  %v516_v54 = vsel %vm201_vm1, %v396_v39, 0.0  ;;  %v518_v60 = vsel %vm201_vm1, %v397_v47, 0.0 }
  0x73   : > { %v479_v34 = vadd.f32 %v478_v3, %v477_v31  ;;  %v500_v31 = vsel %vm201_vm1, %v388_v0, 0.0 }
  0x74   : > { %v300_v26 = vadd.f32 %v299_v15, %v298_v18  ;;  %v317_v15 = vsel %vm201_vm1, %v1031_v5, 0.0 }
  0x75   : > { %v481_v37 = vadd.f32 %v480_v14, %v479_v34  ;;  %v502_v14 = vsel %vm201_vm1, %v389_v56, 0.0 }
  0x76   : > { %v302_v33 = vadd.f32 %v301_v23, %v300_v26  ;;  %v319_v23 = vsel %vm201_vm1, %v1039_v9, 0.0 }
  0x77   : > { %v483_v40 = vadd.f32 %v482_v21, %v481_v37  ;;  %v506_v37 = vsel %vm201_vm1, %v391_v1, 0.0 }
  0x78   : > { %v304_v41 = vadd.f32 %v303_v30, %v302_v33  ;;  %v321_v30 = vsel %vm201_vm1, %v1047_v10, 0.0 }
  0x79   : > { %v485_v16 = vadd.f32 %v484_v29, %v483_v40  ;;  %v508_v29 = vsel %vm201_vm1, %v392_v7, 0.0  ;;  %v510_v40 = vsel %vm201_vm1, %v393_v17, 0.0 }
  0x7a   : > { %v306_v48 = vadd.f32 %v305_v38, %v304_v41  ;;  %v323_v38 = vsel %vm201_vm1, %v1055_v13, 0.0 }
  0x7b   : > { %v487_v19 = vadd.f32 %v486_v36, %v485_v16 }
  0x7c   : > { %v308_v55 = vadd.f32 %v307_v45, %v306_v48  ;;  %v325_v45 = vsel %vm201_vm1, %v1063_v43, 0.0  ;;  %v1071_v48 = vld [vmem:[%s646_s15 + $0x1f8] sm:$0xff] }
  0x7d   : > { %v489_v22 = vadd.f32 %v488_v44, %v487_v19  ;;  %v399_v44 = vmul.f32 %v1047_v10, %v1047_v10  ;;  %v400_v19 = vmul.f32 %v1055_v13, %v1055_v13 }
  0x7e   : > { %v310_v62 = vadd.f32 %v309_v53, %v308_v55  ;;  %v327_v53 = vsel %vm201_vm1, %v1071_v48, 0.0 }
  0x7f   : > { %v491_v58 = vadd.f32 %v490_v51, %v489_v22  ;;  %v524_v10 = vsel %vm201_vm1, %v400_v19, 0.0 }
  0x80   : > { %v312_v6 = vadd.f32 %v311_v59, %v310_v62  ;;  %v494_v62 = vsel %vm201_vm1, %v385_v50, 0.0  ;;  %v401_v50 = vmul.f32 %v1063_v43, %v1063_v43 }
  0x81   : > { %v493_v52 = vadd.f32 %v492_v57, %v491_v58 }
  0x82   : > { %v314_v11 = vadd.f32 %v313_v4, %v312_v6  ;;  %v496_v4 = vsel %vm201_vm1, %v386_v49, 0.0 }
  0x83   : > { %v495_v28 = vadd.f32 %v494_v62, %v493_v52 }
  0x84   : > { %v316_v18 = vadd.f32 %v315_v8, %v314_v11 }
  0x85   : > { %v497_v3 = vadd.f32 %v496_v4, %v495_v28 }
  0x86   : > { %v318_v26 = vadd.f32 %v317_v15, %v316_v18  ;;  %v504_v18 = vsel %vm201_vm1, %v390_v61, 0.0 }
  0x87   : > { %v499_v11 = vadd.f32 %v498_v2, %v497_v3 }
  0x88   : > { %v320_v33 = vadd.f32 %v319_v23, %v318_v26 }
  0x89   : > { %v501_v15 = vadd.f32 %v500_v31, %v499_v11 }
  0x8a   : > { %v322_v41 = vadd.f32 %v321_v30, %v320_v33 }
  0x8b   : > { %v503_v21 = vadd.f32 %v502_v14, %v501_v15 }
  0x8c   : > { %v324_v46 = vadd.f32 %v323_v38, %v322_v41  ;;  %v514_v38 = vsel %vm201_vm1, %v395_v32, 0.0  ;;  %v398_v41 = vmul.f32 %v1039_v9, %v1039_v9  ;;  %v522_v9 = vsel %vm201_vm1, %v399_v44, 0.0 }
  0x8d   : > { %v505_v26 = vadd.f32 %v504_v18, %v503_v21 }
  0x8e   : > { %v326_v55 = vadd.f32 %v325_v45, %v324_v46  ;;  %v520_v5 = vsel %vm201_vm1, %v398_v41, 0.0 }
  0x8f   : > { %v507_v30 = vadd.f32 %v506_v37, %v505_v26 }
  0x90   : > { %v328_v59 = vadd.f32 %v327_v53, %v326_v55  ;;  %v402_v53 = vmul.f32 %v1071_v48, %v1071_v48  ;;  %v526_v55 = vsel %vm201_vm1, %v401_v50, 0.0 }
  0x91   : > { %v509_v33 = vadd.f32 %v508_v29, %v507_v30 }
  0x92   : > { %v329_v63 = vrot.slane %v328_v59, 4  ;;  %v528_v13 = vsel %vm201_vm1, %v402_v53, 0.0 }
  0x93   : > { %v511_v36 = vadd.f32 %v510_v40, %v509_v33 }
  0x94   : > { %v330_v6 = vadd.f32 %v329_v63, %v328_v59  ;;  %v338_v63 = vld [vmem:[#allocation3] sm:$0x1] }
  0x95   : > { %v513_v16 = vadd.f32 %v512_v35, %v511_v36 }
  0x96   : > { %v331_v8 = vrot.slane %v330_v6, 2 }
  0x97   : > { %v515_v42 = vadd.f32 %v514_v38, %v513_v16 }
  0x98   : > { %v332_v12 = vadd.f32 %v331_v8, %v330_v6 }
  0x99   : > { %v517_v45 = vadd.f32 %v516_v54, %v515_v42 }
  0x9a   : > { %v333_v34 = vrot.slane %v332_v12, 1 }
  0x9b   : > { %v519_v46 = vadd.f32 %v518_v60, %v517_v45 }
  0x9c   : > { %v334_v23 = vadd.f32 %v333_v34, %v332_v12 }
  0x9d   : > { %v521_v51 = vadd.f32 %v520_v5, %v519_v46 }
  0x9e   : > { %v335_v24 = vadd.f32 %v334_v23, %v200_v20 }
  0x9f   : > { %v523_v22 = vadd.f32 %v522_v9, %v521_v51 }
  0xa0   : > { %337 = vst.msk [vmem:[#allocation2] sm:$0x1] %vm336_vm2, %v335_v24 }
  0xa1   : > { %v525_v49 = vadd.f32 %v524_v10, %v523_v22 }
  0xa3   : > { %v527_v57 = vadd.f32 %v526_v55, %v525_v49 }
  0xa5   : > { %v529_v58 = vadd.f32 %v528_v13, %v527_v57 }
  0xa7   : > { %v530_v59 = vrot.slane %v529_v58, 4 }
  0xa9   : > { %v531_v25 = vadd.f32 %v530_v59, %v529_v58 }
  0xab   : > { %v532_v62 = vrot.slane %v531_v25, 2 }
  0xad   : > { %v533_v43 = vadd.f32 %v532_v62, %v531_v25 }
  0xaf   : > { %v534_v52 = vrot.slane %v533_v43, 1 }
  0xb1   : > { %v535_v0 = vadd.f32 %v534_v52, %v533_v43  ;;  %541 = sbr.rel (%p594_p5) target bundleno = 212 (0xd4), region = 32 }
  0xb3   : > { %v536_v4 = vadd.f32 %v535_v0, %v338_v63 }
  0xb5   : > { %537 = vst.msk [vmem:[#allocation3] sm:$0x1] %vm336_vm2, %v536_v4 }
  0xb6   : > { %v542_v48 = vld [vmem:[#allocation2] sm:$0x1] }
  0xb7   : > { %v543_v6 = vmul.f32 0.00048828125, %v542_v48 }
  0xb9   : > { %v546_v2 = vmul.f32 %v543_v6, %v543_v6  ;;  %549 = vst.msk [vmem:[%s1146_s1] sm:$0x1] %vm336_vm2, %v543_v6 }
  0xbc   : > { %v544_v28 = vld [vmem:[#allocation3] sm:$0x1] }
  0xbd   : > { %v545_v56 = vmul.f32 0.00048828125, %v544_v28 }
  0xbf   : > { %v547_v3 = vsub.f32 %v545_v56, %v546_v2 }
  0xc1   : > { %v548_v8 = vmax.f32 %v547_v3, 0.0 }
  0xc3   : > { %v550_v61 = vadd.f32 1e-05, %v548_v8 }
  0xc5   : > { %606 = vrsqrt.f32 %v550_v61 }
  0xd2   : > { %v607_v31 = vpop.eup %606 }
  0xd3   : > { %552 = vst.msk [vmem:[%s1147_s2] sm:$0x1] %vm336_vm2, %v607_v31 }
  0xd4 PF: > { %s13_s9 = sadd.s32 1, %s614_s9  }
  0xd5   : > { %p10_p6 = scmp.ge.s32.totalorder %s13_s9, 6  }
  0xd7   :  { %12 = sbr.rel (!%p10_p6) target bundleno = 1 (0x1), region = 66 }

// kernel: generator_forward.26
= control target key start
LH: loop header
LB: loop body
LE: loop exit
PB: predicated region body
PF: predicated region fallthrough
CT: control target
= control target key end

     0   :  { %s1276_s9 = smov 0   ;;  %s1278_s10 = smov 0   ;;  %s1457_s0 = inlined_call_operand.vmem [shape: bf16[2048,64], index: 0, kind: input, shape index: {}]   ;;  %s1458_s1 = inlined_call_operand.vmem [shape: bf16[64,128], index: 1, kind: input, shape index: {}]   ;;  %s1459_s2 = inlined_call_operand.vmem [shape: f32[2048,128], index: 2, kind: output, shape index: {}]  }
   0x1   :  { %s1280_s11 = smov 0  }
   0x2 LB: > { %s24_s12 = sadd.s32 1, %s1255_s10  ;;  %p986_p0 = scmp.ge.s32.totalorder %s1259_s11, 1  ;;  %s1259_s11 = sphi %s1280_s11, %s12_s11   ;;  %s1255_s10 = sphi %s1278_s10, %s1461_s10   ;;  %s1251_s9 = sphi %s1276_s9, %s1460_s9  }
   0x3   : > { %p26_p1 = scmp.ge.s32.totalorder %s24_s12, 4  ;;  %p136_p2 = scmp.lt.s32.totalorder %s1259_s11, 5 }
   0x5   : > { %s1463_s12 = smov (%p26_p1, %s24_s12), 0  ;;  %p137_p3 = pnand %p986_p0, %p136_p2 }
   0x6   : > { %s987_s15 = sshll.u32 (!%p137_p3), %s1251_s9, 6 }
   0x7   : > { %140 = sbr.rel (%p137_p3) target bundleno = 285 (0x11d), region = 28  ;;  %p166_p4 = scmp.lt.s32.totalorder (!%p137_p3), %s987_s15, 255 }
   0xc   : > { %v1201_v0 = vld [vmem:[%s1458_s1 + $0x18] sm:$0xff]   ;;  %v1202_v1 = vld [vmem:[%s1458_s1 + $0x10] sm:$0xff]   ;;  %s1465_s15 = smov (!%p166_p4, %s987_s15), 255  ;;  %v1203_v2 = vld [vmem:[%s1458_s1 + $0x8] sm:$0xff]   ;;  %vm441_vm0 = vcmask 523264  }
   0xd   : > { %1097 = vmatprep.subr.bf16.mxu0 %v1201_v0  ;;  %1169 = vmatprep.subr.bf16.mxu1 %v1201_v0  ;;  %s988_s20 = sshll.u32 %s1465_s15, 2  ;;  %v1204_v3 = vld [vmem:[%s1458_s1] sm:$0xff]   ;;  %s990_s26 = sshll.u32 %s1465_s15, 3 }
   0xe   : > { %1098 = vmatpush3.bf16.msra.mxu0 %v1201_v0  ;;  %1173 = vmatpush3.bf16.msra.mxu1 %v1201_v0  ;;  %s1312_s25 = scalar_lea.vmem %s1457_s0, %s988_s20  ;;  %s1382_s29 = scalar_lea.vmem %s1459_s2, %s990_s26 }
   0xf   : > { %1099 = vmatprep.subr.bf16.mxu0 %v1202_v1  ;;  %1170 = vmatprep.subr.bf16.mxu1 %v1202_v1  ;;  %v1205_v4 = vld [vmem:[%s1312_s25] sm:$0xff]   ;;  %v1207_v6 = vld [vmem:[%s1312_s25 + $0x8] sm:$0xff]   ;;  %v1209_v8 = vld [vmem:[%s1312_s25 + $0x10] sm:$0xff]  }
  0x10   : > { %v1206_v5 = vld [vmem:[%s1312_s25 + $0x80] sm:$0xff]   ;;  %1105 = vmatprep.mubr.msk.bf16.mxu0 %vm441_vm0, %v1205_v4  ;;  %v1208_v7 = vld [vmem:[%s1312_s25 + $0x88] sm:$0xff]   ;;  %v1210_v9 = vld [vmem:[%s1312_s25 + $0x90] sm:$0xff]  }
  0x11   : > { %1137 = vmatprep.mubr.msk.bf16.mxu1 %vm441_vm0, %v1206_v5  ;;  %v1211_v10 = vld [vmem:[%s1312_s25 + $0x18] sm:$0xff]   ;;  %v1213_v12 = vld [vmem:[%s1312_s25 + $0x20] sm:$0xff]   ;;  %v1215_v14 = vld [vmem:[%s1312_s25 + $0x28] sm:$0xff]  }
  0x12   : > { %1100 = vmatpush3.bf16.msra.mxu0 %v1202_v1  ;;  %1174 = vmatpush3.bf16.msra.mxu1 %v1202_v1  ;;  %v1212_v11 = vld [vmem:[%s1312_s25 + $0x98] sm:$0xff]   ;;  %v1214_v13 = vld [vmem:[%s1312_s25 + $0xa0] sm:$0xff]   ;;  %v1216_v15 = vld [vmem:[%s1312_s25 + $0xa8] sm:$0xff]  }
  0x13   : > { %1101 = vmatprep.subr.bf16.mxu0 %v1203_v2  ;;  %1171 = vmatprep.subr.bf16.mxu1 %v1203_v2  ;;  %v1217_v16 = vld [vmem:[%s1312_s25 + $0x30] sm:$0xff]   ;;  %v1219_v18 = vld [vmem:[%s1312_s25 + $0x38] sm:$0xff]   ;;  %v1221_v20 = vld [vmem:[%s1312_s25 + $0x40] sm:$0xff]  }
  0x14   : > { %v1218_v17 = vld [vmem:[%s1312_s25 + $0xb0] sm:$0xff]   ;;  %v1220_v19 = vld [vmem:[%s1312_s25 + $0xb8] sm:$0xff]   ;;  %v1222_v21 = vld [vmem:[%s1312_s25 + $0xc0] sm:$0xff]  }
  0x15   : > { %v1223_v22 = vld [vmem:[%s1312_s25 + $0x48] sm:$0xff]   ;;  %v1225_v24 = vld [vmem:[%s1312_s25 + $0x50] sm:$0xff]   ;;  %v1227_v26 = vld [vmem:[%s1312_s25 + $0x58] sm:$0xff]  }
  0x16   : > { %1102 = vmatpush3.bf16.msra.mxu0 %v1203_v2  ;;  %1175 = vmatpush3.bf16.msra.mxu1 %v1203_v2  ;;  %v1224_v23 = vld [vmem:[%s1312_s25 + $0xc8] sm:$0xff]   ;;  %v1226_v25 = vld [vmem:[%s1312_s25 + $0xd0] sm:$0xff]   ;;  %v1228_v27 = vld [vmem:[%s1312_s25 + $0xd8] sm:$0xff]  }
  0x17   : > { %1103 = vmatprep.subr.bf16.mxu0 %v1204_v3  ;;  %1172 = vmatprep.subr.bf16.mxu1 %v1204_v3  ;;  %v1229_v28 = vld [vmem:[%s1312_s25 + $0x60] sm:$0xff]   ;;  %v1231_v30 = vld [vmem:[%s1312_s25 + $0x68] sm:$0xff]   ;;  %v1233_v32 = vld [vmem:[%s1312_s25 + $0x70] sm:$0xff]  }
  0x18   : > { %v1230_v29 = vld [vmem:[%s1312_s25 + $0xe0] sm:$0xff]   ;;  %v1232_v31 = vld [vmem:[%s1312_s25 + $0xe8] sm:$0xff]   ;;  %v1234_v33 = vld [vmem:[%s1312_s25 + $0xf0] sm:$0xff]  }
  0x19   : > { %v1235_v34 = vld [vmem:[%s1312_s25 + $0x78] sm:$0xff]  }
  0x1a   : > { %1104 = vmatpush3.bf16.msra.mxu0 %v1204_v3  ;;  %1176 = vmatpush3.bf16.msra.mxu1 %v1204_v3  ;;  %v1236_v35 = vld [vmem:[%s1312_s25 + $0xf8] sm:$0xff]  }
  0x1d   : > { %1106 = vmatmul.mubr.msk.bf16.vlgmr.msra.gmra.mxu0 %vm441_vm0, %v1207_v6  ;;  %1138 = vmatmul.mubr.msk.bf16.vlgmr.msra.gmra.mxu1 %vm441_vm0, %v1208_v7 }
  0x1e   : > { %1109 = vmatprep.mubr.msk.bf16.mxu0 %vm441_vm0, %v1209_v8  ;;  %1141 = vmatprep.mubr.msk.bf16.mxu1 %vm441_vm0, %v1210_v9 }
  0x25   : > { %1110 = vmatmul.mubr.msk.bf16.gmra.mxu0 %vm441_vm0, %v1211_v10  ;;  %1142 = vmatmul.mubr.msk.bf16.gmra.mxu1 %vm441_vm0, %v1212_v11 }
  0x26   : > { %1113 = vmatprep.mubr.msk.bf16.mxu0 %vm441_vm0, %v1213_v12  ;;  %1145 = vmatprep.mubr.msk.bf16.mxu1 %vm441_vm0, %v1214_v13 }
  0x2d   : > { %1114 = vmatmul.mubr.msk.bf16.gmra.mxu0 %vm441_vm0, %v1215_v14  ;;  %1146 = vmatmul.mubr.msk.bf16.gmra.mxu1 %vm441_vm0, %v1216_v15 }
  0x2e   : > { %1117 = vmatprep.mubr.msk.bf16.mxu0 %vm441_vm0, %v1217_v16  ;;  %1149 = vmatprep.mubr.msk.bf16.mxu1 %vm441_vm0, %v1218_v17 }
  0x35   : > { %1118 = vmatmul.mubr.msk.bf16.gmra.mxu0 %vm441_vm0, %v1219_v18  ;;  %1150 = vmatmul.mubr.msk.bf16.gmra.mxu1 %vm441_vm0, %v1220_v19 }
  0x36   : > { %1121 = vmatprep.mubr.msk.bf16.mxu0 %vm441_vm0, %v1221_v20  ;;  %1153 = vmatprep.mubr.msk.bf16.mxu1 %vm441_vm0, %v1222_v21 }
  0x3d   : > { %1122 = vmatmul.mubr.msk.bf16.gmra.mxu0 %vm441_vm0, %v1223_v22  ;;  %1154 = vmatmul.mubr.msk.bf16.gmra.mxu1 %vm441_vm0, %v1224_v23 }
  0x3e   : > { %1125 = vmatprep.mubr.msk.bf16.mxu0 %vm441_vm0, %v1225_v24  ;;  %1157 = vmatprep.mubr.msk.bf16.mxu1 %vm441_vm0, %v1226_v25 }
  0x45   : > { %1126 = vmatmul.mubr.msk.bf16.gmra.mxu0 %vm441_vm0, %v1227_v26  ;;  %1158 = vmatmul.mubr.msk.bf16.gmra.mxu1 %vm441_vm0, %v1228_v27 }
  0x46   : > { %1129 = vmatprep.mubr.msk.bf16.mxu0 %vm441_vm0, %v1229_v28  ;;  %1161 = vmatprep.mubr.msk.bf16.mxu1 %vm441_vm0, %v1230_v29 }
  0x4d   : > { %1130 = vmatmul.mubr.msk.bf16.gmra.mxu0 %vm441_vm0, %v1231_v30  ;;  %1162 = vmatmul.mubr.msk.bf16.gmra.mxu1 %vm441_vm0, %v1232_v31 }
  0x4e   : > { %1133 = vmatprep.mubr.msk.bf16.mxu0 %vm441_vm0, %v1233_v32  ;;  %1165 = vmatprep.mubr.msk.bf16.mxu1 %vm441_vm0, %v1234_v33 }
  0x55   : > { %1134 = vmatmul.mubr.msk.bf16.gmra.mxu0 %vm441_vm0, %v1235_v34  ;;  %1166 = vmatmul.mubr.msk.bf16.gmra.mxu1 %vm441_vm0, %v1236_v35 }
  0xdd   : > { %v1107_v36 = vpop.f32.mrf.mxu0  ;;  %v1139_v37 = vpop.f32.mrf.mxu1 }
  0xde   : > { %829 = vst [vmem:[%s1382_s29 + $0x10] sm:$0xff] %v1107_v36  ;;  %861 = vst [vmem:[%s1382_s29 + $0x110] sm:$0xff] %v1139_v37 }
  0xdf   : > { %v572_v38 = vpop.f32.mrf.mxu0  ;;  %v700_v39 = vpop.f32.mrf.mxu1 }
  0xe0   : > { %827 = vst [vmem:[%s1382_s29] sm:$0xff] %v572_v38  ;;  %859 = vst [vmem:[%s1382_s29 + $0x100] sm:$0xff] %v700_v39 }
  0xe1   : > { %v1108_v40 = vpop.f32.mrf.mxu0  ;;  %v1140_v41 = vpop.f32.mrf.mxu1 }
  0xe2   : > { %830 = vst [vmem:[%s1382_s29 + $0x18] sm:$0xff] %v1108_v40  ;;  %862 = vst [vmem:[%s1382_s29 + $0x118] sm:$0xff] %v1140_v41 }
  0xe3   : > { %v575_v42 = vpop.f32.mrf.mxu0  ;;  %v703_v43 = vpop.f32.mrf.mxu1 }
  0xe4   : > { %828 = vst [vmem:[%s1382_s29 + $0x8] sm:$0xff] %v575_v42  ;;  %860 = vst [vmem:[%s1382_s29 + $0x108] sm:$0xff] %v703_v43 }
  0xe5   : > { %v1111_v44 = vpop.f32.mrf.mxu0  ;;  %v1143_v45 = vpop.f32.mrf.mxu1 }
  0xe6   : > { %833 = vst [vmem:[%s1382_s29 + $0x30] sm:$0xff] %v1111_v44  ;;  %865 = vst [vmem:[%s1382_s29 + $0x130] sm:$0xff] %v1143_v45 }
  0xe7   : > { %v588_v46 = vpop.f32.mrf.mxu0  ;;  %v716_v47 = vpop.f32.mrf.mxu1 }
  0xe8   : > { %831 = vst [vmem:[%s1382_s29 + $0x20] sm:$0xff] %v588_v46  ;;  %863 = vst [vmem:[%s1382_s29 + $0x120] sm:$0xff] %v716_v47 }
  0xe9   : > { %v1112_v48 = vpop.f32.mrf.mxu0  ;;  %v1144_v49 = vpop.f32.mrf.mxu1 }
  0xea   : > { %834 = vst [vmem:[%s1382_s29 + $0x38] sm:$0xff] %v1112_v48  ;;  %866 = vst [vmem:[%s1382_s29 + $0x138] sm:$0xff] %v1144_v49 }
  0xeb   : > { %v591_v50 = vpop.f32.mrf.mxu0  ;;  %v719_v51 = vpop.f32.mrf.mxu1 }
  0xec   : > { %832 = vst [vmem:[%s1382_s29 + $0x28] sm:$0xff] %v591_v50  ;;  %864 = vst [vmem:[%s1382_s29 + $0x128] sm:$0xff] %v719_v51 }
  0xed   : > { %v1115_v52 = vpop.f32.mrf.mxu0  ;;  %v1147_v53 = vpop.f32.mrf.mxu1 }
  0xee   : > { %837 = vst [vmem:[%s1382_s29 + $0x50] sm:$0xff] %v1115_v52  ;;  %869 = vst [vmem:[%s1382_s29 + $0x150] sm:$0xff] %v1147_v53 }
  0xef   : > { %v604_v54 = vpop.f32.mrf.mxu0  ;;  %v732_v55 = vpop.f32.mrf.mxu1 }
  0xf0   : > { %835 = vst [vmem:[%s1382_s29 + $0x40] sm:$0xff] %v604_v54  ;;  %867 = vst [vmem:[%s1382_s29 + $0x140] sm:$0xff] %v732_v55 }
  0xf1   : > { %v1116_v56 = vpop.f32.mrf.mxu0  ;;  %v1148_v57 = vpop.f32.mrf.mxu1 }
  0xf2   : > { %838 = vst [vmem:[%s1382_s29 + $0x58] sm:$0xff] %v1116_v56  ;;  %870 = vst [vmem:[%s1382_s29 + $0x158] sm:$0xff] %v1148_v57 }
  0xf3   : > { %v607_v58 = vpop.f32.mrf.mxu0  ;;  %v735_v59 = vpop.f32.mrf.mxu1 }
  0xf4   : > { %836 = vst [vmem:[%s1382_s29 + $0x48] sm:$0xff] %v607_v58  ;;  %868 = vst [vmem:[%s1382_s29 + $0x148] sm:$0xff] %v735_v59 }
  0xf5   : > { %v1119_v60 = vpop.f32.mrf.mxu0  ;;  %v1151_v61 = vpop.f32.mrf.mxu1 }
  0xf6   : > { %841 = vst [vmem:[%s1382_s29 + $0x70] sm:$0xff] %v1119_v60  ;;  %873 = vst [vmem:[%s1382_s29 + $0x170] sm:$0xff] %v1151_v61 }
  0xf7   : > { %v620_v62 = vpop.f32.mrf.mxu0  ;;  %v748_v63 = vpop.f32.mrf.mxu1 }
  0xf8   : > { %839 = vst [vmem:[%s1382_s29 + $0x60] sm:$0xff] %v620_v62  ;;  %871 = vst [vmem:[%s1382_s29 + $0x160] sm:$0xff] %v748_v63 }
  0xf9   : > { %v1120_v0 = vpop.f32.mrf.mxu0  ;;  %v1152_v1 = vpop.f32.mrf.mxu1 }
  0xfa   : > { %842 = vst [vmem:[%s1382_s29 + $0x78] sm:$0xff] %v1120_v0  ;;  %874 = vst [vmem:[%s1382_s29 + $0x178] sm:$0xff] %v1152_v1 }
  0xfb   : > { %v623_v2 = vpop.f32.mrf.mxu0  ;;  %v751_v3 = vpop.f32.mrf.mxu1 }
  0xfc   : > { %840 = vst [vmem:[%s1382_s29 + $0x68] sm:$0xff] %v623_v2  ;;  %872 = vst [vmem:[%s1382_s29 + $0x168] sm:$0xff] %v751_v3 }
  0xfd   : > { %v1123_v4 = vpop.f32.mrf.mxu0  ;;  %v1155_v5 = vpop.f32.mrf.mxu1 }
  0xfe   : > { %845 = vst [vmem:[%s1382_s29 + $0x90] sm:$0xff] %v1123_v4  ;;  %877 = vst [vmem:[%s1382_s29 + $0x190] sm:$0xff] %v1155_v5 }
  0xff   : > { %v636_v6 = vpop.f32.mrf.mxu0  ;;  %v764_v7 = vpop.f32.mrf.mxu1 }
 0x100   : > { %843 = vst [vmem:[%s1382_s29 + $0x80] sm:$0xff] %v636_v6  ;;  %875 = vst [vmem:[%s1382_s29 + $0x180] sm:$0xff] %v764_v7 }
 0x101   : > { %v1124_v8 = vpop.f32.mrf.mxu0  ;;  %v1156_v9 = vpop.f32.mrf.mxu1 }
 0x102   : > { %846 = vst [vmem:[%s1382_s29 + $0x98] sm:$0xff] %v1124_v8  ;;  %878 = vst [vmem:[%s1382_s29 + $0x198] sm:$0xff] %v1156_v9 }
 0x103   : > { %v639_v10 = vpop.f32.mrf.mxu0  ;;  %v767_v11 = vpop.f32.mrf.mxu1 }
 0x104   : > { %844 = vst [vmem:[%s1382_s29 + $0x88] sm:$0xff] %v639_v10  ;;  %876 = vst [vmem:[%s1382_s29 + $0x188] sm:$0xff] %v767_v11 }
 0x105   : > { %v1127_v12 = vpop.f32.mrf.mxu0  ;;  %v1159_v13 = vpop.f32.mrf.mxu1 }
 0x106   : > { %849 = vst [vmem:[%s1382_s29 + $0xb0] sm:$0xff] %v1127_v12  ;;  %881 = vst [vmem:[%s1382_s29 + $0x1b0] sm:$0xff] %v1159_v13 }
 0x107   : > { %v652_v14 = vpop.f32.mrf.mxu0  ;;  %v780_v15 = vpop.f32.mrf.mxu1 }
 0x108   : > { %847 = vst [vmem:[%s1382_s29 + $0xa0] sm:$0xff] %v652_v14  ;;  %879 = vst [vmem:[%s1382_s29 + $0x1a0] sm:$0xff] %v780_v15 }
 0x109   : > { %v1128_v16 = vpop.f32.mrf.mxu0  ;;  %v1160_v17 = vpop.f32.mrf.mxu1 }
 0x10a   : > { %850 = vst [vmem:[%s1382_s29 + $0xb8] sm:$0xff] %v1128_v16  ;;  %882 = vst [vmem:[%s1382_s29 + $0x1b8] sm:$0xff] %v1160_v17 }
 0x10b   : > { %v655_v18 = vpop.f32.mrf.mxu0  ;;  %v783_v19 = vpop.f32.mrf.mxu1 }
 0x10c   : > { %848 = vst [vmem:[%s1382_s29 + $0xa8] sm:$0xff] %v655_v18  ;;  %880 = vst [vmem:[%s1382_s29 + $0x1a8] sm:$0xff] %v783_v19 }
 0x10d   : > { %v1131_v20 = vpop.f32.mrf.mxu0  ;;  %v1163_v21 = vpop.f32.mrf.mxu1 }
 0x10e   : > { %853 = vst [vmem:[%s1382_s29 + $0xd0] sm:$0xff] %v1131_v20  ;;  %885 = vst [vmem:[%s1382_s29 + $0x1d0] sm:$0xff] %v1163_v21 }
 0x10f   : > { %v668_v22 = vpop.f32.mrf.mxu0  ;;  %v796_v23 = vpop.f32.mrf.mxu1 }
 0x110   : > { %851 = vst [vmem:[%s1382_s29 + $0xc0] sm:$0xff] %v668_v22  ;;  %883 = vst [vmem:[%s1382_s29 + $0x1c0] sm:$0xff] %v796_v23 }
 0x111   : > { %v1132_v24 = vpop.f32.mrf.mxu0  ;;  %v1164_v25 = vpop.f32.mrf.mxu1 }
 0x112   : > { %854 = vst [vmem:[%s1382_s29 + $0xd8] sm:$0xff] %v1132_v24  ;;  %886 = vst [vmem:[%s1382_s29 + $0x1d8] sm:$0xff] %v1164_v25 }
 0x113   : > { %v671_v26 = vpop.f32.mrf.mxu0  ;;  %v799_v27 = vpop.f32.mrf.mxu1 }
 0x114   : > { %852 = vst [vmem:[%s1382_s29 + $0xc8] sm:$0xff] %v671_v26  ;;  %884 = vst [vmem:[%s1382_s29 + $0x1c8] sm:$0xff] %v799_v27 }
 0x115   : > { %v1135_v28 = vpop.f32.mrf.mxu0  ;;  %v1167_v29 = vpop.f32.mrf.mxu1 }
 0x116   : > { %857 = vst [vmem:[%s1382_s29 + $0xf0] sm:$0xff] %v1135_v28  ;;  %889 = vst [vmem:[%s1382_s29 + $0x1f0] sm:$0xff] %v1167_v29 }
 0x117   : > { %v684_v30 = vpop.f32.mrf.mxu0  ;;  %v812_v31 = vpop.f32.mrf.mxu1 }
 0x118   : > { %855 = vst [vmem:[%s1382_s29 + $0xe0] sm:$0xff] %v684_v30  ;;  %887 = vst [vmem:[%s1382_s29 + $0x1e0] sm:$0xff] %v812_v31 }
 0x119   : > { %v1136_v32 = vpop.f32.mrf.mxu0  ;;  %v1168_v33 = vpop.f32.mrf.mxu1 }
 0x11a   : > { %858 = vst [vmem:[%s1382_s29 + $0xf8] sm:$0xff] %v1136_v32  ;;  %890 = vst [vmem:[%s1382_s29 + $0x1f8] sm:$0xff] %v1168_v33 }
 0x11b   : > { %v687_v34 = vpop.f32.mrf.mxu0  ;;  %v815_v35 = vpop.f32.mrf.mxu1 }
 0x11c   : > { %856 = vst [vmem:[%s1382_s29 + $0xe8] sm:$0xff] %v687_v34  ;;  %888 = vst [vmem:[%s1382_s29 + $0x1e8] sm:$0xff] %v815_v35 }
 0x11d PF: > { %s12_s11 = sadd.s32 1, %s1259_s11   ;;  %s1460_s9 = smov %s1255_s10 }
 0x11e   : > { %p9_p5 = scmp.ge.s32.totalorder %s12_s11, 6   ;;  %s1461_s10 = smov %s1463_s12 }
 0x120   :  { %11 = sbr.rel (!%p9_p5) target bundleno = 2 (0x2), region = 61 }

// kernel: generator_forward.25
= control target key start
LH: loop header
LB: loop body
LE: loop exit
PB: predicated region body
PF: predicated region fallthrough
CT: control target
= control target key end

     0   :  { %s1135_s18 = smov 0   ;;  %s1562_s0 = inlined_call_operand.vmem [shape: f32[2048,64], index: 0, kind: input, shape index: {}]   ;;  %s1563_s1 = inlined_call_operand.vmem [shape: f32[1,64], index: 1, kind: input, shape index: {}]   ;;  %s1564_s2 = inlined_call_operand.vmem [shape: f32[1,64], index: 2, kind: input, shape index: {}]   ;;  %s1565_s3 = inlined_call_operand.vmem [shape: f32[1,64], index: 3, kind: input, shape index: {}]   ;;  %s1566_s4 = inlined_call_operand.vmem [shape: f32[1,64], index: 4, kind: input, shape index: {}]   ;;  %s1567_s5 = inlined_call_operand.vmem [shape: bf16[2048,64], index: 5, kind: output, shape index: {}]  }
   0x1 LB: > { %s948_s19 = sadd.s32 4294967295, %s1103_s18   ;;  %p952_p0 = scmp.ge.s32.totalorder %s1103_s18, 1  ;;  %s1103_s18 = sphi %s1135_s18, %s15_s18  }
   0x2   : > { %p188_p1 = scmp.lt.s32.totalorder %s1103_s18, 5 }
   0x4   : > { %p189_p2 = pnand %p952_p0, %p188_p1 }
   0x5   : > { %s953_s20 = sshll.u32 (!%p189_p2), %s948_s19, 6 }
   0x6   : > { %192 = sbr.rel (%p189_p2) target bundleno = 106 (0x6a), region = 40  ;;  %p217_p3 = scmp.lt.s32.totalorder (!%p189_p2), %s953_s20, 255 }
   0xb   : > { %v292_v0 = vld [vmem:[%s1564_s2] sm:$0x1]  ;;  %v367_v2 = vlaneseq  ;;  %s1569_s20 = smov (!%p217_p3, %s953_s20), 255  ;;  %vm827_vm0 = vcmask 519168  }
   0xc   : > { %v293_v1 = vld [vmem:[%s1565_s3] sm:$0x1]  ;;  %s954_s25 = sshll.u32 %s1569_s20, 3  ;;  %s956_s8 = sshll.u32 %s1569_s20, 2 }
   0xd   : > { %v294_v3 = vmul.f32 %v293_v1, %v292_v0  ;;  %v368_v4 = vshrl.u32 %v367_v2, 7  ;;  %v1155_v6 = vld [vmem:[%s1563_s1] ss:$0 sm:$0xff]  ;;  %s1160_s30 = scalar_lea.vmem %s1562_s0, %s954_s25  ;;  %s1204_s11 = scalar_lea.vmem %s1567_s5, %s956_s8 }
   0xe   : > { %v228_v8 = vld [vmem:[%s1160_s30] sm:$0xff]  ;;  %v229_v9 = vld [vmem:[%s1160_s30 + $0x8] sm:$0xff]  ;;  %v230_v10 = vld [vmem:[%s1160_s30 + $0x10] sm:$0xff] }
   0xf   : > { %v369_v5 = vsub.s32 0, %v368_v4  ;;  %v302_v11 = vsub.f32 %v228_v8, %v1155_v6  ;;  %v303_v12 = vsub.f32 %v229_v9, %v1155_v6  ;;  %v304_v13 = vsub.f32 %v230_v10, %v1155_v6  ;;  %v231_v14 = vld [vmem:[%s1160_s30 + $0x18] sm:$0xff]  ;;  %v232_v15 = vld [vmem:[%s1160_s30 + $0x20] sm:$0xff]  ;;  %v233_v16 = vld [vmem:[%s1160_s30 + $0x28] sm:$0xff] }
  0x10   : > { %v1176_v17 = vld [vmem:[%s1566_s4] ss:$0 sm:$0xff]  ;;  %v305_v18 = vsub.f32 %v231_v14, %v1155_v6  ;;  %v306_v19 = vsub.f32 %v232_v15, %v1155_v6  ;;  %v307_v20 = vsub.f32 %v233_v16, %v1155_v6  ;;  %v234_v21 = vld [vmem:[%s1160_s30 + $0x30] sm:$0xff]  ;;  %v235_v22 = vld [vmem:[%s1160_s30 + $0x38] sm:$0xff] }
  0x11   : > { %v1162_v7 = vrot.slane %v294_v3, %v369_v5  ;;  %v308_v26 = vsub.f32 %v234_v21, %v1155_v6  ;;  %v309_v30 = vsub.f32 %v235_v22, %v1155_v6  ;;  %v236_v47 = vld [vmem:[%s1160_s30 + $0x40] sm:$0xff]  ;;  %v237_v48 = vld [vmem:[%s1160_s30 + $0x48] sm:$0xff]  ;;  %v238_v49 = vld [vmem:[%s1160_s30 + $0x50] sm:$0xff] }
  0x12   : > { %v239_v54 = vld [vmem:[%s1160_s30 + $0x58] sm:$0xff]  ;;  %v240_v55 = vld [vmem:[%s1160_s30 + $0x60] sm:$0xff]  ;;  %v241_v56 = vld [vmem:[%s1160_s30 + $0x68] sm:$0xff]  ;;  %v310_v63 = vsub.f32 %v236_v47, %v1155_v6  ;;  %v311_v0 = vsub.f32 %v237_v48, %v1155_v6  ;;  %v312_v1 = vsub.f32 %v238_v49, %v1155_v6 }
  0x13   : > { %v372_v23 = vmul.f32 %v1162_v7, %v302_v11  ;;  %v373_v24 = vmul.f32 %v1162_v7, %v303_v12  ;;  %v374_v25 = vmul.f32 %v1162_v7, %v304_v13  ;;  %v375_v27 = vmul.f32 %v1162_v7, %v305_v18  ;;  %v242_v61 = vld [vmem:[%s1160_s30 + $0x70] sm:$0xff]  ;;  %v243_v2 = vld [vmem:[%s1160_s30 + $0x78] sm:$0xff] }
  0x14   : > { %v376_v28 = vmul.f32 %v1162_v7, %v306_v19  ;;  %v377_v29 = vmul.f32 %v1162_v7, %v307_v20  ;;  %v378_v34 = vmul.f32 %v1162_v7, %v308_v26  ;;  %v379_v38 = vmul.f32 %v1162_v7, %v309_v30  ;;  %v250_v48 = vld [vmem:[%s1160_s30 + $0xb0] sm:$0xff] }
  0x15   : > { %v443_v31 = vadd.f32 %v1176_v17, %v372_v23  ;;  %v444_v32 = vadd.f32 %v1176_v17, %v373_v24  ;;  %v445_v33 = vadd.f32 %v1176_v17, %v374_v25  ;;  %v446_v35 = vadd.f32 %v1176_v17, %v375_v27 }
  0x16   : > { %v447_v36 = vadd.f32 %v1176_v17, %v376_v28  ;;  %v448_v37 = vadd.f32 %v1176_v17, %v377_v29  ;;  %v449_v42 = vadd.f32 %v1176_v17, %v378_v34  ;;  %v450_v46 = vadd.f32 %v1176_v17, %v379_v38  ;;  %v244_v34 = vld [vmem:[%s1160_s30 + $0x80] sm:$0xff] }
  0x17   : > { %v507_v39 = vmax.f32 %v443_v31, 0.0  ;;  %v508_v40 = vmax.f32 %v444_v32, 0.0  ;;  %v509_v41 = vmax.f32 %v445_v33, 0.0  ;;  %v510_v43 = vmax.f32 %v446_v35, 0.0  ;;  %v245_v35 = vld [vmem:[%s1160_s30 + $0x88] sm:$0xff] }
  0x18   : > { %v511_v44 = vmax.f32 %v447_v36, 0.0  ;;  %v512_v45 = vmax.f32 %v448_v37, 0.0  ;;  %v513_v53 = vmax.f32 %v449_v42, 0.0  ;;  %v514_v60 = vmax.f32 %v450_v46, 0.0  ;;  %v246_v36 = vld [vmem:[%s1160_s30 + $0x90] sm:$0xff]  ;;  %v248_v42 = vld [vmem:[%s1160_s30 + $0xa0] sm:$0xff] }
  0x19   : > { %v1025_v50 = vpack.c.bf16 %v507_v39, %v507_v39  ;;  %v1026_v51 = vpack.c.bf16 %v508_v40, %v508_v40  ;;  %v1027_v52 = vpack.c.bf16 %v509_v41, %v509_v41  ;;  %v1028_v57 = vpack.c.bf16 %v510_v43, %v510_v43  ;;  %v247_v41 = vld [vmem:[%s1160_s30 + $0x98] sm:$0xff]  ;;  %v249_v43 = vld [vmem:[%s1160_s30 + $0xa8] sm:$0xff] }
  0x1a   : > { %v1029_v58 = vpack.c.bf16 %v511_v44, %v511_v44  ;;  %v1030_v59 = vpack.c.bf16 %v512_v45, %v512_v45  ;;  %v1031_v62 = vpack.c.bf16 %v513_v53, %v513_v53  ;;  %v1032_v3 = vpack.c.bf16 %v514_v60, %v514_v60  ;;  %v251_v53 = vld [vmem:[%s1160_s30 + $0xb8] sm:$0xff] }
  0x1b   : > { %828 = vst.msk [vmem:[%s1204_s11] sm:$0xf] %vm827_vm0, %v1025_v50  ;;  %829 = vst.msk [vmem:[%s1204_s11 + $0x4] sm:$0xf] %vm827_vm0, %v1026_v51  ;;  %v313_v4 = vsub.f32 %v239_v54, %v1155_v6  ;;  %v314_v5 = vsub.f32 %v240_v55, %v1155_v6  ;;  %v315_v8 = vsub.f32 %v241_v56, %v1155_v6 }
  0x1c   : > { %830 = vst.msk [vmem:[%s1204_s11 + $0x8] sm:$0xf] %vm827_vm0, %v1027_v52  ;;  %831 = vst.msk [vmem:[%s1204_s11 + $0xc] sm:$0xf] %vm827_vm0, %v1028_v57  ;;  %v380_v9 = vmul.f32 %v1162_v7, %v310_v63  ;;  %v381_v10 = vmul.f32 %v1162_v7, %v311_v0  ;;  %v382_v11 = vmul.f32 %v1162_v7, %v312_v1 }
  0x1d   : > { %832 = vst.msk [vmem:[%s1204_s11 + $0x10] sm:$0xf] %vm827_vm0, %v1029_v58  ;;  %833 = vst.msk [vmem:[%s1204_s11 + $0x14] sm:$0xf] %vm827_vm0, %v1030_v59  ;;  %v316_v12 = vsub.f32 %v242_v61, %v1155_v6  ;;  %v383_v13 = vmul.f32 %v1162_v7, %v313_v4  ;;  %v384_v14 = vmul.f32 %v1162_v7, %v314_v5 }
  0x1e   : > { %834 = vst.msk [vmem:[%s1204_s11 + $0x18] sm:$0xf] %vm827_vm0, %v1031_v62  ;;  %835 = vst.msk [vmem:[%s1204_s11 + $0x1c] sm:$0xf] %vm827_vm0, %v1032_v3  ;;  %v385_v15 = vmul.f32 %v1162_v7, %v315_v8  ;;  %v317_v16 = vsub.f32 %v243_v2, %v1155_v6  ;;  %v451_v18 = vadd.f32 %v1176_v17, %v380_v9 }
  0x1f   : > { %v452_v19 = vadd.f32 %v1176_v17, %v381_v10  ;;  %v453_v20 = vadd.f32 %v1176_v17, %v382_v11  ;;  %v386_v21 = vmul.f32 %v1162_v7, %v316_v12  ;;  %v454_v22 = vadd.f32 %v1176_v17, %v383_v13 }
  0x20   : > { %v455_v23 = vadd.f32 %v1176_v17, %v384_v14  ;;  %v456_v24 = vadd.f32 %v1176_v17, %v385_v15  ;;  %v387_v25 = vmul.f32 %v1162_v7, %v317_v16  ;;  %v515_v26 = vmax.f32 %v451_v18, 0.0 }
  0x21   : > { %v516_v27 = vmax.f32 %v452_v19, 0.0  ;;  %v517_v28 = vmax.f32 %v453_v20, 0.0  ;;  %v457_v29 = vadd.f32 %v1176_v17, %v386_v21  ;;  %v518_v30 = vmax.f32 %v454_v22, 0.0  ;;  %v252_v21 = vld [vmem:[%s1160_s30 + $0xc0] sm:$0xff]  ;;  %v253_v22 = vld [vmem:[%s1160_s30 + $0xc8] sm:$0xff] }
  0x22   : > { %v519_v31 = vmax.f32 %v455_v23, 0.0  ;;  %v520_v32 = vmax.f32 %v456_v24, 0.0  ;;  %v458_v33 = vadd.f32 %v1176_v17, %v387_v25  ;;  %v1033_v37 = vpack.c.bf16 %v515_v26, %v515_v26  ;;  %v254_v23 = vld [vmem:[%s1160_s30 + $0xd0] sm:$0xff] }
  0x23   : > { %v1034_v38 = vpack.c.bf16 %v516_v27, %v516_v27  ;;  %v1035_v39 = vpack.c.bf16 %v517_v28, %v517_v28  ;;  %v521_v40 = vmax.f32 %v457_v29, 0.0  ;;  %v1036_v44 = vpack.c.bf16 %v518_v30, %v518_v30  ;;  %v255_v28 = vld [vmem:[%s1160_s30 + $0xd8] sm:$0xff]  ;;  %v256_v29 = vld [vmem:[%s1160_s30 + $0xe0] sm:$0xff]  ;;  %v257_v30 = vld [vmem:[%s1160_s30 + $0xe8] sm:$0xff] }
  0x24   : > { %v1037_v45 = vpack.c.bf16 %v519_v31, %v519_v31  ;;  %v1038_v46 = vpack.c.bf16 %v520_v32, %v520_v32  ;;  %v522_v47 = vmax.f32 %v458_v33, 0.0  ;;  %836 = vst.msk [vmem:[%s1204_s11 + $0x20] sm:$0xf] %vm827_vm0, %v1033_v37  ;;  %v318_v50 = vsub.f32 %v244_v34, %v1155_v6 }
  0x25   : > { %837 = vst.msk [vmem:[%s1204_s11 + $0x24] sm:$0xf] %vm827_vm0, %v1034_v38  ;;  %838 = vst.msk [vmem:[%s1204_s11 + $0x28] sm:$0xf] %vm827_vm0, %v1035_v39  ;;  %v1039_v49 = vpack.c.bf16 %v521_v40, %v521_v40  ;;  %v319_v51 = vsub.f32 %v245_v35, %v1155_v6  ;;  %v320_v52 = vsub.f32 %v246_v36, %v1155_v6  ;;  %v258_v35 = vld [vmem:[%s1160_s30 + $0xf0] sm:$0xff]  ;;  %v259_v40 = vld [vmem:[%s1160_s30 + $0xf8] sm:$0xff] }
  0x26   : > { %839 = vst.msk [vmem:[%s1204_s11 + $0x2c] sm:$0xf] %vm827_vm0, %v1036_v44  ;;  %840 = vst.msk [vmem:[%s1204_s11 + $0x30] sm:$0xf] %vm827_vm0, %v1037_v45  ;;  %v1040_v54 = vpack.c.bf16 %v522_v47, %v522_v47  ;;  %v321_v55 = vsub.f32 %v247_v41, %v1155_v6  ;;  %v322_v56 = vsub.f32 %v248_v42, %v1155_v6 }
  0x27   : > { %841 = vst.msk [vmem:[%s1204_s11 + $0x34] sm:$0xf] %vm827_vm0, %v1038_v46  ;;  %v323_v57 = vsub.f32 %v249_v43, %v1155_v6  ;;  %842 = vst.msk [vmem:[%s1204_s11 + $0x38] sm:$0xf] %vm827_vm0, %v1039_v49  ;;  %v388_v58 = vmul.f32 %v1162_v7, %v318_v50  ;;  %v389_v59 = vmul.f32 %v1162_v7, %v319_v51 }
  0x28   : > { %v390_v60 = vmul.f32 %v1162_v7, %v320_v52  ;;  %v324_v61 = vsub.f32 %v250_v48, %v1155_v6  ;;  %843 = vst.msk [vmem:[%s1204_s11 + $0x3c] sm:$0xf] %vm827_vm0, %v1040_v54  ;;  %v391_v62 = vmul.f32 %v1162_v7, %v321_v55  ;;  %v392_v63 = vmul.f32 %v1162_v7, %v322_v56 }
  0x29   : > { %v393_v0 = vmul.f32 %v1162_v7, %v323_v57  ;;  %v325_v1 = vsub.f32 %v251_v53, %v1155_v6  ;;  %v459_v2 = vadd.f32 %v1176_v17, %v388_v58  ;;  %v460_v3 = vadd.f32 %v1176_v17, %v389_v59 }
  0x2a   : > { %v461_v4 = vadd.f32 %v1176_v17, %v390_v60  ;;  %v394_v5 = vmul.f32 %v1162_v7, %v324_v61  ;;  %v462_v8 = vadd.f32 %v1176_v17, %v391_v62  ;;  %v463_v9 = vadd.f32 %v1176_v17, %v392_v63 }
  0x2b   : > { %v464_v10 = vadd.f32 %v1176_v17, %v393_v0  ;;  %v395_v11 = vmul.f32 %v1162_v7, %v325_v1  ;;  %v523_v12 = vmax.f32 %v459_v2, 0.0  ;;  %v524_v13 = vmax.f32 %v460_v3, 0.0 }
  0x2c   : > { %v525_v14 = vmax.f32 %v461_v4, 0.0  ;;  %v465_v15 = vadd.f32 %v1176_v17, %v394_v5  ;;  %v526_v16 = vmax.f32 %v462_v8, 0.0  ;;  %v527_v18 = vmax.f32 %v463_v9, 0.0  ;;  %v260_v5 = vld [vmem:[%s1160_s30 + $0x100] sm:$0xff]  ;;  %v261_v8 = vld [vmem:[%s1160_s30 + $0x108] sm:$0xff]  ;;  %v262_v9 = vld [vmem:[%s1160_s30 + $0x110] sm:$0xff] }
  0x2d   : > { %v528_v19 = vmax.f32 %v464_v10, 0.0  ;;  %v466_v20 = vadd.f32 %v1176_v17, %v395_v11  ;;  %v1041_v24 = vpack.c.bf16 %v523_v12, %v523_v12  ;;  %v1042_v25 = vpack.c.bf16 %v524_v13, %v524_v13 }
  0x2e   : > { %v1043_v26 = vpack.c.bf16 %v525_v14, %v525_v14  ;;  %v529_v27 = vmax.f32 %v465_v15, 0.0  ;;  %v1044_v31 = vpack.c.bf16 %v526_v16, %v526_v16  ;;  %v1045_v32 = vpack.c.bf16 %v527_v18, %v527_v18  ;;  %v263_v14 = vld [vmem:[%s1160_s30 + $0x118] sm:$0xff]  ;;  %v264_v15 = vld [vmem:[%s1160_s30 + $0x120] sm:$0xff]  ;;  %v265_v16 = vld [vmem:[%s1160_s30 + $0x128] sm:$0xff] }
  0x2f   : > { %v1046_v33 = vpack.c.bf16 %v528_v19, %v528_v19  ;;  %v530_v34 = vmax.f32 %v466_v20, 0.0  ;;  %844 = vst.msk [vmem:[%s1204_s11 + $0x40] sm:$0xf] %vm827_vm0, %v1041_v24  ;;  %845 = vst.msk [vmem:[%s1204_s11 + $0x44] sm:$0xf] %vm827_vm0, %v1042_v25  ;;  %v326_v37 = vsub.f32 %v252_v21, %v1155_v6  ;;  %v327_v38 = vsub.f32 %v253_v22, %v1155_v6  ;;  %v266_v22 = vld [vmem:[%s1160_s30 + $0x130] sm:$0xff] }
  0x30   : > { %846 = vst.msk [vmem:[%s1204_s11 + $0x48] sm:$0xf] %vm827_vm0, %v1043_v26  ;;  %v1047_v36 = vpack.c.bf16 %v529_v27, %v529_v27  ;;  %v328_v39 = vsub.f32 %v254_v23, %v1155_v6  ;;  %847 = vst.msk [vmem:[%s1204_s11 + $0x4c] sm:$0xf] %vm827_vm0, %v1044_v31  ;;  %v329_v42 = vsub.f32 %v255_v28, %v1155_v6  ;;  %v267_v27 = vld [vmem:[%s1160_s30 + $0x138] sm:$0xff] }
  0x31   : > { %848 = vst.msk [vmem:[%s1204_s11 + $0x50] sm:$0xf] %vm827_vm0, %v1045_v32  ;;  %849 = vst.msk [vmem:[%s1204_s11 + $0x54] sm:$0xf] %vm827_vm0, %v1046_v33  ;;  %v1048_v41 = vpack.c.bf16 %v530_v34, %v530_v34  ;;  %v330_v43 = vsub.f32 %v256_v29, %v1155_v6  ;;  %v331_v44 = vsub.f32 %v257_v30, %v1155_v6 }
  0x32   : > { %850 = vst.msk [vmem:[%s1204_s11 + $0x58] sm:$0xf] %vm827_vm0, %v1047_v36  ;;  %v396_v45 = vmul.f32 %v1162_v7, %v326_v37  ;;  %v397_v46 = vmul.f32 %v1162_v7, %v327_v38  ;;  %v398_v47 = vmul.f32 %v1162_v7, %v328_v39  ;;  %v332_v48 = vsub.f32 %v258_v35, %v1155_v6 }
  0x33   : > { %851 = vst.msk [vmem:[%s1204_s11 + $0x5c] sm:$0xf] %vm827_vm0, %v1048_v41  ;;  %v399_v49 = vmul.f32 %v1162_v7, %v329_v42  ;;  %v400_v50 = vmul.f32 %v1162_v7, %v330_v43  ;;  %v401_v51 = vmul.f32 %v1162_v7, %v331_v44  ;;  %v333_v52 = vsub.f32 %v259_v40, %v1155_v6 }
  0x34   : > { %v467_v53 = vadd.f32 %v1176_v17, %v396_v45  ;;  %v468_v54 = vadd.f32 %v1176_v17, %v397_v46  ;;  %v469_v55 = vadd.f32 %v1176_v17, %v398_v47  ;;  %v402_v56 = vmul.f32 %v1162_v7, %v332_v48 }
  0x35   : > { %v470_v57 = vadd.f32 %v1176_v17, %v399_v49  ;;  %v471_v58 = vadd.f32 %v1176_v17, %v400_v50  ;;  %v472_v59 = vadd.f32 %v1176_v17, %v401_v51  ;;  %v403_v60 = vmul.f32 %v1162_v7, %v333_v52 }
  0x36   : > { %v531_v61 = vmax.f32 %v467_v53, 0.0  ;;  %v532_v62 = vmax.f32 %v468_v54, 0.0  ;;  %v533_v63 = vmax.f32 %v469_v55, 0.0  ;;  %v473_v0 = vadd.f32 %v1176_v17, %v402_v56  ;;  %v268_v56 = vld [vmem:[%s1160_s30 + $0x140] sm:$0xff] }
  0x37   : > { %v534_v1 = vmax.f32 %v470_v57, 0.0  ;;  %v535_v2 = vmax.f32 %v471_v58, 0.0  ;;  %v536_v3 = vmax.f32 %v472_v59, 0.0  ;;  %v474_v4 = vadd.f32 %v1176_v17, %v403_v60  ;;  %v269_v57 = vld [vmem:[%s1160_s30 + $0x148] sm:$0xff]  ;;  %v270_v58 = vld [vmem:[%s1160_s30 + $0x150] sm:$0xff] }
  0x38   : > { %v1049_v10 = vpack.c.bf16 %v531_v61, %v531_v61  ;;  %v1050_v11 = vpack.c.bf16 %v532_v62, %v532_v62  ;;  %v1051_v12 = vpack.c.bf16 %v533_v63, %v533_v63  ;;  %v537_v13 = vmax.f32 %v473_v0, 0.0  ;;  %v271_v63 = vld [vmem:[%s1160_s30 + $0x158] sm:$0xff]  ;;  %v272_v0 = vld [vmem:[%s1160_s30 + $0x160] sm:$0xff] }
  0x39   : > { %v1052_v18 = vpack.c.bf16 %v534_v1, %v534_v1  ;;  %v1053_v19 = vpack.c.bf16 %v535_v2, %v535_v2  ;;  %v1054_v20 = vpack.c.bf16 %v536_v3, %v536_v3  ;;  %v538_v21 = vmax.f32 %v474_v4, 0.0  ;;  %v273_v1 = vld [vmem:[%s1160_s30 + $0x168] sm:$0xff] }
  0x3a   : > { %852 = vst.msk [vmem:[%s1204_s11 + $0x60] sm:$0xf] %vm827_vm0, %v1049_v10  ;;  %853 = vst.msk [vmem:[%s1204_s11 + $0x64] sm:$0xf] %vm827_vm0, %v1050_v11  ;;  %v1055_v23 = vpack.c.bf16 %v537_v13, %v537_v13  ;;  %v334_v24 = vsub.f32 %v260_v5, %v1155_v6  ;;  %v335_v25 = vsub.f32 %v261_v8, %v1155_v6  ;;  %v274_v8 = vld [vmem:[%s1160_s30 + $0x170] sm:$0xff]  ;;  %v275_v13 = vld [vmem:[%s1160_s30 + $0x178] sm:$0xff] }
  0x3b   : > { %854 = vst.msk [vmem:[%s1204_s11 + $0x68] sm:$0xf] %vm827_vm0, %v1051_v12  ;;  %v336_v26 = vsub.f32 %v262_v9, %v1155_v6  ;;  %855 = vst.msk [vmem:[%s1204_s11 + $0x6c] sm:$0xf] %vm827_vm0, %v1052_v18  ;;  %v1056_v28 = vpack.c.bf16 %v538_v21, %v538_v21  ;;  %v337_v29 = vsub.f32 %v263_v14, %v1155_v6 }
  0x3c   : > { %856 = vst.msk [vmem:[%s1204_s11 + $0x70] sm:$0xf] %vm827_vm0, %v1053_v19  ;;  %857 = vst.msk [vmem:[%s1204_s11 + $0x74] sm:$0xf] %vm827_vm0, %v1054_v20  ;;  %v338_v30 = vsub.f32 %v264_v15, %v1155_v6  ;;  %v339_v31 = vsub.f32 %v265_v16, %v1155_v6  ;;  %v404_v32 = vmul.f32 %v1162_v7, %v334_v24 }
  0x3d   : > { %858 = vst.msk [vmem:[%s1204_s11 + $0x78] sm:$0xf] %vm827_vm0, %v1055_v23  ;;  %v405_v33 = vmul.f32 %v1162_v7, %v335_v25  ;;  %v406_v34 = vmul.f32 %v1162_v7, %v336_v26  ;;  %v340_v35 = vsub.f32 %v266_v22, %v1155_v6  ;;  %859 = vst.msk [vmem:[%s1204_s11 + $0x7c] sm:$0xf] %vm827_vm0, %v1056_v28 }
  0x3e   : > { %v407_v36 = vmul.f32 %v1162_v7, %v337_v29  ;;  %v408_v37 = vmul.f32 %v1162_v7, %v338_v30  ;;  %v409_v38 = vmul.f32 %v1162_v7, %v339_v31  ;;  %v341_v39 = vsub.f32 %v267_v27, %v1155_v6 }
  0x3f   : > { %v475_v40 = vadd.f32 %v1176_v17, %v404_v32  ;;  %v476_v41 = vadd.f32 %v1176_v17, %v405_v33  ;;  %v477_v42 = vadd.f32 %v1176_v17, %v406_v34  ;;  %v410_v43 = vmul.f32 %v1162_v7, %v340_v35 }
  0x40   : > { %v478_v44 = vadd.f32 %v1176_v17, %v407_v36  ;;  %v479_v45 = vadd.f32 %v1176_v17, %v408_v37  ;;  %v480_v46 = vadd.f32 %v1176_v17, %v409_v38  ;;  %v411_v47 = vmul.f32 %v1162_v7, %v341_v39 }
  0x41   : > { %v539_v48 = vmax.f32 %v475_v40, 0.0  ;;  %v540_v49 = vmax.f32 %v476_v41, 0.0  ;;  %v541_v50 = vmax.f32 %v477_v42, 0.0  ;;  %v481_v51 = vadd.f32 %v1176_v17, %v410_v43  ;;  %v276_v43 = vld [vmem:[%s1160_s30 + $0x180] sm:$0xff] }
  0x42   : > { %v542_v52 = vmax.f32 %v478_v44, 0.0  ;;  %v543_v53 = vmax.f32 %v479_v45, 0.0  ;;  %v544_v54 = vmax.f32 %v480_v46, 0.0  ;;  %v482_v55 = vadd.f32 %v1176_v17, %v411_v47  ;;  %v277_v44 = vld [vmem:[%s1160_s30 + $0x188] sm:$0xff]  ;;  %v278_v45 = vld [vmem:[%s1160_s30 + $0x190] sm:$0xff] }
  0x43   : > { %v1057_v59 = vpack.c.bf16 %v539_v48, %v539_v48  ;;  %v1058_v60 = vpack.c.bf16 %v540_v49, %v540_v49  ;;  %v1059_v61 = vpack.c.bf16 %v541_v50, %v541_v50  ;;  %v545_v62 = vmax.f32 %v481_v51, 0.0  ;;  %v279_v50 = vld [vmem:[%s1160_s30 + $0x198] sm:$0xff]  ;;  %v280_v51 = vld [vmem:[%s1160_s30 + $0x1a0] sm:$0xff] }
  0x44   : > { %v1060_v2 = vpack.c.bf16 %v542_v52, %v542_v52  ;;  %v1061_v3 = vpack.c.bf16 %v543_v53, %v543_v53  ;;  %v1062_v4 = vpack.c.bf16 %v544_v54, %v544_v54  ;;  %v546_v5 = vmax.f32 %v482_v55, 0.0  ;;  %v281_v52 = vld [vmem:[%s1160_s30 + $0x1a8] sm:$0xff] }
  0x45   : > { %860 = vst.msk [vmem:[%s1204_s11 + $0x80] sm:$0xf] %vm827_vm0, %v1057_v59  ;;  %861 = vst.msk [vmem:[%s1204_s11 + $0x84] sm:$0xf] %vm827_vm0, %v1058_v60  ;;  %v1063_v9 = vpack.c.bf16 %v545_v62, %v545_v62  ;;  %v342_v10 = vsub.f32 %v268_v56, %v1155_v6  ;;  %v343_v11 = vsub.f32 %v269_v57, %v1155_v6  ;;  %v282_v57 = vld [vmem:[%s1160_s30 + $0x1b0] sm:$0xff]  ;;  %v283_v62 = vld [vmem:[%s1160_s30 + $0x1b8] sm:$0xff] }
  0x46   : > { %862 = vst.msk [vmem:[%s1204_s11 + $0x88] sm:$0xf] %vm827_vm0, %v1059_v61  ;;  %v344_v12 = vsub.f32 %v270_v58, %v1155_v6  ;;  %863 = vst.msk [vmem:[%s1204_s11 + $0x8c] sm:$0xf] %vm827_vm0, %v1060_v2  ;;  %v1064_v14 = vpack.c.bf16 %v546_v5, %v546_v5  ;;  %v345_v15 = vsub.f32 %v271_v63, %v1155_v6 }
  0x47   : > { %864 = vst.msk [vmem:[%s1204_s11 + $0x90] sm:$0xf] %vm827_vm0, %v1061_v3  ;;  %865 = vst.msk [vmem:[%s1204_s11 + $0x94] sm:$0xf] %vm827_vm0, %v1062_v4  ;;  %v346_v16 = vsub.f32 %v272_v0, %v1155_v6  ;;  %v347_v18 = vsub.f32 %v273_v1, %v1155_v6  ;;  %v412_v19 = vmul.f32 %v1162_v7, %v342_v10 }
  0x48   : > { %866 = vst.msk [vmem:[%s1204_s11 + $0x98] sm:$0xf] %vm827_vm0, %v1063_v9  ;;  %v413_v20 = vmul.f32 %v1162_v7, %v343_v11  ;;  %v414_v21 = vmul.f32 %v1162_v7, %v344_v12  ;;  %v348_v22 = vsub.f32 %v274_v8, %v1155_v6  ;;  %867 = vst.msk [vmem:[%s1204_s11 + $0x9c] sm:$0xf] %vm827_vm0, %v1064_v14 }
  0x49   : > { %v415_v23 = vmul.f32 %v1162_v7, %v345_v15  ;;  %v416_v24 = vmul.f32 %v1162_v7, %v346_v16  ;;  %v417_v25 = vmul.f32 %v1162_v7, %v347_v18  ;;  %v349_v26 = vsub.f32 %v275_v13, %v1155_v6 }
  0x4a   : > { %v483_v27 = vadd.f32 %v1176_v17, %v412_v19  ;;  %v484_v28 = vadd.f32 %v1176_v17, %v413_v20  ;;  %v485_v29 = vadd.f32 %v1176_v17, %v414_v21  ;;  %v418_v30 = vmul.f32 %v1162_v7, %v348_v22 }
  0x4b   : > { %v486_v31 = vadd.f32 %v1176_v17, %v415_v23  ;;  %v487_v32 = vadd.f32 %v1176_v17, %v416_v24  ;;  %v488_v33 = vadd.f32 %v1176_v17, %v417_v25  ;;  %v419_v34 = vmul.f32 %v1162_v7, %v349_v26 }
  0x4c   : > { %v547_v35 = vmax.f32 %v483_v27, 0.0  ;;  %v548_v36 = vmax.f32 %v484_v28, 0.0  ;;  %v549_v37 = vmax.f32 %v485_v29, 0.0  ;;  %v489_v38 = vadd.f32 %v1176_v17, %v418_v30  ;;  %v284_v30 = vld [vmem:[%s1160_s30 + $0x1c0] sm:$0xff] }
  0x4d   : > { %v550_v39 = vmax.f32 %v486_v31, 0.0  ;;  %v551_v40 = vmax.f32 %v487_v32, 0.0  ;;  %v552_v41 = vmax.f32 %v488_v33, 0.0  ;;  %v490_v42 = vadd.f32 %v1176_v17, %v419_v34  ;;  %v285_v31 = vld [vmem:[%s1160_s30 + $0x1c8] sm:$0xff]  ;;  %v286_v32 = vld [vmem:[%s1160_s30 + $0x1d0] sm:$0xff] }
  0x4e   : > { %v1065_v46 = vpack.c.bf16 %v547_v35, %v547_v35  ;;  %v1066_v47 = vpack.c.bf16 %v548_v36, %v548_v36  ;;  %v1067_v48 = vpack.c.bf16 %v549_v37, %v549_v37  ;;  %v553_v49 = vmax.f32 %v489_v38, 0.0  ;;  %v287_v37 = vld [vmem:[%s1160_s30 + $0x1d8] sm:$0xff]  ;;  %v288_v38 = vld [vmem:[%s1160_s30 + $0x1e0] sm:$0xff] }
  0x4f   : > { %v1068_v53 = vpack.c.bf16 %v550_v39, %v550_v39  ;;  %v1069_v54 = vpack.c.bf16 %v551_v40, %v551_v40  ;;  %v1070_v55 = vpack.c.bf16 %v552_v41, %v552_v41  ;;  %v554_v56 = vmax.f32 %v490_v42, 0.0  ;;  %v289_v39 = vld [vmem:[%s1160_s30 + $0x1e8] sm:$0xff] }
  0x50   : > { %868 = vst.msk [vmem:[%s1204_s11 + $0xa0] sm:$0xf] %vm827_vm0, %v1065_v46  ;;  %869 = vst.msk [vmem:[%s1204_s11 + $0xa4] sm:$0xf] %vm827_vm0, %v1066_v47  ;;  %v1071_v58 = vpack.c.bf16 %v553_v49, %v553_v49  ;;  %v350_v59 = vsub.f32 %v276_v43, %v1155_v6  ;;  %v351_v60 = vsub.f32 %v277_v44, %v1155_v6  ;;  %v290_v44 = vld [vmem:[%s1160_s30 + $0x1f0] sm:$0xff]  ;;  %v291_v49 = vld [vmem:[%s1160_s30 + $0x1f8] sm:$0xff] }
  0x51   : > { %870 = vst.msk [vmem:[%s1204_s11 + $0xa8] sm:$0xf] %vm827_vm0, %v1067_v48  ;;  %v352_v61 = vsub.f32 %v278_v45, %v1155_v6  ;;  %871 = vst.msk [vmem:[%s1204_s11 + $0xac] sm:$0xf] %vm827_vm0, %v1068_v53  ;;  %v1072_v63 = vpack.c.bf16 %v554_v56, %v554_v56  ;;  %v353_v0 = vsub.f32 %v279_v50, %v1155_v6 }
  0x52   : > { %872 = vst.msk [vmem:[%s1204_s11 + $0xb0] sm:$0xf] %vm827_vm0, %v1069_v54  ;;  %873 = vst.msk [vmem:[%s1204_s11 + $0xb4] sm:$0xf] %vm827_vm0, %v1070_v55  ;;  %v354_v1 = vsub.f32 %v280_v51, %v1155_v6  ;;  %v355_v2 = vsub.f32 %v281_v52, %v1155_v6  ;;  %v420_v3 = vmul.f32 %v1162_v7, %v350_v59 }
  0x53   : > { %874 = vst.msk [vmem:[%s1204_s11 + $0xb8] sm:$0xf] %vm827_vm0, %v1071_v58  ;;  %v421_v4 = vmul.f32 %v1162_v7, %v351_v60  ;;  %v422_v5 = vmul.f32 %v1162_v7, %v352_v61  ;;  %v356_v8 = vsub.f32 %v282_v57, %v1155_v6  ;;  %875 = vst.msk [vmem:[%s1204_s11 + $0xbc] sm:$0xf] %vm827_vm0, %v1072_v63 }
  0x54   : > { %v423_v9 = vmul.f32 %v1162_v7, %v353_v0  ;;  %v424_v10 = vmul.f32 %v1162_v7, %v354_v1  ;;  %v425_v11 = vmul.f32 %v1162_v7, %v355_v2  ;;  %v357_v12 = vsub.f32 %v283_v62, %v1155_v6 }
  0x55   : > { %v491_v13 = vadd.f32 %v1176_v17, %v420_v3  ;;  %v492_v14 = vadd.f32 %v1176_v17, %v421_v4  ;;  %v493_v15 = vadd.f32 %v1176_v17, %v422_v5  ;;  %v426_v16 = vmul.f32 %v1162_v7, %v356_v8 }
  0x56   : > { %v494_v18 = vadd.f32 %v1176_v17, %v423_v9  ;;  %v495_v19 = vadd.f32 %v1176_v17, %v424_v10  ;;  %v496_v20 = vadd.f32 %v1176_v17, %v425_v11  ;;  %v427_v21 = vmul.f32 %v1162_v7, %v357_v12 }
  0x57   : > { %v555_v22 = vmax.f32 %v491_v13, 0.0  ;;  %v556_v23 = vmax.f32 %v492_v14, 0.0  ;;  %v557_v24 = vmax.f32 %v493_v15, 0.0  ;;  %v497_v25 = vadd.f32 %v1176_v17, %v426_v16 }
  0x58   : > { %v558_v26 = vmax.f32 %v494_v18, 0.0  ;;  %v559_v27 = vmax.f32 %v495_v19, 0.0  ;;  %v560_v28 = vmax.f32 %v496_v20, 0.0  ;;  %v498_v29 = vadd.f32 %v1176_v17, %v427_v21 }
  0x59   : > { %v1073_v33 = vpack.c.bf16 %v555_v22, %v555_v22  ;;  %v1074_v34 = vpack.c.bf16 %v556_v23, %v556_v23  ;;  %v1075_v35 = vpack.c.bf16 %v557_v24, %v557_v24  ;;  %v561_v36 = vmax.f32 %v497_v25, 0.0 }
  0x5a   : > { %v1076_v40 = vpack.c.bf16 %v558_v26, %v558_v26  ;;  %v1077_v41 = vpack.c.bf16 %v559_v27, %v559_v27  ;;  %v1078_v42 = vpack.c.bf16 %v560_v28, %v560_v28  ;;  %v562_v43 = vmax.f32 %v498_v29, 0.0 }
  0x5b   : > { %876 = vst.msk [vmem:[%s1204_s11 + $0xc0] sm:$0xf] %vm827_vm0, %v1073_v33  ;;  %877 = vst.msk [vmem:[%s1204_s11 + $0xc4] sm:$0xf] %vm827_vm0, %v1074_v34  ;;  %v1079_v45 = vpack.c.bf16 %v561_v36, %v561_v36  ;;  %v358_v46 = vsub.f32 %v284_v30, %v1155_v6  ;;  %v359_v47 = vsub.f32 %v285_v31, %v1155_v6 }
  0x5c   : > { %878 = vst.msk [vmem:[%s1204_s11 + $0xc8] sm:$0xf] %vm827_vm0, %v1075_v35  ;;  %v360_v48 = vsub.f32 %v286_v32, %v1155_v6  ;;  %879 = vst.msk [vmem:[%s1204_s11 + $0xcc] sm:$0xf] %vm827_vm0, %v1076_v40  ;;  %v1080_v50 = vpack.c.bf16 %v562_v43, %v562_v43  ;;  %v361_v51 = vsub.f32 %v287_v37, %v1155_v6 }
  0x5d   : > { %880 = vst.msk [vmem:[%s1204_s11 + $0xd0] sm:$0xf] %vm827_vm0, %v1077_v41  ;;  %881 = vst.msk [vmem:[%s1204_s11 + $0xd4] sm:$0xf] %vm827_vm0, %v1078_v42  ;;  %v362_v52 = vsub.f32 %v288_v38, %v1155_v6  ;;  %v363_v53 = vsub.f32 %v289_v39, %v1155_v6  ;;  %v428_v54 = vmul.f32 %v1162_v7, %v358_v46 }
  0x5e   : > { %882 = vst.msk [vmem:[%s1204_s11 + $0xd8] sm:$0xf] %vm827_vm0, %v1079_v45  ;;  %v429_v55 = vmul.f32 %v1162_v7, %v359_v47  ;;  %v430_v56 = vmul.f32 %v1162_v7, %v360_v48  ;;  %v364_v57 = vsub.f32 %v290_v44, %v1155_v6  ;;  %883 = vst.msk [vmem:[%s1204_s11 + $0xdc] sm:$0xf] %vm827_vm0, %v1080_v50 }
  0x5f   : > { %v431_v58 = vmul.f32 %v1162_v7, %v361_v51  ;;  %v432_v59 = vmul.f32 %v1162_v7, %v362_v52  ;;  %v433_v60 = vmul.f32 %v1162_v7, %v363_v53  ;;  %v365_v61 = vsub.f32 %v291_v49, %v1155_v6 }
  0x60   : > { %v499_v62 = vadd.f32 %v1176_v17, %v428_v54  ;;  %v500_v63 = vadd.f32 %v1176_v17, %v429_v55  ;;  %v501_v0 = vadd.f32 %v1176_v17, %v430_v56  ;;  %v434_v1 = vmul.f32 %v1162_v7, %v364_v57 }
  0x61   : > { %v502_v2 = vadd.f32 %v1176_v17, %v431_v58  ;;  %v503_v3 = vadd.f32 %v1176_v17, %v432_v59  ;;  %v504_v4 = vadd.f32 %v1176_v17, %v433_v60  ;;  %v435_v5 = vmul.f32 %v1162_v7, %v365_v61 }
  0x62   : > { %v563_v8 = vmax.f32 %v499_v62, 0.0  ;;  %v564_v9 = vmax.f32 %v500_v63, 0.0  ;;  %v565_v6 = vmax.f32 %v501_v0, 0.0  ;;  %v505_v10 = vadd.f32 %v1176_v17, %v434_v1 }
  0x63   : > { %v566_v11 = vmax.f32 %v502_v2, 0.0  ;;  %v567_v12 = vmax.f32 %v503_v3, 0.0  ;;  %v568_v13 = vmax.f32 %v504_v4, 0.0  ;;  %v506_v14 = vadd.f32 %v1176_v17, %v435_v5 }
  0x64   : > { %v1081_v15 = vpack.c.bf16 %v563_v8, %v563_v8  ;;  %v1082_v16 = vpack.c.bf16 %v564_v9, %v564_v9  ;;  %v1083_v7 = vpack.c.bf16 %v565_v6, %v565_v6  ;;  %v569_v18 = vmax.f32 %v505_v10, 0.0 }
  0x65   : > { %v1084_v19 = vpack.c.bf16 %v566_v11, %v566_v11  ;;  %v1085_v20 = vpack.c.bf16 %v567_v12, %v567_v12  ;;  %v1086_v21 = vpack.c.bf16 %v568_v13, %v568_v13  ;;  %v570_v22 = vmax.f32 %v506_v14, 0.0 }
  0x66   : > { %884 = vst.msk [vmem:[%s1204_s11 + $0xe0] sm:$0xf] %vm827_vm0, %v1081_v15  ;;  %885 = vst.msk [vmem:[%s1204_s11 + $0xe4] sm:$0xf] %vm827_vm0, %v1082_v16  ;;  %v1087_v23 = vpack.c.bf16 %v569_v18, %v569_v18 }
  0x67   : > { %886 = vst.msk [vmem:[%s1204_s11 + $0xe8] sm:$0xf] %vm827_vm0, %v1083_v7  ;;  %887 = vst.msk [vmem:[%s1204_s11 + $0xec] sm:$0xf] %vm827_vm0, %v1084_v19  ;;  %v1088_v17 = vpack.c.bf16 %v570_v22, %v570_v22 }
  0x68   : > { %888 = vst.msk [vmem:[%s1204_s11 + $0xf0] sm:$0xf] %vm827_vm0, %v1085_v20  ;;  %889 = vst.msk [vmem:[%s1204_s11 + $0xf4] sm:$0xf] %vm827_vm0, %v1086_v21 }
  0x69   : > { %890 = vst.msk [vmem:[%s1204_s11 + $0xf8] sm:$0xf] %vm827_vm0, %v1087_v23  ;;  %891 = vst.msk [vmem:[%s1204_s11 + $0xfc] sm:$0xf] %vm827_vm0, %v1088_v17 }
  0x6a PF: > { %s15_s18 = sadd.s32 1, %s1103_s18  }
  0x6b   : > { %p12_p4 = scmp.ge.s32.totalorder %s15_s18, 6  }
  0x6d   :  { %14 = sbr.rel (!%p12_p4) target bundleno = 1 (0x1), region = 70 }

// kernel: generator_forward.27
= control target key start
LH: loop header
LB: loop body
LE: loop exit
PB: predicated region body
PF: predicated region fallthrough
CT: control target
= control target key end

     0   :  { %s286_s0 = inlined_call_operand.vmem [shape: f32[192,128], index: 0, kind: input, shape index: {}]   ;;  %s287_s1 = inlined_call_operand.vmem [shape: f32[192,128], index: 1, kind: output, shape index: {}]  }
   0x1   :  { %v8_v0 = vld [vmem:[%s286_s0] sm:$0xff]  ;;  %v9_v1 = vld [vmem:[%s286_s0 + $0x8] sm:$0xff]  ;;  %v10_v2 = vld [vmem:[%s286_s0 + $0x10] sm:$0xff] }
   0x2   :  { %84 = vtanh.f32 %v8_v0  ;;  %v11_v3 = vld [vmem:[%s286_s0 + $0x18] sm:$0xff]  ;;  %v12_v4 = vld [vmem:[%s286_s0 + $0x20] sm:$0xff]  ;;  %v13_v5 = vld [vmem:[%s286_s0 + $0x28] sm:$0xff] }
   0x3   :  { %86 = vtanh.f32 %v9_v1  ;;  %v14_v6 = vld [vmem:[%s286_s0 + $0x30] sm:$0xff]  ;;  %v15_v7 = vld [vmem:[%s286_s0 + $0x38] sm:$0xff]  ;;  %v16_v8 = vld [vmem:[%s286_s0 + $0x40] sm:$0xff] }
   0x4   :  { %88 = vtanh.f32 %v10_v2  ;;  %v17_v9 = vld [vmem:[%s286_s0 + $0x48] sm:$0xff]  ;;  %v18_v10 = vld [vmem:[%s286_s0 + $0x50] sm:$0xff]  ;;  %v19_v11 = vld [vmem:[%s286_s0 + $0x58] sm:$0xff] }
   0x5   :  { %90 = vtanh.f32 %v11_v3  ;;  %v20_v12 = vld [vmem:[%s286_s0 + $0x60] sm:$0xff]  ;;  %v21_v13 = vld [vmem:[%s286_s0 + $0x68] sm:$0xff]  ;;  %v22_v14 = vld [vmem:[%s286_s0 + $0x70] sm:$0xff] }
   0x6   :  { %92 = vtanh.f32 %v12_v4  ;;  %v23_v15 = vld [vmem:[%s286_s0 + $0x78] sm:$0xff]  ;;  %v24_v17 = vld [vmem:[%s286_s0 + $0x80] sm:$0xff]  ;;  %v25_v19 = vld [vmem:[%s286_s0 + $0x88] sm:$0xff] }
   0x7   :  { %94 = vtanh.f32 %v13_v5  ;;  %v26_v21 = vld [vmem:[%s286_s0 + $0x90] sm:$0xff]  ;;  %v27_v23 = vld [vmem:[%s286_s0 + $0x98] sm:$0xff]  ;;  %v28_v25 = vld [vmem:[%s286_s0 + $0xa0] sm:$0xff] }
   0x8   :  { %96 = vtanh.f32 %v14_v6  ;;  %v29_v27 = vld [vmem:[%s286_s0 + $0xa8] sm:$0xff]  ;;  %v30_v29 = vld [vmem:[%s286_s0 + $0xb0] sm:$0xff]  ;;  %v31_v31 = vld [vmem:[%s286_s0 + $0xb8] sm:$0xff] }
   0x9   :  { %98 = vtanh.f32 %v15_v7 }
   0xa   :  { %100 = vtanh.f32 %v16_v8 }
   0xb   :  { %102 = vtanh.f32 %v17_v9 }
   0xc   :  { %104 = vtanh.f32 %v18_v10 }
   0xd   :  { %106 = vtanh.f32 %v19_v11 }
   0xe   :  { %108 = vtanh.f32 %v20_v12 }
   0xf   :  { %v85_v16 = vpop.eup %84  ;;  %110 = vtanh.f32 %v21_v13 }
  0x10   :  { %v87_v18 = vpop.eup %86  ;;  %56 = vst [vmem:[%s287_s1] sm:$0xff] %v85_v16  ;;  %112 = vtanh.f32 %v22_v14 }
  0x11   :  { %v89_v20 = vpop.eup %88  ;;  %57 = vst [vmem:[%s287_s1 + $0x8] sm:$0xff] %v87_v18  ;;  %114 = vtanh.f32 %v23_v15 }
  0x12   :  { %v91_v22 = vpop.eup %90  ;;  %58 = vst [vmem:[%s287_s1 + $0x10] sm:$0xff] %v89_v20  ;;  %116 = vtanh.f32 %v24_v17 }
  0x13   :  { %v93_v24 = vpop.eup %92  ;;  %59 = vst [vmem:[%s287_s1 + $0x18] sm:$0xff] %v91_v22  ;;  %118 = vtanh.f32 %v25_v19 }
  0x14   :  { %v95_v26 = vpop.eup %94  ;;  %60 = vst [vmem:[%s287_s1 + $0x20] sm:$0xff] %v93_v24  ;;  %120 = vtanh.f32 %v26_v21 }
  0x15   :  { %v97_v28 = vpop.eup %96  ;;  %61 = vst [vmem:[%s287_s1 + $0x28] sm:$0xff] %v95_v26  ;;  %122 = vtanh.f32 %v27_v23 }
  0x16   :  { %v99_v30 = vpop.eup %98  ;;  %62 = vst [vmem:[%s287_s1 + $0x30] sm:$0xff] %v97_v28  ;;  %124 = vtanh.f32 %v28_v25 }
  0x17   :  { %v101_v32 = vpop.eup %100  ;;  %63 = vst [vmem:[%s287_s1 + $0x38] sm:$0xff] %v99_v30  ;;  %126 = vtanh.f32 %v29_v27 }
  0x18   :  { %v103_v33 = vpop.eup %102  ;;  %64 = vst [vmem:[%s287_s1 + $0x40] sm:$0xff] %v101_v32  ;;  %128 = vtanh.f32 %v30_v29 }
  0x19   :  { %v105_v34 = vpop.eup %104  ;;  %65 = vst [vmem:[%s287_s1 + $0x48] sm:$0xff] %v103_v33  ;;  %130 = vtanh.f32 %v31_v31 }
  0x1a   :  { %v107_v35 = vpop.eup %106  ;;  %66 = vst [vmem:[%s287_s1 + $0x50] sm:$0xff] %v105_v34 }
  0x1b   :  { %v109_v36 = vpop.eup %108  ;;  %67 = vst [vmem:[%s287_s1 + $0x58] sm:$0xff] %v107_v35 }
  0x1c   :  { %v111_v37 = vpop.eup %110  ;;  %68 = vst [vmem:[%s287_s1 + $0x60] sm:$0xff] %v109_v36 }
  0x1d   :  { %v113_v38 = vpop.eup %112  ;;  %69 = vst [vmem:[%s287_s1 + $0x68] sm:$0xff] %v111_v37 }
  0x1e   :  { %v115_v39 = vpop.eup %114  ;;  %70 = vst [vmem:[%s287_s1 + $0x70] sm:$0xff] %v113_v38 }
  0x1f   :  { %v117_v40 = vpop.eup %116  ;;  %71 = vst [vmem:[%s287_s1 + $0x78] sm:$0xff] %v115_v39 }
  0x20   :  { %v119_v41 = vpop.eup %118  ;;  %72 = vst [vmem:[%s287_s1 + $0x80] sm:$0xff] %v117_v40 }
  0x21   :  { %v121_v42 = vpop.eup %120  ;;  %73 = vst [vmem:[%s287_s1 + $0x88] sm:$0xff] %v119_v41 }
  0x22   :  { %v123_v43 = vpop.eup %122  ;;  %74 = vst [vmem:[%s287_s1 + $0x90] sm:$0xff] %v121_v42 }
  0x23   :  { %v125_v44 = vpop.eup %124  ;;  %75 = vst [vmem:[%s287_s1 + $0x98] sm:$0xff] %v123_v43 }
  0x24   :  { %v127_v45 = vpop.eup %126  ;;  %76 = vst [vmem:[%s287_s1 + $0xa0] sm:$0xff] %v125_v44 }
  0x25   :  { %v129_v46 = vpop.eup %128  ;;  %77 = vst [vmem:[%s287_s1 + $0xa8] sm:$0xff] %v127_v45 }
  0x26   :  { %v131_v47 = vpop.eup %130  ;;  %78 = vst [vmem:[%s287_s1 + $0xb0] sm:$0xff] %v129_v46 }
  0x27   :  { %79 = vst [vmem:[%s287_s1 + $0xb8] sm:$0xff] %v131_v47 }

</bundles_post_ra>
